<compile_context>
chip_gen: v5e
topology: v5e:2x2
jax: 0.10.0
libtpu: 0.0.40
codegen_flags: <defaults>
</compile_context>

<pallas_src>
import math
import functools

import jax
import jax.numpy as jnp
from jax.experimental import pallas as pl
from jax.experimental.pallas import tpu as pltpu

NEG_SLOPE = 0.2
F32 = jnp.float32


def _round_up(a, b):
    return (a + b - 1) // b * b


# ---------------------------------------------------------------------------
# Kernel 1: node sigma   sig = x @ v,  v = W1^T @ [att_l; att_r]^T  ([F, 2])
#   sig[:, 0] = sigma_l,  sig[:, 1] = sigma_r   (no [N, C] intermediate)
# ---------------------------------------------------------------------------
def _node_sigma_kernel(x_ref, v_ref, o_ref):
    o_ref[...] = jnp.dot(x_ref[...], v_ref[...],
                         preferred_element_type=jnp.float32)


def _node_sigma(x_pad, v, tm):
    n_pad, f = x_pad.shape
    return pl.pallas_call(
        _node_sigma_kernel,
        grid=(n_pad // tm,),
        in_specs=[pl.BlockSpec((tm, f), lambda i: (i, 0)),
                  pl.BlockSpec((f, 2), lambda i: (0, 0))],
        out_specs=pl.BlockSpec((tm, 2), lambda i: (i, 0)),
        out_shape=jax.ShapeDtypeStruct((n_pad, 2), F32),
        compiler_params=pltpu.CompilerParams(
            dimension_semantics=("parallel",)),
    )(x_pad, v)


# ---------------------------------------------------------------------------
# Kernel 2: tiled fused aggregation + output projections
#   acc       = sum_k S[i, k] @ x[k]                 (MXU, K-tiled)
#   agg_pos   = acc * (1/deg)
#   agg_neg   = x_i * ((deg - sum_s)/deg)            (scales precomputed)
#   out[:, :Cp] = agg_pos @ Wp + (x_i @ Wr)[:, :Cp] + bp     (even C)
#   out[:, Cp:] = agg_neg @ Wn + (x_i @ Wr)[:, Cp:] + bn
#   out         = agg_pos @ Wp + agg_neg @ Wn + x_i @ Wr + bp + bn   (odd C)
# ---------------------------------------------------------------------------
def _make_agg_kernel(even_c, root_weight, cp):
    def kernel(*refs):
        s_ref, xk_ref, xr_ref, invd_ref, negs_ref = refs[:5]
        wp_ref, wn_ref = refs[5], refs[6]
        idx = 7
        wr_ref = None
        if root_weight:
            wr_ref = refs[idx]
            idx += 1
        b_ref = refs[idx]
        o_ref = refs[idx + 1]
        acc_ref = refs[idx + 2]

        k = pl.program_id(1)

        @pl.when(k == 0)
        def _():
            acc_ref[...] = jnp.zeros_like(acc_ref)

        # MXU: accumulate weighted-adjacency matmul S @ x over K tiles.
        acc_ref[...] += jnp.dot(s_ref[...], xk_ref[...],
                                preferred_element_type=jnp.float32)

        @pl.when(k == pl.num_programs(1) - 1)
        def _():
            x_i = xr_ref[...]                                 # [TM, F]
            agg_pos = acc_ref[...] * invd_ref[...]            # mean of x_j * s
            agg_neg = x_i * negs_ref[...]                     # mean of x_i*(1-s)
            b = b_ref[...]                                    # [1, C]

            pos_proj = jnp.dot(agg_pos, wp_ref[...],
                               preferred_element_type=jnp.float32)
            neg_proj = jnp.dot(agg_neg, wn_ref[...],
                               preferred_element_type=jnp.float32)
            if root_weight:
                root_proj = jnp.dot(x_i, wr_ref[...],
                                    preferred_element_type=jnp.float32)

            if even_c:
                left = pos_proj + b[:, :cp]
                right = neg_proj + b[:, cp:]
                if root_weight:
                    left = left + root_proj[:, :cp]
                    right = right + root_proj[:, cp:]
                o_ref[:, :cp] = left
                o_ref[:, cp:] = right
            else:
                out = pos_proj + neg_proj + b
                if root_weight:
                    out = out + root_proj
                o_ref[...] = out

    return kernel


# ---------------------------------------------------------------------------
# Wrapper
# ---------------------------------------------------------------------------
def sage_conv_new_forward(x, edge_index, params, out_channels,
                          normalize=False, root_weight=True):
    n, f = x.shape
    c = out_channels
    even_c = (c % 2 == 0)
    cp = c // 2 if even_c else c

    x = x.astype(F32)
    w1_t = params["w1_t"].astype(F32)     # [F, C]
    att_l = params["att_l"].astype(F32)   # [1, C]
    att_r = params["att_r"].astype(F32)   # [1, C]
    wp_t = params["wp_t"].astype(F32)     # [F, Cp]
    wn_t = params["wn_t"].astype(F32)     # [F, Cp]
    bp = params["bp"].astype(F32)         # [Cp]
    bn = params["bn"].astype(F32)         # [Cp]
    wr_t = params["wr_t"].astype(F32)     # [F, C]

    # ---- tiling / padding (tiles must be (8,128)-aligned unless full) ------
    if n <= 256:
        tm = tk = n_pad = n                       # single full-array block
    else:
        tm = 256
        tk = 512 if n >= 2048 else 256
        n_pad = _round_up(n, max(tm, tk))
    x_pad = x if n_pad == n else jnp.pad(x, ((0, n_pad - n), (0, 0)))

    # ---- kernel 1: node sigma via folded [F, 2] projection ------------------
    v = jnp.dot(w1_t, jnp.concatenate([att_l, att_r], axis=0).T)   # [F, 2]
    sig_nodes = _node_sigma(x_pad, v, tm)                          # [N_pad, 2]
    sigma_l = sig_nodes[:, 0]
    sigma_r = sig_nodes[:, 1]

    # ---- per-edge gate: data-dependent gather, fused by XLA ----------------
    # TODO(synk): for huge E a scalar-prefetch Pallas edge kernel could do the
    #             gather + gate on-chip; XLA fusion is used here instead.
    src = edge_index[0]
    dst = edge_index[1]
    sigma_e = jax.nn.sigmoid(
        jax.nn.leaky_relu(sigma_l[src] + sigma_r[dst], NEG_SLOPE))  # [E]

    # ---- dense weighted adjacency + per-node scales (scatter glue) ---------
    # TODO(synk): for large sparse graphs replace the dense S (O(N^2)) with a
    #             CSR scalar-prefetch edge-aggregation Pallas kernel (O(E)).
    s_mat = jnp.zeros((n_pad, n_pad), F32).at[dst, src].add(sigma_e)
    deg = jnp.zeros((n_pad,), F32).at[dst].add(1.0)
    sum_s = jnp.zeros((n_pad,), F32).at[dst].add(sigma_e)
    inv_den = (1.0 / jnp.maximum(deg, 1.0)).reshape(n_pad, 1)
    neg_scale = (deg - sum_s).reshape(n_pad, 1) * inv_den

    bias = (jnp.concatenate([bp, bn]) if even_c else (bp + bn)).reshape(1, c)

    # ---- kernel 2: tiled fused aggregation + projections --------------------
    grid = (n_pad // tm, n_pad // tk)
    kernel = _make_agg_kernel(even_c, root_weight, cp)

    in_specs = [
        pl.BlockSpec((tm, tk), lambda i, k: (i, k)),   # S tile
        pl.BlockSpec((tk, f), lambda i, k: (k, 0)),    # x (K operand)
        pl.BlockSpec((tm, f), lambda i, k: (i, 0)),    # x (row operand)
        pl.BlockSpec((tm, 1), lambda i, k: (i, 0)),    # 1/deg
        pl.BlockSpec((tm, 1), lambda i, k: (i, 0)),    # (deg - sum_s)/deg
        pl.BlockSpec(wp_t.shape, lambda i, k: (0, 0)),
        pl.BlockSpec(wn_t.shape, lambda i, k: (0, 0)),
    ]
    operands = [s_mat, x_pad, x_pad, inv_den, neg_scale, wp_t, wn_t]
    if root_weight:
        in_specs.append(pl.BlockSpec(wr_t.shape, lambda i, k: (0, 0)))
        operands.append(wr_t)
    in_specs.append(pl.BlockSpec((1, c), lambda i, k: (0, 0)))
    operands.append(bias)

    # explicit scoped-VMEM budget: double-buffered tiles + accumulator + weights
    w_bytes = 4 * (wp_t.size + wn_t.size + (wr_t.size if root_weight else 0) + c)
    vmem_need = 4 * (2 * (tm * tk + tk * f + tm * f + 2 * tm)
                     + 2 * tm * c + tm * f) + 2 * w_bytes
    vmem_limit = int(min(64 << 20, max(32 << 20, 2 * vmem_need)))

    out_pad = pl.pallas_call(
        kernel,
        grid=grid,
        in_specs=in_specs,
        out_specs=pl.BlockSpec((tm, c), lambda i, k: (i, 0)),
        out_shape=jax.ShapeDtypeStruct((n_pad, c), F32),
        scratch_shapes=[pltpu.VMEM((tm, f), jnp.float32)],
        compiler_params=pltpu.CompilerParams(
            dimension_semantics=("parallel", "arbitrary"),
            vmem_limit_bytes=vmem_limit),
    )(*operands)

    out = out_pad[:n]
    if normalize:
        out = out / jnp.maximum(jnp.linalg.norm(out, axis=-1, keepdims=True),
                                1e-12)
    return out, sigma_e


# ---------------------------------------------------------------------------
# Pure-JAX reference (for in-script verification)
# ---------------------------------------------------------------------------
def _reference(x, edge_index, params, C):
    h = x @ params["w1_t"]
    sl = jnp.sum(h * params["att_l"], -1)
    sr = jnp.sum(h * params["att_r"], -1)
    src, dst = edge_index[0], edge_index[1]
    N, F = x.shape
    s = jax.nn.sigmoid(jax.nn.leaky_relu(sl[src] + sr[dst], NEG_SLOPE))
    deg = jnp.zeros((N,)).at[dst].add(1.0)
    denom = jnp.maximum(deg, 1.0)[:, None]
    agg_pos = jnp.zeros((N, F)).at[dst].add(x[src] * s[:, None]) / denom
    agg_neg = jnp.zeros((N, F)).at[dst].add(x[dst] * (1.0 - s)[:, None]) / denom
    p = agg_pos @ params["wp_t"] + params["bp"]
    q = agg_neg @ params["wn_t"] + params["bn"]
    if C % 2 == 0:
        out = jnp.concatenate([p, q], axis=1)
    else:
        out = p + q
    out = out + x @ params["wr_t"]
    return out, s


def _glorot(key, shape):
    fan_in, fan_out = shape[-2], shape[-1]
    stdv = math.sqrt(6.0 / (fan_in + fan_out))
    return jax.random.uniform(key, shape, F32, -stdv, stdv)


if __name__ == "__main__":
    # keep reference / glue matmuls in full f32 so they match the MXU kernels
    jax.config.update("jax_default_matmul_precision", "highest")

    def run_case(N, F, C, E, seed):
        Cp = C // 2 if C % 2 == 0 else C
        key = jax.random.PRNGKey(seed)
        keys = jax.random.split(key, 10)
        x = jax.random.normal(keys[0], (N, F), F32)
        edge_index = jax.random.randint(keys[1], (2, E), 0, N, jnp.int32)
        bound = 1.0 / math.sqrt(F)
        params = {
            "w1_t": _glorot(keys[2], (F, C)),
            "att_l": _glorot(keys[3], (1, C)),
            "att_r": _glorot(keys[4], (1, C)),
            "wp_t": _glorot(keys[5], (F, Cp)),
            "bp": jax.random.uniform(keys[6], (Cp,), F32, -bound, bound),
            "wn_t": _glorot(keys[7], (F, Cp)),
            "bn": jax.random.uniform(keys[8], (Cp,), F32, -bound, bound),
            "wr_t": jax.random.uniform(keys[9], (F, C), F32, -bound, bound),
        }

        fwd = jax.jit(functools.partial(sage_conv_new_forward, out_channels=C))
        out, sigma = fwd(x, edge_index, params)
        out = jax.block_until_ready(out)
        sigma = jax.block_until_ready(sigma)

        ref_out, ref_sigma = _reference(x, edge_index, params, C)
        assert out.shape == (N, C) and sigma.shape == (E,)
        assert jnp.allclose(out, ref_out, rtol=2e-4, atol=2e-4), \
            f"output mismatch (N={N}, C={C})"
        assert jnp.allclose(sigma, ref_sigma, rtol=2e-4, atol=2e-4), \
            f"sigma mismatch (N={N}, C={C})"

    run_case(N=512, F=32, C=16, E=2048, seed=0)   # tiled path, even C (grid 2x2)
    run_case(N=64, F=32, C=7, E=256, seed=1)      # single-block path, odd C
    print("KERNEL_OK")
</pallas_src>

<mosaic_0001>
module attributes {stable_mosaic.version = 11 : i64} {
  func.func @_node_sigma_kernel(%arg0: i32, %arg1: memref<256x32xf32, #tpu.memory_space<vmem>>, %arg2: memref<32x2xf32, #tpu.memory_space<vmem>>, %arg3: memref<256x2xf32, #tpu.memory_space<vmem>>) attributes {dimension_semantics = [#tpu.dimension_semantics<parallel>], iteration_bounds = array<i64: 2>, scalar_prefetch = 0 : i64, scratch_operands = 0 : i64, tpu.core_type = #tpu.core_type<tc>, window_params = [{transform_indices = @transform_0, window_bounds = array<i64: 256, 32>}, {pipeline_mode = #tpu.pipeline_mode<synchronous>, transform_indices = @transform_1, window_bounds = array<i64: 32, 2>}, {transform_indices = @transform_2, window_bounds = array<i64: 256, 2>}]} {
    %c0 = arith.constant 0 : index
    %c0_0 = arith.constant 0 : index
    %0 = vector.load %arg1[%c0, %c0_0] : memref<256x32xf32, #tpu.memory_space<vmem>>, vector<256x32xf32>
    %c0_1 = arith.constant 0 : index
    %c0_2 = arith.constant 0 : index
    %1 = vector.load %arg2[%c0_1, %c0_2] : memref<32x2xf32, #tpu.memory_space<vmem>>, vector<32x2xf32>
    %cst = arith.constant dense<0.000000e+00> : vector<256x2xf32>
    %2 = tpu.matmul %0, %1, %cst {dimension_numbers = #tpu.dot_dimension_numbers<[1], [0], [0], [1], [0, 0, 1, 1], [], []>, precision = #tpu.contract_precision<fp32>} : vector<256x32xf32>, vector<32x2xf32>, vector<256x2xf32> -> vector<256x2xf32>
    %c0_3 = arith.constant 0 : index
    %c0_4 = arith.constant 0 : index
    %3 = vector.load %arg3[%c0_3, %c0_4] : memref<256x2xf32, #tpu.memory_space<vmem>>, vector<256x2xf32>
    tpu.vector_store %arg3[%c0_3, %c0_4], %2 {strides = array<i32>} : memref<256x2xf32, #tpu.memory_space<vmem>>, vector<256x2xf32>,
    return
  }
  func.func @transform_0(%arg0: i32) -> (i32, i32) {
    %c0_i32 = arith.constant 0 : i32
    %c0_i32_0 = arith.constant 0 : i32
    return %arg0, %c0_i32 : i32, i32
  }
  func.func @transform_1(%arg0: i32) -> (i32, i32) {
    %c0_i32 = arith.constant 0 : i32
    %c0_i32_0 = arith.constant 0 : i32
    %c0_i32_1 = arith.constant 0 : i32
    return %c0_i32, %c0_i32_0 : i32, i32
  }
  func.func @transform_2(%arg0: i32) -> (i32, i32) {
    %c0_i32 = arith.constant 0 : i32
    %c0_i32_0 = arith.constant 0 : i32
    return %arg0, %c0_i32 : i32, i32
  }
}

module attributes {stable_mosaic.version = 11 : i64} {
  func.func @kernel(%arg0: i32, %arg1: i32, %arg2: memref<256x256xf32, #tpu.memory_space<vmem>>, %arg3: memref<256x32xf32, #tpu.memory_space<vmem>>, %arg4: memref<256x32xf32, #tpu.memory_space<vmem>>, %arg5: memref<256x1xf32, #tpu.memory_space<vmem>>, %arg6: memref<256x1xf32, #tpu.memory_space<vmem>>, %arg7: memref<32x8xf32, #tpu.memory_space<vmem>>, %arg8: memref<32x8xf32, #tpu.memory_space<vmem>>, %arg9: memref<32x16xf32, #tpu.memory_space<vmem>>, %arg10: memref<1x16xf32, #tpu.memory_space<vmem>>, %arg11: memref<256x16xf32, #tpu.memory_space<vmem>>, %arg12: memref<256x32xf32, #tpu.memory_space<vmem>>) attributes {dimension_semantics = [#tpu.dimension_semantics<parallel>, #tpu.dimension_semantics<arbitrary>], iteration_bounds = array<i64: 2, 2>, scalar_prefetch = 0 : i64, scratch_operands = 1 : i64, tpu.core_type = #tpu.core_type<tc>, window_params = [{transform_indices = @transform_0, window_bounds = array<i64: 256, 256>}, {transform_indices = @transform_1, window_bounds = array<i64: 256, 32>}, {transform_indices = @transform_2, window_bounds = array<i64: 256, 32>}, {transform_indices = @transform_3, window_bounds = array<i64: 256, 1>}, {transform_indices = @transform_4, window_bounds = array<i64: 256, 1>}, {pipeline_mode = #tpu.pipeline_mode<synchronous>, transform_indices = @transform_5, window_bounds = array<i64: 32, 8>}, {pipeline_mode = #tpu.pipeline_mode<synchronous>, transform_indices = @transform_6, window_bounds = array<i64: 32, 8>}, {pipeline_mode = #tpu.pipeline_mode<synchronous>, transform_indices = @transform_7, window_bounds = array<i64: 32, 16>}, {pipeline_mode = #tpu.pipeline_mode<synchronous>, transform_indices = @transform_8, window_bounds = array<i64: 1, 16>}, {transform_indices = @transform_9, window_bounds = array<i64: 256, 16>}]} {
    %c0_i32 = arith.constant 0 : i32
    %0 = arith.cmpi eq, %arg1, %c0_i32 : i32
    %1 = arith.extui %0 : i1 to i32
    %c0_i32_0 = arith.constant 0 : i32
    %2 = arith.cmpi ne, %1, %c0_i32_0 : i32
    scf.if %2 {
      %cst_9 = arith.constant 0.000000e+00 : f32
      %12 = vector.broadcast %cst_9 : f32 to vector<256x32xf32>
      %c0_10 = arith.constant 0 : index
      %c0_11 = arith.constant 0 : index
      %13 = vector.load %arg12[%c0_10, %c0_11] : memref<256x32xf32, #tpu.memory_space<vmem>>, vector<256x32xf32>
      tpu.vector_store %arg12[%c0_10, %c0_11], %12 {strides = array<i32>} : memref<256x32xf32, #tpu.memory_space<vmem>>, vector<256x32xf32>,
    } else {
    }
    %c0 = arith.constant 0 : index
    %c0_1 = arith.constant 0 : index
    %3 = vector.load %arg12[%c0, %c0_1] : memref<256x32xf32, #tpu.memory_space<vmem>>, vector<256x32xf32>
    %c0_2 = arith.constant 0 : index
    %c0_3 = arith.constant 0 : index
    %4 = vector.load %arg2[%c0_2, %c0_3] : memref<256x256xf32, #tpu.memory_space<vmem>>, vector<256x256xf32>
    %c0_4 = arith.constant 0 : index
    %c0_5 = arith.constant 0 : index
    %5 = vector.load %arg3[%c0_4, %c0_5] : memref<256x32xf32, #tpu.memory_space<vmem>>, vector<256x32xf32>
    %cst = arith.constant dense<0.000000e+00> : vector<256x32xf32>
    %6 = tpu.matmul %4, %5, %cst {dimension_numbers = #tpu.dot_dimension_numbers<[1], [0], [0], [1], [0, 0, 1, 1], [], []>, precision = #tpu.contract_precision<fp32>} : vector<256x256xf32>, vector<256x32xf32>, vector<256x32xf32> -> vector<256x32xf32>
    %7 = arith.addf %3, %6 : vector<256x32xf32>
    %c0_6 = arith.constant 0 : index
    %c0_7 = arith.constant 0 : index
    %8 = vector.load %arg12[%c0_6, %c0_7] : memref<256x32xf32, #tpu.memory_space<vmem>>, vector<256x32xf32>
    tpu.vector_store %arg12[%c0_6, %c0_7], %7 {strides = array<i32>} : memref<256x32xf32, #tpu.memory_space<vmem>>, vector<256x32xf32>,
    %c1_i32 = arith.constant 1 : i32
    %9 = arith.cmpi eq, %arg1, %c1_i32 : i32
    %10 = arith.extui %9 : i1 to i32
    %c0_i32_8 = arith.constant 0 : i32
    %11 = arith.cmpi ne, %10, %c0_i32_8 : i32
    scf.if %11 {
      %c0_9 = arith.constant 0 : index
      %c0_10 = arith.constant 0 : index
      %12 = vector.load %arg4[%c0_9, %c0_10] : memref<256x32xf32, #tpu.memory_space<vmem>>, vector<256x32xf32>
      %c0_11 = arith.constant 0 : index
      %c0_12 = arith.constant 0 : index
      %13 = vector.load %arg12[%c0_11, %c0_12] : memref<256x32xf32, #tpu.memory_space<vmem>>, vector<256x32xf32>
      %c0_13 = arith.constant 0 : index
      %c0_14 = arith.constant 0 : index
      %14 = vector.load %arg5[%c0_13, %c0_14] : memref<256x1xf32, #tpu.memory_space<vmem>>, vector<256x1xf32>
      %15 = vector.broadcast %14 : vector<256x1xf32> to vector<256x32xf32>
      %16 = arith.mulf %13, %15 : vector<256x32xf32>
      %c0_15 = arith.constant 0 : index
      %c0_16 = arith.constant 0 : index
      %17 = vector.load %arg6[%c0_15, %c0_16] : memref<256x1xf32, #tpu.memory_space<vmem>>, vector<256x1xf32>
      %18 = vector.broadcast %17 : vector<256x1xf32> to vector<256x32xf32>
      %19 = arith.mulf %12, %18 : vector<256x32xf32>
      %c0_17 = arith.constant 0 : index
      %c0_18 = arith.constant 0 : index
      %20 = vector.load %arg10[%c0_17, %c0_18] : memref<1x16xf32, #tpu.memory_space<vmem>>, vector<1x16xf32>
      %c0_19 = arith.constant 0 : index
      %c0_20 = arith.constant 0 : index
      %21 = vector.load %arg7[%c0_19, %c0_20] : memref<32x8xf32, #tpu.memory_space<vmem>>, vector<32x8xf32>
      %cst_21 = arith.constant dense<0.000000e+00> : vector<256x8xf32>
      %22 = tpu.matmul %16, %21, %cst_21 {dimension_numbers = #tpu.dot_dimension_numbers<[1], [0], [0], [1], [0, 0, 1, 1], [], []>, precision = #tpu.contract_precision<fp32>} : vector<256x32xf32>, vector<32x8xf32>, vector<256x8xf32> -> vector<256x8xf32>
      %c0_22 = arith.constant 0 : index
      %c0_23 = arith.constant 0 : index
      %23 = vector.load %arg8[%c0_22, %c0_23] : memref<32x8xf32, #tpu.memory_space<vmem>>, vector<32x8xf32>
      %cst_24 = arith.constant dense<0.000000e+00> : vector<256x8xf32>
      %24 = tpu.matmul %19, %23, %cst_24 {dimension_numbers = #tpu.dot_dimension_numbers<[1], [0], [0], [1], [0, 0, 1, 1], [], []>, precision = #tpu.contract_precision<fp32>} : vector<256x32xf32>, vector<32x8xf32>, vector<256x8xf32> -> vector<256x8xf32>
      %c0_25 = arith.constant 0 : index
      %c0_26 = arith.constant 0 : index
      %25 = vector.load %arg9[%c0_25, %c0_26] : memref<32x16xf32, #tpu.memory_space<vmem>>, vector<32x16xf32>
      %cst_27 = arith.constant dense<0.000000e+00> : vector<256x16xf32>
      %26 = tpu.matmul %12, %25, %cst_27 {dimension_numbers = #tpu.dot_dimension_numbers<[1], [0], [0], [1], [0, 0, 1, 1], [], []>, precision = #tpu.contract_precision<fp32>} : vector<256x32xf32>, vector<32x16xf32>, vector<256x16xf32> -> vector<256x16xf32>
      %27 = vector.extract_strided_slice %20 {offsets = [0, 0], sizes = [1, 8], strides = [1, 1]} : vector<1x16xf32> to vector<1x8xf32>
      %28 = vector.broadcast %27 : vector<1x8xf32> to vector<256x8xf32>
      %29 = arith.addf %22, %28 : vector<256x8xf32>
      %30 = vector.extract_strided_slice %20 {offsets = [0, 8], sizes = [1, 8], strides = [1, 1]} : vector<1x16xf32> to vector<1x8xf32>
      %31 = vector.broadcast %30 : vector<1x8xf32> to vector<256x8xf32>
      %32 = arith.addf %24, %31 : vector<256x8xf32>
      %33 = vector.extract_strided_slice %26 {offsets = [0, 0], sizes = [256, 8], strides = [1, 1]} : vector<256x16xf32> to vector<256x8xf32>
      %34 = arith.addf %29, %33 : vector<256x8xf32>
      %35 = vector.extract_strided_slice %26 {offsets = [0, 8], sizes = [256, 8], strides = [1, 1]} : vector<256x16xf32> to vector<256x8xf32>
      %36 = arith.addf %32, %35 : vector<256x8xf32>
      %c0_28 = arith.constant 0 : index
      %c0_29 = arith.constant 0 : index
      %37 = vector.load %arg11[%c0_28, %c0_29] : memref<256x16xf32, #tpu.memory_space<vmem>>, vector<256x8xf32>
      tpu.vector_store %arg11[%c0_28, %c0_29], %34 {strides = array<i32>} : memref<256x16xf32, #tpu.memory_space<vmem>>, vector<256x8xf32>,
      %c0_30 = arith.constant 0 : index
      %c8 = arith.constant 8 : index
      %38 = vector.load %arg11[%c0_30, %c8] : memref<256x16xf32, #tpu.memory_space<vmem>>, vector<256x8xf32>
      tpu.vector_store %arg11[%c0_30, %c8], %36 {strides = array<i32>} : memref<256x16xf32, #tpu.memory_space<vmem>>, vector<256x8xf32>,
    } else {
    }
    return
  }
  func.func @transform_0(%arg0: i32, %arg1: i32) -> (i32, i32) {
    %c0_i32 = arith.constant 0 : i32
    return %arg0, %arg1 : i32, i32
  }
  func.func @transform_1(%arg0: i32, %arg1: i32) -> (i32, i32) {
    %c0_i32 = arith.constant 0 : i32
    %c0_i32_0 = arith.constant 0 : i32
    return %arg1, %c0_i32 : i32, i32
  }
  func.func @transform_2(%arg0: i32, %arg1: i32) -> (i32, i32) {
    %c0_i32 = arith.constant 0 : i32
    %c0_i32_0 = arith.constant 0 : i32
    return %arg0, %c0_i32 : i32, i32
  }
  func.func @transform_3(%arg0: i32, %arg1: i32) -> (i32, i32) {
    %c0_i32 = arith.constant 0 : i32
    %c0_i32_0 = arith.constant 0 : i32
    return %arg0, %c0_i32 : i32, i32
  }
  func.func @transform_4(%arg0: i32, %arg1: i32) -> (i32, i32) {
    %c0_i32 = arith.constant 0 : i32
    %c0_i32_0 = arith.constant 0 : i32
    return %arg0, %c0_i32 : i32, i32
  }
  func.func @transform_5(%arg0: i32, %arg1: i32) -> (i32, i32) {
    %c0_i32 = arith.constant 0 : i32
    %c0_i32_0 = arith.constant 0 : i32
    %c0_i32_1 = arith.constant 0 : i32
    return %c0_i32, %c0_i32_0 : i32, i32
  }
  func.func @transform_6(%arg0: i32, %arg1: i32) -> (i32, i32) {
    %c0_i32 = arith.constant 0 : i32
    %c0_i32_0 = arith.constant 0 : i32
    %c0_i32_1 = arith.constant 0 : i32
    return %c0_i32, %c0_i32_0 : i32, i32
  }
  func.func @transform_7(%arg0: i32, %arg1: i32) -> (i32, i32) {
    %c0_i32 = arith.constant 0 : i32
    %c0_i32_0 = arith.constant 0 : i32
    %c0_i32_1 = arith.constant 0 : i32
    return %c0_i32, %c0_i32_0 : i32, i32
  }
  func.func @transform_8(%arg0: i32, %arg1: i32) -> (i32, i32) {
    %c0_i32 = arith.constant 0 : i32
    %c0_i32_0 = arith.constant 0 : i32
    %c0_i32_1 = arith.constant 0 : i32
    return %c0_i32, %c0_i32_0 : i32, i32
  }
  func.func @transform_9(%arg0: i32, %arg1: i32) -> (i32, i32) {
    %c0_i32 = arith.constant 0 : i32
    %c0_i32_0 = arith.constant 0 : i32
    return %arg0, %c0_i32 : i32, i32
  }
}

</mosaic_0001>

<bundles_post_ra>
// kernel: sage_conv_new_forward.2
= control target key start
LH: loop header
LB: loop body
LE: loop exit
PB: predicated region body
PF: predicated region fallthrough
CT: control target
= control target key end

     0   :  { %s1565_s9 = smov 0   ;;  %s2390_s0 = inlined_call_operand.vmem [shape: f32[512,32], index: 0, kind: input, shape index: {}]   ;;  %s2391_s1 = inlined_call_operand.vmem [shape: f32[32,2], index: 1, kind: input, shape index: {}]   ;;  %s2392_s2 = inlined_call_operand.vmem [shape: f32[512,2], index: 2, kind: output, shape index: {}]  }
   0x1 LB: > { %s1515_s10 = sadd.s32 4294967295, %s1548_s9   ;;  %p1519_p0 = scmp.ge.s32.totalorder %s1548_s9, 1  ;;  %s1548_s9 = sphi %s1565_s9, %s12_s9  }
   0x2   : > { %p113_p1 = scmp.lt.s32.totalorder %s1548_s9, 3 }
   0x4   : > { %p114_p2 = pnand %p1519_p0, %p113_p1 }
   0x6   : > { %117 = sbr.rel (%p114_p2) target bundleno = 548 (0x224), region = 28 }
   0xb   : > { %v182_v0 = vld [vmem:[%s2391_s1 + $0x18] sm:$0xff]  ;;  %v181_v1 = vld [vmem:[%s2391_s1 + $0x10] sm:$0xff]  ;;  %v180_v2 = vld [vmem:[%s2391_s1 + $0x8] sm:$0xff]  ;;  %s1520_s17 = sshll.u32 %s1515_s10, 5  ;;  %vm183_vm0 = vcmask 261120   ;;  %vm1426_vm1 = vcmask 15360  }
   0xc   : > { %v1582_v3 = vand.u32 4294901760, %v182_v0  ;;  %v1584_v4 = vand.u32 4294901760, %v181_v1  ;;  %v1586_v5 = vand.u32 4294901760, %v180_v2  ;;  %v179_v6 = vld [vmem:[%s2391_s1] sm:$0xff]  ;;  %p136_p3 = scmp.lt.s32.totalorder %s1520_s17, 63 }
   0xd   : > { %v1591_v7 = vand.u32 4294901760, %v179_v6 }
   0xe   : > { %1526 = vmatpush.msra.mxu2 %v1582_v3  ;;  %v570_v8 = vsub.f32 %v182_v0, %v1582_v3  ;;  %v576_v9 = vsub.f32 %v181_v1, %v1584_v4  ;;  %v582_v10 = vsub.f32 %v180_v2, %v1586_v5  ;;  %s2534_s17 = smov (!%p136_p3, %s1520_s17), 63  ;;  %293 = vmatpush.msra.mxu0 %v1582_v3 }
   0xf   : > { %v1601_v11 = vsub.f32 %v179_v6, %v1591_v7  ;;  %s1521_s20 = sshll.u32 %s2534_s17, 3 }
  0x10   : > { %v571_v12 = vand.u32 4294901760, %v570_v8  ;;  %1527 = vmatpush.msra.mxu2 %v1584_v4  ;;  %v577_v13 = vand.u32 4294901760, %v576_v9  ;;  %v583_v14 = vand.u32 4294901760, %v582_v10  ;;  %295 = vmatpush.msra.mxu0 %v1584_v4  ;;  %s1612_s23 = scalar_lea.vmem %s2390_s0, %s1521_s20  ;;  %s2204_s26 = scalar_lea.vmem %s2392_s2, %s1521_s20 }
  0x11   : > { %v589_v15 = vand.u32 4294901760, %v1601_v11  ;;  %v163_v19 = vld [vmem:[%s1612_s23 + $0x80] sm:$0xff]  ;;  %v164_v20 = vld [vmem:[%s1612_s23 + $0x88] sm:$0xff]  ;;  %v165_v30 = vld [vmem:[%s1612_s23 + $0x90] sm:$0xff] }
  0x12   : > { %v572_v16 = vsub.f32 %v570_v8, %v571_v12  ;;  %v578_v17 = vsub.f32 %v576_v9, %v577_v13  ;;  %1528 = vmatpush.msra.mxu2 %v1586_v5  ;;  %v584_v18 = vsub.f32 %v582_v10, %v583_v14  ;;  %297 = vmatpush.msra.mxu0 %v1586_v5  ;;  %v147_v21 = vld [vmem:[%s1612_s23] sm:$0xff]  ;;  %v233_v22 = vsel %vm183_vm0, %v163_v19, 0  ;;  %v148_v25 = vld [vmem:[%s1612_s23 + $0x8] sm:$0xff]  ;;  %v149_v33 = vld [vmem:[%s1612_s23 + $0x10] sm:$0xff] }
  0x13   : > { %v236_v23 = vsel %vm183_vm0, %v164_v20, 0  ;;  %v185_v24 = vsel %vm183_vm0, %v147_v21, 0  ;;  %v590_v28 = vsub.f32 %v1601_v11, %v589_v15  ;;  %v1625_v29 = vand.u32 4294901760, %v233_v22  ;;  %v166_v53 = vld [vmem:[%s1612_s23 + $0x98] sm:$0xff]  ;;  %v167_v6 = vld [vmem:[%s1612_s23 + $0xa0] sm:$0xff]  ;;  %v152_v19 = vld [vmem:[%s1612_s23 + $0x28] sm:$0xff] }
  0x14   : > { %v573_v26 = vand.u32 4294901760, %v572_v16  ;;  %v579_v27 = vand.u32 4294901760, %v578_v17  ;;  %1529 = vmatpush.msra.mxu2 %v1591_v7  ;;  %299 = vmatpush.msra.mxu0 %v1591_v7  ;;  %v1629_v31 = vand.u32 4294901760, %v236_v23  ;;  %v1631_v32 = vand.u32 4294901760, %v185_v24  ;;  %v150_v55 = vld [vmem:[%s1612_s23 + $0x18] sm:$0xff] }
  0x15   : > { %v585_v34 = vand.u32 4294901760, %v584_v18  ;;  %v1635_v35 = vsub.f32 %v233_v22, %v1625_v29  ;;  %v188_v36 = vsel %vm183_vm0, %v148_v25, 0  ;;  %v239_v39 = vsel %vm183_vm0, %v165_v30, 0  ;;  %v168_v18 = vld [vmem:[%s1612_s23 + $0xa8] sm:$0xff] }
  0x16   : > { %736 = vmatpush.msrb.mxu2 %v570_v8  ;;  %1135 = vmatpush.msrb.mxu0 %v571_v12  ;;  %v1639_v37 = vsub.f32 %v236_v23, %v1629_v31  ;;  %v1642_v38 = vsub.f32 %v185_v24, %v1631_v32  ;;  %v1645_v40 = vand.u32 4294901760, %v188_v36  ;;  %v591_v41 = vand.u32 4294901760, %v590_v28 }
  0x17   : > { %1530 = vmatpush.msra.mxu3 %v573_v26  ;;  %574 = vmatpush.msra.mxu1 %v573_v26  ;;  %v2401_v42 = vand.u32 4294901760, %v1635_v35  ;;  %v191_v43 = vsel %vm183_vm0, %v149_v33, 0  ;;  %v1657_v48 = vand.u32 4294901760, %v239_v39  ;;  %v242_v59 = vsel %vm183_vm0, %v166_v53, 0 }
  0x18   : > { %739 = vmatpush.msrb.mxu2 %v576_v9  ;;  %1139 = vmatpush.msrb.mxu0 %v577_v13  ;;  %v2414_v44 = vand.u32 4294901760, %v1642_v38  ;;  %v1651_v45 = vsub.f32 %v188_v36, %v1645_v40  ;;  %v2400_v47 = vand.u32 4294901760, %v1639_v37  ;;  %v1663_v51 = vand.u32 4294901760, %v191_v43  ;;  %v169_v36 = vld [vmem:[%s1612_s23 + $0xb0] sm:$0xff] }
  0x19   : > { %1531 = vmatpush.msra.mxu3 %v579_v27  ;;  %580 = vmatpush.msra.mxu1 %v579_v27  ;;  %v431_v46 = vsub.f32 %v1635_v35, %v2401_v42  ;;  %v1675_v57 = vsub.f32 %v239_v39, %v1657_v48  ;;  %v194_v61 = vsel %vm183_vm0, %v150_v55, 0  ;;  %v1689_v0 = vand.u32 4294901760, %v242_v59  ;;  %v153_v39 = vld [vmem:[%s1612_s23 + $0x30] sm:$0xff] }
  0x1a   : > { %742 = vmatpush.msrb.mxu2 %v582_v10  ;;  %1143 = vmatpush.msrb.mxu0 %v583_v14  ;;  %v303_v49 = vsub.f32 %v1642_v38, %v2414_v44  ;;  %v2412_v50 = vand.u32 4294901760, %v1651_v45  ;;  %v439_v56 = vsub.f32 %v1639_v37, %v2400_v47  ;;  %v1683_v60 = vsub.f32 %v191_v43, %v1663_v51  ;;  %v174_v47 = vld [vmem:[%s1612_s23 + $0xd8] sm:$0xff] }
  0x1b   : > { %1532 = vmatpush.msra.mxu3 %v585_v34  ;;  %586 = vmatpush.msra.mxu1 %v585_v34  ;;  %v432_v52 = vand.u32 4294901760, %v431_v46  ;;  %v2399_v63 = vand.u32 4294901760, %v1675_v57  ;;  %v1705_v9 = vsub.f32 %v242_v59, %v1689_v0  ;;  %v245_v10 = vsel %vm183_vm0, %v167_v6, 0 }
  0x1c   : > { %745 = vmatpush.msrb.mxu2 %v1601_v11  ;;  %1147 = vmatpush.msrb.mxu0 %v589_v15  ;;  %v304_v54 = vand.u32 4294901760, %v303_v49  ;;  %v311_v58 = vsub.f32 %v1651_v45, %v2412_v50  ;;  %v440_v62 = vand.u32 4294901760, %v439_v56  ;;  %v2411_v2 = vand.u32 4294901760, %v1683_v60  ;;  %v176_v50 = vld [vmem:[%s1612_s23 + $0xe8] sm:$0xff] }
  0x1d   : > { %1533 = vmatpush.msra.mxu3 %v591_v41  ;;  %592 = vmatpush.msra.mxu1 %v591_v41  ;;  %v447_v8 = vsub.f32 %v1675_v57, %v2399_v63  ;;  %v2397_v14 = vand.u32 4294901760, %v1705_v9  ;;  %v1717_v15 = vand.u32 4294901760, %v245_v10  ;;  %v248_v23 = vsel %vm183_vm0, %v168_v18, 0 }
  0x1e   : > { %658 = vmatmul.f32.vlgmr.msra.gmra.mxu3 %v1625_v29  ;;  %594 = vmatmul.f32.vlgmr.msra.gmra.mxu1 %v1631_v32  ;;  %v312_v1 = vand.u32 4294901760, %v311_v58  ;;  %v200_v25 = vsel %vm183_vm0, %v152_v19, 0  ;;  %v1741_v28 = vand.u32 4294901760, %v248_v23  ;;  %v251_v49 = vsel %vm183_vm0, %v169_v36, 0 }
  0x1f   : > { %433 = vmatmul.f32.vlgmr.msra.gmra.mxu2 %v432_v52  ;;  %920 = vmatpush.msrb.mxu3 %v1582_v3  ;;  %v448_v13 = vand.u32 4294901760, %v447_v8  ;;  %v455_v20 = vsub.f32 %v1705_v9, %v2397_v14  ;;  %v1730_v21 = vsub.f32 %v245_v10, %v1717_v15  ;;  %v1744_v34 = vand.u32 4294901760, %v200_v25 }
  0x20   : > { %305 = vmatmul.f32.vlgmr.msra.gmra.mxu0 %v304_v54  ;;  %1290 = vmatpush.msrb.mxu1 %v1582_v3  ;;  %v1693_v3 = vand.u32 4294901760, %v194_v61  ;;  %v1754_v43 = vsub.f32 %v248_v23, %v1741_v28  ;;  %v203_v53 = vsel %vm183_vm0, %v153_v39, 0  ;;  %v1765_v56 = vand.u32 4294901760, %v251_v49  ;;  %v171_v23 = vld [vmem:[%s1612_s23 + $0xc0] sm:$0xff] }
  0x21   : > { %922 = vmatpush.msrb.mxu3 %v1584_v4  ;;  %v456_v26 = vand.u32 4294901760, %v455_v20  ;;  %v2396_v27 = vand.u32 4294901760, %v1730_v21  ;;  %v1761_v52 = vsub.f32 %v200_v25, %v1744_v34  ;;  %v155_v25 = vld [vmem:[%s1612_s23 + $0x40] sm:$0xff]  ;;  %v257_v39 = vsel %vm183_vm0, %v171_v23, 0 }
  0x22   : > { %1292 = vmatpush.msrb.mxu1 %v1584_v4  ;;  %v151_v4 = vld [vmem:[%s1612_s23 + $0x20] sm:$0xff]  ;;  %v1713_v11 = vsub.f32 %v194_v61, %v1693_v3  ;;  %v2395_v55 = vand.u32 4294901760, %v1754_v43  ;;  %v1768_v61 = vand.u32 4294901760, %v203_v53 }
  0x23   : > { %924 = vmatpush.msrb.mxu3 %v1586_v5  ;;  %v197_v12 = vsel %vm183_vm0, %v151_v4, 0  ;;  %v463_v41 = vsub.f32 %v1730_v21, %v2396_v27  ;;  %v2406_v59 = vand.u32 4294901760, %v1761_v52  ;;  %v1778_v4 = vsub.f32 %v251_v49, %v1765_v56 }
  0x24   : > { %1294 = vmatpush.msrb.mxu1 %v1586_v5  ;;  %v319_v5 = vsub.f32 %v1683_v60, %v2411_v2  ;;  %v1720_v17 = vand.u32 4294901760, %v197_v12  ;;  %v471_v6 = vsub.f32 %v1754_v43, %v2395_v55  ;;  %v1785_v10 = vsub.f32 %v203_v53, %v1768_v61 }
  0x25   : > { %926 = vmatpush.msrb.mxu3 %v1591_v7  ;;  %v464_v54 = vand.u32 4294901760, %v463_v41  ;;  %v343_v8 = vsub.f32 %v1761_v52, %v2406_v59  ;;  %v175_v59 = vld [vmem:[%s1612_s23 + $0xe0] sm:$0xff] }
  0x26   : > { %662 = vmatmul.f32.gmra.mxu3 %v1629_v31  ;;  %598 = vmatmul.f32.gmra.mxu1 %v1645_v40  ;;  %v320_v16 = vand.u32 4294901760, %v319_v5  ;;  %v1737_v24 = vsub.f32 %v197_v12, %v1720_v17  ;;  %v2405_v20 = vand.u32 4294901760, %v1785_v10 }
  0x27   : > { %441 = vmatmul.f32.gmra.mxu2 %v440_v62  ;;  %1296 = vmatpush.msrb.mxu1 %v1591_v7  ;;  %v2409_v7 = vand.u32 4294901760, %v1713_v11  ;;  %v170_v62 = vld [vmem:[%s1612_s23 + $0xb8] sm:$0xff]  ;;  %v344_v19 = vand.u32 4294901760, %v343_v8  ;;  %v156_v8 = vld [vmem:[%s1612_s23 + $0x48] sm:$0xff] }
  0x28   : > { %313 = vmatmul.f32.gmra.mxu0 %v312_v1  ;;  %v2408_v33 = vand.u32 4294901760, %v1737_v24  ;;  %v154_v1 = vld [vmem:[%s1612_s23 + $0x38] sm:$0xff]  ;;  %v254_v5 = vsel %vm183_vm0, %v170_v62, 0  ;;  %v351_v36 = vsub.f32 %v1785_v10, %v2405_v20 }
  0x29   : > { %v327_v22 = vsub.f32 %v1713_v11, %v2409_v7  ;;  %v206_v12 = vsel %vm183_vm0, %v154_v1, 0  ;;  %v1789_v18 = vand.u32 4294901760, %v254_v5 }
  0x2a   : > { %v335_v46 = vsub.f32 %v1737_v24, %v2408_v33 }
  0x2b   : > { %v328_v30 = vand.u32 4294901760, %v327_v22  ;;  %v1792_v22 = vand.u32 4294901760, %v206_v12 }
  0x2c   : > { %v336_v58 = vand.u32 4294901760, %v335_v46  ;;  %v209_v46 = vsel %vm183_vm0, %v155_v25, 0  ;;  %v212_v25 = vsel %vm183_vm0, %v156_v8, 0 }
  0x2d   : > { %v1809_v41 = vsub.f32 %v206_v12, %v1792_v22  ;;  %v1816_v1 = vand.u32 4294901760, %v209_v46 }
  0x2e   : > { %666 = vmatmul.f32.gmra.mxu3 %v1657_v48  ;;  %602 = vmatmul.f32.gmra.mxu1 %v1663_v51 }
  0x2f   : > { %449 = vmatmul.f32.gmra.mxu2 %v448_v13  ;;  %v472_v13 = vand.u32 4294901760, %v471_v6  ;;  %v2403_v62 = vand.u32 4294901760, %v1809_v41  ;;  %v172_v6 = vld [vmem:[%s1612_s23 + $0xc8] sm:$0xff]  ;;  %v1833_v23 = vsub.f32 %v209_v46, %v1816_v1  ;;  %v157_v46 = vld [vmem:[%s1612_s23 + $0x50] sm:$0xff] }
  0x30   : > { %321 = vmatmul.f32.gmra.mxu0 %v320_v16  ;;  %v2394_v16 = vand.u32 4294901760, %v1778_v4 }
  0x36   : > { %670 = vmatmul.f32.gmra.mxu3 %v1689_v0  ;;  %606 = vmatmul.f32.gmra.mxu1 %v1693_v3 }
  0x37   : > { %457 = vmatmul.f32.gmra.mxu2 %v456_v26  ;;  %v479_v26 = vsub.f32 %v1778_v4, %v2394_v16  ;;  %v173_v16 = vld [vmem:[%s1612_s23 + $0xd0] sm:$0xff] }
  0x38   : > { %329 = vmatmul.f32.gmra.mxu0 %v328_v30  ;;  %v1802_v30 = vsub.f32 %v254_v5, %v1789_v18 }
  0x39   : > { %v480_v49 = vand.u32 4294901760, %v479_v26 }
  0x3a   : > { %v2393_v53 = vand.u32 4294901760, %v1802_v30 }
  0x3c   : > { %v487_v5 = vsub.f32 %v1802_v30, %v2393_v53 }
  0x3e   : > { %674 = vmatmul.f32.gmra.mxu3 %v1717_v15  ;;  %610 = vmatmul.f32.gmra.mxu1 %v1720_v17  ;;  %v488_v26 = vand.u32 4294901760, %v487_v5 }
  0x3f   : > { %465 = vmatmul.f32.gmra.mxu2 %v464_v54  ;;  %v1813_v54 = vand.u32 4294901760, %v257_v39 }
  0x40   : > { %337 = vmatmul.f32.gmra.mxu0 %v336_v58  ;;  %v352_v58 = vand.u32 4294901760, %v351_v36 }
  0x41   : > { %2447 = vst [vmem:[#allocation2_spill] sm:$0xff] %v1813_v54  ;;  %v1826_v12 = vsub.f32 %v257_v39, %v1813_v54  ;;  %v2402_v39 = vand.u32 4294901760, %v1833_v23 }
  0x43   : > { %2448 = vst [vmem:[#allocation3_spill] sm:$0xff] %v1826_v12  ;;  %v2398_v36 = vand.u32 4294901760, %v1826_v12  ;;  %v367_v5 = vsub.f32 %v1833_v23, %v2402_v39 }
  0x45   : > { %v368_v63 = vand.u32 4294901760, %v367_v5  ;;  %v266_v5 = vsel %vm183_vm0, %v174_v47, 0  ;;  %v159_v47 = vld [vmem:[%s1612_s23 + $0x60] sm:$0xff] }
  0x46   : > { %678 = vmatmul.f32.gmra.mxu3 %v1741_v28  ;;  %614 = vmatmul.f32.gmra.mxu1 %v1744_v34 }
  0x47   : > { %473 = vmatmul.f32.gmra.mxu2 %v472_v13  ;;  %v359_v13 = vsub.f32 %v1809_v41, %v2403_v62 }
  0x48   : > { %345 = vmatmul.f32.gmra.mxu0 %v344_v19  ;;  %v260_v19 = vsel %vm183_vm0, %v172_v6, 0  ;;  %v495_v6 = vsub.f32 %v1826_v12, %v2398_v36 }
  0x49   : > { %v360_v53 = vand.u32 4294901760, %v359_v13  ;;  %v263_v13 = vsel %vm183_vm0, %v173_v16, 0  ;;  %v158_v16 = vld [vmem:[%s1612_s23 + $0x58] sm:$0xff] }
  0x4a   : > { %v496_v27 = vand.u32 4294901760, %v495_v6  ;;  %v1861_v36 = vand.u32 4294901760, %v263_v13 }
  0x4c   : > { %2451 = vst [vmem:[#allocation6_spill] sm:$0xff] %v1861_v36 }
  0x4e   : > { %682 = vmatmul.f32.gmra.mxu3 %v1765_v56  ;;  %618 = vmatmul.f32.gmra.mxu1 %v1768_v61 }
  0x4f   : > { %481 = vmatmul.f32.gmra.mxu2 %v480_v49  ;;  %v1837_v49 = vand.u32 4294901760, %v260_v19 }
  0x50   : > { %353 = vmatmul.f32.gmra.mxu0 %v352_v58  ;;  %v1840_v58 = vand.u32 4294901760, %v212_v25 }
  0x51   : > { %2449 = vst [vmem:[#allocation4_spill] sm:$0xff] %v1837_v49  ;;  %v1850_v8 = vsub.f32 %v260_v19, %v1837_v49 }
  0x52   : > { %v1857_v55 = vsub.f32 %v212_v25, %v1840_v58 }
  0x53   : > { %2450 = vst [vmem:[#allocation5_spill] sm:$0xff] %v1850_v8  ;;  %v2404_v14 = vand.u32 4294901760, %v1850_v8 }
  0x54   : > { %v2407_v19 = vand.u32 4294901760, %v1857_v55 }
  0x55   : > { %v503_v25 = vsub.f32 %v1850_v8, %v2404_v14  ;;  %v1885_v14 = vand.u32 4294901760, %v266_v5  ;;  %v178_v8 = vld [vmem:[%s1612_s23 + $0xf8] sm:$0xff] }
  0x56   : > { %686 = vmatmul.f32.gmra.mxu3 %v1789_v18  ;;  %622 = vmatmul.f32.gmra.mxu1 %v1792_v22  ;;  %v375_v6 = vsub.f32 %v1857_v55, %v2407_v19 }
  0x57   : > { %489 = vmatmul.f32.gmra.mxu2 %v488_v26  ;;  %v215_v26 = vsel %vm183_vm0, %v157_v46, 0  ;;  %v1874_v46 = vsub.f32 %v263_v13, %v1861_v36  ;;  %v504_v39 = vand.u32 4294901760, %v503_v25  ;;  %2453 = vst [vmem:[#allocation8_spill] sm:$0xff] %v1885_v14 }
  0x58   : > { %361 = vmatmul.f32.gmra.mxu0 %v360_v53  ;;  %v1864_v53 = vand.u32 4294901760, %v215_v26  ;;  %v376_v20 = vand.u32 4294901760, %v375_v6  ;;  %v269_v6 = vsel %vm183_vm0, %v175_v59, 0  ;;  %v160_v59 = vld [vmem:[%s1612_s23 + $0x68] sm:$0xff] }
  0x59   : > { %2452 = vst [vmem:[#allocation7_spill] sm:$0xff] %v1874_v46  ;;  %v2410_v62 = vand.u32 4294901760, %v1874_v46 }
  0x5a   : > { %v1881_v42 = vsub.f32 %v215_v26, %v1864_v53 }
  0x5b   : > { %v511_v26 = vsub.f32 %v1874_v46, %v2410_v62  ;;  %v1909_v62 = vand.u32 4294901760, %v269_v6  ;;  %v177_v46 = vld [vmem:[%s1612_s23 + $0xf0] sm:$0xff] }
  0x5c   : > { %v2413_v13 = vand.u32 4294901760, %v1881_v42 }
  0x5d   : > { %v512_v33 = vand.u32 4294901760, %v511_v26  ;;  %2455 = vst [vmem:[#allocation10_spill] sm:$0xff] %v1909_v62 }
  0x5e   : > { %690 = vmatmul.f32.gmra.mxu3 %v1813_v54  ;;  %626 = vmatmul.f32.gmra.mxu1 %v1816_v1  ;;  %v383_v25 = vsub.f32 %v1881_v42, %v2413_v13 }
  0x5f   : > { %497 = vmatmul.f32.gmra.mxu2 %v496_v27  ;;  %v218_v27 = vsel %vm183_vm0, %v158_v16, 0  ;;  %v1898_v16 = vsub.f32 %v266_v5, %v1885_v14 }
  0x60   : > { %369 = vmatmul.f32.gmra.mxu0 %v368_v63  ;;  %v1888_v63 = vand.u32 4294901760, %v218_v27  ;;  %v384_v2 = vand.u32 4294901760, %v383_v25  ;;  %v272_v25 = vsel %vm183_vm0, %v176_v50, 0  ;;  %v161_v50 = vld [vmem:[%s1612_s23 + $0x70] sm:$0xff] }
  0x61   : > { %2454 = vst [vmem:[#allocation9_spill] sm:$0xff] %v1898_v16  ;;  %v2417_v7 = vand.u32 4294901760, %v1898_v16 }
  0x62   : > { %v1905_v19 = vsub.f32 %v218_v27, %v1888_v63 }
  0x63   : > { %v519_v27 = vsub.f32 %v1898_v16, %v2417_v7  ;;  %v1933_v7 = vand.u32 4294901760, %v272_v25 }
  0x64   : > { %v2422_v5 = vand.u32 4294901760, %v1905_v19 }
  0x65   : > { %v520_v44 = vand.u32 4294901760, %v519_v27  ;;  %2457 = vst [vmem:[#allocation12_spill] sm:$0xff] %v1933_v7 }
  0x66   : > { %694 = vmatmul.f32.gmra.mxu3 %v1837_v49  ;;  %630 = vmatmul.f32.gmra.mxu1 %v1840_v58  ;;  %v391_v26 = vsub.f32 %v1905_v19, %v2422_v5 }
  0x67   : > { %505 = vmatmul.f32.gmra.mxu2 %v504_v39  ;;  %v221_v39 = vsel %vm183_vm0, %v159_v47, 0  ;;  %v1922_v47 = vsub.f32 %v269_v6, %v1909_v62 }
  0x68   : > { %377 = vmatmul.f32.gmra.mxu0 %v376_v20  ;;  %v1912_v20 = vand.u32 4294901760, %v221_v39  ;;  %v392_v16 = vand.u32 4294901760, %v391_v26  ;;  %v275_v26 = vsel %vm183_vm0, %v177_v46, 0  ;;  %v162_v46 = vld [vmem:[%s1612_s23 + $0x78] sm:$0xff] }
  0x69   : > { %2456 = vst [vmem:[#allocation11_spill] sm:$0xff] %v1922_v47 }
  0x6a   : > { %v1929_v13 = vsub.f32 %v221_v39, %v1912_v20 }
  0x6c   : > { %v2432_v6 = vand.u32 4294901760, %v1929_v13 }
  0x6e   : > { %698 = vmatmul.f32.gmra.mxu3 %v1861_v36  ;;  %634 = vmatmul.f32.gmra.mxu1 %v1864_v53  ;;  %v2427_v36 = vand.u32 4294901760, %v1922_v47  ;;  %v399_v27 = vsub.f32 %v1929_v13, %v2432_v6 }
  0x6f   : > { %513 = vmatmul.f32.gmra.mxu2 %v512_v33  ;;  %v224_v33 = vsel %vm183_vm0, %v160_v59, 0  ;;  %v1946_v59 = vsub.f32 %v272_v25, %v1933_v7 }
  0x70   : > { %385 = vmatmul.f32.gmra.mxu0 %v384_v2  ;;  %v1936_v2 = vand.u32 4294901760, %v224_v33  ;;  %v527_v39 = vsub.f32 %v1922_v47, %v2427_v36  ;;  %v1957_v36 = vand.u32 4294901760, %v275_v26  ;;  %v400_v47 = vand.u32 4294901760, %v399_v27 }
  0x71   : > { %v2439_v49 = vand.u32 4294901760, %v1946_v59  ;;  %v278_v27 = vsel %vm183_vm0, %v178_v8, 0 }
  0x72   : > { %v1953_v5 = vsub.f32 %v224_v33, %v1936_v2  ;;  %v1981_v12 = vand.u32 4294901760, %v278_v27 }
  0x73   : > { %v535_v33 = vsub.f32 %v1946_v59, %v2439_v49 }
  0x74   : > { %v2440_v25 = vand.u32 4294901760, %v1953_v5 }
  0x76   : > { %702 = vmatmul.f32.gmra.mxu3 %v1885_v14  ;;  %638 = vmatmul.f32.gmra.mxu1 %v1888_v63  ;;  %v528_v14 = vand.u32 4294901760, %v527_v39  ;;  %v407_v39 = vsub.f32 %v1953_v5, %v2440_v25 }
  0x77   : > { %521 = vmatmul.f32.gmra.mxu2 %v520_v44  ;;  %v227_v44 = vsel %vm183_vm0, %v161_v50, 0  ;;  %v1970_v50 = vsub.f32 %v275_v26, %v1957_v36 }
  0x78   : > { %393 = vmatmul.f32.gmra.mxu0 %v392_v16  ;;  %v1960_v16 = vand.u32 4294901760, %v227_v44  ;;  %v408_v49 = vand.u32 4294901760, %v407_v39 }
  0x79   : > { %v2443_v54 = vand.u32 4294901760, %v1970_v50 }
  0x7a   : > { %v1977_v6 = vsub.f32 %v227_v44, %v1960_v16  ;;  %v1992_v44 = vsub.f32 %v278_v27, %v1981_v12 }
  0x7b   : > { %v543_v8 = vsub.f32 %v1970_v50, %v2443_v54  ;;  %v2458_v54 = vand.u32 4294901760, %v1642_v38 }
  0x7c   : > { %v2446_v26 = vand.u32 4294901760, %v1977_v6  ;;  %v2444_v25 = vand.u32 4294901760, %v1992_v44 }
  0x7d   : > { %v544_v39 = vand.u32 4294901760, %v543_v8 }
  0x7e   : > { %706 = vmatmul.f32.gmra.mxu3 %v1909_v62  ;;  %642 = vmatmul.f32.gmra.mxu1 %v1912_v20  ;;  %v230_v62 = vsel %vm183_vm0, %v162_v46, 0  ;;  %v415_v46 = vsub.f32 %v1977_v6, %v2446_v26 }
  0x7f   : > { %529 = vmatmul.f32.gmra.mxu2 %v528_v14  ;;  %v536_v14 = vand.u32 4294901760, %v535_v33 }
  0x80   : > { %401 = vmatmul.f32.gmra.mxu0 %v400_v47  ;;  %v1984_v47 = vand.u32 4294901760, %v230_v62 }
  0x82   : > { %v1998_v33 = vsub.f32 %v230_v62, %v1984_v47 }
  0x86   : > { %710 = vmatmul.f32.gmra.mxu3 %v1933_v7  ;;  %646 = vmatmul.f32.gmra.mxu1 %v1936_v2  ;;  %v416_v7 = vand.u32 4294901760, %v415_v46 }
  0x87   : > { %537 = vmatmul.f32.gmra.mxu2 %v536_v14  ;;  %v2445_v14 = vand.u32 4294901760, %v1998_v33 }
  0x88   : > { %409 = vmatmul.f32.gmra.mxu0 %v408_v49  ;;  %v551_v49 = vsub.f32 %v1992_v44, %v2444_v25 }
  0x89   : > { %v423_v62 = vsub.f32 %v1998_v33, %v2445_v14 }
  0x8a   : > { %v552_v27 = vand.u32 4294901760, %v551_v49 }
  0x8b   : > { %v424_v8 = vand.u32 4294901760, %v423_v62 }
  0x8e   : > { %714 = vmatmul.f32.gmra.mxu3 %v1957_v36  ;;  %650 = vmatmul.f32.gmra.mxu1 %v1960_v16 }
  0x8f   : > { %545 = vmatmul.f32.gmra.mxu2 %v544_v39 }
  0x90   : > { %417 = vmatmul.f32.gmra.mxu0 %v416_v7 }
  0x96   : > { %718 = vmatmul.f32.gmra.mxu3 %v1981_v12  ;;  %654 = vmatmul.f32.gmra.mxu1 %v1984_v47 }
  0x97   : > { %553 = vmatmul.f32.gmra.mxu2 %v552_v27 }
  0x98   : > { %425 = vmatmul.f32.gmra.mxu0 %v424_v8  ;;  %v2460_v8 = vand.u32 4294901760, %v1651_v45 }
  0x9b   : > { %v2012_v46 = vpop.f32.mrf.mxu1 }
  0x9d   : > { %v2014_v39 = vpop.f32.mrf.mxu0 }
  0x9e   : > { %930 = vmatmul.f32.vlgmr.msrb.gmra.mxu3 %v2458_v54  ;;  %1298 = vmatmul.f32.vlgmr.msrb.gmra.mxu1 %v1631_v32 }
  0x9f   : > { %748 = vmatmul.f32.vlgmr.msrb.gmra.mxu2 %v1642_v38 }
  0xa0   : > { %1149 = vmatmul.f32.vlgmr.msrb.gmra.mxu0 %v1631_v32 }
  0xa1   : > { %v659_v7 = vpop.f32.mrf.mxu3 }
  0xa2   : > { %v434_v49 = vpop.f32.mrf.mxu2 }
  0xa3   : > { %v2021_v62 = vadd.f32 %v659_v7, %v434_v49  ;;  %v2023_v25 = vpop.f32.mrf.mxu1  ;;  %v2462_v49 = vand.u32 4294901760, %v1683_v60 }
  0xa5   : > { %2459 = vst [vmem:[#allocation13_spill] sm:$0xff] %v2021_v62  ;;  %v2025_v27 = vpop.f32.mrf.mxu0  ;;  %v2491_v62 = vand.u32 4294901760, %v1639_v37 }
  0xa6   : > { %936 = vmatmul.f32.gmra.mxu3 %v2460_v8  ;;  %1302 = vmatmul.f32.gmra.mxu1 %v1645_v40 }
  0xa7   : > { %753 = vmatmul.f32.gmra.mxu2 %v1651_v45 }
  0xa8   : > { %1153 = vmatmul.f32.gmra.mxu0 %v1645_v40 }
  0xa9   : > { %v663_v38 = vpop.f32.mrf.mxu3 }
  0xaa   : > { %v442_v54 = vpop.f32.mrf.mxu2 }
  0xab   : > { %v2032_v32 = vadd.f32 %v663_v38, %v442_v54  ;;  %v2034_v14 = vpop.f32.mrf.mxu1  ;;  %v2464_v54 = vand.u32 4294901760, %v1713_v11 }
  0xad   : > { %2461 = vst [vmem:[#allocation14_spill] sm:$0xff] %v2032_v32  ;;  %v2036_v7 = vpop.f32.mrf.mxu0 }
  0xae   : > { %942 = vmatmul.f32.gmra.mxu3 %v2462_v49  ;;  %1306 = vmatmul.f32.gmra.mxu1 %v1663_v51 }
  0xaf   : > { %758 = vmatmul.f32.gmra.mxu2 %v1683_v60 }
  0xb0   : > { %1157 = vmatmul.f32.gmra.mxu0 %v1663_v51 }
  0xb1   : > { %v667_v45 = vpop.f32.mrf.mxu3 }
  0xb2   : > { %v450_v8 = vpop.f32.mrf.mxu2 }
  0xb3   : > { %v2043_v40 = vadd.f32 %v667_v45, %v450_v8  ;;  %v2045_v26 = vpop.f32.mrf.mxu1  ;;  %v2466_v8 = vand.u32 4294901760, %v1737_v24 }
  0xb5   : > { %2463 = vst [vmem:[#allocation15_spill] sm:$0xff] %v2043_v40  ;;  %v2047_v38 = vpop.f32.mrf.mxu0 }
  0xb6   : > { %948 = vmatmul.f32.gmra.mxu3 %v2464_v54  ;;  %1310 = vmatmul.f32.gmra.mxu1 %v1693_v3 }
  0xb7   : > { %763 = vmatmul.f32.gmra.mxu2 %v1713_v11 }
  0xb8   : > { %1161 = vmatmul.f32.gmra.mxu0 %v1693_v3 }
  0xb9   : > { %v671_v60 = vpop.f32.mrf.mxu3 }
  0xba   : > { %v458_v49 = vpop.f32.mrf.mxu2 }
  0xbb   : > { %v2054_v51 = vadd.f32 %v671_v60, %v458_v49  ;;  %v2056_v32 = vpop.f32.mrf.mxu1  ;;  %v2468_v49 = vand.u32 4294901760, %v1761_v52 }
  0xbd   : > { %2465 = vst [vmem:[#allocation16_spill] sm:$0xff] %v2054_v51  ;;  %v2058_v45 = vpop.f32.mrf.mxu0 }
  0xbe   : > { %954 = vmatmul.f32.gmra.mxu3 %v2466_v8  ;;  %1314 = vmatmul.f32.gmra.mxu1 %v1720_v17 }
  0xbf   : > { %768 = vmatmul.f32.gmra.mxu2 %v1737_v24 }
  0xc0   : > { %1165 = vmatmul.f32.gmra.mxu0 %v1720_v17 }
  0xc1   : > { %v675_v11 = vpop.f32.mrf.mxu3 }
  0xc2   : > { %v466_v54 = vpop.f32.mrf.mxu2 }
  0xc3   : > { %v2065_v3 = vadd.f32 %v675_v11, %v466_v54  ;;  %v2067_v40 = vpop.f32.mrf.mxu1  ;;  %v2470_v54 = vand.u32 4294901760, %v1785_v10 }
  0xc5   : > { %2467 = vst [vmem:[#allocation17_spill] sm:$0xff] %v2065_v3  ;;  %v2069_v60 = vpop.f32.mrf.mxu0 }
  0xc6   : > { %960 = vmatmul.f32.gmra.mxu3 %v2468_v49  ;;  %1318 = vmatmul.f32.gmra.mxu1 %v1744_v34 }
  0xc7   : > { %773 = vmatmul.f32.gmra.mxu2 %v1761_v52 }
  0xc8   : > { %1169 = vmatmul.f32.gmra.mxu0 %v1744_v34 }
  0xc9   : > { %v679_v24 = vpop.f32.mrf.mxu3 }
  0xca   : > { %v474_v8 = vpop.f32.mrf.mxu2 }
  0xcb   : > { %v2076_v17 = vadd.f32 %v679_v24, %v474_v8  ;;  %v2078_v51 = vpop.f32.mrf.mxu1  ;;  %v2472_v8 = vand.u32 4294901760, %v1809_v41 }
  0xcd   : > { %2469 = vst [vmem:[#allocation18_spill] sm:$0xff] %v2076_v17  ;;  %v2080_v11 = vpop.f32.mrf.mxu0 }
  0xce   : > { %966 = vmatmul.f32.gmra.mxu3 %v2470_v54  ;;  %1322 = vmatmul.f32.gmra.mxu1 %v1768_v61 }
  0xcf   : > { %778 = vmatmul.f32.gmra.mxu2 %v1785_v10 }
  0xd0   : > { %1173 = vmatmul.f32.gmra.mxu0 %v1768_v61 }
  0xd1   : > { %v683_v52 = vpop.f32.mrf.mxu3 }
  0xd2   : > { %v482_v49 = vpop.f32.mrf.mxu2 }
  0xd3   : > { %v2087_v34 = vadd.f32 %v683_v52, %v482_v49  ;;  %v2089_v3 = vpop.f32.mrf.mxu1  ;;  %v2474_v49 = vand.u32 4294901760, %v1833_v23 }
  0xd5   : > { %2471 = vst [vmem:[#allocation19_spill] sm:$0xff] %v2087_v34  ;;  %v2091_v24 = vpop.f32.mrf.mxu0 }
  0xd6   : > { %972 = vmatmul.f32.gmra.mxu3 %v2472_v8  ;;  %1326 = vmatmul.f32.gmra.mxu1 %v1792_v22 }
  0xd7   : > { %783 = vmatmul.f32.gmra.mxu2 %v1809_v41 }
  0xd8   : > { %1177 = vmatmul.f32.gmra.mxu0 %v1792_v22 }
  0xd9   : > { %v687_v10 = vpop.f32.mrf.mxu3 }
  0xda   : > { %v490_v54 = vpop.f32.mrf.mxu2 }
  0xdb   : > { %v2098_v61 = vadd.f32 %v687_v10, %v490_v54  ;;  %v2100_v17 = vpop.f32.mrf.mxu1  ;;  %v2476_v54 = vand.u32 4294901760, %v1857_v55 }
  0xdd   : > { %2473 = vst [vmem:[#allocation20_spill] sm:$0xff] %v2098_v61  ;;  %v2102_v52 = vpop.f32.mrf.mxu0 }
  0xde   : > { %978 = vmatmul.f32.gmra.mxu3 %v2474_v49  ;;  %1330 = vmatmul.f32.gmra.mxu1 %v1816_v1 }
  0xdf   : > { %788 = vmatmul.f32.gmra.mxu2 %v1833_v23 }
  0xe0   : > { %1181 = vmatmul.f32.gmra.mxu0 %v1816_v1 }
  0xe1   : > { %v691_v41 = vpop.f32.mrf.mxu3 }
  0xe2   : > { %v498_v8 = vpop.f32.mrf.mxu2 }
  0xe3   : > { %v2109_v22 = vadd.f32 %v691_v41, %v498_v8  ;;  %v2111_v34 = vpop.f32.mrf.mxu1  ;;  %v2478_v8 = vand.u32 4294901760, %v1881_v42 }
  0xe5   : > { %2475 = vst [vmem:[#allocation21_spill] sm:$0xff] %v2109_v22  ;;  %v2113_v10 = vpop.f32.mrf.mxu0 }
  0xe6   : > { %984 = vmatmul.f32.gmra.mxu3 %v2476_v54  ;;  %1334 = vmatmul.f32.gmra.mxu1 %v1840_v58 }
  0xe7   : > { %793 = vmatmul.f32.gmra.mxu2 %v1857_v55 }
  0xe8   : > { %1185 = vmatmul.f32.gmra.mxu0 %v1840_v58 }
  0xe9   : > { %v695_v23 = vpop.f32.mrf.mxu3 }
  0xea   : > { %v506_v49 = vpop.f32.mrf.mxu2 }
  0xeb   : > { %v2120_v1 = vadd.f32 %v695_v23, %v506_v49  ;;  %v2122_v61 = vpop.f32.mrf.mxu1  ;;  %v2480_v49 = vand.u32 4294901760, %v1905_v19 }
  0xed   : > { %2477 = vst [vmem:[#allocation22_spill] sm:$0xff] %v2120_v1  ;;  %v2124_v41 = vpop.f32.mrf.mxu0 }
  0xee   : > { %990 = vmatmul.f32.gmra.mxu3 %v2478_v8  ;;  %1338 = vmatmul.f32.gmra.mxu1 %v1864_v53 }
  0xef   : > { %798 = vmatmul.f32.gmra.mxu2 %v1881_v42 }
  0xf0   : > { %1189 = vmatmul.f32.gmra.mxu0 %v1864_v53 }
  0xf1   : > { %v699_v55 = vpop.f32.mrf.mxu3 }
  0xf2   : > { %v514_v54 = vpop.f32.mrf.mxu2 }
  0xf3   : > { %v2131_v58 = vadd.f32 %v699_v55, %v514_v54  ;;  %v2133_v22 = vpop.f32.mrf.mxu1  ;;  %v2482_v54 = vand.u32 4294901760, %v1929_v13 }
  0xf5   : > { %2479 = vst [vmem:[#allocation23_spill] sm:$0xff] %v2131_v58  ;;  %v2135_v23 = vpop.f32.mrf.mxu0 }
  0xf6   : > { %996 = vmatmul.f32.gmra.mxu3 %v2480_v49  ;;  %1342 = vmatmul.f32.gmra.mxu1 %v1888_v63 }
  0xf7   : > { %803 = vmatmul.f32.gmra.mxu2 %v1905_v19 }
  0xf8   : > { %1193 = vmatmul.f32.gmra.mxu0 %v1888_v63 }
  0xf9   : > { %v703_v42 = vpop.f32.mrf.mxu3 }
  0xfa   : > { %v522_v8 = vpop.f32.mrf.mxu2 }
  0xfb   : > { %v2142_v53 = vadd.f32 %v703_v42, %v522_v8  ;;  %v2144_v1 = vpop.f32.mrf.mxu1  ;;  %v2484_v8 = vand.u32 4294901760, %v1953_v5 }
  0xfd   : > { %2481 = vst [vmem:[#allocation24_spill] sm:$0xff] %v2142_v53  ;;  %v2146_v55 = vpop.f32.mrf.mxu0 }
  0xfe   : > { %1002 = vmatmul.f32.gmra.mxu3 %v2482_v54  ;;  %1346 = vmatmul.f32.gmra.mxu1 %v1912_v20 }
  0xff   : > { %808 = vmatmul.f32.gmra.mxu2 %v1929_v13 }
 0x100   : > { %1197 = vmatmul.f32.gmra.mxu0 %v1912_v20 }
 0x101   : > { %v707_v19 = vpop.f32.mrf.mxu3 }
 0x102   : > { %v530_v49 = vpop.f32.mrf.mxu2 }
 0x103   : > { %v2153_v63 = vadd.f32 %v707_v19, %v530_v49  ;;  %v2155_v58 = vpop.f32.mrf.mxu1  ;;  %v2486_v49 = vand.u32 4294901760, %v1977_v6 }
 0x105   : > { %2483 = vst [vmem:[#allocation25_spill] sm:$0xff] %v2153_v63  ;;  %v2157_v42 = vpop.f32.mrf.mxu0 }
 0x106   : > { %1008 = vmatmul.f32.gmra.mxu3 %v2484_v8  ;;  %1350 = vmatmul.f32.gmra.mxu1 %v1936_v2 }
 0x107   : > { %813 = vmatmul.f32.gmra.mxu2 %v1953_v5 }
 0x108   : > { %1201 = vmatmul.f32.gmra.mxu0 %v1936_v2 }
 0x109   : > { %v711_v13 = vpop.f32.mrf.mxu3 }
 0x10a   : > { %v538_v54 = vpop.f32.mrf.mxu2 }
 0x10b   : > { %v2164_v20 = vadd.f32 %v711_v13, %v538_v54  ;;  %v2166_v53 = vpop.f32.mrf.mxu1  ;;  %v2488_v54 = vand.u32 4294901760, %v1998_v33 }
 0x10d   : > { %2485 = vst [vmem:[#allocation26_spill] sm:$0xff] %v2164_v20  ;;  %v2168_v19 = vpop.f32.mrf.mxu0 }
 0x10e   : > { %1014 = vmatmul.f32.gmra.mxu3 %v2486_v49  ;;  %1354 = vmatmul.f32.gmra.mxu1 %v1960_v16 }
 0x10f   : > { %818 = vmatmul.f32.gmra.mxu2 %v1977_v6 }
 0x110   : > { %1205 = vmatmul.f32.gmra.mxu0 %v1960_v16 }
 0x111   : > { %v715_v5 = vpop.f32.mrf.mxu3 }
 0x112   : > { %v546_v8 = vpop.f32.mrf.mxu2 }
 0x113   : > { %v2175_v2 = vadd.f32 %v715_v5, %v546_v8  ;;  %v2177_v63 = vpop.f32.mrf.mxu1  ;;  %v2490_v8 = vand.u32 4294901760, %v1635_v35 }
 0x115   : > { %2487 = vst [vmem:[#allocation27_spill] sm:$0xff] %v2175_v2  ;;  %v2179_v13 = vpop.f32.mrf.mxu0 }
 0x116   : > { %1020 = vmatmul.f32.gmra.mxu3 %v2488_v54  ;;  %1358 = vmatmul.f32.gmra.mxu1 %v1984_v47 }
 0x117   : > { %823 = vmatmul.f32.gmra.mxu2 %v1998_v33  ;;  %v596_v33 = vadd.f32 %v2012_v46, %v2014_v39 }
 0x118   : > { %1209 = vmatmul.f32.gmra.mxu0 %v1984_v47 }
 0x119   : > { %v719_v6 = vpop.f32.mrf.mxu3 }
 0x11a   : > { %v554_v49 = vpop.f32.mrf.mxu2 }
 0x11b   : > { %v2186_v16 = vadd.f32 %v719_v6, %v554_v49  ;;  %v1299_v20 = vpop.f32.mrf.mxu1 }
 0x11d   : > { %2489 = vst [vmem:[#allocation28_spill] sm:$0xff] %v2186_v16  ;;  %v1150_v5 = vpop.f32.mrf.mxu0 }
 0x11e   : > { %1026 = vmatmul.f32.gmra.mxu3 %v2490_v8  ;;  %1362 = vmatmul.f32.gmra.mxu1 %v1625_v29 }
 0x11f   : > { %828 = vmatmul.f32.gmra.mxu2 %v1635_v35 }
 0x120   : > { %1213 = vmatmul.f32.gmra.mxu0 %v1625_v29  ;;  %v600_v29 = vadd.f32 %v2023_v25, %v2025_v27 }
 0x121   : > { %v931_v47 = vpop.f32.mrf.mxu3 }
 0x122   : > { %v749_v54 = vpop.f32.mrf.mxu2 }
 0x123   : > { %v750_v2 = vadd.f32 %v749_v54, %v596_v33  ;;  %v1303_v6 = vpop.f32.mrf.mxu1  ;;  %v2492_v33 = vand.u32 4294901760, %v1675_v57 }
 0x125   : > { %v932_v49 = vadd.f32 %v931_v47, %v750_v2  ;;  %v1154_v16 = vpop.f32.mrf.mxu0 }
 0x126   : > { %1032 = vmatmul.f32.gmra.mxu3 %v2491_v62  ;;  %1366 = vmatmul.f32.gmra.mxu1 %v1629_v31 }
 0x127   : > { %v1151_v8 = vadd.f32 %v1150_v5, %v932_v49  ;;  %833 = vmatmul.f32.gmra.mxu2 %v1639_v37 }
 0x128   : > { %1217 = vmatmul.f32.gmra.mxu0 %v1629_v31  ;;  %v604_v31 = vadd.f32 %v2034_v14, %v2036_v7 }
 0x129   : > { %v1300_v35 = vadd.f32 %v1299_v20, %v1151_v8  ;;  %v937_v46 = vpop.f32.mrf.mxu3 }
 0x12a   : > { %v754_v39 = vpop.f32.mrf.mxu2 }
 0x12b   : > { %1427 = vst.msk [vmem:[%s2204_s26] sm:$0xff] %vm1426_vm1, %v1300_v35  ;;  %v755_v37 = vadd.f32 %v754_v39, %v600_v29  ;;  %v1307_v62 = vpop.f32.mrf.mxu1  ;;  %v2493_v35 = vand.u32 4294901760, %v1705_v9 }
 0x12d   : > { %v938_v2 = vadd.f32 %v937_v46, %v755_v37  ;;  %v1158_v5 = vpop.f32.mrf.mxu0 }
 0x12e   : > { %1038 = vmatmul.f32.gmra.mxu3 %v2492_v33  ;;  %1370 = vmatmul.f32.gmra.mxu1 %v1657_v48 }
 0x12f   : > { %v1155_v47 = vadd.f32 %v1154_v16, %v938_v2  ;;  %838 = vmatmul.f32.gmra.mxu2 %v1675_v57  ;;  %v2494_v2 = vand.u32 4294901760, %v1730_v21 }
 0x130   : > { %1221 = vmatmul.f32.gmra.mxu0 %v1657_v48  ;;  %v608_v48 = vadd.f32 %v2045_v26, %v2047_v38 }
 0x131   : > { %v1304_v25 = vadd.f32 %v1303_v6, %v1155_v47  ;;  %v943_v27 = vpop.f32.mrf.mxu3 }
 0x132   : > { %v759_v20 = vpop.f32.mrf.mxu2 }
 0x133   : > { %1428 = vst.msk [vmem:[%s2204_s26 + $0x8] sm:$0xff] %vm1426_vm1, %v1304_v25  ;;  %v760_v54 = vadd.f32 %v759_v20, %v604_v31  ;;  %v1311_v49 = vpop.f32.mrf.mxu1  ;;  %v2495_v25 = vand.u32 4294901760, %v1754_v43 }
 0x135   : > { %v944_v8 = vadd.f32 %v943_v27, %v760_v54  ;;  %v1162_v29 = vpop.f32.mrf.mxu0 }
 0x136   : > { %1044 = vmatmul.f32.gmra.mxu3 %v2493_v35  ;;  %1374 = vmatmul.f32.gmra.mxu1 %v1689_v0 }
 0x137   : > { %v1159_v57 = vadd.f32 %v1158_v5, %v944_v8  ;;  %843 = vmatmul.f32.gmra.mxu2 %v1705_v9 }
 0x138   : > { %1225 = vmatmul.f32.gmra.mxu0 %v1689_v0  ;;  %v612_v0 = vadd.f32 %v2056_v32, %v2058_v45 }
 0x139   : > { %v1308_v14 = vadd.f32 %v1307_v62, %v1159_v57  ;;  %v949_v7 = vpop.f32.mrf.mxu3 }
 0x13a   : > { %v764_v16 = vpop.f32.mrf.mxu2 }
 0x13b   : > { %1429 = vst.msk [vmem:[%s2204_s26 + $0x10] sm:$0xff] %vm1426_vm1, %v1308_v14  ;;  %v765_v6 = vadd.f32 %v764_v16, %v608_v48  ;;  %v1315_v46 = vpop.f32.mrf.mxu1  ;;  %v2497_v16 = vand.u32 4294901760, %v1802_v30 }
 0x13d   : > { %v950_v39 = vadd.f32 %v949_v7, %v765_v6  ;;  %v1166_v37 = vpop.f32.mrf.mxu0 }
 0x13e   : > { %1050 = vmatmul.f32.gmra.mxu3 %v2494_v2  ;;  %1378 = vmatmul.f32.gmra.mxu1 %v1717_v15 }
 0x13f   : > { %v1163_v9 = vadd.f32 %v1162_v29, %v950_v39  ;;  %848 = vmatmul.f32.gmra.mxu2 %v1730_v21  ;;  %v2496_v29 = vand.u32 4294901760, %v1778_v4 }
 0x140   : > { %1229 = vmatmul.f32.gmra.mxu0 %v1717_v15  ;;  %v616_v15 = vadd.f32 %v2067_v40, %v2069_v60 }
 0x141   : > { %v1312_v26 = vadd.f32 %v1311_v49, %v1163_v9  ;;  %v955_v38 = vpop.f32.mrf.mxu3  ;;  %v2498_v9 = vld [vmem:[#allocation3_spill] sm:$0xff] }
 0x142   : > { %v769_v62 = vpop.f32.mrf.mxu2 }
 0x143   : > { %1430 = vst.msk [vmem:[%s2204_s26 + $0x18] sm:$0xff] %vm1426_vm1, %v1312_v26  ;;  %v770_v5 = vadd.f32 %v769_v62, %v612_v0  ;;  %v1319_v33 = vpop.f32.mrf.mxu1  ;;  %v2499_v0 = vand.u32 4294901760, %v2498_v9  ;;  %v2500_v26 = vld [vmem:[#allocation2_spill] sm:$0xff] }
 0x145   : > { %v956_v47 = vadd.f32 %v955_v38, %v770_v5  ;;  %v1170_v31 = vpop.f32.mrf.mxu0 }
 0x146   : > { %1056 = vmatmul.f32.gmra.mxu3 %v2495_v25  ;;  %1382 = vmatmul.f32.gmra.mxu1 %v1741_v28 }
 0x147   : > { %v1167_v21 = vadd.f32 %v1166_v37, %v956_v47  ;;  %853 = vmatmul.f32.gmra.mxu2 %v1754_v43 }
 0x148   : > { %1233 = vmatmul.f32.gmra.mxu0 %v1741_v28  ;;  %v620_v28 = vadd.f32 %v2078_v51, %v2080_v11 }
 0x149   : > { %v1316_v32 = vadd.f32 %v1315_v46, %v1167_v21  ;;  %v961_v45 = vpop.f32.mrf.mxu3  ;;  %v2503_v21 = vld [vmem:[#allocation4_spill] sm:$0xff] }
 0x14a   : > { %v774_v27 = vpop.f32.mrf.mxu2 }
 0x14b   : > { %1431 = vst.msk [vmem:[%s2204_s26 + $0x20] sm:$0xff] %vm1426_vm1, %v1316_v32  ;;  %v775_v20 = vadd.f32 %v774_v27, %v616_v15  ;;  %v1323_v54 = vpop.f32.mrf.mxu1 }
 0x14d   : > { %v962_v49 = vadd.f32 %v961_v45, %v775_v20  ;;  %v1174_v8 = vpop.f32.mrf.mxu0 }
 0x14e   : > { %1062 = vmatmul.f32.gmra.mxu3 %v2496_v29  ;;  %1386 = vmatmul.f32.gmra.mxu1 %v1765_v56 }
 0x14f   : > { %v1171_v43 = vadd.f32 %v1170_v31, %v962_v49  ;;  %858 = vmatmul.f32.gmra.mxu2 %v1778_v4  ;;  %v2501_v31 = vld [vmem:[#allocation5_spill] sm:$0xff] }
 0x150   : > { %1237 = vmatmul.f32.gmra.mxu0 %v1765_v56  ;;  %v624_v56 = vadd.f32 %v2089_v3, %v2091_v24  ;;  %v2502_v25 = vand.u32 4294901760, %v2501_v31 }
 0x151   : > { %v1320_v40 = vadd.f32 %v1319_v33, %v1171_v43  ;;  %v967_v60 = vpop.f32.mrf.mxu3  ;;  %v2506_v43 = vld [vmem:[#allocation6_spill] sm:$0xff] }
 0x152   : > { %v779_v35 = vpop.f32.mrf.mxu2 }
 0x153   : > { %1432 = vst.msk [vmem:[%s2204_s26 + $0x28] sm:$0xff] %vm1426_vm1, %v1320_v40  ;;  %v780_v57 = vadd.f32 %v779_v35, %v620_v28  ;;  %v1327_v48 = vpop.f32.mrf.mxu1 }
 0x155   : > { %v968_v14 = vadd.f32 %v967_v60, %v780_v57  ;;  %v1178_v7 = vpop.f32.mrf.mxu0 }
 0x156   : > { %1068 = vmatmul.f32.gmra.mxu3 %v2497_v16  ;;  %1390 = vmatmul.f32.gmra.mxu1 %v1789_v18 }
 0x157   : > { %v1175_v4 = vadd.f32 %v1174_v8, %v968_v14  ;;  %863 = vmatmul.f32.gmra.mxu2 %v1802_v30  ;;  %v2504_v8 = vld [vmem:[#allocation7_spill] sm:$0xff] }
 0x158   : > { %1241 = vmatmul.f32.gmra.mxu0 %v1789_v18  ;;  %v628_v18 = vadd.f32 %v2100_v17, %v2102_v52  ;;  %v632_v17 = vadd.f32 %v2111_v34, %v2113_v10  ;;  %v2505_v29 = vand.u32 4294901760, %v2504_v8  ;;  %v636_v34 = vadd.f32 %v2122_v61, %v2124_v41 }
 0x159   : > { %v1324_v51 = vadd.f32 %v1323_v54, %v1175_v4  ;;  %v973_v11 = vpop.f32.mrf.mxu3  ;;  %v2509_v4 = vld [vmem:[#allocation8_spill] sm:$0xff]  ;;  %v640_v61 = vadd.f32 %v2133_v22, %v2135_v23  ;;  %v644_v22 = vadd.f32 %v2144_v1, %v2146_v55  ;;  %v648_v1 = vadd.f32 %v2155_v58, %v2157_v42 }
 0x15a   : > { %v784_v6 = vpop.f32.mrf.mxu2  ;;  %v652_v58 = vadd.f32 %v2166_v53, %v2168_v19 }
 0x15b   : > { %1433 = vst.msk [vmem:[%s2204_s26 + $0x30] sm:$0xff] %vm1426_vm1, %v1324_v51  ;;  %v785_v46 = vadd.f32 %v784_v6, %v624_v56  ;;  %v1331_v39 = vpop.f32.mrf.mxu1 }
 0x15d   : > { %v974_v37 = vadd.f32 %v973_v11, %v785_v46  ;;  %v1182_v2 = vpop.f32.mrf.mxu0 }
 0x15e   : > { %1074 = vmatmul.f32.gmra.mxu3 %v2499_v0  ;;  %1394 = vmatmul.f32.gmra.mxu1 %v2500_v26  ;;  %v2512_v0 = vld [vmem:[#allocation10_spill] sm:$0xff] }
 0x15f   : > { %v1179_v30 = vadd.f32 %v1178_v7, %v974_v37  ;;  %868 = vmatmul.f32.gmra.mxu2 %v2498_v9  ;;  %v2507_v7 = vld [vmem:[#allocation9_spill] sm:$0xff] }
 0x160   : > { %1245 = vmatmul.f32.gmra.mxu0 %v2500_v26  ;;  %v2508_v16 = vand.u32 4294901760, %v2507_v7 }
 0x161   : > { %v1328_v3 = vadd.f32 %v1327_v48, %v1179_v30  ;;  %v979_v24 = vpop.f32.mrf.mxu3 }
 0x162   : > { %v789_v38 = vpop.f32.mrf.mxu2 }
 0x163   : > { %1434 = vst.msk [vmem:[%s2204_s26 + $0x38] sm:$0xff] %vm1426_vm1, %v1328_v3  ;;  %v790_v62 = vadd.f32 %v789_v38, %v628_v18  ;;  %v1335_v5 = vpop.f32.mrf.mxu1 }
 0x165   : > { %v980_v33 = vadd.f32 %v979_v24, %v790_v62  ;;  %v1186_v47 = vpop.f32.mrf.mxu0 }
 0x166   : > { %1080 = vmatmul.f32.gmra.mxu3 %v2502_v25  ;;  %1398 = vmatmul.f32.gmra.mxu1 %v2503_v21 }
 0x167   : > { %v1183_v15 = vadd.f32 %v1182_v2, %v980_v33  ;;  %873 = vmatmul.f32.gmra.mxu2 %v2501_v31  ;;  %v2510_v2 = vld [vmem:[#allocation11_spill] sm:$0xff]  ;;  %v2514_v33 = vld [vmem:[#allocation12_spill] sm:$0xff] }
 0x168   : > { %1249 = vmatmul.f32.gmra.mxu0 %v2503_v21  ;;  %v2511_v9 = vand.u32 4294901760, %v2510_v2 }
 0x169   : > { %v1332_v52 = vadd.f32 %v1331_v39, %v1183_v15  ;;  %v985_v32 = vpop.f32.mrf.mxu3 }
 0x16a   : > { %v794_v45 = vpop.f32.mrf.mxu2 }
 0x16b   : > { %1435 = vst.msk [vmem:[%s2204_s26 + $0x40] sm:$0xff] %vm1426_vm1, %v1332_v52  ;;  %v795_v27 = vadd.f32 %v794_v45, %v632_v17  ;;  %v1339_v20 = vpop.f32.mrf.mxu1 }
 0x16d   : > { %v986_v54 = vadd.f32 %v985_v32, %v795_v27  ;;  %v1190_v49 = vpop.f32.mrf.mxu0  ;;  %v2515_v32 = vand.u32 4294901760, %v1970_v50 }
 0x16e   : > { %1086 = vmatmul.f32.gmra.mxu3 %v2505_v29  ;;  %1402 = vmatmul.f32.gmra.mxu1 %v2506_v43  ;;  %v2516_v29 = vand.u32 4294901760, %v1992_v44 }
 0x16f   : > { %v1187_v28 = vadd.f32 %v1186_v47, %v986_v54  ;;  %878 = vmatmul.f32.gmra.mxu2 %v2504_v8 }
 0x170   : > { %1253 = vmatmul.f32.gmra.mxu0 %v2506_v43 }
 0x171   : > { %v1336_v10 = vadd.f32 %v1335_v5, %v1187_v28  ;;  %v991_v40 = vpop.f32.mrf.mxu3  ;;  %v2513_v5 = vand.u32 4294901760, %v1946_v59 }
 0x172   : > { %v799_v60 = vpop.f32.mrf.mxu2 }
 0x173   : > { %1436 = vst.msk [vmem:[%s2204_s26 + $0x48] sm:$0xff] %vm1426_vm1, %v1336_v10  ;;  %v800_v35 = vadd.f32 %v799_v60, %v636_v34  ;;  %v1343_v57 = vpop.f32.mrf.mxu1 }
 0x175   : > { %v992_v48 = vadd.f32 %v991_v40, %v800_v35  ;;  %v1194_v14 = vpop.f32.mrf.mxu0 }
 0x176   : > { %1092 = vmatmul.f32.gmra.mxu3 %v2508_v16  ;;  %1406 = vmatmul.f32.gmra.mxu1 %v2509_v4 }
 0x177   : > { %v1191_v56 = vadd.f32 %v1190_v49, %v992_v48  ;;  %883 = vmatmul.f32.gmra.mxu2 %v2507_v7 }
 0x178   : > { %1257 = vmatmul.f32.gmra.mxu0 %v2509_v4 }
 0x179   : > { %v1340_v41 = vadd.f32 %v1339_v20, %v1191_v56  ;;  %v997_v51 = vpop.f32.mrf.mxu3 }
 0x17a   : > { %v804_v11 = vpop.f32.mrf.mxu2 }
 0x17b   : > { %1437 = vst.msk [vmem:[%s2204_s26 + $0x50] sm:$0xff] %vm1426_vm1, %v1340_v41  ;;  %v805_v6 = vadd.f32 %v804_v11, %v640_v61  ;;  %v1347_v46 = vpop.f32.mrf.mxu1  ;;  %v2518_v61 = vld [vmem:[#allocation14_spill] sm:$0xff] }
 0x17d   : > { %v998_v39 = vadd.f32 %v997_v51, %v805_v6  ;;  %v1198_v37 = vpop.f32.mrf.mxu0 }
 0x17e   : > { %1098 = vmatmul.f32.gmra.mxu3 %v2511_v9  ;;  %1410 = vmatmul.f32.gmra.mxu1 %v2512_v0  ;;  %v2519_v9 = vld [vmem:[#allocation15_spill] sm:$0xff] }
 0x17f   : > { %v1195_v26 = vadd.f32 %v1194_v14, %v998_v39  ;;  %888 = vmatmul.f32.gmra.mxu2 %v2510_v2 }
 0x180   : > { %1261 = vmatmul.f32.gmra.mxu0 %v2512_v0 }
 0x181   : > { %v1344_v23 = vadd.f32 %v1343_v57, %v1195_v26  ;;  %v1003_v30 = vpop.f32.mrf.mxu3 }
 0x182   : > { %v809_v18 = vpop.f32.mrf.mxu2 }
 0x183   : > { %1438 = vst.msk [vmem:[%s2204_s26 + $0x58] sm:$0xff] %vm1426_vm1, %v1344_v23  ;;  %v810_v3 = vadd.f32 %v809_v18, %v644_v22  ;;  %v1351_v24 = vpop.f32.mrf.mxu1 }
 0x185   : > { %v1004_v38 = vadd.f32 %v1003_v30, %v810_v3  ;;  %v1202_v62 = vpop.f32.mrf.mxu0 }
 0x186   : > { %1104 = vmatmul.f32.gmra.mxu3 %v2513_v5  ;;  %1414 = vmatmul.f32.gmra.mxu1 %v2514_v33 }
 0x187   : > { %v1199_v47 = vadd.f32 %v1198_v37, %v1004_v38  ;;  %893 = vmatmul.f32.gmra.mxu2 %v1946_v59  ;;  %v2520_v38 = vld [vmem:[#allocation16_spill] sm:$0xff] }
 0x188   : > { %1265 = vmatmul.f32.gmra.mxu0 %v2514_v33 }
 0x189   : > { %v1348_v55 = vadd.f32 %v1347_v46, %v1199_v47  ;;  %v1009_v31 = vpop.f32.mrf.mxu3 }
 0x18a   : > { %v814_v25 = vpop.f32.mrf.mxu2 }
 0x18b   : > { %1439 = vst.msk [vmem:[%s2204_s26 + $0x60] sm:$0xff] %vm1426_vm1, %v1348_v55  ;;  %v815_v21 = vadd.f32 %v814_v25, %v648_v1  ;;  %v1355_v15 = vpop.f32.mrf.mxu1 }
 0x18d   : > { %v1010_v17 = vadd.f32 %v1009_v31, %v815_v21  ;;  %v1206_v52 = vpop.f32.mrf.mxu0  ;;  %v2521_v21 = vld [vmem:[#allocation17_spill] sm:$0xff] }
 0x18e   : > { %1110 = vmatmul.f32.gmra.mxu3 %v2515_v32  ;;  %1418 = vmatmul.f32.gmra.mxu1 %v1957_v36 }
 0x18f   : > { %v1203_v59 = vadd.f32 %v1202_v62, %v1010_v17  ;;  %898 = vmatmul.f32.gmra.mxu2 %v1970_v50 }
 0x190   : > { %1269 = vmatmul.f32.gmra.mxu0 %v1957_v36  ;;  %v656_v36 = vadd.f32 %v2177_v63, %v2179_v13 }
 0x191   : > { %v1352_v42 = vadd.f32 %v1351_v24, %v1203_v59  ;;  %v1015_v45 = vpop.f32.mrf.mxu3 }
 0x192   : > { %v819_v27 = vpop.f32.mrf.mxu2 }
 0x193   : > { %1440 = vst.msk [vmem:[%s2204_s26 + $0x68] sm:$0xff] %vm1426_vm1, %v1352_v42  ;;  %v820_v20 = vadd.f32 %v819_v27, %v652_v58  ;;  %v1359_v54 = vpop.f32.mrf.mxu1  ;;  %v2522_v27 = vld [vmem:[#allocation18_spill] sm:$0xff] }
 0x195   : > { %v1016_v49 = vadd.f32 %v1015_v45, %v820_v20  ;;  %v1210_v8 = vpop.f32.mrf.mxu0 }
 0x196   : > { %1116 = vmatmul.f32.gmra.mxu3 %v2516_v29  ;;  %1422 = vmatmul.f32.gmra.mxu1 %v1981_v12 }
 0x197   : > { %v1207_v50 = vadd.f32 %v1206_v52, %v1016_v49  ;;  %903 = vmatmul.f32.gmra.mxu2 %v1992_v44 }
 0x198   : > { %1273 = vmatmul.f32.gmra.mxu0 %v1981_v12  ;;  %v2517_v12 = vld [vmem:[#allocation13_spill] sm:$0xff] }
 0x199   : > { %v1356_v53 = vadd.f32 %v1355_v15, %v1207_v50  ;;  %v1021_v19 = vpop.f32.mrf.mxu3 }
 0x19a   : > { %v824_v43 = vpop.f32.mrf.mxu2 }
 0x19b   : > { %1441 = vst.msk [vmem:[%s2204_s26 + $0x70] sm:$0xff] %vm1426_vm1, %v1356_v53  ;;  %v825_v28 = vadd.f32 %v824_v43, %v656_v36  ;;  %v1363_v34 = vpop.f32.mrf.mxu1 }
 0x19d   : > { %v1022_v10 = vadd.f32 %v1021_v19, %v825_v28  ;;  %v1214_v40 = vpop.f32.mrf.mxu0  ;;  %v2523_v19 = vld [vmem:[#allocation19_spill] sm:$0xff] }
 0x19f   : > { %v1211_v60 = vadd.f32 %v1210_v8, %v1022_v10 }
 0x1a1   : > { %v1360_v35 = vadd.f32 %v1359_v54, %v1211_v60  ;;  %v1027_v57 = vpop.f32.mrf.mxu3 }
 0x1a2   : > { %v829_v48 = vpop.f32.mrf.mxu2 }
 0x1a3   : > { %1442 = vst.msk [vmem:[%s2204_s26 + $0x78] sm:$0xff] %vm1426_vm1, %v1360_v35  ;;  %v830_v44 = vadd.f32 %v829_v48, %v2517_v12  ;;  %v1367_v14 = vpop.f32.mrf.mxu1  ;;  %v2524_v48 = vld [vmem:[#allocation20_spill] sm:$0xff] }
 0x1a5   : > { %v1028_v63 = vadd.f32 %v1027_v57, %v830_v44  ;;  %v1218_v13 = vpop.f32.mrf.mxu0 }
 0x1a7   : > { %v1215_v7 = vadd.f32 %v1214_v40, %v1028_v63 }
 0x1a9   : > { %v1364_v16 = vadd.f32 %v1363_v34, %v1215_v7  ;;  %v1033_v4 = vpop.f32.mrf.mxu3 }
 0x1aa   : > { %v834_v56 = vpop.f32.mrf.mxu2 }
 0x1ab   : > { %1443 = vst.msk [vmem:[%s2204_s26 + $0x80] sm:$0xff] %vm1426_vm1, %v1364_v16  ;;  %v835_v41 = vadd.f32 %v834_v56, %v2518_v61  ;;  %v1371_v51 = vpop.f32.mrf.mxu1  ;;  %v2525_v56 = vld [vmem:[#allocation21_spill] sm:$0xff] }
 0x1ad   : > { %v1034_v11 = vadd.f32 %v1033_v4, %v835_v41  ;;  %v1222_v6 = vpop.f32.mrf.mxu0 }
 0x1af   : > { %v1219_v46 = vadd.f32 %v1218_v13, %v1034_v11 }
 0x1b1   : > { %v1368_v39 = vadd.f32 %v1367_v14, %v1219_v46  ;;  %v1039_v37 = vpop.f32.mrf.mxu3 }
 0x1b2   : > { %v839_v2 = vpop.f32.mrf.mxu2 }
 0x1b3   : > { %1444 = vst.msk [vmem:[%s2204_s26 + $0x88] sm:$0xff] %vm1426_vm1, %v1368_v39  ;;  %v840_v0 = vadd.f32 %v839_v2, %v2519_v9  ;;  %v1375_v26 = vpop.f32.mrf.mxu1  ;;  %v2526_v2 = vld [vmem:[#allocation22_spill] sm:$0xff] }
 0x1b5   : > { %v1040_v22 = vadd.f32 %v1039_v37, %v840_v0  ;;  %v1226_v23 = vpop.f32.mrf.mxu0 }
 0x1b7   : > { %v1223_v30 = vadd.f32 %v1222_v6, %v1040_v22 }
 0x1b9   : > { %v1372_v18 = vadd.f32 %v1371_v51, %v1223_v30  ;;  %v1045_v3 = vpop.f32.mrf.mxu3 }
 0x1ba   : > { %v844_v24 = vpop.f32.mrf.mxu2 }
 0x1bb   : > { %1445 = vst.msk [vmem:[%s2204_s26 + $0x90] sm:$0xff] %vm1426_vm1, %v1372_v18  ;;  %v845_v62 = vadd.f32 %v844_v24, %v2520_v38  ;;  %v1379_v5 = vpop.f32.mrf.mxu1  ;;  %v2527_v24 = vld [vmem:[#allocation23_spill] sm:$0xff] }
 0x1bd   : > { %v1046_v33 = vadd.f32 %v1045_v3, %v845_v62  ;;  %v1230_v47 = vpop.f32.mrf.mxu0 }
 0x1bf   : > { %v1227_v1 = vadd.f32 %v1226_v23, %v1046_v33 }
 0x1c1   : > { %v1376_v55 = vadd.f32 %v1375_v26, %v1227_v1  ;;  %v1051_v31 = vpop.f32.mrf.mxu3 }
 0x1c2   : > { %v849_v25 = vpop.f32.mrf.mxu2 }
 0x1c3   : > { %1446 = vst.msk [vmem:[%s2204_s26 + $0x98] sm:$0xff] %vm1426_vm1, %v1376_v55  ;;  %v850_v15 = vadd.f32 %v849_v25, %v2521_v21  ;;  %v1383_v17 = vpop.f32.mrf.mxu1  ;;  %v2528_v25 = vld [vmem:[#allocation24_spill] sm:$0xff] }
 0x1c5   : > { %v1052_v52 = vadd.f32 %v1051_v31, %v850_v15  ;;  %v1234_v32 = vpop.f32.mrf.mxu0 }
 0x1c7   : > { %v1231_v59 = vadd.f32 %v1230_v47, %v1052_v52 }
 0x1c9   : > { %v1380_v58 = vadd.f32 %v1379_v5, %v1231_v59  ;;  %v1057_v42 = vpop.f32.mrf.mxu3 }
 0x1ca   : > { %v854_v45 = vpop.f32.mrf.mxu2 }
 0x1cb   : > { %1447 = vst.msk [vmem:[%s2204_s26 + $0xa0] sm:$0xff] %vm1426_vm1, %v1380_v58  ;;  %v855_v20 = vadd.f32 %v854_v45, %v2522_v27  ;;  %v1387_v54 = vpop.f32.mrf.mxu1  ;;  %v2529_v45 = vld [vmem:[#allocation25_spill] sm:$0xff] }
 0x1cd   : > { %v1058_v49 = vadd.f32 %v1057_v42, %v855_v20  ;;  %v1238_v8 = vpop.f32.mrf.mxu0 }
 0x1cf   : > { %v1235_v29 = vadd.f32 %v1234_v32, %v1058_v49 }
 0x1d1   : > { %v1384_v50 = vadd.f32 %v1383_v17, %v1235_v29  ;;  %v1063_v36 = vpop.f32.mrf.mxu3 }
 0x1d2   : > { %v859_v53 = vpop.f32.mrf.mxu2 }
 0x1d3   : > { %1448 = vst.msk [vmem:[%s2204_s26 + $0xa8] sm:$0xff] %vm1426_vm1, %v1384_v50  ;;  %v860_v43 = vadd.f32 %v859_v53, %v2523_v19  ;;  %v1391_v28 = vpop.f32.mrf.mxu1  ;;  %v2530_v53 = vld [vmem:[#allocation26_spill] sm:$0xff] }
 0x1d5   : > { %v1064_v34 = vadd.f32 %v1063_v36, %v860_v43  ;;  %v1242_v10 = vpop.f32.mrf.mxu0 }
 0x1d7   : > { %v1239_v40 = vadd.f32 %v1238_v8, %v1064_v34 }
 0x1d9   : > { %v1388_v60 = vadd.f32 %v1387_v54, %v1239_v40  ;;  %v1069_v35 = vpop.f32.mrf.mxu3 }
 0x1da   : > { %v864_v57 = vpop.f32.mrf.mxu2 }
 0x1db   : > { %1449 = vst.msk [vmem:[%s2204_s26 + $0xb0] sm:$0xff] %vm1426_vm1, %v1388_v60  ;;  %v865_v12 = vadd.f32 %v864_v57, %v2524_v48  ;;  %v1395_v44 = vpop.f32.mrf.mxu1 }
 0x1dd   : > { %v1070_v14 = vadd.f32 %v1069_v35, %v865_v12  ;;  %v1246_v63 = vpop.f32.mrf.mxu0  ;;  %v2531_v35 = vld [vmem:[#allocation27_spill] sm:$0xff] }
 0x1df   : > { %v1243_v13 = vadd.f32 %v1242_v10, %v1070_v14 }
 0x1e1   : > { %v1392_v7 = vadd.f32 %v1391_v28, %v1243_v13  ;;  %v1075_v16 = vpop.f32.mrf.mxu3 }
 0x1e2   : > { %v869_v4 = vpop.f32.mrf.mxu2 }
 0x1e3   : > { %1450 = vst.msk [vmem:[%s2204_s26 + $0xb8] sm:$0xff] %vm1426_vm1, %v1392_v7  ;;  %v870_v61 = vadd.f32 %v869_v4, %v2525_v56  ;;  %v1399_v41 = vpop.f32.mrf.mxu1  ;;  %v2532_v7 = vld [vmem:[#allocation28_spill] sm:$0xff] }
 0x1e5   : > { %v1076_v51 = vadd.f32 %v1075_v16, %v870_v61  ;;  %v1250_v11 = vpop.f32.mrf.mxu0 }
 0x1e7   : > { %v1247_v6 = vadd.f32 %v1246_v63, %v1076_v51 }
 0x1e9   : > { %v1396_v46 = vadd.f32 %v1395_v44, %v1247_v6  ;;  %v1081_v39 = vpop.f32.mrf.mxu3 }
 0x1ea   : > { %v874_v37 = vpop.f32.mrf.mxu2 }
 0x1eb   : > { %1451 = vst.msk [vmem:[%s2204_s26 + $0xc0] sm:$0xff] %vm1426_vm1, %v1396_v46  ;;  %v875_v9 = vadd.f32 %v874_v37, %v2526_v2  ;;  %v1403_v0 = vpop.f32.mrf.mxu1 }
 0x1ed   : > { %v1082_v26 = vadd.f32 %v1081_v39, %v875_v9  ;;  %v1254_v22 = vpop.f32.mrf.mxu0 }
 0x1ef   : > { %v1251_v23 = vadd.f32 %v1250_v11, %v1082_v26 }
 0x1f1   : > { %v1400_v30 = vadd.f32 %v1399_v41, %v1251_v23  ;;  %v1087_v18 = vpop.f32.mrf.mxu3 }
 0x1f2   : > { %v879_v3 = vpop.f32.mrf.mxu2 }
 0x1f3   : > { %1452 = vst.msk [vmem:[%s2204_s26 + $0xc8] sm:$0xff] %vm1426_vm1, %v1400_v30  ;;  %v880_v38 = vadd.f32 %v879_v3, %v2527_v24  ;;  %v1407_v33 = vpop.f32.mrf.mxu1 }
 0x1f5   : > { %v1088_v62 = vadd.f32 %v1087_v18, %v880_v38  ;;  %v1258_v5 = vpop.f32.mrf.mxu0 }
 0x1f7   : > { %v1255_v47 = vadd.f32 %v1254_v22, %v1088_v62 }
 0x1f9   : > { %v1404_v1 = vadd.f32 %v1403_v0, %v1255_v47  ;;  %v1093_v55 = vpop.f32.mrf.mxu3 }
 0x1fa   : > { %v884_v31 = vpop.f32.mrf.mxu2 }
 0x1fb   : > { %1453 = vst.msk [vmem:[%s2204_s26 + $0xd0] sm:$0xff] %vm1426_vm1, %v1404_v1  ;;  %v885_v21 = vadd.f32 %v884_v31, %v2528_v25  ;;  %v1411_v32 = vpop.f32.mrf.mxu1 }
 0x1fd   : > { %v1094_v15 = vadd.f32 %v1093_v55, %v885_v21  ;;  %v1262_v17 = vpop.f32.mrf.mxu0 }
 0x1ff   : > { %v1259_v52 = vadd.f32 %v1258_v5, %v1094_v15 }
 0x201   : > { %v1408_v59 = vadd.f32 %v1407_v33, %v1259_v52  ;;  %v1099_v58 = vpop.f32.mrf.mxu3 }
 0x202   : > { %v889_v42 = vpop.f32.mrf.mxu2 }
 0x203   : > { %1454 = vst.msk [vmem:[%s2204_s26 + $0xd8] sm:$0xff] %vm1426_vm1, %v1408_v59  ;;  %v890_v27 = vadd.f32 %v889_v42, %v2529_v45  ;;  %v1415_v36 = vpop.f32.mrf.mxu1 }
 0x205   : > { %v1100_v20 = vadd.f32 %v1099_v58, %v890_v27  ;;  %v1266_v49 = vpop.f32.mrf.mxu0 }
 0x207   : > { %v1263_v54 = vadd.f32 %v1262_v17, %v1100_v20 }
 0x209   : > { %v1412_v8 = vadd.f32 %v1411_v32, %v1263_v54  ;;  %v1105_v29 = vpop.f32.mrf.mxu3 }
 0x20a   : > { %v894_v50 = vpop.f32.mrf.mxu2 }
 0x20b   : > { %1455 = vst.msk [vmem:[%s2204_s26 + $0xe0] sm:$0xff] %vm1426_vm1, %v1412_v8  ;;  %v895_v19 = vadd.f32 %v894_v50, %v2530_v53  ;;  %v1419_v48 = vpop.f32.mrf.mxu1 }
 0x20d   : > { %v1106_v43 = vadd.f32 %v1105_v29, %v895_v19  ;;  %v1270_v60 = vpop.f32.mrf.mxu0 }
 0x20f   : > { %v1267_v28 = vadd.f32 %v1266_v49, %v1106_v43 }
 0x211   : > { %v1416_v34 = vadd.f32 %v1415_v36, %v1267_v28  ;;  %v1111_v10 = vpop.f32.mrf.mxu3 }
 0x212   : > { %v899_v40 = vpop.f32.mrf.mxu2 }
 0x213   : > { %1456 = vst.msk [vmem:[%s2204_s26 + $0xe8] sm:$0xff] %vm1426_vm1, %v1416_v34  ;;  %v900_v57 = vadd.f32 %v899_v40, %v2531_v35  ;;  %v1423_v61 = vpop.f32.mrf.mxu1 }
 0x215   : > { %v1112_v12 = vadd.f32 %v1111_v10, %v900_v57  ;;  %v1274_v4 = vpop.f32.mrf.mxu0 }
 0x217   : > { %v1271_v44 = vadd.f32 %v1270_v60, %v1112_v12 }
 0x219   : > { %v1420_v14 = vadd.f32 %v1419_v48, %v1271_v44  ;;  %v1117_v13 = vpop.f32.mrf.mxu3 }
 0x21a   : > { %v904_v63 = vpop.f32.mrf.mxu2 }
 0x21b   : > { %1457 = vst.msk [vmem:[%s2204_s26 + $0xf0] sm:$0xff] %vm1426_vm1, %v1420_v14  ;;  %v905_v16 = vadd.f32 %v904_v63, %v2532_v7 }
 0x21d   : > { %v1118_v56 = vadd.f32 %v1117_v13, %v905_v16 }
 0x21f   : > { %v1275_v41 = vadd.f32 %v1274_v4, %v1118_v56 }
 0x221   : > { %v1424_v51 = vadd.f32 %v1423_v61, %v1275_v41 }
 0x223   : > { %1458 = vst.msk [vmem:[%s2204_s26 + $0xf8] sm:$0xff] %vm1426_vm1, %v1424_v51 }
 0x224 PF: > { %s12_s9 = sadd.s32 1, %s1548_s9  }
 0x225   : > { %p9_p4 = scmp.ge.s32.totalorder %s12_s9, 4  }
 0x227   :  { %11 = sbr.rel (!%p9_p4) target bundleno = 1 (0x1), region = 58 }

// kernel: mul.5
= control target key start
LH: loop header
LB: loop body
LE: loop exit
PB: predicated region body
PF: predicated region fallthrough
CT: control target
= control target key end

     0   :  { %s100_s0 = inlined_call_operand.vmem [shape: f32[512,1], index: 0, kind: input, shape index: {}]   ;;  %s101_s1 = inlined_call_operand.vmem [shape: f32[512,1], index: 1, kind: input, shape index: {}]   ;;  %s102_s2 = inlined_call_operand.vmem [shape: f32[512,1], index: 2, kind: output, shape index: {}]  }
   0x1   :  { %v3_v0 = vld [vmem:[%s100_s0] sm:$0x1]  ;;  %v40_v2 = vld [vmem:[%s100_s0 + $0x1] sm:$0x1]  ;;  %v43_v5 = vld [vmem:[%s100_s0 + $0x2] sm:$0x1] }
   0x2   :  { %v4_v1 = vld [vmem:[%s101_s1] sm:$0x1]  ;;  %v41_v4 = vld [vmem:[%s101_s1 + $0x1] sm:$0x1]  ;;  %v44_v6 = vld [vmem:[%s101_s1 + $0x2] sm:$0x1] }
   0x3   :  { %v7_v3 = vmul.f32 %v4_v1, %v3_v0  ;;  %v16_v7 = vmul.f32 %v41_v4, %v40_v2  ;;  %v26_v8 = vmul.f32 %v44_v6, %v43_v5  ;;  %v46_v9 = vld [vmem:[%s100_s0 + $0x3] sm:$0x1] }
   0x4   :  { %v47_v10 = vld [vmem:[%s101_s1 + $0x3] sm:$0x1] }
   0x5   :  { %9 = vst [vmem:[%s102_s2] sm:$0x1] %v7_v3  ;;  %v36_v11 = vmul.f32 %v47_v10, %v46_v9 }
   0x6   :  { %42 = vst [vmem:[%s102_s2 + $0x1] sm:$0x1] %v16_v7 }
   0x7   :  { %45 = vst [vmem:[%s102_s2 + $0x2] sm:$0x1] %v26_v8 }
   0x8   :  { %48 = vst [vmem:[%s102_s2 + $0x3] sm:$0x1] %v36_v11 }

// kernel: sage_conv_new_forward.3
= control target key start
LH: loop header
LB: loop body
LE: loop exit
PB: predicated region body
PF: predicated region fallthrough
CT: control target
= control target key end

     0   :  { %s12678_s0 = inlined_call_operand.vmem [shape: f32[512,512], index: 0, kind: input, shape index: {}]   ;;  %s12679_s1 = inlined_call_operand.vmem [shape: f32[512,32], index: 1, kind: input, shape index: {}, may-alias: {1,2}]   ;;  %s12680_s2 = inlined_call_operand.vmem [shape: f32[512,32], index: 2, kind: input, shape index: {}, may-alias: {1,2}]   ;;  %s12681_s3 = inlined_call_operand.vmem [shape: f32[512,1], index: 3, kind: input, shape index: {}]   ;;  %s12682_s4 = inlined_call_operand.vmem [shape: f32[512,1], index: 4, kind: input, shape index: {}]   ;;  %s12683_s5 = inlined_call_operand.vmem [shape: f32[32,8], index: 5, kind: input, shape index: {}]   ;;  %s12684_s6 = inlined_call_operand.vmem [shape: f32[32,8], index: 6, kind: input, shape index: {}]   ;;  %s12685_s7 = inlined_call_operand.vmem [shape: f32[32,16], index: 7, kind: input, shape index: {}]   ;;  %s12686_s8 = inlined_call_operand.vmem [shape: f32[1,16], index: 8, kind: input, shape index: {}]   ;;  %s12687_s9 = inlined_call_operand.vmem [shape: f32[512,16], index: 9, kind: output, shape index: {}]  }
   0x1   :  { %13087 = sst [smem:[#allocation141_spill]] %s12678_s0 }
   0x2   :  { %s8435_s30 = smov 0   ;;  %s8437_s10 = smov 0  }
   0x3   :  { %s8439_s11 = smov 0   ;;  %s8441_s12 = smov 0  }
   0x4   :  { %s8443_s13 = smov 0   ;;  %s8445_s14 = smov 0  }
   0x5   :  { %s8447_s15 = smov 0  }
   0x6 LB: > { %s28_s16 = sadd.s32 1, %s8371_s13  ;;  %s31_s17 = sadd.s32 1, %s8375_s14  ;;  %s8379_s15 = sphi %s8447_s15, %s19_s15   ;;  %s8375_s14 = sphi %s8445_s14, %s13682_s14   ;;  %s8371_s13 = sphi %s8443_s13, %s13681_s13   ;;  %s8367_s12 = sphi %s8441_s12, %s13680_s12   ;;  %s8363_s11 = sphi %s8439_s11, %s13679_s11   ;;  %s8359_s10 = sphi %s8437_s10, %s13678_s10   ;;  %s8355_s30 = sphi %s8435_s30, %s13677_s30  }
   0x7   : > { %p29_p0 = scmp.ge.s32.totalorder %s28_s16, 2  ;;  %p47_p1 = scmp.ne.s32.totalorder %s8359_s10, %s8355_s30 }
   0x8   : > { %p48_p2 = scmp.eq.s32.totalorder %s8379_s15, 0  ;;  %s40_s21 = sadd.s32 1, %s8359_s10 }
   0x9   : > { %s13684_s16 = smov (%p29_p0, %s28_s16), 0  ;;  %s13686_s17 = smov (!%p29_p0, %s31_s17), %s8375_s14 }
   0xa   : > { %13088 = sst [smem:[#allocation4_spill]] %s13684_s16  ;;  %p49_p3 = por %p48_p2, %p47_p1 }
   0xb   : > { %p33_p4 = scmp.ge.s32.totalorder %s13686_s17, 2  ;;  %s36_s18 = ssub.s32 %s8371_s13, %s13684_s16 }
   0xc   : > { %p8196_p6 = scmp.ge.s32.totalorder %s8379_s15, 4 }
   0xd   : > { %s13688_s17 = smov (%p33_p4, %s13686_s17), 0 }
   0xe   : > { %13089 = sst [smem:[#allocation5_spill]] %s13688_s17  ;;  %s35_s19 = ssub.s32 %s8375_s14, %s13688_s17 }
   0xf   : > { %s37_s20 = sor.u32 %s36_s18, %s35_s19  ;;  %299 = sbr.rel (%p8196_p6) target bundleno = 94 (0x5e), region = 32 }
  0x10   : > { %p38_p5 = scmp.eq.s32.totalorder %s37_s20, 0 }
  0x12   : > { %s8486_s22 = scalar_select %p38_p5, %s8359_s10, %s40_s21  }
  0x14   : > { %302 = sbr.rel (!%p49_p3) target bundleno = 94 (0x5e), region = 36  ;;  %s304_s23 = sand.u32 (%p49_p3), 1, %s8359_s10  }
  0x15   : > { %s8199_s24 = sshll.u32 (%p49_p3), %s8371_s13, 1  ;;  %s8197_s25 = sshll.u32 (%p49_p3), %s304_s23, 9 }
  0x16   : > { %s8218_s26 = sshll.u32 (%p49_p3), %s8375_s14, 7  ;;  %s13090_s0 = sld [smem:[#allocation141_spill]] (%p49_p3) }
  0x17   : > { %s310_s27 = sadd.s32 (%p49_p3), %s8218_s26, %s8199_s24  ;;  %s8500_s19 = scalar_lea.vmem (%p49_p3), [#allocation3], %s8197_s25 }
  0x18   : > { %s8201_s28 = sshll.u32 (%p49_p3), %s310_s27, 3 }
  0x1c   : > { %s8495_s18 = scalar_lea.vmem %s13090_s0, %s8201_s28 }
  0x1d   : > { %v325_v0 = vld [vmem:[%s8495_s18] sm:$0xff]  ;;  %v327_v1 = vld [vmem:[%s8495_s18 + $0x8] sm:$0xff] }
  0x1e   : > { %v329_v2 = vld [vmem:[%s8495_s18 + $0x20] sm:$0xff]  ;;  %326 = vst [vmem:[%s8500_s19] sm:$0xff] %v325_v0  ;;  %v331_v3 = vld [vmem:[%s8495_s18 + $0x28] sm:$0xff] }
  0x1f   : > { %328 = vst [vmem:[%s8500_s19 + $0x8] sm:$0xff] %v327_v1  ;;  %v333_v4 = vld [vmem:[%s8495_s18 + $0x40] sm:$0xff]  ;;  %v335_v5 = vld [vmem:[%s8495_s18 + $0x48] sm:$0xff] }
  0x20   : > { %330 = vst [vmem:[%s8500_s19 + $0x10] sm:$0xff] %v329_v2  ;;  %v337_v6 = vld [vmem:[%s8495_s18 + $0x60] sm:$0xff]  ;;  %v339_v7 = vld [vmem:[%s8495_s18 + $0x68] sm:$0xff] }
  0x21   : > { %332 = vst [vmem:[%s8500_s19 + $0x18] sm:$0xff] %v331_v3  ;;  %v341_v8 = vld [vmem:[%s8495_s18 + $0x80] sm:$0xff]  ;;  %v343_v9 = vld [vmem:[%s8495_s18 + $0x88] sm:$0xff] }
  0x22   : > { %334 = vst [vmem:[%s8500_s19 + $0x20] sm:$0xff] %v333_v4  ;;  %v345_v10 = vld [vmem:[%s8495_s18 + $0xa0] sm:$0xff]  ;;  %v347_v11 = vld [vmem:[%s8495_s18 + $0xa8] sm:$0xff] }
  0x23   : > { %336 = vst [vmem:[%s8500_s19 + $0x28] sm:$0xff] %v335_v5  ;;  %v349_v12 = vld [vmem:[%s8495_s18 + $0xc0] sm:$0xff]  ;;  %v351_v13 = vld [vmem:[%s8495_s18 + $0xc8] sm:$0xff] }
  0x24   : > { %338 = vst [vmem:[%s8500_s19 + $0x30] sm:$0xff] %v337_v6  ;;  %v353_v14 = vld [vmem:[%s8495_s18 + $0xe0] sm:$0xff]  ;;  %v355_v15 = vld [vmem:[%s8495_s18 + $0xe8] sm:$0xff] }
  0x25   : > { %340 = vst [vmem:[%s8500_s19 + $0x38] sm:$0xff] %v339_v7  ;;  %v357_v16 = vld [vmem:[%s8495_s18 + $0x100] sm:$0xff]  ;;  %v359_v17 = vld [vmem:[%s8495_s18 + $0x108] sm:$0xff] }
  0x26   : > { %342 = vst [vmem:[%s8500_s19 + $0x40] sm:$0xff] %v341_v8  ;;  %v361_v18 = vld [vmem:[%s8495_s18 + $0x120] sm:$0xff]  ;;  %v363_v19 = vld [vmem:[%s8495_s18 + $0x128] sm:$0xff] }
  0x27   : > { %344 = vst [vmem:[%s8500_s19 + $0x48] sm:$0xff] %v343_v9  ;;  %v365_v20 = vld [vmem:[%s8495_s18 + $0x140] sm:$0xff]  ;;  %v367_v21 = vld [vmem:[%s8495_s18 + $0x148] sm:$0xff] }
  0x28   : > { %346 = vst [vmem:[%s8500_s19 + $0x50] sm:$0xff] %v345_v10  ;;  %v369_v22 = vld [vmem:[%s8495_s18 + $0x160] sm:$0xff]  ;;  %v371_v23 = vld [vmem:[%s8495_s18 + $0x168] sm:$0xff] }
  0x29   : > { %348 = vst [vmem:[%s8500_s19 + $0x58] sm:$0xff] %v347_v11  ;;  %v373_v24 = vld [vmem:[%s8495_s18 + $0x180] sm:$0xff]  ;;  %v375_v25 = vld [vmem:[%s8495_s18 + $0x188] sm:$0xff] }
  0x2a   : > { %350 = vst [vmem:[%s8500_s19 + $0x60] sm:$0xff] %v349_v12  ;;  %v377_v26 = vld [vmem:[%s8495_s18 + $0x1a0] sm:$0xff]  ;;  %v379_v27 = vld [vmem:[%s8495_s18 + $0x1a8] sm:$0xff] }
  0x2b   : > { %352 = vst [vmem:[%s8500_s19 + $0x68] sm:$0xff] %v351_v13  ;;  %v381_v28 = vld [vmem:[%s8495_s18 + $0x1c0] sm:$0xff]  ;;  %v383_v29 = vld [vmem:[%s8495_s18 + $0x1c8] sm:$0xff] }
  0x2c   : > { %354 = vst [vmem:[%s8500_s19 + $0x70] sm:$0xff] %v353_v14  ;;  %v385_v30 = vld [vmem:[%s8495_s18 + $0x1e0] sm:$0xff]  ;;  %v387_v31 = vld [vmem:[%s8495_s18 + $0x1e8] sm:$0xff] }
  0x2d   : > { %356 = vst [vmem:[%s8500_s19 + $0x78] sm:$0xff] %v355_v15  ;;  %v389_v32 = vld [vmem:[%s8495_s18 + $0x200] sm:$0xff]  ;;  %v391_v33 = vld [vmem:[%s8495_s18 + $0x208] sm:$0xff] }
  0x2e   : > { %358 = vst [vmem:[%s8500_s19 + $0x80] sm:$0xff] %v357_v16  ;;  %v393_v34 = vld [vmem:[%s8495_s18 + $0x220] sm:$0xff]  ;;  %v395_v35 = vld [vmem:[%s8495_s18 + $0x228] sm:$0xff] }
  0x2f   : > { %360 = vst [vmem:[%s8500_s19 + $0x88] sm:$0xff] %v359_v17  ;;  %v397_v36 = vld [vmem:[%s8495_s18 + $0x240] sm:$0xff]  ;;  %v399_v37 = vld [vmem:[%s8495_s18 + $0x248] sm:$0xff] }
  0x30   : > { %362 = vst [vmem:[%s8500_s19 + $0x90] sm:$0xff] %v361_v18  ;;  %v401_v38 = vld [vmem:[%s8495_s18 + $0x260] sm:$0xff]  ;;  %v403_v39 = vld [vmem:[%s8495_s18 + $0x268] sm:$0xff] }
  0x31   : > { %364 = vst [vmem:[%s8500_s19 + $0x98] sm:$0xff] %v363_v19  ;;  %v405_v40 = vld [vmem:[%s8495_s18 + $0x280] sm:$0xff]  ;;  %v407_v41 = vld [vmem:[%s8495_s18 + $0x288] sm:$0xff] }
  0x32   : > { %366 = vst [vmem:[%s8500_s19 + $0xa0] sm:$0xff] %v365_v20  ;;  %v409_v42 = vld [vmem:[%s8495_s18 + $0x2a0] sm:$0xff]  ;;  %v411_v43 = vld [vmem:[%s8495_s18 + $0x2a8] sm:$0xff] }
  0x33   : > { %368 = vst [vmem:[%s8500_s19 + $0xa8] sm:$0xff] %v367_v21  ;;  %v413_v44 = vld [vmem:[%s8495_s18 + $0x2c0] sm:$0xff]  ;;  %v415_v45 = vld [vmem:[%s8495_s18 + $0x2c8] sm:$0xff] }
  0x34   : > { %370 = vst [vmem:[%s8500_s19 + $0xb0] sm:$0xff] %v369_v22  ;;  %v417_v46 = vld [vmem:[%s8495_s18 + $0x2e0] sm:$0xff]  ;;  %v419_v47 = vld [vmem:[%s8495_s18 + $0x2e8] sm:$0xff] }
  0x35   : > { %372 = vst [vmem:[%s8500_s19 + $0xb8] sm:$0xff] %v371_v23  ;;  %v421_v48 = vld [vmem:[%s8495_s18 + $0x300] sm:$0xff]  ;;  %v423_v49 = vld [vmem:[%s8495_s18 + $0x308] sm:$0xff] }
  0x36   : > { %374 = vst [vmem:[%s8500_s19 + $0xc0] sm:$0xff] %v373_v24  ;;  %v425_v50 = vld [vmem:[%s8495_s18 + $0x320] sm:$0xff]  ;;  %v427_v51 = vld [vmem:[%s8495_s18 + $0x328] sm:$0xff] }
  0x37   : > { %376 = vst [vmem:[%s8500_s19 + $0xc8] sm:$0xff] %v375_v25  ;;  %v429_v52 = vld [vmem:[%s8495_s18 + $0x340] sm:$0xff]  ;;  %v431_v53 = vld [vmem:[%s8495_s18 + $0x348] sm:$0xff] }
  0x38   : > { %378 = vst [vmem:[%s8500_s19 + $0xd0] sm:$0xff] %v377_v26  ;;  %v433_v54 = vld [vmem:[%s8495_s18 + $0x360] sm:$0xff]  ;;  %v435_v55 = vld [vmem:[%s8495_s18 + $0x368] sm:$0xff] }
  0x39   : > { %380 = vst [vmem:[%s8500_s19 + $0xd8] sm:$0xff] %v379_v27  ;;  %v437_v56 = vld [vmem:[%s8495_s18 + $0x380] sm:$0xff]  ;;  %v439_v57 = vld [vmem:[%s8495_s18 + $0x388] sm:$0xff] }
  0x3a   : > { %382 = vst [vmem:[%s8500_s19 + $0xe0] sm:$0xff] %v381_v28  ;;  %v441_v58 = vld [vmem:[%s8495_s18 + $0x3a0] sm:$0xff]  ;;  %v443_v59 = vld [vmem:[%s8495_s18 + $0x3a8] sm:$0xff] }
  0x3b   : > { %384 = vst [vmem:[%s8500_s19 + $0xe8] sm:$0xff] %v383_v29  ;;  %v445_v60 = vld [vmem:[%s8495_s18 + $0x3c0] sm:$0xff]  ;;  %v447_v61 = vld [vmem:[%s8495_s18 + $0x3c8] sm:$0xff] }
  0x3c   : > { %386 = vst [vmem:[%s8500_s19 + $0xf0] sm:$0xff] %v385_v30  ;;  %v449_v62 = vld [vmem:[%s8495_s18 + $0x3e0] sm:$0xff]  ;;  %v451_v63 = vld [vmem:[%s8495_s18 + $0x3e8] sm:$0xff] }
  0x3d   : > { %388 = vst [vmem:[%s8500_s19 + $0xf8] sm:$0xff] %v387_v31 }
  0x3e   : > { %390 = vst [vmem:[%s8500_s19 + $0x100] sm:$0xff] %v389_v32 }
  0x3f   : > { %392 = vst [vmem:[%s8500_s19 + $0x108] sm:$0xff] %v391_v33 }
  0x40   : > { %394 = vst [vmem:[%s8500_s19 + $0x110] sm:$0xff] %v393_v34 }
  0x41   : > { %396 = vst [vmem:[%s8500_s19 + $0x118] sm:$0xff] %v395_v35 }
  0x42   : > { %398 = vst [vmem:[%s8500_s19 + $0x120] sm:$0xff] %v397_v36 }
  0x43   : > { %400 = vst [vmem:[%s8500_s19 + $0x128] sm:$0xff] %v399_v37 }
  0x44   : > { %402 = vst [vmem:[%s8500_s19 + $0x130] sm:$0xff] %v401_v38 }
  0x45   : > { %404 = vst [vmem:[%s8500_s19 + $0x138] sm:$0xff] %v403_v39 }
  0x46   : > { %406 = vst [vmem:[%s8500_s19 + $0x140] sm:$0xff] %v405_v40 }
  0x47   : > { %408 = vst [vmem:[%s8500_s19 + $0x148] sm:$0xff] %v407_v41 }
  0x48   : > { %410 = vst [vmem:[%s8500_s19 + $0x150] sm:$0xff] %v409_v42 }
  0x49   : > { %412 = vst [vmem:[%s8500_s19 + $0x158] sm:$0xff] %v411_v43 }
  0x4a   : > { %414 = vst [vmem:[%s8500_s19 + $0x160] sm:$0xff] %v413_v44 }
  0x4b   : > { %416 = vst [vmem:[%s8500_s19 + $0x168] sm:$0xff] %v415_v45 }
  0x4c   : > { %418 = vst [vmem:[%s8500_s19 + $0x170] sm:$0xff] %v417_v46 }
  0x4d   : > { %420 = vst [vmem:[%s8500_s19 + $0x178] sm:$0xff] %v419_v47 }
  0x4e   : > { %422 = vst [vmem:[%s8500_s19 + $0x180] sm:$0xff] %v421_v48 }
  0x4f   : > { %424 = vst [vmem:[%s8500_s19 + $0x188] sm:$0xff] %v423_v49 }
  0x50   : > { %426 = vst [vmem:[%s8500_s19 + $0x190] sm:$0xff] %v425_v50 }
  0x51   : > { %428 = vst [vmem:[%s8500_s19 + $0x198] sm:$0xff] %v427_v51 }
  0x52   : > { %430 = vst [vmem:[%s8500_s19 + $0x1a0] sm:$0xff] %v429_v52 }
  0x53   : > { %432 = vst [vmem:[%s8500_s19 + $0x1a8] sm:$0xff] %v431_v53 }
  0x54   : > { %434 = vst [vmem:[%s8500_s19 + $0x1b0] sm:$0xff] %v433_v54 }
  0x55   : > { %436 = vst [vmem:[%s8500_s19 + $0x1b8] sm:$0xff] %v435_v55 }
  0x56   : > { %438 = vst [vmem:[%s8500_s19 + $0x1c0] sm:$0xff] %v437_v56 }
  0x57   : > { %440 = vst [vmem:[%s8500_s19 + $0x1c8] sm:$0xff] %v439_v57 }
  0x58   : > { %442 = vst [vmem:[%s8500_s19 + $0x1d0] sm:$0xff] %v441_v58 }
  0x59   : > { %444 = vst [vmem:[%s8500_s19 + $0x1d8] sm:$0xff] %v443_v59 }
  0x5a   : > { %446 = vst [vmem:[%s8500_s19 + $0x1e0] sm:$0xff] %v445_v60 }
  0x5b   : > { %448 = vst [vmem:[%s8500_s19 + $0x1e8] sm:$0xff] %v447_v61 }
  0x5c   : > { %450 = vst [vmem:[%s8500_s19 + $0x1f0] sm:$0xff] %v449_v62 }
  0x5d   : > { %452 = vst [vmem:[%s8500_s19 + $0x1f8] sm:$0xff] %v451_v63 }
  0x5e PF: > { %p8202_p7 = scmp.ge.s32.totalorder %s8379_s15, 1  ;;  %p493_p8 = scmp.lt.s32.totalorder %s8379_s15, 5 }
  0x60   : > { %p494_p9 = pnand %p8202_p7, %p493_p8 }
  0x62   : > { %497 = sbr.rel (%p494_p9) target bundleno = 2495 (0x9bf), region = 75 }
  0x67   : > { %s500_s17 = sand.u32 1, %s8355_s30   ;;  %s8204_s20 = sshll.u32 %s8363_s11, 5 }
  0x68   : > { %s8203_s21 = sshll.u32 %s500_s17, 9  ;;  %p558_p10 = scmp.lt.s32.totalorder %s8204_s20, 63 }
  0x69   : > { %s8206_s23 = sshll.u32 %s8367_s12, 5  ;;  %p8214_p12 = scmp.ne.s32.totalorder %s8363_s11, 0 }
  0x6a   : > { %s13690_s20 = smov (!%p558_p10, %s8204_s20), 63  ;;  %p564_p11 = scmp.lt.s32.totalorder %s8206_s23, 63 }
  0x6b   : > { %s8205_s24 = sshll.u32 %s13690_s20, 3  ;;  %590 = sbr.rel (%p8214_p12) target bundleno = 145 (0x91), region = 83 }
  0x6c   : > { %s8635_s27 = scalar_lea.vmem %s12679_s1, %s8205_s24  ;;  %s13692_s23 = smov (!%p564_p11, %s8206_s23), 63 }
  0x6d   : > { %s8207_s28 = sshll.u32 %s13692_s23, 3  ;;  %s8657_s23 = scalar_lea.vmem [#allocation3], %s8203_s21 }
  0x6e   : > { %s8640_s19 = scalar_lea.vmem %s12680_s2, %s8207_s28  ;;  %s8645_s17 = scalar_lea.vmem %s12681_s3, %s8207_s28 }
  0x6f   : > { %s8650_s20 = scalar_lea.vmem %s12682_s4, %s8207_s28  ;;  %s8655_s26 = scalar_lea.vmem %s12687_s9, %s8207_s28 }
  0x70   : > { %vm591_vm0 = vcmask 261120   ;;  %v8381_v0 = vmov 0.0  }
  0x71   : > { %592 = vst.msk [vmem:[#allocation2] sm:$0xff] %vm591_vm0, %v8381_v0 }
  0x72   : > { %593 = vst.msk [vmem:[#allocation2 + $0x8] sm:$0xff] %vm591_vm0, %v8381_v0 }
  0x73   : > { %594 = vst.msk [vmem:[#allocation2 + $0x10] sm:$0xff] %vm591_vm0, %v8381_v0 }
  0x74   : > { %595 = vst.msk [vmem:[#allocation2 + $0x18] sm:$0xff] %vm591_vm0, %v8381_v0 }
  0x75   : > { %596 = vst.msk [vmem:[#allocation2 + $0x20] sm:$0xff] %vm591_vm0, %v8381_v0 }
  0x76   : > { %597 = vst.msk [vmem:[#allocation2 + $0x28] sm:$0xff] %vm591_vm0, %v8381_v0 }
  0x77   : > { %598 = vst.msk [vmem:[#allocation2 + $0x30] sm:$0xff] %vm591_vm0, %v8381_v0 }
  0x78   : > { %599 = vst.msk [vmem:[#allocation2 + $0x38] sm:$0xff] %vm591_vm0, %v8381_v0 }
  0x79   : > { %600 = vst.msk [vmem:[#allocation2 + $0x40] sm:$0xff] %vm591_vm0, %v8381_v0 }
  0x7a   : > { %601 = vst.msk [vmem:[#allocation2 + $0x48] sm:$0xff] %vm591_vm0, %v8381_v0 }
  0x7b   : > { %602 = vst.msk [vmem:[#allocation2 + $0x50] sm:$0xff] %vm591_vm0, %v8381_v0 }
  0x7c   : > { %603 = vst.msk [vmem:[#allocation2 + $0x58] sm:$0xff] %vm591_vm0, %v8381_v0 }
  0x7d   : > { %604 = vst.msk [vmem:[#allocation2 + $0x60] sm:$0xff] %vm591_vm0, %v8381_v0 }
  0x7e   : > { %605 = vst.msk [vmem:[#allocation2 + $0x68] sm:$0xff] %vm591_vm0, %v8381_v0 }
  0x7f   : > { %606 = vst.msk [vmem:[#allocation2 + $0x70] sm:$0xff] %vm591_vm0, %v8381_v0 }
  0x80   : > { %607 = vst.msk [vmem:[#allocation2 + $0x78] sm:$0xff] %vm591_vm0, %v8381_v0 }
  0x81   : > { %608 = vst.msk [vmem:[#allocation2 + $0x80] sm:$0xff] %vm591_vm0, %v8381_v0 }
  0x82   : > { %609 = vst.msk [vmem:[#allocation2 + $0x88] sm:$0xff] %vm591_vm0, %v8381_v0 }
  0x83   : > { %610 = vst.msk [vmem:[#allocation2 + $0x90] sm:$0xff] %vm591_vm0, %v8381_v0 }
  0x84   : > { %611 = vst.msk [vmem:[#allocation2 + $0x98] sm:$0xff] %vm591_vm0, %v8381_v0 }
  0x85   : > { %612 = vst.msk [vmem:[#allocation2 + $0xa0] sm:$0xff] %vm591_vm0, %v8381_v0 }
  0x86   : > { %613 = vst.msk [vmem:[#allocation2 + $0xa8] sm:$0xff] %vm591_vm0, %v8381_v0 }
  0x87   : > { %614 = vst.msk [vmem:[#allocation2 + $0xb0] sm:$0xff] %vm591_vm0, %v8381_v0 }
  0x88   : > { %615 = vst.msk [vmem:[#allocation2 + $0xb8] sm:$0xff] %vm591_vm0, %v8381_v0 }
  0x89   : > { %616 = vst.msk [vmem:[#allocation2 + $0xc0] sm:$0xff] %vm591_vm0, %v8381_v0 }
  0x8a   : > { %617 = vst.msk [vmem:[#allocation2 + $0xc8] sm:$0xff] %vm591_vm0, %v8381_v0 }
  0x8b   : > { %618 = vst.msk [vmem:[#allocation2 + $0xd0] sm:$0xff] %vm591_vm0, %v8381_v0 }
  0x8c   : > { %619 = vst.msk [vmem:[#allocation2 + $0xd8] sm:$0xff] %vm591_vm0, %v8381_v0 }
  0x8d   : > { %620 = vst.msk [vmem:[#allocation2 + $0xe0] sm:$0xff] %vm591_vm0, %v8381_v0 }
  0x8e   : > { %621 = vst.msk [vmem:[#allocation2 + $0xe8] sm:$0xff] %vm591_vm0, %v8381_v0 }
  0x8f   : > { %622 = vst.msk [vmem:[#allocation2 + $0xf0] sm:$0xff] %vm591_vm0, %v8381_v0 }
  0x90   : > { %623 = vst.msk [vmem:[#allocation2 + $0xf8] sm:$0xff] %vm591_vm0, %v8381_v0 }
  0x91 PF: > { %v735_v1 = vld [vmem:[%s8635_s27 + $0x78] sm:$0xff]  ;;  %v734_v2 = vld [vmem:[%s8635_s27 + $0x70] sm:$0xff]  ;;  %v733_v3 = vld [vmem:[%s8635_s27 + $0x68] sm:$0xff]  ;;  %vm3388_vm1 = vcmask 261120   ;;  %p8215_p13 = scmp.ne.s32.totalorder %s8363_s11, 1 }
  0x92   : > { %v8695_v4 = vand.u32 4294901760, %v735_v1  ;;  %v8697_v5 = vand.u32 4294901760, %v734_v2  ;;  %v8699_v6 = vand.u32 4294901760, %v733_v3  ;;  %v732_v7 = vld [vmem:[%s8635_s27 + $0x60] sm:$0xff]  ;;  %v731_v8 = vld [vmem:[%s8635_s27 + $0x58] sm:$0xff]  ;;  %v730_v9 = vld [vmem:[%s8635_s27 + $0x50] sm:$0xff] }
  0x93   : > { %v8704_v10 = vand.u32 4294901760, %v732_v7  ;;  %v8706_v11 = vand.u32 4294901760, %v731_v8  ;;  %v8708_v12 = vand.u32 4294901760, %v730_v9  ;;  %v729_v13 = vld [vmem:[%s8635_s27 + $0x48] sm:$0xff]  ;;  %v728_v14 = vld [vmem:[%s8635_s27 + $0x40] sm:$0xff]  ;;  %v727_v19 = vld [vmem:[%s8635_s27 + $0x38] sm:$0xff] }
  0x94   : > { %753 = vmatpush.msra.mxu0 %v8695_v4  ;;  %v8714_v15 = vsub.f32 %v735_v1, %v8695_v4  ;;  %v8717_v16 = vsub.f32 %v734_v2, %v8697_v5  ;;  %1476 = vmatpush.msra.mxu3 %v8695_v4  ;;  %v8721_v17 = vsub.f32 %v733_v3, %v8699_v6  ;;  %v8723_v18 = vand.u32 4294901760, %v729_v13  ;;  %v726_v27 = vld [vmem:[%s8635_s27 + $0x30] sm:$0xff]  ;;  %v725_v35 = vld [vmem:[%s8635_s27 + $0x28] sm:$0xff]  ;;  %v724_v45 = vld [vmem:[%s8635_s27 + $0x20] sm:$0xff] }
  0x95   : > { %v8727_v20 = vsub.f32 %v732_v7, %v8704_v10  ;;  %v8730_v21 = vsub.f32 %v731_v8, %v8706_v11  ;;  %v8733_v22 = vsub.f32 %v730_v9, %v8708_v12  ;;  %v8740_v26 = vand.u32 4294901760, %v728_v14  ;;  %v723_v50 = vld [vmem:[%s8635_s27 + $0x18] sm:$0xff]  ;;  %v722_v57 = vld [vmem:[%s8635_s27 + $0x10] sm:$0xff]  ;;  %v656_v58 = vld [vmem:[%s8657_s23] sm:$0xff] }
  0x96   : > { %755 = vmatpush.msra.mxu0 %v8697_v5  ;;  %1268 = vmatpush.msra.mxu2 %v8714_v15  ;;  %v1043_v23 = vand.u32 4294901760, %v8714_v15  ;;  %v1049_v24 = vand.u32 4294901760, %v8717_v16  ;;  %v1055_v25 = vand.u32 4294901760, %v8721_v17  ;;  %v8745_v29 = vand.u32 4294901760, %v727_v19  ;;  %v721_v63 = vld [vmem:[%s8635_s27 + $0x8] sm:$0xff]  ;;  %v751_v0 = vld [vmem:[%s8635_s27 + $0xf8] sm:$0xff] }
  0x97   : > { %1478 = vmatpush.msra.mxu3 %v8697_v5  ;;  %v1061_v28 = vand.u32 4294901760, %v8727_v20  ;;  %v8748_v30 = vsub.f32 %v729_v13, %v8723_v18  ;;  %v1067_v34 = vand.u32 4294901760, %v8730_v21  ;;  %v8764_v36 = vand.u32 4294901760, %v726_v27 }
  0x98   : > { %757 = vmatpush.msra.mxu0 %v8699_v6  ;;  %1271 = vmatpush.msra.mxu2 %v8717_v16  ;;  %v1044_v31 = vsub.f32 %v8714_v15, %v1043_v23  ;;  %v1050_v32 = vsub.f32 %v8717_v16, %v1049_v24  ;;  %v1056_v33 = vsub.f32 %v8721_v17, %v1055_v25  ;;  %v1073_v37 = vand.u32 4294901760, %v8733_v22 }
  0x99   : > { %1480 = vmatpush.msra.mxu3 %v8699_v6  ;;  %v1062_v40 = vsub.f32 %v8727_v20, %v1061_v28  ;;  %v8773_v41 = vsub.f32 %v728_v14, %v8740_v26  ;;  %v8776_v42 = vand.u32 4294901760, %v725_v35  ;;  %v12699_v43 = vand.u32 4294901760, %v8748_v30  ;;  %v720_v14 = vld [vmem:[%s8635_s27] sm:$0xff] }
  0x9a   : > { %759 = vmatpush.msra.mxu0 %v8704_v10  ;;  %v1045_v38 = vand.u32 4294901760, %v1044_v31  ;;  %1274 = vmatpush.msra.mxu2 %v8721_v17  ;;  %v1051_v39 = vand.u32 4294901760, %v1050_v32  ;;  %v8780_v44 = vsub.f32 %v727_v19, %v8745_v29  ;;  %v1057_v46 = vand.u32 4294901760, %v1056_v33  ;;  %v658_v33 = vld [vmem:[%s8657_s23 + $0x10] sm:$0xff] }
  0x9b   : > { %1482 = vmatpush.msra.mxu3 %v8704_v10  ;;  %v1068_v47 = vsub.f32 %v8730_v21, %v1067_v34  ;;  %v1074_v48 = vsub.f32 %v8733_v22, %v1073_v37  ;;  %v8793_v49 = vsub.f32 %v726_v27, %v8764_v36  ;;  %v1063_v51 = vand.u32 4294901760, %v1062_v40 }
  0x9c   : > { %761 = vmatpush.msra.mxu0 %v8706_v11  ;;  %1046 = vmatpush.msra.mxu1 %v1045_v38  ;;  %v8797_v52 = vand.u32 4294901760, %v724_v45  ;;  %v12695_v53 = vand.u32 4294901760, %v8773_v41  ;;  %v1080_v54 = vsub.f32 %v8748_v30, %v12699_v43  ;;  %v12694_v55 = vand.u32 4294901760, %v8780_v44 }
  0x9d   : > { %1277 = vmatpush.msra.mxu2 %v8727_v20  ;;  %1484 = vmatpush.msra.mxu3 %v8706_v11  ;;  %v8807_v56 = vsub.f32 %v725_v35, %v8776_v42  ;;  %v1069_v59 = vand.u32 4294901760, %v1068_v47  ;;  %v8812_v60 = vand.u32 4294901760, %v723_v50  ;;  %v1075_v61 = vand.u32 4294901760, %v1074_v48 }
  0x9e   : > { %763 = vmatpush.msra.mxu0 %v8708_v12  ;;  %1052 = vmatpush.msra.mxu1 %v1051_v39  ;;  %v12693_v62 = vand.u32 4294901760, %v8793_v49  ;;  %v1086_v1 = vsub.f32 %v8773_v41, %v12695_v53  ;;  %v8823_v2 = vand.u32 4294901760, %v722_v57  ;;  %v8826_v3 = vsub.f32 %v724_v45, %v8797_v52 }
  0x9f   : > { %1280 = vmatpush.msra.mxu2 %v8730_v21  ;;  %1486 = vmatpush.msra.mxu3 %v8708_v12  ;;  %v8828_v7 = vand.u32 4294901760, %v656_v58  ;;  %v1081_v8 = vand.u32 4294901760, %v1080_v54  ;;  %v1092_v9 = vsub.f32 %v8780_v44, %v12694_v55  ;;  %v12691_v13 = vand.u32 4294901760, %v8807_v56 }
  0xa0   : > { %765 = vmatpush.msra.mxu0 %v8723_v18  ;;  %1058 = vmatpush.msra.mxu1 %v1057_v46  ;;  %v8838_v19 = vand.u32 4294901760, %v721_v63  ;;  %v8841_v27 = vsub.f32 %v723_v50, %v8812_v60  ;;  %v8846_v32 = vand.u32 4294901760, %v751_v0  ;;  %v1098_v35 = vsub.f32 %v8793_v49, %v12693_v62  ;;  %v750_v46 = vld [vmem:[%s8635_s27 + $0xf0] sm:$0xff] }
  0xa1   : > { %1283 = vmatpush.msra.mxu2 %v8733_v22  ;;  %1488 = vmatpush.msra.mxu3 %v8723_v18  ;;  %v8844_v31 = vsub.f32 %v656_v58, %v8828_v7  ;;  %v1087_v38 = vand.u32 4294901760, %v1086_v1  ;;  %v8855_v39 = vand.u32 4294901760, %v720_v14  ;;  %v12690_v40 = vand.u32 4294901760, %v8826_v3 }
  0xa2   : > { %767 = vmatpush.msra.mxu0 %v8740_v26  ;;  %1064 = vmatpush.msra.mxu1 %v1063_v51  ;;  %v8859_v45 = vsub.f32 %v722_v57, %v8823_v2  ;;  %v1093_v47 = vand.u32 4294901760, %v1092_v9  ;;  %v1104_v48 = vsub.f32 %v8807_v56, %v12691_v13  ;;  %v8868_v51 = vand.u32 4294901760, %v658_v33  ;;  %v660_v13 = vld [vmem:[%s8657_s23 + $0x20] sm:$0xff] }
  0xa3   : > { %1286 = vmatpush.msra.mxu2 %v8748_v30  ;;  %1490 = vmatpush.msra.mxu3 %v8740_v26  ;;  %v786_v50 = vand.u32 4294901760, %v8844_v31  ;;  %v12692_v54 = vand.u32 4294901760, %v8841_v27  ;;  %v8873_v57 = vsub.f32 %v721_v63, %v8838_v19  ;;  %v8876_v58 = vsub.f32 %v751_v0, %v8846_v32 }
  0xa4   : > { %769 = vmatpush.msra.mxu0 %v8745_v29  ;;  %1070 = vmatpush.msra.mxu1 %v1069_v59  ;;  %v8878_v59 = vand.u32 4294901760, %v750_v46  ;;  %v1110_v1 = vsub.f32 %v8826_v3, %v12690_v40  ;;  %v12696_v63 = vand.u32 4294901760, %v8859_v45  ;;  %v8888_v0 = vsub.f32 %v720_v14, %v8855_v39 }
  0xa5   : > { %1289 = vmatpush.msra.mxu2 %v8773_v41  ;;  %1492 = vmatpush.msra.mxu3 %v8745_v29  ;;  %v787_v9 = vsub.f32 %v8844_v31, %v786_v50  ;;  %v1116_v14 = vsub.f32 %v8841_v27, %v12692_v54  ;;  %v12697_v40 = vand.u32 4294901760, %v8876_v58  ;;  %v8917_v53 = vand.u32 4294901760, %v660_v13 }
  0xa6   : > { %771 = vmatpush.msra.mxu0 %v8764_v36  ;;  %1076 = vmatpush.msra.mxu1 %v1075_v61  ;;  %v1099_v61 = vand.u32 4294901760, %v1098_v35  ;;  %v8897_v35 = vsub.f32 %v658_v33, %v8868_v51  ;;  %v1111_v33 = vand.u32 4294901760, %v1110_v1  ;;  %v13092_v22 = vand.u32 4294901760, %v8773_v41 }
  0xa7   : > { %1292 = vmatpush.msra.mxu2 %v8780_v44  ;;  %1494 = vmatpush.msra.mxu3 %v8764_v36  ;;  %v788_v62 = vand.u32 4294901760, %v787_v9 }
  0xa8   : > { %773 = vmatpush.msra.mxu0 %v8776_v42  ;;  %1082 = vmatpush.msra.mxu1 %v1081_v8  ;;  %v8891_v8 = vsub.f32 %v750_v46, %v8878_v59  ;;  %v12698_v46 = vand.u32 4294901760, %v8873_v57  ;;  %v794_v55 = vand.u32 4294901760, %v8897_v35 }
  0xa9   : > { %1295 = vmatpush.msra.mxu2 %v8793_v49  ;;  %1496 = vmatpush.msra.mxu3 %v8776_v42 }
  0xaa   : > { %775 = vmatpush.msra.mxu0 %v8797_v52  ;;  %1088 = vmatpush.msra.mxu1 %v1087_v38  ;;  %v1105_v38 = vand.u32 4294901760, %v1104_v48  ;;  %v12701_v48 = vand.u32 4294901760, %v8888_v0  ;;  %v12700_v54 = vand.u32 4294901760, %v8891_v8  ;;  %v1128_v1 = vsub.f32 %v8873_v57, %v12698_v46 }
  0xab   : > { %1298 = vmatpush.msra.mxu2 %v8807_v56  ;;  %1498 = vmatpush.msra.mxu3 %v8797_v52  ;;  %v801_v46 = vsub.f32 %v660_v13, %v8917_v53 }
  0xac   : > { %777 = vmatpush.msra.mxu0 %v8812_v60  ;;  %1094 = vmatpush.msra.mxu1 %v1093_v47  ;;  %v1122_v47 = vsub.f32 %v8859_v45, %v12696_v63  ;;  %v2346_v63 = vsub.f32 %v8876_v58, %v12697_v40  ;;  %v795_v40 = vsub.f32 %v8897_v35, %v794_v55  ;;  %v1129_v43 = vand.u32 4294901760, %v1128_v1 }
  0xad   : > { %1301 = vmatpush.msra.mxu2 %v8826_v3  ;;  %1500 = vmatpush.msra.mxu3 %v8812_v60 }
  0xae   : > { %779 = vmatpush.msra.mxu0 %v8823_v2  ;;  %1100 = vmatpush.msra.mxu1 %v1099_v61  ;;  %v1117_v61 = vand.u32 4294901760, %v1116_v14  ;;  %v1123_v9 = vand.u32 4294901760, %v1122_v47  ;;  %v2352_v14 = vsub.f32 %v8891_v8, %v12700_v54  ;;  %v662_v47 = vld [vmem:[%s8657_s23 + $0x30] sm:$0xff]  ;;  %v796_v13 = vand.u32 4294901760, %v795_v40 }
  0xaf   : > { %1304 = vmatpush.msra.mxu2 %v8841_v27  ;;  %1502 = vmatpush.msra.mxu3 %v8823_v2  ;;  %v8946_v1 = vand.u32 4294901760, %v662_v47 }
  0xb0   : > { %781 = vmatpush.msra.mxu0 %v8838_v19  ;;  %1106 = vmatpush.msra.mxu1 %v1105_v38  ;;  %v1134_v38 = vsub.f32 %v8888_v0, %v12701_v48  ;;  %v749_v48 = vld [vmem:[%s8635_s27 + $0xe8] sm:$0xff] }
  0xb1   : > { %1307 = vmatpush.msra.mxu2 %v8859_v45  ;;  %1504 = vmatpush.msra.mxu3 %v8838_v19 }
  0xb2   : > { %783 = vmatpush.msra.mxu0 %v8855_v39  ;;  %1112 = vmatpush.msra.mxu1 %v1111_v33  ;;  %v2347_v33 = vand.u32 4294901760, %v2346_v63  ;;  %v1135_v54 = vand.u32 4294901760, %v1134_v38  ;;  %v8948_v63 = vand.u32 4294901760, %v749_v48 }
  0xb3   : > { %789 = vmatmul.f32.vlgmr.msra.gmra.mxu0 %v788_v62  ;;  %1310 = vmatpush.msra.mxu2 %v8873_v57  ;;  %v2353_v62 = vand.u32 4294901760, %v2352_v14  ;;  %v670_v14 = vld [vmem:[%s8657_s23 + $0x70] sm:$0xff] }
  0xb4   : > { %1118 = vmatpush.msra.mxu1 %v1117_v61  ;;  %1506 = vmatpush.msra.mxu3 %v8855_v39  ;;  %v802_v61 = vand.u32 4294901760, %v801_v46 }
  0xb5   : > { %1313 = vmatpush.msra.mxu2 %v8888_v0  ;;  %1510 = vmatmul.f32.vlgmr.msra.gmra.mxu3 %v786_v50 }
  0xb6   : > { %1124 = vmatpush.msra.mxu1 %v1123_v9  ;;  %1316 = vmatmul.f32.vlgmr.msra.gmra.mxu2 %v8844_v31  ;;  %v8954_v31 = vsub.f32 %v749_v48, %v8948_v63  ;;  %v803_v15 = vsub.f32 %v801_v46, %v802_v61 }
  0xb7   : > { %2055 = vmatpush.msrb.mxu2 %v8846_v32  ;;  %1703 = vmatpush.msrb.mxu0 %v1043_v23  ;;  %v809_v23 = vsub.f32 %v662_v47, %v8946_v1 }
  0xb8   : > { %1130 = vmatpush.msra.mxu1 %v1129_v43  ;;  %2348 = vmatpush.msrb.mxu3 %v2347_v33  ;;  %v12709_v40 = vand.u32 4294901760, %v8954_v31  ;;  %v664_v43 = vld [vmem:[%s8657_s23 + $0x40] sm:$0xff]  ;;  %v9027_v33 = vand.u32 4294901760, %v670_v14 }
  0xb9   : > { %2057 = vmatpush.msrb.mxu2 %v8878_v59  ;;  %1707 = vmatpush.msrb.mxu0 %v1049_v24  ;;  %v804_v24 = vand.u32 4294901760, %v803_v15  ;;  %v810_v50 = vand.u32 4294901760, %v809_v23 }
  0xba   : > { %1136 = vmatpush.msra.mxu1 %v1135_v54  ;;  %2354 = vmatpush.msrb.mxu3 %v2353_v62  ;;  %v2358_v16 = vsub.f32 %v8954_v31, %v12709_v40  ;;  %v8969_v54 = vand.u32 4294901760, %v664_v43  ;;  %v13098_v62 = vand.u32 4294901760, %v8859_v45 }
  0xbb   : > { %797 = vmatmul.f32.gmra.mxu0 %v796_v13  ;;  %1138 = vmatmul.f32.vlgmr.msra.gmra.mxu1 %v8828_v7  ;;  %v841_v13 = vsub.f32 %v670_v14, %v9027_v33 }
  0xbc   : > { %1894 = vmatpush.msrb.mxu1 %v8695_v4  ;;  %2059 = vmatpush.msrb.mxu2 %v8948_v63  ;;  %v2359_v4 = vand.u32 4294901760, %v2358_v16  ;;  %v817_v17 = vsub.f32 %v664_v43, %v8969_v54  ;;  %v674_v16 = vld [vmem:[%s8657_s23 + $0x90] sm:$0xff] }
  0xbd   : > { %1516 = vmatmul.f32.gmra.mxu3 %v794_v55  ;;  %1711 = vmatpush.msrb.mxu0 %v1055_v25  ;;  %v666_v25 = vld [vmem:[%s8657_s23 + $0x50] sm:$0xff]  ;;  %v668_v55 = vld [vmem:[%s8657_s23 + $0x60] sm:$0xff]  ;;  %v842_v15 = vand.u32 4294901760, %v841_v13 }
  0xbe   : > { %1321 = vmatmul.f32.gmra.mxu2 %v8897_v35  ;;  %1896 = vmatpush.msrb.mxu1 %v8697_v5  ;;  %v811_v5 = vsub.f32 %v809_v23, %v810_v50  ;;  %v8985_v21 = vand.u32 4294901760, %v666_v25  ;;  %v9011_v48 = vand.u32 4294901760, %v668_v55 }
  0xbf   : > { %1715 = vmatpush.msrb.mxu0 %v1061_v28  ;;  %2360 = vmatpush.msrb.mxu3 %v2359_v4 }
  0xc0   : > { %1898 = vmatpush.msrb.mxu1 %v8699_v6  ;;  %v748_v6 = vld [vmem:[%s8635_s27 + $0xe0] sm:$0xff]  ;;  %v812_v20 = vand.u32 4294901760, %v811_v5  ;;  %v833_v38 = vsub.f32 %v668_v55, %v9011_v48  ;;  %v9066_v5 = vand.u32 4294901760, %v674_v16 }
  0xc1   : > { %1719 = vmatpush.msrb.mxu0 %v1067_v34  ;;  %v8987_v28 = vand.u32 4294901760, %v748_v6  ;;  %v13091_v34 = vand.u32 4294901760, %v8748_v30 }
  0xc2   : > { %1900 = vmatpush.msrb.mxu1 %v8704_v10  ;;  %v818_v10 = vand.u32 4294901760, %v817_v17  ;;  %13102 = vst [vmem:[#allocation7_spill] sm:$0xff] %v9066_v5 }
  0xc3   : > { %805 = vmatmul.f32.gmra.mxu0 %v804_v24  ;;  %1142 = vmatmul.f32.gmra.mxu1 %v8868_v51  ;;  %v746_v24 = vld [vmem:[%s8635_s27 + $0xd0] sm:$0xff] }
  0xc4   : > { %1902 = vmatpush.msrb.mxu1 %v8706_v11  ;;  %1723 = vmatpush.msrb.mxu0 %v1073_v37  ;;  %v8994_v11 = vsub.f32 %v748_v6, %v8987_v28  ;;  %v825_v37 = vsub.f32 %v666_v25, %v8985_v21 }
  0xc5   : > { %1522 = vmatmul.f32.gmra.mxu3 %v802_v61  ;;  %2061 = vmatpush.msrb.mxu2 %v8987_v28  ;;  %v672_v61 = vld [vmem:[%s8657_s23 + $0x80] sm:$0xff] }
  0xc6   : > { %1326 = vmatmul.f32.gmra.mxu2 %v801_v46  ;;  %1904 = vmatpush.msrb.mxu1 %v8708_v12  ;;  %v819_v12 = vsub.f32 %v817_v17, %v818_v10  ;;  %v12708_v30 = vand.u32 4294901760, %v8994_v11  ;;  %v826_v46 = vand.u32 4294901760, %v825_v37 }
  0xc7   : > { %1727 = vmatpush.msrb.mxu0 %v13091_v34  ;;  %v676_v34 = vld [vmem:[%s8657_s23 + $0xa0] sm:$0xff] }
  0xc8   : > { %1906 = vmatpush.msrb.mxu1 %v8723_v18  ;;  %v13093_v18 = vand.u32 4294901760, %v8780_v44  ;;  %v2364_v41 = vsub.f32 %v8994_v11, %v12708_v30  ;;  %v820_v35 = vand.u32 4294901760, %v819_v12  ;;  %v13096_v44 = vand.u32 4294901760, %v8826_v3 }
  0xc9   : > { %1731 = vmatpush.msrb.mxu0 %v13092_v22  ;;  %v834_v3 = vand.u32 4294901760, %v833_v38  ;;  %v9084_v55 = vand.u32 4294901760, %v676_v34 }
  0xca   : > { %1908 = vmatpush.msrb.mxu1 %v8740_v26  ;;  %v13094_v26 = vand.u32 4294901760, %v8793_v49  ;;  %v2365_v9 = vand.u32 4294901760, %v2364_v41  ;;  %v827_v49 = vsub.f32 %v825_v37, %v826_v46 }
  0xcb   : > { %813 = vmatmul.f32.gmra.mxu0 %v812_v20  ;;  %1146 = vmatmul.f32.gmra.mxu1 %v8917_v53  ;;  %v857_v20 = vsub.f32 %v674_v16, %v9066_v5  ;;  %13103 = vst [vmem:[#allocation8_spill] sm:$0xff] %v9084_v55 }
  0xcc   : > { %1735 = vmatpush.msrb.mxu0 %v13093_v18  ;;  %1910 = vmatpush.msrb.mxu1 %v8745_v29  ;;  %v13095_v29 = vand.u32 4294901760, %v8807_v56  ;;  %v747_v56 = vld [vmem:[%s8635_s27 + $0xd8] sm:$0xff] }
  0xcd   : > { %1528 = vmatmul.f32.gmra.mxu3 %v810_v50  ;;  %v9029_v47 = vand.u32 4294901760, %v747_v56 }
  0xce   : > { %1331 = vmatmul.f32.gmra.mxu2 %v809_v23  ;;  %1739 = vmatpush.msrb.mxu0 %v13094_v26  ;;  %v9053_v23 = vand.u32 4294901760, %v672_v61  ;;  %v865_v26 = vsub.f32 %v676_v34, %v9084_v55 }
  0xcf   : > { %1912 = vmatpush.msrb.mxu1 %v8764_v36  ;;  %2366 = vmatpush.msrb.mxu3 %v2365_v9  ;;  %v13097_v36 = vand.u32 4294901760, %v8841_v27  ;;  %v13099_v27 = vand.u32 4294901760, %v8873_v57 }
  0xd0   : > { %1743 = vmatpush.msrb.mxu0 %v13095_v29  ;;  %2063 = vmatpush.msrb.mxu2 %v9029_v47  ;;  %13101 = vst [vmem:[#allocation6_spill] sm:$0xff] %v9053_v23  ;;  %v849_v43 = vsub.f32 %v672_v61, %v9053_v23  ;;  %v866_v29 = vand.u32 4294901760, %v865_v26 }
  0xd1   : > { %1914 = vmatpush.msrb.mxu1 %v8776_v42  ;;  %v828_v42 = vand.u32 4294901760, %v827_v49 }
  0xd2   : > { %1747 = vmatpush.msrb.mxu0 %v13096_v44  ;;  %v850_v4 = vand.u32 4294901760, %v849_v43  ;;  %v867_v14 = vsub.f32 %v865_v26, %v866_v29 }
  0xd3   : > { %821 = vmatmul.f32.gmra.mxu0 %v820_v35  ;;  %1150 = vmatmul.f32.gmra.mxu1 %v8946_v1  ;;  %v678_v35 = vld [vmem:[%s8657_s23 + $0xb0] sm:$0xff] }
  0xd4   : > { %1916 = vmatpush.msrb.mxu1 %v8797_v52  ;;  %1751 = vmatpush.msrb.mxu0 %v13097_v36  ;;  %v9036_v52 = vsub.f32 %v747_v56, %v9029_v47  ;;  %v851_v6 = vsub.f32 %v849_v43, %v850_v4  ;;  %v9090_v44 = vand.u32 4294901760, %v678_v35 }
  0xd5   : > { %1534 = vmatmul.f32.gmra.mxu3 %v818_v10 }
  0xd6   : > { %1336 = vmatmul.f32.gmra.mxu2 %v817_v17  ;;  %1918 = vmatpush.msrb.mxu1 %v8812_v60  ;;  %v835_v60 = vsub.f32 %v833_v38, %v834_v3  ;;  %v12707_v45 = vand.u32 4294901760, %v9036_v52  ;;  %v9068_v17 = vand.u32 4294901760, %v746_v24  ;;  %v852_v12 = vand.u32 4294901760, %v851_v6  ;;  %13104 = vst [vmem:[#allocation9_spill] sm:$0xff] %v9090_v44  ;;  %v684_v6 = vld [vmem:[%s8657_s23 + $0xe0] sm:$0xff] }
  0xd7   : > { %1755 = vmatpush.msrb.mxu0 %v13098_v62  ;;  %v873_v36 = vsub.f32 %v678_v35, %v9090_v44  ;;  %v868_v62 = vand.u32 4294901760, %v867_v14  ;;  %v743_v35 = vld [vmem:[%s8635_s27 + $0xb8] sm:$0xff] }
  0xd8   : > { %1920 = vmatpush.msrb.mxu1 %v8823_v2  ;;  %v13100_v2 = vand.u32 4294901760, %v8888_v0  ;;  %v2370_v57 = vsub.f32 %v9036_v52, %v12707_v45  ;;  %2065 = vmatpush.msrb.mxu2 %v9068_v17  ;;  %v9073_v25 = vsub.f32 %v746_v24, %v9068_v17  ;;  %v9138_v14 = vand.u32 4294901760, %v743_v35 }
  0xd9   : > { %1759 = vmatpush.msrb.mxu0 %v13099_v27  ;;  %v874_v27 = vand.u32 4294901760, %v873_v36 }
  0xda   : > { %1922 = vmatpush.msrb.mxu1 %v8838_v19  ;;  %v836_v19 = vand.u32 4294901760, %v835_v60  ;;  %v2371_v0 = vand.u32 4294901760, %v2370_v57  ;;  %v12706_v10 = vand.u32 4294901760, %v9073_v25  ;;  %v682_v57 = vld [vmem:[%s8657_s23 + $0xd0] sm:$0xff] }
  0xdb   : > { %829 = vmatmul.f32.gmra.mxu0 %v828_v42  ;;  %1154 = vmatmul.f32.gmra.mxu1 %v8969_v54  ;;  %v680_v42 = vld [vmem:[%s8657_s23 + $0xc0] sm:$0xff]  ;;  %v875_v61 = vsub.f32 %v873_v36, %v874_v27 }
  0xdc   : > { %1763 = vmatpush.msrb.mxu0 %v13100_v2  ;;  %1924 = vmatpush.msrb.mxu1 %v8855_v39  ;;  %v843_v39 = vsub.f32 %v841_v13, %v842_v15  ;;  %v2376_v22 = vsub.f32 %v9073_v25, %v12706_v10  ;;  %v9107_v60 = vand.u32 4294901760, %v680_v42 }
  0xdd   : > { %1540 = vmatmul.f32.gmra.mxu3 %v826_v46  ;;  %v745_v46 = vld [vmem:[%s8635_s27 + $0xc8] sm:$0xff] }
  0xde   : > { %2570 = vmatpush.msra.mxu0 %v8876_v58  ;;  %1341 = vmatmul.f32.gmra.mxu2 %v825_v37  ;;  %v844_v50 = vand.u32 4294901760, %v843_v39  ;;  %v858_v37 = vand.u32 4294901760, %v857_v20  ;;  %v2377_v18 = vand.u32 4294901760, %v2376_v22  ;;  %v9092_v49 = vand.u32 4294901760, %v745_v46  ;;  %13105 = vst [vmem:[#allocation10_spill] sm:$0xff] %v9107_v60 }
  0xdf   : > { %2778 = vmatpush.msra.mxu1 %v8846_v32  ;;  %2372 = vmatpush.msrb.mxu3 %v2371_v0  ;;  %v881_v2 = vsub.f32 %v680_v42, %v9107_v60  ;;  %v9113_v39 = vand.u32 4294901760, %v682_v57 }
  0xe0   : > { %2573 = vmatpush.msra.mxu0 %v8891_v8  ;;  %v859_v41 = vsub.f32 %v857_v20, %v858_v37  ;;  %2067 = vmatpush.msrb.mxu2 %v9092_v49 }
  0xe1   : > { %2780 = vmatpush.msra.mxu1 %v8878_v59  ;;  %2378 = vmatpush.msrb.mxu3 %v2377_v18  ;;  %v882_v0 = vand.u32 4294901760, %v881_v2  ;;  %13106 = vst [vmem:[#allocation11_spill] sm:$0xff] %v9113_v39 }
  0xe2   : > { %2576 = vmatpush.msra.mxu0 %v8954_v31  ;;  %v860_v9 = vand.u32 4294901760, %v859_v41 }
  0xe3   : > { %2782 = vmatpush.msra.mxu1 %v8948_v63  ;;  %837 = vmatmul.f32.gmra.mxu0 %v836_v19  ;;  %v744_v19 = vld [vmem:[%s8635_s27 + $0xc0] sm:$0xff]  ;;  %v883_v24 = vsub.f32 %v881_v2, %v882_v0 }
  0xe4   : > { %1158 = vmatmul.f32.gmra.mxu1 %v8985_v21  ;;  %2579 = vmatpush.msra.mxu0 %v8994_v11 }
  0xe5   : > { %2784 = vmatpush.msra.mxu1 %v8987_v28  ;;  %1546 = vmatmul.f32.gmra.mxu3 %v834_v3  ;;  %v884_v34 = vand.u32 4294901760, %v883_v24  ;;  %v690_v24 = vld [vmem:[%s8657_s23 + $0x110] sm:$0xff] }
  0xe6   : > { %1346 = vmatmul.f32.gmra.mxu2 %v833_v38  ;;  %2582 = vmatpush.msra.mxu0 %v9036_v52  ;;  %v9096_v38 = vsub.f32 %v745_v46, %v9092_v49 }
  0xe7   : > { %2786 = vmatpush.msra.mxu1 %v9029_v47 }
  0xe8   : > { %2585 = vmatpush.msra.mxu0 %v9073_v25  ;;  %v12705_v56 = vand.u32 4294901760, %v9096_v38 }
  0xe9   : > { %2788 = vmatpush.msra.mxu1 %v9068_v17 }
  0xea   : > { %2588 = vmatpush.msra.mxu0 %v9096_v38  ;;  %v2382_v3 = vsub.f32 %v9096_v38, %v12705_v56  ;;  %v696_v56 = vld [vmem:[%s8657_s23 + $0x140] sm:$0xff] }
  0xeb   : > { %845 = vmatmul.f32.gmra.mxu0 %v844_v50  ;;  %2790 = vmatpush.msra.mxu1 %v9092_v49  ;;  %v889_v50 = vsub.f32 %v682_v57, %v9113_v39 }
  0xec   : > { %1162 = vmatmul.f32.gmra.mxu1 %v9011_v48 }
  0xed   : > { %1552 = vmatmul.f32.gmra.mxu3 %v842_v15  ;;  %v876_v15 = vand.u32 4294901760, %v875_v61  ;;  %v890_v22 = vand.u32 4294901760, %v889_v50 }
  0xee   : > { %1351 = vmatmul.f32.gmra.mxu2 %v841_v13  ;;  %v2383_v13 = vand.u32 4294901760, %v2382_v3 }
  0xef   : > { %v891_v18 = vsub.f32 %v889_v50, %v890_v22 }
  0xf0   : > { %2384 = vmatpush.msrb.mxu3 %v2383_v13 }
  0xf1   : > { %v892_v46 = vand.u32 4294901760, %v891_v18 }
  0xf3   : > { %853 = vmatmul.f32.gmra.mxu0 %v852_v12  ;;  %v9130_v12 = vand.u32 4294901760, %v684_v6 }
  0xf4   : > { %1166 = vmatmul.f32.gmra.mxu1 %v9027_v33 }
  0xf5   : > { %1558 = vmatmul.f32.gmra.mxu3 %v850_v4  ;;  %13107 = vst [vmem:[#allocation12_spill] sm:$0xff] %v9130_v12  ;;  %v897_v41 = vsub.f32 %v684_v6, %v9130_v12  ;;  %v742_v6 = vld [vmem:[%s8635_s27 + $0xb0] sm:$0xff] }
  0xf6   : > { %1356 = vmatmul.f32.gmra.mxu2 %v849_v43  ;;  %v9115_v43 = vand.u32 4294901760, %v744_v19 }
  0xf8   : > { %2069 = vmatpush.msrb.mxu2 %v9115_v43  ;;  %v9119_v16 = vsub.f32 %v744_v19, %v9115_v43  ;;  %2792 = vmatpush.msra.mxu1 %v9115_v43 }
  0xfa   : > { %v12704_v4 = vand.u32 4294901760, %v9119_v16  ;;  %2591 = vmatpush.msra.mxu0 %v9119_v16  ;;  %2071 = vmatpush.msrb.mxu2 %v9138_v14 }
  0xfb   : > { %861 = vmatmul.f32.gmra.mxu0 %v860_v9  ;;  %v898_v9 = vand.u32 4294901760, %v897_v41  ;;  %2794 = vmatpush.msra.mxu1 %v9138_v14 }
  0xfc   : > { %1170 = vmatmul.f32.gmra.mxu1 %v9053_v23 }
  0xfd   : > { %1564 = vmatmul.f32.gmra.mxu3 %v858_v37  ;;  %v899_v42 = vsub.f32 %v897_v41, %v898_v9 }
  0xfe   : > { %1361 = vmatmul.f32.gmra.mxu2 %v857_v20  ;;  %v2388_v20 = vsub.f32 %v9119_v16, %v12704_v4 }
  0xff   : > { %v900_v61 = vand.u32 4294901760, %v899_v42 }
 0x100   : > { %v2389_v37 = vand.u32 4294901760, %v2388_v20 }
 0x102   : > { %2390 = vmatpush.msrb.mxu3 %v2389_v37 }
 0x103   : > { %869 = vmatmul.f32.gmra.mxu0 %v868_v62 }
 0x104   : > { %1174 = vmatmul.f32.gmra.mxu1 %v9066_v5 }
 0x105   : > { %1570 = vmatmul.f32.gmra.mxu3 %v866_v29 }
 0x106   : > { %1366 = vmatmul.f32.gmra.mxu2 %v865_v26  ;;  %v686_v26 = vld [vmem:[%s8657_s23 + $0xf0] sm:$0xff] }
 0x107   : > { %v9136_v29 = vand.u32 4294901760, %v686_v26 }
 0x109   : > { %13108 = vst [vmem:[#allocation13_spill] sm:$0xff] %v9136_v29  ;;  %v905_v3 = vsub.f32 %v686_v26, %v9136_v29 }
 0x10b   : > { %877 = vmatmul.f32.gmra.mxu0 %v876_v15 }
 0x10c   : > { %1178 = vmatmul.f32.gmra.mxu1 %v9084_v55 }
 0x10d   : > { %1576 = vmatmul.f32.gmra.mxu3 %v874_v27  ;;  %v688_v27 = vld [vmem:[%s8657_s23 + $0x100] sm:$0xff] }
 0x10e   : > { %1371 = vmatmul.f32.gmra.mxu2 %v873_v36  ;;  %v9142_v36 = vsub.f32 %v743_v35, %v9138_v14  ;;  %v9153_v57 = vand.u32 4294901760, %v688_v27  ;;  %v692_v35 = vld [vmem:[%s8657_s23 + $0x120] sm:$0xff] }
 0x110   : > { %v12703_v62 = vand.u32 4294901760, %v9142_v36  ;;  %2594 = vmatpush.msra.mxu0 %v9142_v36  ;;  %13109 = vst [vmem:[#allocation14_spill] sm:$0xff] %v9153_v57 }
 0x112   : > { %v2394_v13 = vsub.f32 %v9142_v36, %v12703_v62 }
 0x113   : > { %885 = vmatmul.f32.gmra.mxu0 %v884_v34 }
 0x114   : > { %1182 = vmatmul.f32.gmra.mxu1 %v9090_v44  ;;  %v2395_v19 = vand.u32 4294901760, %v2394_v13 }
 0x115   : > { %1582 = vmatmul.f32.gmra.mxu3 %v882_v0  ;;  %v913_v0 = vsub.f32 %v688_v27, %v9153_v57  ;;  %v9176_v27 = vand.u32 4294901760, %v692_v35 }
 0x116   : > { %1376 = vmatmul.f32.gmra.mxu2 %v881_v2  ;;  %v906_v2 = vand.u32 4294901760, %v905_v3  ;;  %2396 = vmatpush.msrb.mxu3 %v2395_v19 }
 0x117   : > { %v914_v34 = vand.u32 4294901760, %v913_v0  ;;  %13111 = vst [vmem:[#allocation16_spill] sm:$0xff] %v9176_v27 }
 0x118   : > { %v907_v15 = vsub.f32 %v905_v3, %v906_v2 }
 0x119   : > { %v915_v18 = vsub.f32 %v913_v0, %v914_v34 }
 0x11a   : > { %v908_v20 = vand.u32 4294901760, %v907_v15  ;;  %v929_v15 = vsub.f32 %v692_v35, %v9176_v27 }
 0x11b   : > { %893 = vmatmul.f32.gmra.mxu0 %v892_v46 }
 0x11c   : > { %1186 = vmatmul.f32.gmra.mxu1 %v9107_v60 }
 0x11d   : > { %1588 = vmatmul.f32.gmra.mxu3 %v890_v22  ;;  %v9161_v22 = vand.u32 4294901760, %v742_v6 }
 0x11e   : > { %1381 = vmatmul.f32.gmra.mxu2 %v889_v50  ;;  %v9159_v50 = vand.u32 4294901760, %v690_v24 }
 0x11f   : > { %2073 = vmatpush.msrb.mxu2 %v9161_v22  ;;  %v9165_v37 = vsub.f32 %v742_v6, %v9161_v22  ;;  %2796 = vmatpush.msra.mxu1 %v9161_v22 }
 0x120   : > { %13110 = vst [vmem:[#allocation15_spill] sm:$0xff] %v9159_v50 }
 0x121   : > { %v12702_v26 = vand.u32 4294901760, %v9165_v37  ;;  %2597 = vmatpush.msra.mxu0 %v9165_v37 }
 0x123   : > { %901 = vmatmul.f32.gmra.mxu0 %v900_v61  ;;  %v2400_v46 = vsub.f32 %v9165_v37, %v12702_v26 }
 0x124   : > { %1190 = vmatmul.f32.gmra.mxu1 %v9113_v39 }
 0x125   : > { %1594 = vmatmul.f32.gmra.mxu3 %v898_v9  ;;  %v916_v9 = vand.u32 4294901760, %v915_v18  ;;  %v2401_v13 = vand.u32 4294901760, %v2400_v46 }
 0x126   : > { %1386 = vmatmul.f32.gmra.mxu2 %v897_v41  ;;  %v921_v41 = vsub.f32 %v690_v24, %v9159_v50  ;;  %v741_v24 = vld [vmem:[%s8635_s27 + $0xa8] sm:$0xff] }
 0x127   : > { %2402 = vmatpush.msrb.mxu3 %v2401_v13  ;;  %v9184_v18 = vand.u32 4294901760, %v741_v24 }
 0x128   : > { %v922_v42 = vand.u32 4294901760, %v921_v41 }
 0x129   : > { %2075 = vmatpush.msrb.mxu2 %v9184_v18  ;;  %v9188_v35 = vsub.f32 %v741_v24, %v9184_v18  ;;  %2798 = vmatpush.msra.mxu1 %v9184_v18 }
 0x12a   : > { %v923_v19 = vsub.f32 %v921_v41, %v922_v42 }
 0x12b   : > { %909 = vmatmul.f32.gmra.mxu0 %v908_v20  ;;  %v930_v20 = vand.u32 4294901760, %v929_v15  ;;  %v12710_v4 = vand.u32 4294901760, %v9188_v35 }
 0x12c   : > { %1194 = vmatmul.f32.gmra.mxu1 %v9130_v12  ;;  %v924_v6 = vand.u32 4294901760, %v923_v19  ;;  %2600 = vmatpush.msra.mxu0 %v9188_v35 }
 0x12d   : > { %1600 = vmatmul.f32.gmra.mxu3 %v906_v2  ;;  %v694_v2 = vld [vmem:[%s8657_s23 + $0x130] sm:$0xff] }
 0x12e   : > { %1391 = vmatmul.f32.gmra.mxu2 %v905_v3  ;;  %v9182_v3 = vand.u32 4294901760, %v694_v2 }
 0x130   : > { %v790_v61 = vpop.f32.mrf.mxu0  ;;  %13112 = vst [vmem:[#allocation17_spill] sm:$0xff] %v9182_v3  ;;  %v937_v19 = vsub.f32 %v694_v2, %v9182_v3 }
 0x133   : > { %917 = vmatmul.f32.gmra.mxu0 %v916_v9 }
 0x134   : > { %1198 = vmatmul.f32.gmra.mxu1 %v9136_v29 }
 0x135   : > { %1606 = vmatmul.f32.gmra.mxu3 %v914_v34  ;;  %v931_v34 = vsub.f32 %v929_v15, %v930_v20 }
 0x136   : > { %1396 = vmatmul.f32.gmra.mxu2 %v913_v0 }
 0x137   : > { %v932_v24 = vand.u32 4294901760, %v931_v34 }
 0x138   : > { %v798_v46 = vpop.f32.mrf.mxu0  ;;  %v1139_v26 = vpop.f32.mrf.mxu1 }
 0x139   : > { %v1140_v13 = vadd.f32 %v1139_v26, %v790_v61  ;;  %v1317_v9 = vpop.f32.mrf.mxu2  ;;  %v1511_v62 = vpop.f32.mrf.mxu3  ;;  %v2406_v61 = vsub.f32 %v9188_v35, %v12710_v4 }
 0x13b   : > { %v1318_v0 = vadd.f32 %v1317_v9, %v1140_v13  ;;  %925 = vmatmul.f32.gmra.mxu0 %v924_v6  ;;  %v938_v6 = vand.u32 4294901760, %v937_v19  ;;  %v9201_v13 = vand.u32 4294901760, %v696_v56  ;;  %v2407_v9 = vand.u32 4294901760, %v2406_v61  ;;  %v740_v61 = vld [vmem:[%s8635_s27 + $0xa0] sm:$0xff] }
 0x13c   : > { %1202 = vmatmul.f32.gmra.mxu1 %v9153_v57 }
 0x13d   : > { %v9196_v26 = vadd.f32 %v1511_v62, %v1318_v0  ;;  %1612 = vmatmul.f32.gmra.mxu3 %v922_v42  ;;  %13114 = vst [vmem:[#allocation19_spill] sm:$0xff] %v9201_v13  ;;  %v939_v42 = vsub.f32 %v937_v19, %v938_v6  ;;  %v698_v0 = vld [vmem:[%s8657_s23 + $0x150] sm:$0xff] }
 0x13e   : > { %1401 = vmatmul.f32.gmra.mxu2 %v921_v41  ;;  %2408 = vmatpush.msrb.mxu3 %v2407_v9  ;;  %v945_v41 = vsub.f32 %v696_v56, %v9201_v13  ;;  %v9209_v57 = vand.u32 4294901760, %v698_v0 }
 0x13f   : > { %13113 = vst [vmem:[#allocation18_spill] sm:$0xff] %v9196_v26  ;;  %v940_v4 = vand.u32 4294901760, %v939_v42  ;;  %v700_v42 = vld [vmem:[%s8657_s23 + $0x160] sm:$0xff] }
 0x140   : > { %v806_v2 = vpop.f32.mrf.mxu0  ;;  %v1143_v10 = vpop.f32.mrf.mxu1  ;;  %v946_v26 = vand.u32 4294901760, %v945_v41  ;;  %13116 = vst [vmem:[#allocation21_spill] sm:$0xff] %v9209_v57 }
 0x141   : > { %v1144_v45 = vadd.f32 %v1143_v10, %v798_v46  ;;  %v1322_v30 = vpop.f32.mrf.mxu2  ;;  %v1517_v40 = vpop.f32.mrf.mxu3  ;;  %v9211_v10 = vand.u32 4294901760, %v740_v61 }
 0x143   : > { %v1323_v62 = vadd.f32 %v1322_v30, %v1144_v45  ;;  %933 = vmatmul.f32.gmra.mxu0 %v932_v24  ;;  %2077 = vmatpush.msrb.mxu2 %v9211_v10 }
 0x144   : > { %1206 = vmatmul.f32.gmra.mxu1 %v9159_v50 }
 0x145   : > { %v9206_v34 = vadd.f32 %v1517_v40, %v1323_v62  ;;  %1618 = vmatmul.f32.gmra.mxu3 %v930_v20  ;;  %v9215_v40 = vsub.f32 %v740_v61, %v9211_v10  ;;  %2800 = vmatpush.msra.mxu1 %v9211_v10  ;;  %v953_v20 = vsub.f32 %v698_v0, %v9209_v57 }
 0x146   : > { %1406 = vmatmul.f32.gmra.mxu2 %v929_v15  ;;  %v947_v15 = vsub.f32 %v945_v41, %v946_v26 }
 0x147   : > { %13115 = vst [vmem:[#allocation20_spill] sm:$0xff] %v9206_v34  ;;  %v12719_v62 = vand.u32 4294901760, %v9215_v40  ;;  %2603 = vmatpush.msra.mxu0 %v9215_v40 }
 0x148   : > { %v814_v30 = vpop.f32.mrf.mxu0  ;;  %v1147_v45 = vpop.f32.mrf.mxu1 }
 0x149   : > { %v1148_v46 = vadd.f32 %v1147_v45, %v806_v2  ;;  %v1327_v24 = vpop.f32.mrf.mxu2  ;;  %v1523_v9 = vpop.f32.mrf.mxu3  ;;  %v2412_v61 = vsub.f32 %v9215_v40, %v12719_v62  ;;  %v954_v45 = vand.u32 4294901760, %v953_v20 }
 0x14b   : > { %v1328_v56 = vadd.f32 %v1327_v24, %v1148_v46  ;;  %941 = vmatmul.f32.gmra.mxu0 %v940_v4  ;;  %v948_v4 = vand.u32 4294901760, %v947_v15  ;;  %v9228_v46 = vand.u32 4294901760, %v700_v42  ;;  %v2413_v24 = vand.u32 4294901760, %v2412_v61  ;;  %v739_v61 = vld [vmem:[%s8635_s27 + $0x98] sm:$0xff] }
 0x14c   : > { %1210 = vmatmul.f32.gmra.mxu1 %v9176_v27 }
 0x14d   : > { %v9223_v2 = vadd.f32 %v1523_v9, %v1328_v56  ;;  %1624 = vmatmul.f32.gmra.mxu3 %v938_v6  ;;  %13118 = vst [vmem:[#allocation23_spill] sm:$0xff] %v9228_v46  ;;  %v955_v6 = vsub.f32 %v953_v20, %v954_v45  ;;  %v702_v56 = vld [vmem:[%s8657_s23 + $0x170] sm:$0xff] }
 0x14e   : > { %1411 = vmatmul.f32.gmra.mxu2 %v937_v19  ;;  %2414 = vmatpush.msrb.mxu3 %v2413_v24  ;;  %v961_v19 = vsub.f32 %v700_v42, %v9228_v46  ;;  %v9236_v12 = vand.u32 4294901760, %v702_v56 }
 0x14f   : > { %13117 = vst [vmem:[#allocation22_spill] sm:$0xff] %v9223_v2  ;;  %v956_v62 = vand.u32 4294901760, %v955_v6  ;;  %v704_v6 = vld [vmem:[%s8657_s23 + $0x180] sm:$0xff] }
 0x150   : > { %v822_v0 = vpop.f32.mrf.mxu0  ;;  %v1151_v27 = vpop.f32.mrf.mxu1  ;;  %v962_v2 = vand.u32 4294901760, %v961_v19  ;;  %13120 = vst [vmem:[#allocation25_spill] sm:$0xff] %v9236_v12  ;;  %v969_v42 = vsub.f32 %v702_v56, %v9236_v12 }
 0x151   : > { %v1152_v34 = vadd.f32 %v1151_v27, %v814_v30  ;;  %v1332_v50 = vpop.f32.mrf.mxu2  ;;  %v1529_v29 = vpop.f32.mrf.mxu3  ;;  %v9238_v27 = vand.u32 4294901760, %v739_v61 }
 0x153   : > { %v1333_v9 = vadd.f32 %v1332_v50, %v1152_v34  ;;  %949 = vmatmul.f32.gmra.mxu0 %v948_v4  ;;  %2079 = vmatpush.msrb.mxu2 %v9238_v27 }
 0x154   : > { %1214 = vmatmul.f32.gmra.mxu1 %v9182_v3 }
 0x155   : > { %v9233_v15 = vadd.f32 %v1529_v29, %v1333_v9  ;;  %1630 = vmatmul.f32.gmra.mxu3 %v946_v26  ;;  %v9242_v29 = vsub.f32 %v739_v61, %v9238_v27  ;;  %2802 = vmatpush.msra.mxu1 %v9238_v27 }
 0x156   : > { %1416 = vmatmul.f32.gmra.mxu2 %v945_v41  ;;  %v963_v41 = vsub.f32 %v961_v19, %v962_v2 }
 0x157   : > { %13119 = vst [vmem:[#allocation24_spill] sm:$0xff] %v9233_v15  ;;  %v12728_v9 = vand.u32 4294901760, %v9242_v29  ;;  %2606 = vmatpush.msra.mxu0 %v9242_v29 }
 0x158   : > { %v830_v50 = vpop.f32.mrf.mxu0  ;;  %v1155_v34 = vpop.f32.mrf.mxu1 }
 0x159   : > { %v1156_v30 = vadd.f32 %v1155_v34, %v822_v0  ;;  %v1337_v4 = vpop.f32.mrf.mxu2  ;;  %v1535_v24 = vpop.f32.mrf.mxu3  ;;  %v2418_v61 = vsub.f32 %v9242_v29, %v12728_v9  ;;  %v970_v34 = vand.u32 4294901760, %v969_v42 }
 0x15b   : > { %v1338_v26 = vadd.f32 %v1337_v4, %v1156_v30  ;;  %957 = vmatmul.f32.gmra.mxu0 %v956_v62  ;;  %v964_v62 = vand.u32 4294901760, %v963_v41  ;;  %v9255_v30 = vand.u32 4294901760, %v704_v6  ;;  %v2419_v4 = vand.u32 4294901760, %v2418_v61  ;;  %v738_v61 = vld [vmem:[%s8635_s27 + $0x90] sm:$0xff] }
 0x15c   : > { %1218 = vmatmul.f32.gmra.mxu1 %v9201_v13 }
 0x15d   : > { %v9250_v0 = vadd.f32 %v1535_v24, %v1338_v26  ;;  %1636 = vmatmul.f32.gmra.mxu3 %v954_v45  ;;  %13122 = vst [vmem:[#allocation27_spill] sm:$0xff] %v9255_v30  ;;  %v971_v45 = vsub.f32 %v969_v42, %v970_v34  ;;  %v706_v26 = vld [vmem:[%s8657_s23 + $0x190] sm:$0xff] }
 0x15e   : > { %1421 = vmatmul.f32.gmra.mxu2 %v953_v20  ;;  %2420 = vmatpush.msrb.mxu3 %v2419_v4  ;;  %v977_v20 = vsub.f32 %v704_v6, %v9255_v30  ;;  %v9263_v60 = vand.u32 4294901760, %v706_v26 }
 0x15f   : > { %13121 = vst [vmem:[#allocation26_spill] sm:$0xff] %v9250_v0  ;;  %v972_v9 = vand.u32 4294901760, %v971_v45  ;;  %v708_v45 = vld [vmem:[%s8657_s23 + $0x1a0] sm:$0xff] }
 0x160   : > { %v838_v56 = vpop.f32.mrf.mxu0  ;;  %v978_v0 = vand.u32 4294901760, %v977_v20  ;;  %v985_v6 = vsub.f32 %v706_v26, %v9263_v60 }
 0x161   : > { %v1159_v13 = vpop.f32.mrf.mxu1  ;;  %v1342_v3 = vpop.f32.mrf.mxu2 }
 0x162   : > { %v1160_v15 = vadd.f32 %v1159_v13, %v830_v50  ;;  %v1541_v39 = vpop.f32.mrf.mxu3  ;;  %v9265_v13 = vand.u32 4294901760, %v738_v61 }
 0x163   : > { %965 = vmatmul.f32.gmra.mxu0 %v964_v62 }
 0x164   : > { %v1343_v24 = vadd.f32 %v1342_v3, %v1160_v15  ;;  %1222 = vmatmul.f32.gmra.mxu1 %v9209_v57  ;;  %2081 = vmatpush.msrb.mxu2 %v9265_v13 }
 0x165   : > { %1642 = vmatmul.f32.gmra.mxu3 %v962_v2  ;;  %2804 = vmatpush.msra.mxu1 %v9265_v13 }
 0x166   : > { %v9260_v41 = vadd.f32 %v1541_v39, %v1343_v24  ;;  %1426 = vmatmul.f32.gmra.mxu2 %v961_v19  ;;  %v9269_v39 = vsub.f32 %v738_v61, %v9265_v13  ;;  %v979_v19 = vsub.f32 %v977_v20, %v978_v0 }
 0x168   : > { %13123 = vst [vmem:[#allocation28_spill] sm:$0xff] %v9260_v41  ;;  %v846_v3 = vpop.f32.mrf.mxu0  ;;  %v12737_v24 = vand.u32 4294901760, %v9269_v39  ;;  %2609 = vmatpush.msra.mxu0 %v9269_v39 }
 0x169   : > { %v1163_v15 = vpop.f32.mrf.mxu1  ;;  %v1347_v62 = vpop.f32.mrf.mxu2 }
 0x16a   : > { %v1164_v50 = vadd.f32 %v1163_v15, %v838_v56  ;;  %v1547_v4 = vpop.f32.mrf.mxu3  ;;  %v2424_v61 = vsub.f32 %v9269_v39, %v12737_v24  ;;  %v986_v15 = vand.u32 4294901760, %v985_v6 }
 0x16b   : > { %973 = vmatmul.f32.gmra.mxu0 %v972_v9  ;;  %v980_v9 = vand.u32 4294901760, %v979_v19 }
 0x16c   : > { %v1348_v2 = vadd.f32 %v1347_v62, %v1164_v50  ;;  %1226 = vmatmul.f32.gmra.mxu1 %v9228_v46  ;;  %v9282_v50 = vand.u32 4294901760, %v708_v45  ;;  %v2425_v62 = vand.u32 4294901760, %v2424_v61  ;;  %v737_v61 = vld [vmem:[%s8635_s27 + $0x88] sm:$0xff] }
 0x16d   : > { %1648 = vmatmul.f32.gmra.mxu3 %v970_v34  ;;  %v987_v34 = vsub.f32 %v985_v6, %v986_v15 }
 0x16e   : > { %v9277_v56 = vadd.f32 %v1547_v4, %v1348_v2  ;;  %1431 = vmatmul.f32.gmra.mxu2 %v969_v42  ;;  %13125 = vst [vmem:[#allocation30_spill] sm:$0xff] %v9282_v50  ;;  %2426 = vmatpush.msrb.mxu3 %v2425_v62  ;;  %v993_v42 = vsub.f32 %v708_v45, %v9282_v50  ;;  %v710_v2 = vld [vmem:[%s8657_s23 + $0x1b0] sm:$0xff] }
 0x16f   : > { %v988_v24 = vand.u32 4294901760, %v987_v34  ;;  %v9290_v55 = vand.u32 4294901760, %v710_v2  ;;  %v712_v34 = vld [vmem:[%s8657_s23 + $0x1c0] sm:$0xff] }
 0x170   : > { %13124 = vst [vmem:[#allocation29_spill] sm:$0xff] %v9277_v56  ;;  %v854_v26 = vpop.f32.mrf.mxu0  ;;  %v994_v56 = vand.u32 4294901760, %v993_v42 }
 0x171   : > { %v1167_v46 = vpop.f32.mrf.mxu1  ;;  %v1352_v57 = vpop.f32.mrf.mxu2  ;;  %v1001_v45 = vsub.f32 %v710_v2, %v9290_v55 }
 0x172   : > { %v1168_v41 = vadd.f32 %v1167_v46, %v846_v3  ;;  %v1553_v44 = vpop.f32.mrf.mxu3  ;;  %v9292_v46 = vand.u32 4294901760, %v737_v61 }
 0x173   : > { %981 = vmatmul.f32.gmra.mxu0 %v980_v9 }
 0x174   : > { %v1353_v4 = vadd.f32 %v1352_v57, %v1168_v41  ;;  %1230 = vmatmul.f32.gmra.mxu1 %v9236_v12  ;;  %2083 = vmatpush.msrb.mxu2 %v9292_v46 }
 0x175   : > { %1654 = vmatmul.f32.gmra.mxu3 %v978_v0  ;;  %2806 = vmatpush.msra.mxu1 %v9292_v46 }
 0x176   : > { %v9287_v19 = vadd.f32 %v1553_v44, %v1353_v4  ;;  %1436 = vmatmul.f32.gmra.mxu2 %v977_v20  ;;  %v9296_v44 = vsub.f32 %v737_v61, %v9292_v46  ;;  %v995_v20 = vsub.f32 %v993_v42, %v994_v56 }
 0x178   : > { %13126 = vst [vmem:[#allocation31_spill] sm:$0xff] %v9287_v19  ;;  %v862_v57 = vpop.f32.mrf.mxu0  ;;  %v12746_v4 = vand.u32 4294901760, %v9296_v44  ;;  %2612 = vmatpush.msra.mxu0 %v9296_v44 }
 0x179   : > { %v1171_v41 = vpop.f32.mrf.mxu1  ;;  %v1357_v9 = vpop.f32.mrf.mxu2 }
 0x17a   : > { %v1172_v3 = vadd.f32 %v1171_v41, %v854_v26  ;;  %v1559_v62 = vpop.f32.mrf.mxu3  ;;  %v2430_v61 = vsub.f32 %v9296_v44, %v12746_v4  ;;  %v1002_v41 = vand.u32 4294901760, %v1001_v45 }
 0x17b   : > { %989 = vmatmul.f32.gmra.mxu0 %v988_v24  ;;  %v996_v24 = vand.u32 4294901760, %v995_v20 }
 0x17c   : > { %v1358_v0 = vadd.f32 %v1357_v9, %v1172_v3  ;;  %1234 = vmatmul.f32.gmra.mxu1 %v9255_v30  ;;  %v9309_v3 = vand.u32 4294901760, %v712_v34  ;;  %v2431_v9 = vand.u32 4294901760, %v2430_v61  ;;  %v736_v61 = vld [vmem:[%s8635_s27 + $0x80] sm:$0xff] }
 0x17d   : > { %1660 = vmatmul.f32.gmra.mxu3 %v986_v15  ;;  %v1003_v15 = vsub.f32 %v1001_v45, %v1002_v41 }
 0x17e   : > { %v9304_v26 = vadd.f32 %v1559_v62, %v1358_v0  ;;  %1441 = vmatmul.f32.gmra.mxu2 %v985_v6  ;;  %2432 = vmatpush.msrb.mxu3 %v2431_v9  ;;  %v1009_v6 = vsub.f32 %v712_v34, %v9309_v3  ;;  %v714_v0 = vld [vmem:[%s8657_s23 + $0x1d0] sm:$0xff] }
 0x17f   : > { %v1004_v4 = vand.u32 4294901760, %v1003_v15  ;;  %v9317_v23 = vand.u32 4294901760, %v714_v0  ;;  %v716_v15 = vld [vmem:[%s8657_s23 + $0x1e0] sm:$0xff] }
 0x180   : > { %13127 = vst [vmem:[#allocation32_spill] sm:$0xff] %v9304_v26  ;;  %v870_v2 = vpop.f32.mrf.mxu0  ;;  %v1010_v26 = vand.u32 4294901760, %v1009_v6 }
 0x181   : > { %v1175_v30 = vpop.f32.mrf.mxu1  ;;  %v1362_v12 = vpop.f32.mrf.mxu2 }
 0x182   : > { %v1176_v19 = vadd.f32 %v1175_v30, %v862_v57  ;;  %v1565_v5 = vpop.f32.mrf.mxu3  ;;  %v9319_v30 = vand.u32 4294901760, %v736_v61  ;;  %v1011_v34 = vsub.f32 %v1009_v6, %v1010_v26 }
 0x183   : > { %997 = vmatmul.f32.gmra.mxu0 %v996_v24 }
 0x184   : > { %v1363_v62 = vadd.f32 %v1362_v12, %v1176_v19  ;;  %1238 = vmatmul.f32.gmra.mxu1 %v9263_v60  ;;  %2085 = vmatpush.msrb.mxu2 %v9319_v30 }
 0x185   : > { %1666 = vmatmul.f32.gmra.mxu3 %v994_v56  ;;  %2808 = vmatpush.msra.mxu1 %v9319_v30  ;;  %v13128_v56 = vand.u32 4294901760, %v8876_v58 }
 0x186   : > { %v9314_v20 = vadd.f32 %v1565_v5, %v1363_v62  ;;  %1446 = vmatmul.f32.gmra.mxu2 %v993_v42  ;;  %v9323_v5 = vsub.f32 %v736_v61, %v9319_v30  ;;  %v1017_v62 = vsub.f32 %v714_v0, %v9317_v23 }
 0x187   : > { %3005 = vmatpush.msra.mxu2 %v13128_v56  ;;  %v13130_v56 = vand.u32 4294901760, %v8954_v31  ;;  %v718_v31 = vld [vmem:[%s8657_s23 + $0x1f0] sm:$0xff] }
 0x188   : > { %v878_v12 = vpop.f32.mrf.mxu0  ;;  %2615 = vmatpush.msra.mxu0 %v9323_v5 }
 0x189   : > { %v1179_v19 = vpop.f32.mrf.mxu1  ;;  %v1367_v24 = vpop.f32.mrf.mxu2 }
 0x18a   : > { %v1180_v57 = vadd.f32 %v1179_v19, %v870_v2  ;;  %v1571_v9 = vpop.f32.mrf.mxu3  ;;  %v2435_v2 = vand.u32 4294901760, %v9323_v5  ;;  %v13129_v19 = vand.u32 4294901760, %v8891_v8 }
 0x18b   : > { %1005 = vmatmul.f32.gmra.mxu0 %v1004_v4  ;;  %v1012_v4 = vand.u32 4294901760, %v1011_v34 }
 0x18c   : > { %v1368_v42 = vadd.f32 %v1367_v24, %v1180_v57  ;;  %1242 = vmatmul.f32.gmra.mxu1 %v9282_v50  ;;  %3009 = vmatpush.msra.mxu2 %v13129_v19  ;;  %v2436_v58 = vsub.f32 %v9323_v5, %v2435_v2  ;;  %v1018_v57 = vand.u32 4294901760, %v1017_v62  ;;  %v9340_v24 = vand.u32 4294901760, %v716_v15 }
 0x18d   : > { %1672 = vmatmul.f32.gmra.mxu3 %v1002_v41  ;;  %v13131_v41 = vand.u32 4294901760, %v8994_v11 }
 0x18e   : > { %v9335_v61 = vadd.f32 %v1571_v9, %v1368_v42  ;;  %1451 = vmatmul.f32.gmra.mxu2 %v1001_v45  ;;  %v2437_v0 = vand.u32 4294901760, %v2436_v58  ;;  %v1019_v34 = vsub.f32 %v1017_v62, %v1018_v57  ;;  %v1025_v58 = vsub.f32 %v716_v15, %v9340_v24 }
 0x18f   : > { %3013 = vmatpush.msra.mxu2 %v13130_v56 }
 0x190   : > { %v886_v8 = vpop.f32.mrf.mxu0  ;;  %2438 = vmatpush.msrb.mxu3 %v2437_v0  ;;  %v1026_v11 = vand.u32 4294901760, %v1025_v58 }
 0x191   : > { %v1183_v19 = vpop.f32.mrf.mxu1  ;;  %v1372_v9 = vpop.f32.mrf.mxu2  ;;  %3017 = vmatpush.msra.mxu2 %v13131_v41 }
 0x192   : > { %v1184_v50 = vadd.f32 %v1183_v19, %v878_v12  ;;  %v1577_v42 = vpop.f32.mrf.mxu3  ;;  %3196 = vmatpush.msra.mxu3 %v8846_v32  ;;  %v13132_v12 = vand.u32 4294901760, %v9036_v52  ;;  %v1020_v32 = vand.u32 4294901760, %v1019_v34 }
 0x193   : > { %1013 = vmatmul.f32.gmra.mxu0 %v1012_v4  ;;  %v13133_v4 = vand.u32 4294901760, %v9073_v25 }
 0x194   : > { %v1373_v45 = vadd.f32 %v1372_v9, %v1184_v50  ;;  %1246 = vmatmul.f32.gmra.mxu1 %v9290_v55  ;;  %3198 = vmatpush.msra.mxu3 %v8878_v59  ;;  %v9356_v50 = vand.u32 4294901760, %v718_v31  ;;  %v13134_v9 = vand.u32 4294901760, %v9096_v38 }
 0x195   : > { %3021 = vmatpush.msra.mxu2 %v13132_v12  ;;  %1678 = vmatmul.f32.gmra.mxu3 %v1010_v26  ;;  %v1027_v26 = vsub.f32 %v1025_v58, %v1026_v11  ;;  %v659_v12 = vld [vmem:[%s8657_s23 + $0x18] sm:$0xff] }
 0x196   : > { %v9353_v56 = vadd.f32 %v1577_v42, %v1373_v45  ;;  %1456 = vmatmul.f32.gmra.mxu2 %v1009_v6  ;;  %3200 = vmatpush.msra.mxu3 %v8948_v63  ;;  %v1033_v25 = vsub.f32 %v718_v31, %v9356_v50  ;;  %v13136_v42 = vand.u32 4294901760, %v9142_v36  ;;  %v13137_v31 = vand.u32 4294901760, %v9165_v37 }
 0x197   : > { %3025 = vmatpush.msra.mxu2 %v13133_v4  ;;  %v1028_v38 = vand.u32 4294901760, %v1027_v26 }
 0x198   : > { %v894_v15 = vpop.f32.mrf.mxu0  ;;  %3202 = vmatpush.msra.mxu3 %v8987_v28  ;;  %v13135_v28 = vand.u32 4294901760, %v9119_v16 }
 0x199   : > { %v1187_v0 = vpop.f32.mrf.mxu1  ;;  %v1377_v52 = vpop.f32.mrf.mxu2  ;;  %3029 = vmatpush.msra.mxu2 %v13134_v9 }
 0x19a   : > { %v1188_v59 = vadd.f32 %v1187_v0, %v886_v8  ;;  %v1583_v19 = vpop.f32.mrf.mxu3  ;;  %3204 = vmatpush.msra.mxu3 %v9029_v47  ;;  %v1034_v47 = vand.u32 4294901760, %v1033_v25  ;;  %v657_v8 = vld [vmem:[%s8657_s23 + $0x8] sm:$0xff] }
 0x19b   : > { %1021 = vmatmul.f32.gmra.mxu0 %v1020_v32  ;;  %3033 = vmatpush.msra.mxu2 %v13135_v28  ;;  %v13139_v32 = vand.u32 4294901760, %v9215_v40  ;;  %v13141_v40 = vand.u32 4294901760, %v9269_v39 }
 0x19c   : > { %v1378_v63 = vadd.f32 %v1377_v52, %v1188_v59  ;;  %1250 = vmatmul.f32.gmra.mxu1 %v9309_v3  ;;  %3206 = vmatpush.msra.mxu3 %v9068_v17  ;;  %v1035_v36 = vsub.f32 %v1033_v25, %v1034_v47  ;;  %v9398_v59 = vand.u32 4294901760, %v659_v12 }
 0x19d   : > { %1684 = vmatmul.f32.gmra.mxu3 %v1018_v57  ;;  %3037 = vmatpush.msra.mxu2 %v13136_v42 }
 0x19e   : > { %v9369_v6 = vadd.f32 %v1583_v19, %v1378_v63  ;;  %1461 = vmatmul.f32.gmra.mxu2 %v1017_v62  ;;  %3208 = vmatpush.msra.mxu3 %v9092_v49  ;;  %v9378_v62 = vand.u32 4294901760, %v657_v8  ;;  %v9411_v52 = vsub.f32 %v659_v12, %v9398_v59  ;;  %v13142_v19 = vand.u32 4294901760, %v9296_v44 }
 0x19f   : > { %3041 = vmatpush.msra.mxu2 %v13137_v31 }
 0x1a0   : > { %v902_v41 = vpop.f32.mrf.mxu0  ;;  %3210 = vmatpush.msra.mxu3 %v9115_v43  ;;  %v13138_v43 = vand.u32 4294901760, %v9188_v35  ;;  %v9388_v37 = vsub.f32 %v657_v8, %v9378_v62  ;;  %v12760_v28 = vand.u32 4294901760, %v9411_v52 }
 0x1a1   : > { %v1191_v45 = vpop.f32.mrf.mxu1  ;;  %v1382_v34 = vpop.f32.mrf.mxu2 }
 0x1a2   : > { %v1192_v17 = vadd.f32 %v1191_v45, %v894_v15  ;;  %v1589_v16 = vpop.f32.mrf.mxu3  ;;  %3212 = vmatpush.msra.mxu3 %v9138_v14  ;;  %3045 = vmatpush.msra.mxu2 %v13138_v43  ;;  %v1036_v14 = vand.u32 4294901760, %v1035_v36 }
 0x1a3   : > { %1029 = vmatmul.f32.gmra.mxu0 %v1028_v38 }
 0x1a4   : > { %v1383_v49 = vadd.f32 %v1382_v34, %v1192_v17  ;;  %1254 = vmatmul.f32.gmra.mxu1 %v9317_v23  ;;  %3214 = vmatpush.msra.mxu3 %v9161_v22 }
 0x1a5   : > { %1690 = vmatmul.f32.gmra.mxu3 %v1026_v11  ;;  %3049 = vmatpush.msra.mxu2 %v13139_v32  ;;  %v13140_v11 = vand.u32 4294901760, %v9242_v29 }
 0x1a6   : > { %v9385_v57 = vadd.f32 %v1589_v16, %v1383_v49  ;;  %1466 = vmatmul.f32.gmra.mxu2 %v1025_v58  ;;  %3216 = vmatpush.msra.mxu3 %v9184_v18  ;;  %v12761_v58 = vand.u32 4294901760, %v9388_v37 }
 0x1a7   : > { %3053 = vmatpush.msra.mxu2 %v13140_v11 }
 0x1a8   : > { %v910_v4 = vpop.f32.mrf.mxu0  ;;  %3218 = vmatpush.msra.mxu3 %v9211_v10  ;;  %v2089_v29 = vsub.f32 %v9388_v37, %v12761_v58 }
 0x1a9   : > { %v1195_v15 = vpop.f32.mrf.mxu1  ;;  %v1387_v35 = vpop.f32.mrf.mxu2  ;;  %3057 = vmatpush.msra.mxu2 %v13141_v40 }
 0x1aa   : > { %v1196_v22 = vadd.f32 %v1195_v15, %v902_v41  ;;  %v1595_v0 = vpop.f32.mrf.mxu3  ;;  %3220 = vmatpush.msra.mxu3 %v9238_v27  ;;  %v661_v27 = vld [vmem:[%s8657_s23 + $0x28] sm:$0xff] }
 0x1ab   : > { %1037 = vmatmul.f32.gmra.mxu0 %v1036_v14  ;;  %3061 = vmatpush.msra.mxu2 %v13142_v19  ;;  %v9421_v38 = vand.u32 4294901760, %v661_v27  ;;  %v665_v14 = vld [vmem:[%s8657_s23 + $0x48] sm:$0xff] }
 0x1ac   : > { %v1388_v18 = vadd.f32 %v1387_v35, %v1196_v22  ;;  %1258 = vmatmul.f32.gmra.mxu1 %v9340_v24  ;;  %3222 = vmatpush.msra.mxu3 %v9265_v13 }
 0x1ad   : > { %1696 = vmatmul.f32.gmra.mxu3 %v1034_v47  ;;  %3065 = vmatpush.msra.mxu2 %v2435_v2  ;;  %v9432_v5 = vsub.f32 %v661_v27, %v9421_v38  ;;  %v663_v2 = vld [vmem:[%s8657_s23 + $0x38] sm:$0xff] }
 0x1ae   : > { %v9405_v10 = vadd.f32 %v1595_v0, %v1388_v18  ;;  %1471 = vmatmul.f32.gmra.mxu2 %v1033_v25  ;;  %3224 = vmatpush.msra.mxu3 %v9292_v46  ;;  %v2090_v25 = vand.u32 4294901760, %v2089_v29  ;;  %v9436_v16 = vand.u32 4294901760, %v663_v2  ;;  %v9451_v0 = vand.u32 4294901760, %v665_v14  ;;  %v667_v27 = vld [vmem:[%s8657_s23 + $0x58] sm:$0xff] }
 0x1af   : > { %v12758_v34 = vand.u32 4294901760, %v9432_v5 }
 0x1b0   : > { %v918_v39 = vpop.f32.mrf.mxu0  ;;  %3226 = vmatpush.msra.mxu3 %v9319_v30  ;;  %v2097_v30 = vsub.f32 %v9411_v52, %v12760_v28  ;;  %v9447_v43 = vsub.f32 %v663_v2, %v9436_v16  ;;  %v9462_v29 = vsub.f32 %v665_v14, %v9451_v0 }
 0x1b1   : > { %v1199_v9 = vpop.f32.mrf.mxu1  ;;  %v1392_v63 = vpop.f32.mrf.mxu2  ;;  %v2105_v36 = vsub.f32 %v9432_v5, %v12758_v34  ;;  %v13150_v34 = vld [vmem:[#allocation8_spill] sm:$0xff] }
 0x1b2   : > { %v1200_v13 = vadd.f32 %v1199_v9, %v910_v4  ;;  %v1601_v26 = vpop.f32.mrf.mxu3  ;;  %v2098_v17 = vand.u32 4294901760, %v2097_v30  ;;  %v12757_v35 = vand.u32 4294901760, %v9447_v43 }
 0x1b3   : > { %1765 = vmatmul.f32.vlgmr.msrb.gmra.mxu0 %v8828_v7 }
 0x1b4   : > { %v1393_v46 = vadd.f32 %v1392_v63, %v1200_v13  ;;  %1262 = vmatmul.f32.gmra.mxu1 %v9356_v50  ;;  %v2113_v40 = vsub.f32 %v9447_v43, %v12757_v35 }
 0x1b5   : > { %2440 = vmatmul.f32.vlgmr.msrb.gmra.mxu3 %v9378_v62 }
 0x1b6   : > { %v9425_v44 = vadd.f32 %v1601_v26, %v1393_v46  ;;  %2091 = vmatmul.f32.vlgmr.msrb.gmra.mxu2 %v2090_v25  ;;  %v12756_v26 = vand.u32 4294901760, %v9462_v29  ;;  %v9466_v25 = vand.u32 4294901760, %v667_v27 }
 0x1b8   : > { %v926_v47 = vpop.f32.mrf.mxu0  ;;  %v2121_v2 = vsub.f32 %v9462_v29, %v12756_v26 }
 0x1b9   : > { %v1203_v8 = vpop.f32.mrf.mxu1  ;;  %v1397_v41 = vpop.f32.mrf.mxu2 }
 0x1ba   : > { %v1204_v42 = vadd.f32 %v1203_v8, %v918_v39  ;;  %v1607_v45 = vpop.f32.mrf.mxu3  ;;  %v669_v8 = vld [vmem:[%s8657_s23 + $0x68] sm:$0xff] }
 0x1bb   : > { %1769 = vmatmul.f32.gmra.mxu0 %v8868_v51  ;;  %v9481_v14 = vand.u32 4294901760, %v669_v8 }
 0x1bc   : > { %v1398_v31 = vadd.f32 %v1397_v41, %v1204_v42  ;;  %1926 = vmatmul.f32.vlgmr.msrb.gmra.mxu1 %v8828_v7  ;;  %v2106_v7 = vand.u32 4294901760, %v2105_v36 }
 0x1bd   : > { %2444 = vmatmul.f32.gmra.mxu3 %v9398_v59 }
 0x1be   : > { %v9440_v49 = vadd.f32 %v1607_v45, %v1398_v31  ;;  %2099 = vmatmul.f32.gmra.mxu2 %v2098_v17 }
 0x1c0   : > { %v934_v12 = vpop.f32.mrf.mxu0 }
 0x1c1   : > { %v1207_v32 = vpop.f32.mrf.mxu1  ;;  %v1402_v15 = vpop.f32.mrf.mxu2 }
 0x1c2   : > { %v1208_v4 = vadd.f32 %v1207_v32, %v926_v47  ;;  %v1613_v22 = vpop.f32.mrf.mxu3  ;;  %v9477_v47 = vsub.f32 %v667_v27, %v9466_v25 }
 0x1c3   : > { %1773 = vmatmul.f32.gmra.mxu0 %v8917_v53 }
 0x1c4   : > { %v1403_v11 = vadd.f32 %v1402_v15, %v1208_v4  ;;  %1930 = vmatmul.f32.gmra.mxu1 %v8868_v51  ;;  %v2114_v51 = vand.u32 4294901760, %v2113_v40  ;;  %v12754_v36 = vand.u32 4294901760, %v9477_v47  ;;  %v9492_v15 = vsub.f32 %v669_v8, %v9481_v14 }
 0x1c5   : > { %2448 = vmatmul.f32.gmra.mxu3 %v9421_v38 }
 0x1c6   : > { %v9455_v18 = vadd.f32 %v1613_v22, %v1403_v11  ;;  %2107 = vmatmul.f32.gmra.mxu2 %v2106_v7  ;;  %v2129_v4 = vsub.f32 %v9477_v47, %v12754_v36  ;;  %v671_v22 = vld [vmem:[%s8657_s23 + $0x78] sm:$0xff]  ;;  %v13147_v36 = vld [vmem:[#allocation7_spill] sm:$0xff] }
 0x1c8   : > { %v942_v19 = vpop.f32.mrf.mxu0 }
 0x1c9   : > { %v1211_v39 = vpop.f32.mrf.mxu1  ;;  %v1407_v13 = vpop.f32.mrf.mxu2 }
 0x1ca   : > { %v1212_v9 = vadd.f32 %v1211_v39, %v934_v12  ;;  %v1619_v63 = vpop.f32.mrf.mxu3  ;;  %v12753_v39 = vand.u32 4294901760, %v9492_v15 }
 0x1cb   : > { %1777 = vmatmul.f32.gmra.mxu0 %v8946_v1 }
 0x1cc   : > { %v1408_v46 = vadd.f32 %v1407_v13, %v1212_v9  ;;  %1934 = vmatmul.f32.gmra.mxu1 %v8917_v53  ;;  %v2122_v53 = vand.u32 4294901760, %v2121_v2  ;;  %v9496_v9 = vand.u32 4294901760, %v671_v22  ;;  %v673_v2 = vld [vmem:[%s8657_s23 + $0x88] sm:$0xff] }
 0x1cd   : > { %2452 = vmatmul.f32.gmra.mxu3 %v9436_v16 }
 0x1ce   : > { %v9470_v30 = vadd.f32 %v1619_v63, %v1408_v46  ;;  %2115 = vmatmul.f32.gmra.mxu2 %v2114_v51  ;;  %v2137_v51 = vsub.f32 %v9492_v15, %v12753_v39  ;;  %v9507_v46 = vsub.f32 %v671_v22, %v9496_v9 }
 0x1d0   : > { %v950_v42 = vpop.f32.mrf.mxu0 }
 0x1d1   : > { %v1215_v41 = vpop.f32.mrf.mxu1  ;;  %v1412_v17 = vpop.f32.mrf.mxu2 }
 0x1d2   : > { %v1216_v45 = vadd.f32 %v1215_v41, %v942_v19  ;;  %v1625_v31 = vpop.f32.mrf.mxu3 }
 0x1d3   : > { %1781 = vmatmul.f32.gmra.mxu0 %v8969_v54 }
 0x1d4   : > { %v1413_v12 = vadd.f32 %v1412_v17, %v1216_v45  ;;  %1938 = vmatmul.f32.gmra.mxu1 %v8946_v1  ;;  %v2130_v1 = vand.u32 4294901760, %v2129_v4 }
 0x1d5   : > { %2456 = vmatmul.f32.gmra.mxu3 %v9451_v0 }
 0x1d6   : > { %v9485_v32 = vadd.f32 %v1625_v31, %v1413_v12  ;;  %2123 = vmatmul.f32.gmra.mxu2 %v2122_v53  ;;  %v12752_v31 = vand.u32 4294901760, %v9507_v46  ;;  %v9511_v53 = vand.u32 4294901760, %v673_v2 }
 0x1d8   : > { %v958_v7 = vpop.f32.mrf.mxu0  ;;  %v2145_v22 = vsub.f32 %v9507_v46, %v12752_v31 }
 0x1d9   : > { %v1219_v11 = vpop.f32.mrf.mxu1  ;;  %v1417_v27 = vpop.f32.mrf.mxu2 }
 0x1da   : > { %v1220_v40 = vadd.f32 %v1219_v11, %v950_v42  ;;  %v1631_v19 = vpop.f32.mrf.mxu3  ;;  %v675_v11 = vld [vmem:[%s8657_s23 + $0x98] sm:$0xff] }
 0x1db   : > { %1785 = vmatmul.f32.gmra.mxu0 %v8985_v21 }
 0x1dc   : > { %v1418_v13 = vadd.f32 %v1417_v27, %v1220_v40  ;;  %1942 = vmatmul.f32.gmra.mxu1 %v8969_v54  ;;  %v2138_v54 = vand.u32 4294901760, %v2137_v51 }
 0x1dd   : > { %2460 = vmatmul.f32.gmra.mxu3 %v9466_v25 }
 0x1de   : > { %v9500_v63 = vadd.f32 %v1631_v19, %v1418_v13  ;;  %2131 = vmatmul.f32.gmra.mxu2 %v2130_v1 }
 0x1e0   : > { %v966_v8 = vpop.f32.mrf.mxu0 }
 0x1e1   : > { %v1223_v42 = vpop.f32.mrf.mxu1  ;;  %v1422_v45 = vpop.f32.mrf.mxu2 }
 0x1e2   : > { %v1224_v41 = vadd.f32 %v1223_v42, %v958_v7  ;;  %v1637_v17 = vpop.f32.mrf.mxu3  ;;  %v9522_v7 = vsub.f32 %v673_v2, %v9511_v53  ;;  %v9526_v42 = vand.u32 4294901760, %v675_v11 }
 0x1e3   : > { %1789 = vmatmul.f32.gmra.mxu0 %v9011_v48 }
 0x1e4   : > { %v1423_v12 = vadd.f32 %v1422_v45, %v1224_v41  ;;  %1946 = vmatmul.f32.gmra.mxu1 %v8985_v21  ;;  %v2146_v21 = vand.u32 4294901760, %v2145_v22  ;;  %v12751_v51 = vand.u32 4294901760, %v9522_v7 }
 0x1e5   : > { %2464 = vmatmul.f32.gmra.mxu3 %v9481_v14 }
 0x1e6   : > { %v9515_v4 = vadd.f32 %v1637_v17, %v1423_v12  ;;  %2139 = vmatmul.f32.gmra.mxu2 %v2138_v54  ;;  %v2153_v2 = vsub.f32 %v9522_v7, %v12751_v51  ;;  %v677_v17 = vld [vmem:[%s8657_s23 + $0xa8] sm:$0xff] }
 0x1e8   : > { %v974_v40 = vpop.f32.mrf.mxu0 }
 0x1e9   : > { %v1227_v27 = vpop.f32.mrf.mxu1  ;;  %v1427_v1 = vpop.f32.mrf.mxu2 }
 0x1ea   : > { %v1228_v19 = vadd.f32 %v1227_v27, %v966_v8  ;;  %v1643_v13 = vpop.f32.mrf.mxu3  ;;  %v9537_v8 = vsub.f32 %v675_v11, %v9526_v42 }
 0x1eb   : > { %1793 = vmatmul.f32.gmra.mxu0 %v9027_v33 }
 0x1ec   : > { %v1428_v41 = vadd.f32 %v1427_v1, %v1228_v19  ;;  %1950 = vmatmul.f32.gmra.mxu1 %v9011_v48  ;;  %v2154_v48 = vand.u32 4294901760, %v2153_v2  ;;  %v12755_v1 = vand.u32 4294901760, %v9537_v8  ;;  %v679_v2 = vld [vmem:[%s8657_s23 + $0xb8] sm:$0xff] }
 0x1ed   : > { %2468 = vmatmul.f32.gmra.mxu3 %v9496_v9 }
 0x1ee   : > { %v9530_v45 = vadd.f32 %v1643_v13, %v1428_v41  ;;  %2147 = vmatmul.f32.gmra.mxu2 %v2146_v21  ;;  %v9541_v13 = vand.u32 4294901760, %v677_v17  ;;  %v13144_v41 = vld [vmem:[#allocation6_spill] sm:$0xff]  ;;  %v2161_v11 = vsub.f32 %v9537_v8, %v12755_v1 }
 0x1f0   : > { %v982_v54 = vpop.f32.mrf.mxu0  ;;  %13143 = vst [vmem:[#allocation33_spill] sm:$0xff] %v9541_v13 }
 0x1f1   : > { %v1231_v12 = vpop.f32.mrf.mxu1  ;;  %v1432_v27 = vpop.f32.mrf.mxu2 }
 0x1f2   : > { %v1232_v22 = vadd.f32 %v1231_v12, %v974_v40  ;;  %v1649_v19 = vpop.f32.mrf.mxu3  ;;  %v9552_v40 = vsub.f32 %v677_v17, %v9541_v13 }
 0x1f3   : > { %1797 = vmatmul.f32.gmra.mxu0 %v13144_v41 }
 0x1f4   : > { %v1433_v21 = vadd.f32 %v1432_v27, %v1232_v22  ;;  %1954 = vmatmul.f32.gmra.mxu1 %v9027_v33  ;;  %13145 = vst [vmem:[#allocation6_spill] sm:$0xff] %v9552_v40  ;;  %v2162_v33 = vand.u32 4294901760, %v2161_v11  ;;  %v681_v11 = vld [vmem:[%s8657_s23 + $0xc8] sm:$0xff] }
 0x1f5   : > { %2472 = vmatmul.f32.gmra.mxu3 %v9511_v53 }
 0x1f6   : > { %v9545_v51 = vadd.f32 %v1649_v19, %v1433_v21  ;;  %2155 = vmatmul.f32.gmra.mxu2 %v2154_v48  ;;  %v12759_v19 = vand.u32 4294901760, %v9552_v40  ;;  %v9556_v21 = vand.u32 4294901760, %v679_v2 }
 0x1f8   : > { %v990_v12 = vpop.f32.mrf.mxu0  ;;  %13146 = vst [vmem:[#allocation34_spill] sm:$0xff] %v9556_v21  ;;  %v2169_v17 = vsub.f32 %v9552_v40, %v12759_v19 }
 0x1f9   : > { %v1235_v22 = vpop.f32.mrf.mxu1  ;;  %v1437_v31 = vpop.f32.mrf.mxu2 }
 0x1fa   : > { %v1236_v27 = vadd.f32 %v1235_v22, %v982_v54  ;;  %v1655_v39 = vpop.f32.mrf.mxu3  ;;  %v9567_v54 = vsub.f32 %v679_v2, %v9556_v21 }
 0x1fb   : > { %1801 = vmatmul.f32.gmra.mxu0 %v13147_v36 }
 0x1fc   : > { %v1438_v48 = vadd.f32 %v1437_v31, %v1236_v27  ;;  %1958 = vmatmul.f32.gmra.mxu1 %v13144_v41  ;;  %13148 = vst [vmem:[#allocation7_spill] sm:$0xff] %v9567_v54  ;;  %v2170_v41 = vand.u32 4294901760, %v2169_v17  ;;  %v683_v17 = vld [vmem:[%s8657_s23 + $0xd8] sm:$0xff] }
 0x1fd   : > { %2476 = vmatmul.f32.gmra.mxu3 %v9526_v42 }
 0x1fe   : > { %v9560_v1 = vadd.f32 %v1655_v39, %v1438_v48  ;;  %2163 = vmatmul.f32.gmra.mxu2 %v2162_v33  ;;  %v12764_v39 = vand.u32 4294901760, %v9567_v54  ;;  %v9571_v48 = vand.u32 4294901760, %v681_v11 }
 0x200   : > { %v998_v22 = vpop.f32.mrf.mxu0  ;;  %13149 = vst [vmem:[#allocation35_spill] sm:$0xff] %v9571_v48  ;;  %v2177_v2 = vsub.f32 %v9567_v54, %v12764_v39 }
 0x201   : > { %v1239_v31 = vpop.f32.mrf.mxu1  ;;  %v1442_v26 = vpop.f32.mrf.mxu2 }
 0x202   : > { %v1240_v27 = vadd.f32 %v1239_v31, %v990_v12  ;;  %v1661_v35 = vpop.f32.mrf.mxu3  ;;  %v9582_v12 = vsub.f32 %v681_v11, %v9571_v48 }
 0x203   : > { %1805 = vmatmul.f32.gmra.mxu0 %v13150_v34 }
 0x204   : > { %v1443_v33 = vadd.f32 %v1442_v26, %v1240_v27  ;;  %1962 = vmatmul.f32.gmra.mxu1 %v13147_v36  ;;  %13152 = vst [vmem:[#allocation36_spill] sm:$0xff] %v9582_v12  ;;  %v2178_v36 = vand.u32 4294901760, %v2177_v2  ;;  %v685_v2 = vld [vmem:[%s8657_s23 + $0xe8] sm:$0xff] }
 0x205   : > { %2480 = vmatmul.f32.gmra.mxu3 %v9541_v13  ;;  %v13154_v13 = vld [vmem:[#allocation9_spill] sm:$0xff] }
 0x206   : > { %v9575_v19 = vadd.f32 %v1661_v35, %v1443_v33  ;;  %2171 = vmatmul.f32.gmra.mxu2 %v2170_v41  ;;  %v12771_v35 = vand.u32 4294901760, %v9582_v12  ;;  %v9586_v33 = vand.u32 4294901760, %v683_v17 }
 0x208   : > { %13151 = vst [vmem:[#allocation8_spill] sm:$0xff] %v9575_v19  ;;  %v1006_v31 = vpop.f32.mrf.mxu0  ;;  %v2185_v11 = vsub.f32 %v9582_v12, %v12771_v35  ;;  %v13179_v19 = vld [vmem:[#allocation15_spill] sm:$0xff] }
 0x209   : > { %v1243_v26 = vpop.f32.mrf.mxu1  ;;  %v1447_v28 = vpop.f32.mrf.mxu2  ;;  %13153 = vst [vmem:[#allocation37_spill] sm:$0xff] %v9586_v33 }
 0x20a   : > { %v1244_v27 = vadd.f32 %v1243_v26, %v998_v22  ;;  %v1667_v58 = vpop.f32.mrf.mxu3  ;;  %v9597_v22 = vsub.f32 %v683_v17, %v9586_v33 }
 0x20b   : > { %1809 = vmatmul.f32.gmra.mxu0 %v13154_v13 }
 0x20c   : > { %v1448_v41 = vadd.f32 %v1447_v28, %v1244_v27  ;;  %1966 = vmatmul.f32.gmra.mxu1 %v13150_v34  ;;  %13156 = vst [vmem:[#allocation38_spill] sm:$0xff] %v9597_v22  ;;  %v2186_v34 = vand.u32 4294901760, %v2185_v11  ;;  %v687_v11 = vld [vmem:[%s8657_s23 + $0xf8] sm:$0xff] }
 0x20d   : > { %2484 = vmatmul.f32.gmra.mxu3 %v9556_v21  ;;  %v13158_v21 = vld [vmem:[#allocation10_spill] sm:$0xff] }
 0x20e   : > { %v9590_v39 = vadd.f32 %v1667_v58, %v1448_v41  ;;  %2179 = vmatmul.f32.gmra.mxu2 %v2178_v36  ;;  %v12776_v58 = vand.u32 4294901760, %v9597_v22  ;;  %v9601_v41 = vand.u32 4294901760, %v685_v2 }
 0x210   : > { %13155 = vst [vmem:[#allocation9_spill] sm:$0xff] %v9590_v39  ;;  %v1014_v26 = vpop.f32.mrf.mxu0  ;;  %v2193_v17 = vsub.f32 %v9597_v22, %v12776_v58 }
 0x211   : > { %v1247_v28 = vpop.f32.mrf.mxu1  ;;  %v1452_v54 = vpop.f32.mrf.mxu2  ;;  %13157 = vst [vmem:[#allocation39_spill] sm:$0xff] %v9601_v41 }
 0x212   : > { %v1248_v27 = vadd.f32 %v1247_v28, %v1006_v31  ;;  %v1673_v40 = vpop.f32.mrf.mxu3  ;;  %v9612_v31 = vsub.f32 %v685_v2, %v9601_v41 }
 0x213   : > { %1813 = vmatmul.f32.gmra.mxu0 %v13158_v21 }
 0x214   : > { %v1453_v36 = vadd.f32 %v1452_v54, %v1248_v27  ;;  %1970 = vmatmul.f32.gmra.mxu1 %v13154_v13  ;;  %13160 = vst [vmem:[#allocation40_spill] sm:$0xff] %v9612_v31  ;;  %v2194_v13 = vand.u32 4294901760, %v2193_v17  ;;  %v689_v17 = vld [vmem:[%s8657_s23 + $0x108] sm:$0xff] }
 0x215   : > { %2488 = vmatmul.f32.gmra.mxu3 %v9571_v48  ;;  %v13162_v48 = vld [vmem:[#allocation11_spill] sm:$0xff] }
 0x216   : > { %v9605_v35 = vadd.f32 %v1673_v40, %v1453_v36  ;;  %2187 = vmatmul.f32.gmra.mxu2 %v2186_v34  ;;  %v12781_v40 = vand.u32 4294901760, %v9612_v31  ;;  %v9616_v36 = vand.u32 4294901760, %v687_v11 }
 0x218   : > { %13159 = vst [vmem:[#allocation10_spill] sm:$0xff] %v9605_v35  ;;  %v1022_v28 = vpop.f32.mrf.mxu0  ;;  %v2201_v2 = vsub.f32 %v9612_v31, %v12781_v40 }
 0x219   : > { %v1251_v54 = vpop.f32.mrf.mxu1  ;;  %v1457_v12 = vpop.f32.mrf.mxu2  ;;  %13161 = vst [vmem:[#allocation41_spill] sm:$0xff] %v9616_v36 }
 0x21a   : > { %v1252_v27 = vadd.f32 %v1251_v54, %v1014_v26  ;;  %v1679_v39 = vpop.f32.mrf.mxu3  ;;  %v9627_v26 = vsub.f32 %v687_v11, %v9616_v36 }
 0x21b   : > { %1817 = vmatmul.f32.gmra.mxu0 %v13162_v48 }
 0x21c   : > { %v1458_v34 = vadd.f32 %v1457_v12, %v1252_v27  ;;  %1974 = vmatmul.f32.gmra.mxu1 %v13158_v21  ;;  %13164 = vst [vmem:[#allocation42_spill] sm:$0xff] %v9627_v26  ;;  %v2202_v21 = vand.u32 4294901760, %v2201_v2  ;;  %v691_v2 = vld [vmem:[%s8657_s23 + $0x118] sm:$0xff] }
 0x21d   : > { %2492 = vmatmul.f32.gmra.mxu3 %v9586_v33  ;;  %v13166_v33 = vld [vmem:[#allocation12_spill] sm:$0xff] }
 0x21e   : > { %v9620_v58 = vadd.f32 %v1679_v39, %v1458_v34  ;;  %2195 = vmatmul.f32.gmra.mxu2 %v2194_v13  ;;  %v12786_v39 = vand.u32 4294901760, %v9627_v26  ;;  %v9631_v34 = vand.u32 4294901760, %v689_v17 }
 0x220   : > { %13163 = vst [vmem:[#allocation11_spill] sm:$0xff] %v9620_v58  ;;  %v1030_v54 = vpop.f32.mrf.mxu0  ;;  %v2209_v11 = vsub.f32 %v9627_v26, %v12786_v39 }
 0x221   : > { %v1255_v12 = vpop.f32.mrf.mxu1  ;;  %v1462_v22 = vpop.f32.mrf.mxu2  ;;  %13165 = vst [vmem:[#allocation43_spill] sm:$0xff] %v9631_v34 }
 0x222   : > { %v1256_v27 = vadd.f32 %v1255_v12, %v1022_v28  ;;  %v1685_v35 = vpop.f32.mrf.mxu3  ;;  %v9642_v28 = vsub.f32 %v689_v17, %v9631_v34 }
 0x223   : > { %1821 = vmatmul.f32.gmra.mxu0 %v13166_v33 }
 0x224   : > { %v1463_v13 = vadd.f32 %v1462_v22, %v1256_v27  ;;  %1978 = vmatmul.f32.gmra.mxu1 %v13162_v48  ;;  %13168 = vst [vmem:[#allocation44_spill] sm:$0xff] %v9642_v28  ;;  %v2210_v48 = vand.u32 4294901760, %v2209_v11  ;;  %v693_v11 = vld [vmem:[%s8657_s23 + $0x128] sm:$0xff] }
 0x225   : > { %2496 = vmatmul.f32.gmra.mxu3 %v9601_v41  ;;  %v13170_v41 = vld [vmem:[#allocation13_spill] sm:$0xff] }
 0x226   : > { %v9635_v40 = vadd.f32 %v1685_v35, %v1463_v13  ;;  %2203 = vmatmul.f32.gmra.mxu2 %v2202_v21  ;;  %v12791_v35 = vand.u32 4294901760, %v9642_v28  ;;  %v9646_v13 = vand.u32 4294901760, %v691_v2 }
 0x228   : > { %13167 = vst [vmem:[#allocation12_spill] sm:$0xff] %v9635_v40  ;;  %v1038_v12 = vpop.f32.mrf.mxu0  ;;  %v2217_v17 = vsub.f32 %v9642_v28, %v12791_v35  ;;  %v695_v28 = vld [vmem:[%s8657_s23 + $0x138] sm:$0xff] }
 0x229   : > { %v1259_v22 = vpop.f32.mrf.mxu1  ;;  %v1467_v31 = vpop.f32.mrf.mxu2  ;;  %13169 = vst [vmem:[#allocation45_spill] sm:$0xff] %v9646_v13 }
 0x22a   : > { %v1260_v27 = vadd.f32 %v1259_v22, %v1030_v54  ;;  %v1691_v58 = vpop.f32.mrf.mxu3  ;;  %v9657_v54 = vsub.f32 %v691_v2, %v9646_v13 }
 0x22b   : > { %1825 = vmatmul.f32.gmra.mxu0 %v13170_v41 }
 0x22c   : > { %v1468_v21 = vadd.f32 %v1467_v31, %v1260_v27  ;;  %1982 = vmatmul.f32.gmra.mxu1 %v13166_v33  ;;  %13172 = vst [vmem:[#allocation46_spill] sm:$0xff] %v9657_v54  ;;  %v2218_v33 = vand.u32 4294901760, %v2217_v17  ;;  %v13177_v17 = vld [vmem:[#allocation18_spill] sm:$0xff] }
 0x22d   : > { %2500 = vmatmul.f32.gmra.mxu3 %v9616_v36  ;;  %v13174_v36 = vld [vmem:[#allocation14_spill] sm:$0xff] }
 0x22e   : > { %v9650_v39 = vadd.f32 %v1691_v58, %v1468_v21  ;;  %2211 = vmatmul.f32.gmra.mxu2 %v2210_v48  ;;  %v12796_v58 = vand.u32 4294901760, %v9657_v54  ;;  %v9661_v21 = vand.u32 4294901760, %v693_v11 }
 0x230   : > { %13171 = vst [vmem:[#allocation13_spill] sm:$0xff] %v9650_v39  ;;  %v1766_v26 = vpop.f32.mrf.mxu0  ;;  %v2225_v2 = vsub.f32 %v9657_v54, %v12796_v58 }
 0x231   : > { %v1263_v22 = vpop.f32.mrf.mxu1  ;;  %v1472_v27 = vpop.f32.mrf.mxu2  ;;  %13173 = vst [vmem:[#allocation47_spill] sm:$0xff] %v9661_v21 }
 0x232   : > { %v1264_v31 = vadd.f32 %v1263_v22, %v1038_v12  ;;  %v1697_v40 = vpop.f32.mrf.mxu3  ;;  %v9672_v12 = vsub.f32 %v693_v11, %v9661_v21  ;;  %v1767_v22 = vadd.f32 %v1766_v26, %v13177_v17  ;;  %v13182_v17 = vld [vmem:[#allocation20_spill] sm:$0xff] }
 0x233   : > { %1829 = vmatmul.f32.gmra.mxu0 %v13174_v36 }
 0x234   : > { %v1473_v48 = vadd.f32 %v1472_v27, %v1264_v31  ;;  %1986 = vmatmul.f32.gmra.mxu1 %v13170_v41  ;;  %13176 = vst [vmem:[#allocation48_spill] sm:$0xff] %v9672_v12 }
 0x235   : > { %2504 = vmatmul.f32.gmra.mxu3 %v9631_v34  ;;  %v12801_v34 = vand.u32 4294901760, %v9672_v12 }
 0x236   : > { %v9665_v35 = vadd.f32 %v1697_v40, %v1473_v48  ;;  %2219 = vmatmul.f32.gmra.mxu2 %v2218_v33  ;;  %v2226_v48 = vand.u32 4294901760, %v2225_v2  ;;  %v9677_v33 = vand.u32 4294901760, %v695_v28 }
 0x237   : > { %v2233_v26 = vsub.f32 %v9672_v12, %v12801_v34 }
 0x238   : > { %13175 = vst [vmem:[#allocation14_spill] sm:$0xff] %v9665_v35  ;;  %v1770_v31 = vpop.f32.mrf.mxu0  ;;  %v9688_v2 = vsub.f32 %v695_v28, %v9677_v33 }
 0x239   : > { %v1927_v27 = vpop.f32.mrf.mxu1  ;;  %v2092_v41 = vpop.f32.mrf.mxu2  ;;  %13178 = vst [vmem:[#allocation18_spill] sm:$0xff] %v9677_v33 }
 0x23a   : > { %v1928_v39 = vadd.f32 %v1927_v27, %v1767_v22  ;;  %v2441_v40 = vpop.f32.mrf.mxu3  ;;  %13181 = vst [vmem:[#allocation49_spill] sm:$0xff] %v9688_v2  ;;  %v1771_v22 = vadd.f32 %v1770_v31, %v13182_v17  ;;  %v697_v27 = vld [vmem:[%s8657_s23 + $0x148] sm:$0xff]  ;;  %v13187_v17 = vld [vmem:[#allocation22_spill] sm:$0xff] }
 0x23b   : > { %1833 = vmatmul.f32.gmra.mxu0 %v13179_v19 }
 0x23c   : > { %v2093_v35 = vadd.f32 %v2092_v41, %v1928_v39  ;;  %1990 = vmatmul.f32.gmra.mxu1 %v13174_v36 }
 0x23d   : > { %2508 = vmatmul.f32.gmra.mxu3 %v9646_v13  ;;  %v12806_v13 = vand.u32 4294901760, %v9688_v2 }
 0x23e   : > { %v9681_v11 = vadd.f32 %v2441_v40, %v2093_v35  ;;  %2227 = vmatmul.f32.gmra.mxu2 %v2226_v48  ;;  %v2234_v40 = vand.u32 4294901760, %v2233_v26  ;;  %v9693_v48 = vand.u32 4294901760, %v697_v27 }
 0x23f   : > { %v2241_v31 = vsub.f32 %v9688_v2, %v12806_v13 }
 0x240   : > { %13180 = vst [vmem:[#allocation15_spill] sm:$0xff] %v9681_v11  ;;  %v1774_v39 = vpop.f32.mrf.mxu0  ;;  %v13184_v11 = vld [vmem:[#allocation16_spill] sm:$0xff]  ;;  %v9704_v26 = vsub.f32 %v697_v27, %v9693_v48 }
 0x241   : > { %v1931_v41 = vpop.f32.mrf.mxu1  ;;  %v2100_v36 = vpop.f32.mrf.mxu2  ;;  %13183 = vst [vmem:[#allocation20_spill] sm:$0xff] %v9693_v48 }
 0x242   : > { %v1932_v58 = vadd.f32 %v1931_v41, %v1771_v22  ;;  %v2445_v35 = vpop.f32.mrf.mxu3  ;;  %13186 = vst [vmem:[#allocation50_spill] sm:$0xff] %v9704_v26  ;;  %v1775_v22 = vadd.f32 %v1774_v39, %v13187_v17  ;;  %v699_v41 = vld [vmem:[%s8657_s23 + $0x158] sm:$0xff]  ;;  %v13192_v17 = vld [vmem:[#allocation24_spill] sm:$0xff] }
 0x243   : > { %1837 = vmatmul.f32.gmra.mxu0 %v13184_v11 }
 0x244   : > { %v2101_v54 = vadd.f32 %v2100_v36, %v1932_v58  ;;  %1994 = vmatmul.f32.gmra.mxu1 %v13179_v19 }
 0x245   : > { %2512 = vmatmul.f32.gmra.mxu3 %v9661_v21  ;;  %v12811_v21 = vand.u32 4294901760, %v9704_v26 }
 0x246   : > { %v9697_v28 = vadd.f32 %v2445_v35, %v2101_v54  ;;  %2235 = vmatmul.f32.gmra.mxu2 %v2234_v40  ;;  %v2242_v35 = vand.u32 4294901760, %v2241_v31  ;;  %v9709_v40 = vand.u32 4294901760, %v699_v41 }
 0x247   : > { %v2249_v39 = vsub.f32 %v9704_v26, %v12811_v21 }
 0x248   : > { %13185 = vst [vmem:[#allocation16_spill] sm:$0xff] %v9697_v28  ;;  %v1778_v58 = vpop.f32.mrf.mxu0  ;;  %v13189_v28 = vld [vmem:[#allocation17_spill] sm:$0xff]  ;;  %v9720_v31 = vsub.f32 %v699_v41, %v9709_v40 }
 0x249   : > { %v1935_v36 = vpop.f32.mrf.mxu1  ;;  %v2108_v19 = vpop.f32.mrf.mxu2  ;;  %13188 = vst [vmem:[#allocation22_spill] sm:$0xff] %v9709_v40 }
 0x24a   : > { %v1936_v34 = vadd.f32 %v1935_v36, %v1775_v22  ;;  %v2449_v54 = vpop.f32.mrf.mxu3  ;;  %13191 = vst [vmem:[#allocation51_spill] sm:$0xff] %v9720_v31  ;;  %v1779_v22 = vadd.f32 %v1778_v58, %v13192_v17  ;;  %v701_v36 = vld [vmem:[%s8657_s23 + $0x168] sm:$0xff]  ;;  %v13197_v17 = vld [vmem:[#allocation26_spill] sm:$0xff] }
 0x24b   : > { %1841 = vmatmul.f32.gmra.mxu0 %v13189_v28 }
 0x24c   : > { %v2109_v12 = vadd.f32 %v2108_v19, %v1936_v34  ;;  %1998 = vmatmul.f32.gmra.mxu1 %v13184_v11 }
 0x24d   : > { %2516 = vmatmul.f32.gmra.mxu3 %v9677_v33  ;;  %v12816_v33 = vand.u32 4294901760, %v9720_v31 }
 0x24e   : > { %v9713_v27 = vadd.f32 %v2449_v54, %v2109_v12  ;;  %2243 = vmatmul.f32.gmra.mxu2 %v2242_v35  ;;  %v2250_v54 = vand.u32 4294901760, %v2249_v39  ;;  %v9725_v35 = vand.u32 4294901760, %v701_v36 }
 0x24f   : > { %v2257_v58 = vsub.f32 %v9720_v31, %v12816_v33 }
 0x250   : > { %13190 = vst [vmem:[#allocation17_spill] sm:$0xff] %v9713_v27  ;;  %v1782_v34 = vpop.f32.mrf.mxu0  ;;  %v13194_v27 = vld [vmem:[#allocation19_spill] sm:$0xff]  ;;  %v9736_v39 = vsub.f32 %v701_v36, %v9725_v35 }
 0x251   : > { %v1939_v19 = vpop.f32.mrf.mxu1  ;;  %v2116_v11 = vpop.f32.mrf.mxu2  ;;  %13193 = vst [vmem:[#allocation24_spill] sm:$0xff] %v9725_v35 }
 0x252   : > { %v1940_v13 = vadd.f32 %v1939_v19, %v1779_v22  ;;  %v2453_v12 = vpop.f32.mrf.mxu3  ;;  %13196 = vst [vmem:[#allocation52_spill] sm:$0xff] %v9736_v39  ;;  %v1783_v22 = vadd.f32 %v1782_v34, %v13197_v17  ;;  %v703_v19 = vld [vmem:[%s8657_s23 + $0x178] sm:$0xff]  ;;  %v13202_v17 = vld [vmem:[#allocation28_spill] sm:$0xff] }
 0x253   : > { %1845 = vmatmul.f32.gmra.mxu0 %v13194_v27 }
 0x254   : > { %v2117_v2 = vadd.f32 %v2116_v11, %v1940_v13  ;;  %2002 = vmatmul.f32.gmra.mxu1 %v13189_v28 }
 0x255   : > { %2520 = vmatmul.f32.gmra.mxu3 %v9693_v48  ;;  %v12821_v48 = vand.u32 4294901760, %v9736_v39 }
 0x256   : > { %v9729_v41 = vadd.f32 %v2453_v12, %v2117_v2  ;;  %2251 = vmatmul.f32.gmra.mxu2 %v2250_v54  ;;  %v2258_v12 = vand.u32 4294901760, %v2257_v58  ;;  %v9741_v54 = vand.u32 4294901760, %v703_v19 }
 0x257   : > { %v2265_v34 = vsub.f32 %v9736_v39, %v12821_v48 }
 0x258   : > { %13195 = vst [vmem:[#allocation19_spill] sm:$0xff] %v9729_v41  ;;  %v1786_v13 = vpop.f32.mrf.mxu0  ;;  %v13199_v41 = vld [vmem:[#allocation21_spill] sm:$0xff]  ;;  %v9752_v58 = vsub.f32 %v703_v19, %v9741_v54 }
 0x259   : > { %v1943_v11 = vpop.f32.mrf.mxu1  ;;  %v2124_v28 = vpop.f32.mrf.mxu2  ;;  %13198 = vst [vmem:[#allocation26_spill] sm:$0xff] %v9741_v54 }
 0x25a   : > { %v1944_v21 = vadd.f32 %v1943_v11, %v1783_v22  ;;  %v2457_v2 = vpop.f32.mrf.mxu3  ;;  %13201 = vst [vmem:[#allocation53_spill] sm:$0xff] %v9752_v58  ;;  %v1787_v22 = vadd.f32 %v1786_v13, %v13202_v17  ;;  %v705_v11 = vld [vmem:[%s8657_s23 + $0x188] sm:$0xff]  ;;  %v13207_v17 = vld [vmem:[#allocation29_spill] sm:$0xff] }
 0x25b   : > { %1849 = vmatmul.f32.gmra.mxu0 %v13199_v41 }
 0x25c   : > { %v2125_v26 = vadd.f32 %v2124_v28, %v1944_v21  ;;  %2006 = vmatmul.f32.gmra.mxu1 %v13194_v27 }
 0x25d   : > { %2524 = vmatmul.f32.gmra.mxu3 %v9709_v40  ;;  %v12826_v40 = vand.u32 4294901760, %v9752_v58 }
 0x25e   : > { %v9745_v36 = vadd.f32 %v2457_v2, %v2125_v26  ;;  %2259 = vmatmul.f32.gmra.mxu2 %v2258_v12  ;;  %v2266_v2 = vand.u32 4294901760, %v2265_v34  ;;  %v9757_v12 = vand.u32 4294901760, %v705_v11 }
 0x25f   : > { %v2273_v13 = vsub.f32 %v9752_v58, %v12826_v40 }
 0x260   : > { %13200 = vst [vmem:[#allocation21_spill] sm:$0xff] %v9745_v36  ;;  %v1790_v21 = vpop.f32.mrf.mxu0  ;;  %v13204_v36 = vld [vmem:[#allocation23_spill] sm:$0xff]  ;;  %v9768_v34 = vsub.f32 %v705_v11, %v9757_v12 }
 0x261   : > { %v1947_v28 = vpop.f32.mrf.mxu1  ;;  %v2132_v27 = vpop.f32.mrf.mxu2  ;;  %13203 = vst [vmem:[#allocation28_spill] sm:$0xff] %v9757_v12 }
 0x262   : > { %v1948_v33 = vadd.f32 %v1947_v28, %v1787_v22  ;;  %v2461_v26 = vpop.f32.mrf.mxu3  ;;  %13206 = vst [vmem:[#allocation54_spill] sm:$0xff] %v9768_v34  ;;  %v1791_v22 = vadd.f32 %v1790_v21, %v13207_v17  ;;  %v707_v28 = vld [vmem:[%s8657_s23 + $0x198] sm:$0xff]  ;;  %v13212_v17 = vld [vmem:[#allocation31_spill] sm:$0xff] }
 0x263   : > { %1853 = vmatmul.f32.gmra.mxu0 %v13204_v36 }
 0x264   : > { %v2133_v31 = vadd.f32 %v2132_v27, %v1948_v33  ;;  %2010 = vmatmul.f32.gmra.mxu1 %v13199_v41 }
 0x265   : > { %2528 = vmatmul.f32.gmra.mxu3 %v9725_v35  ;;  %v12831_v35 = vand.u32 4294901760, %v9768_v34 }
 0x266   : > { %v9761_v19 = vadd.f32 %v2461_v26, %v2133_v31  ;;  %2267 = vmatmul.f32.gmra.mxu2 %v2266_v2  ;;  %v2274_v26 = vand.u32 4294901760, %v2273_v13  ;;  %v9773_v2 = vand.u32 4294901760, %v707_v28 }
 0x267   : > { %v2281_v21 = vsub.f32 %v9768_v34, %v12831_v35 }
 0x268   : > { %13205 = vst [vmem:[#allocation23_spill] sm:$0xff] %v9761_v19  ;;  %v1794_v33 = vpop.f32.mrf.mxu0  ;;  %v13209_v19 = vld [vmem:[#allocation25_spill] sm:$0xff]  ;;  %v9784_v13 = vsub.f32 %v707_v28, %v9773_v2 }
 0x269   : > { %v1951_v27 = vpop.f32.mrf.mxu1  ;;  %v2140_v41 = vpop.f32.mrf.mxu2  ;;  %13208 = vst [vmem:[#allocation29_spill] sm:$0xff] %v9773_v2 }
 0x26a   : > { %v1952_v48 = vadd.f32 %v1951_v27, %v1791_v22  ;;  %v2465_v31 = vpop.f32.mrf.mxu3  ;;  %13211 = vst [vmem:[#allocation55_spill] sm:$0xff] %v9784_v13  ;;  %v1795_v22 = vadd.f32 %v1794_v33, %v13212_v17  ;;  %v709_v27 = vld [vmem:[%s8657_s23 + $0x1a8] sm:$0xff]  ;;  %v13215_v17 = vld [vmem:[#allocation32_spill] sm:$0xff] }
 0x26b   : > { %1857 = vmatmul.f32.gmra.mxu0 %v13209_v19 }
 0x26c   : > { %v2141_v39 = vadd.f32 %v2140_v41, %v1952_v48  ;;  %2014 = vmatmul.f32.gmra.mxu1 %v13204_v36 }
 0x26d   : > { %2532 = vmatmul.f32.gmra.mxu3 %v9741_v54  ;;  %v12836_v54 = vand.u32 4294901760, %v9784_v13 }
 0x26e   : > { %v9777_v11 = vadd.f32 %v2465_v31, %v2141_v39  ;;  %2275 = vmatmul.f32.gmra.mxu2 %v2274_v26  ;;  %v2282_v31 = vand.u32 4294901760, %v2281_v21  ;;  %v9789_v26 = vand.u32 4294901760, %v709_v27 }
 0x26f   : > { %v2289_v33 = vsub.f32 %v9784_v13, %v12836_v54  ;;  %v13218_v13 = vld [vmem:[#allocation30_spill] sm:$0xff] }
 0x270   : > { %13210 = vst [vmem:[#allocation25_spill] sm:$0xff] %v9777_v11  ;;  %v1798_v48 = vpop.f32.mrf.mxu0  ;;  %v13214_v11 = vld [vmem:[#allocation27_spill] sm:$0xff]  ;;  %v9800_v21 = vsub.f32 %v709_v27, %v9789_v26 }
 0x271   : > { %v1955_v41 = vpop.f32.mrf.mxu1  ;;  %v2148_v36 = vpop.f32.mrf.mxu2  ;;  %13213 = vst [vmem:[#allocation31_spill] sm:$0xff] %v9789_v26 }
 0x272   : > { %v1956_v40 = vadd.f32 %v1955_v41, %v1795_v22  ;;  %v2469_v39 = vpop.f32.mrf.mxu3  ;;  %v1799_v22 = vadd.f32 %v1798_v48, %v13215_v17  ;;  %v711_v41 = vld [vmem:[%s8657_s23 + $0x1b8] sm:$0xff] }
 0x273   : > { %1861 = vmatmul.f32.gmra.mxu0 %v13214_v11 }
 0x274   : > { %v2149_v58 = vadd.f32 %v2148_v36, %v1956_v40  ;;  %2018 = vmatmul.f32.gmra.mxu1 %v13209_v19 }
 0x275   : > { %2536 = vmatmul.f32.gmra.mxu3 %v9757_v12  ;;  %v12841_v12 = vand.u32 4294901760, %v9800_v21 }
 0x276   : > { %v9793_v28 = vadd.f32 %v2469_v39, %v2149_v58  ;;  %2283 = vmatmul.f32.gmra.mxu2 %v2282_v31  ;;  %v2290_v39 = vand.u32 4294901760, %v2289_v33  ;;  %v9805_v31 = vand.u32 4294901760, %v711_v41 }
 0x277   : > { %v2297_v48 = vsub.f32 %v9800_v21, %v12841_v12 }
 0x278   : > { %v1802_v40 = vpop.f32.mrf.mxu0  ;;  %13216 = vst [vmem:[#allocation27_spill] sm:$0xff] %v9805_v31  ;;  %v9816_v33 = vsub.f32 %v711_v41, %v9805_v31 }
 0x279   : > { %v1959_v36 = vpop.f32.mrf.mxu1  ;;  %v2156_v19 = vpop.f32.mrf.mxu2  ;;  %v1803_v17 = vadd.f32 %v1802_v40, %v9314_v20 }
 0x27a   : > { %v1960_v35 = vadd.f32 %v1959_v36, %v1799_v22  ;;  %v2473_v58 = vpop.f32.mrf.mxu3  ;;  %v713_v22 = vld [vmem:[%s8657_s23 + $0x1c8] sm:$0xff]  ;;  %v12844_v54 = vand.u32 4294901760, %v9816_v33 }
 0x27b   : > { %1865 = vmatmul.f32.gmra.mxu0 %v9263_v60 }
 0x27c   : > { %v2157_v34 = vadd.f32 %v2156_v19, %v1960_v35  ;;  %2022 = vmatmul.f32.gmra.mxu1 %v13214_v11  ;;  %v2305_v20 = vsub.f32 %v9816_v33, %v12844_v54 }
 0x27d   : > { %2540 = vmatmul.f32.gmra.mxu3 %v9773_v2 }
 0x27e   : > { %v9809_v27 = vadd.f32 %v2473_v58, %v2157_v34  ;;  %2291 = vmatmul.f32.gmra.mxu2 %v2290_v39  ;;  %v2298_v58 = vand.u32 4294901760, %v2297_v48  ;;  %v9821_v39 = vand.u32 4294901760, %v713_v22 }
 0x280   : > { %v1806_v35 = vpop.f32.mrf.mxu0  ;;  %13217 = vst [vmem:[#allocation32_spill] sm:$0xff] %v9821_v39  ;;  %v9832_v40 = vsub.f32 %v713_v22, %v9821_v39 }
 0x281   : > { %v1963_v36 = vpop.f32.mrf.mxu1  ;;  %v2164_v11 = vpop.f32.mrf.mxu2  ;;  %v1807_v48 = vadd.f32 %v1806_v35, %v9335_v61 }
 0x282   : > { %v1964_v19 = vadd.f32 %v1963_v36, %v1803_v17  ;;  %v2477_v34 = vpop.f32.mrf.mxu3  ;;  %v715_v17 = vld [vmem:[%s8657_s23 + $0x1d8] sm:$0xff]  ;;  %v12847_v12 = vand.u32 4294901760, %v9832_v40 }
 0x283   : > { %1869 = vmatmul.f32.gmra.mxu0 %v13218_v13 }
 0x284   : > { %v2165_v2 = vadd.f32 %v2164_v11, %v1964_v19  ;;  %2026 = vmatmul.f32.gmra.mxu1 %v9263_v60  ;;  %v2313_v61 = vsub.f32 %v9832_v40, %v12847_v12 }
 0x285   : > { %2544 = vmatmul.f32.gmra.mxu3 %v9789_v26 }
 0x286   : > { %v9825_v41 = vadd.f32 %v2477_v34, %v2165_v2  ;;  %2299 = vmatmul.f32.gmra.mxu2 %v2298_v58  ;;  %v2306_v34 = vand.u32 4294901760, %v2305_v20  ;;  %v9837_v58 = vand.u32 4294901760, %v715_v17 }
 0x288   : > { %v1810_v36 = vpop.f32.mrf.mxu0  ;;  %v9848_v35 = vsub.f32 %v715_v17, %v9837_v58 }
 0x289   : > { %v1967_v19 = vpop.f32.mrf.mxu1  ;;  %v2172_v60 = vpop.f32.mrf.mxu2  ;;  %v1811_v20 = vadd.f32 %v1810_v36, %v9353_v56 }
 0x28a   : > { %v1968_v11 = vadd.f32 %v1967_v19, %v1807_v48  ;;  %v2481_v2 = vpop.f32.mrf.mxu3  ;;  %v717_v48 = vld [vmem:[%s8657_s23 + $0x1e8] sm:$0xff]  ;;  %v12850_v54 = vand.u32 4294901760, %v9848_v35 }
 0x28b   : > { %1873 = vmatmul.f32.gmra.mxu0 %v9290_v55 }
 0x28c   : > { %v2173_v26 = vadd.f32 %v2172_v60, %v1968_v11  ;;  %2030 = vmatmul.f32.gmra.mxu1 %v13218_v13  ;;  %v2321_v56 = vsub.f32 %v9848_v35, %v12850_v54 }
 0x28d   : > { %2548 = vmatmul.f32.gmra.mxu3 %v9805_v31 }
 0x28e   : > { %v9841_v22 = vadd.f32 %v2481_v2, %v2173_v26  ;;  %2307 = vmatmul.f32.gmra.mxu2 %v2306_v34  ;;  %v2314_v2 = vand.u32 4294901760, %v2313_v61  ;;  %v9853_v34 = vand.u32 4294901760, %v717_v48 }
 0x290   : > { %v1814_v19 = vpop.f32.mrf.mxu0  ;;  %v9864_v36 = vsub.f32 %v717_v48, %v9853_v34 }
 0x291   : > { %v1971_v11 = vpop.f32.mrf.mxu1  ;;  %v2180_v13 = vpop.f32.mrf.mxu2  ;;  %v1815_v61 = vadd.f32 %v1814_v19, %v9369_v6 }
 0x292   : > { %v1972_v60 = vadd.f32 %v1971_v11, %v1811_v20  ;;  %v2485_v26 = vpop.f32.mrf.mxu3  ;;  %v719_v20 = vld [vmem:[%s8657_s23 + $0x1f8] sm:$0xff] }
 0x293   : > { %1877 = vmatmul.f32.gmra.mxu0 %v9309_v3 }
 0x294   : > { %v2181_v31 = vadd.f32 %v2180_v13, %v1972_v60  ;;  %2034 = vmatmul.f32.gmra.mxu1 %v9290_v55 }
 0x295   : > { %2552 = vmatmul.f32.gmra.mxu3 %v9821_v39  ;;  %v9869_v39 = vand.u32 4294901760, %v719_v20 }
 0x296   : > { %v9857_v17 = vadd.f32 %v2485_v26, %v2181_v31  ;;  %2315 = vmatmul.f32.gmra.mxu2 %v2314_v2  ;;  %v2322_v31 = vand.u32 4294901760, %v2321_v56  ;;  %v12851_v26 = vand.u32 4294901760, %v9864_v36 }
 0x297   : > { %v9880_v19 = vsub.f32 %v719_v20, %v9869_v39 }
 0x298   : > { %v1818_v11 = vpop.f32.mrf.mxu0  ;;  %v2329_v6 = vsub.f32 %v9864_v36, %v12851_v26 }
 0x299   : > { %v1975_v60 = vpop.f32.mrf.mxu1  ;;  %v2188_v12 = vpop.f32.mrf.mxu2  ;;  %v1819_v56 = vadd.f32 %v1818_v11, %v9385_v57 }
 0x29a   : > { %v1976_v13 = vadd.f32 %v1975_v60, %v1815_v61  ;;  %v2489_v55 = vpop.f32.mrf.mxu3 }
 0x29b   : > { %1881 = vmatmul.f32.gmra.mxu0 %v9317_v23 }
 0x29c   : > { %v2189_v2 = vadd.f32 %v2188_v12, %v1976_v13  ;;  %2038 = vmatmul.f32.gmra.mxu1 %v9309_v3  ;;  %v2330_v3 = vand.u32 4294901760, %v2329_v6 }
 0x29d   : > { %2556 = vmatmul.f32.gmra.mxu3 %v9837_v58 }
 0x29e   : > { %v9873_v48 = vadd.f32 %v2489_v55, %v2189_v2  ;;  %2323 = vmatmul.f32.gmra.mxu2 %v2322_v31  ;;  %v2336_v55 = vand.u32 4294901760, %v9880_v19 }
 0x2a0   : > { %v1822_v61 = vpop.f32.mrf.mxu0  ;;  %v2337_v57 = vsub.f32 %v9880_v19, %v2336_v55 }
 0x2a1   : > { %v1979_v12 = vpop.f32.mrf.mxu1  ;;  %v2196_v13 = vpop.f32.mrf.mxu2  ;;  %v1823_v20 = vadd.f32 %v1822_v61, %v9405_v10 }
 0x2a2   : > { %v1980_v60 = vadd.f32 %v1979_v12, %v1819_v56  ;;  %v2493_v54 = vpop.f32.mrf.mxu3 }
 0x2a3   : > { %1885 = vmatmul.f32.gmra.mxu0 %v9340_v24 }
 0x2a4   : > { %v2197_v2 = vadd.f32 %v2196_v13, %v1980_v60  ;;  %2042 = vmatmul.f32.gmra.mxu1 %v9317_v23  ;;  %v2338_v13 = vand.u32 4294901760, %v2337_v57 }
 0x2a5   : > { %2560 = vmatmul.f32.gmra.mxu3 %v9853_v34 }
 0x2a6   : > { %v9886_v31 = vadd.f32 %v2493_v54, %v2197_v2  ;;  %2331 = vmatmul.f32.gmra.mxu2 %v2330_v3 }
 0x2a8   : > { %v1826_v11 = vpop.f32.mrf.mxu0 }
 0x2a9   : > { %v1983_v6 = vpop.f32.mrf.mxu1  ;;  %v2204_v12 = vpop.f32.mrf.mxu2  ;;  %v1827_v54 = vadd.f32 %v1826_v11, %v9425_v44 }
 0x2aa   : > { %v1984_v56 = vadd.f32 %v1983_v6, %v1823_v20  ;;  %v2497_v60 = vpop.f32.mrf.mxu3 }
 0x2ab   : > { %1889 = vmatmul.f32.gmra.mxu0 %v9356_v50 }
 0x2ac   : > { %v2205_v26 = vadd.f32 %v2204_v12, %v1984_v56  ;;  %2046 = vmatmul.f32.gmra.mxu1 %v9340_v24 }
 0x2ad   : > { %2564 = vmatmul.f32.gmra.mxu3 %v9869_v39 }
 0x2ae   : > { %v9895_v23 = vadd.f32 %v2497_v60, %v2205_v26  ;;  %2339 = vmatmul.f32.gmra.mxu2 %v2338_v13 }
 0x2b0   : > { %v1830_v3 = vpop.f32.mrf.mxu0 }
 0x2b1   : > { %v1987_v10 = vpop.f32.mrf.mxu1  ;;  %v2212_v2 = vpop.f32.mrf.mxu2  ;;  %v1831_v24 = vadd.f32 %v1830_v3, %v9440_v49 }
 0x2b2   : > { %v1988_v61 = vadd.f32 %v1987_v10, %v1827_v54  ;;  %v2501_v20 = vpop.f32.mrf.mxu3 }
 0x2b3   : > { %2618 = vmatmul.f32.vlgmr.msra.gmra.mxu0 %v9388_v37 }
 0x2b4   : > { %v2213_v6 = vadd.f32 %v2212_v2, %v1988_v61  ;;  %2050 = vmatmul.f32.gmra.mxu1 %v9356_v50  ;;  %v13219_v50 = vand.u32 4294901760, %v9388_v37 }
 0x2b5   : > { %3228 = vmatmul.f32.vlgmr.msra.gmra.mxu3 %v9378_v62 }
 0x2b6   : > { %v9901_v57 = vadd.f32 %v2501_v20, %v2213_v6  ;;  %3067 = vmatmul.f32.vlgmr.msra.gmra.mxu2 %v9378_v62  ;;  %v13220_v20 = vand.u32 4294901760, %v9411_v52 }
 0x2b8   : > { %v1834_v26 = vpop.f32.mrf.mxu0 }
 0x2b9   : > { %v1991_v44 = vpop.f32.mrf.mxu1  ;;  %v2220_v56 = vpop.f32.mrf.mxu2  ;;  %v1835_v62 = vadd.f32 %v1834_v26, %v9455_v18 }
 0x2ba   : > { %v1992_v11 = vadd.f32 %v1991_v44, %v1831_v24  ;;  %v2505_v12 = vpop.f32.mrf.mxu3 }
 0x2bb   : > { %2623 = vmatmul.f32.gmra.mxu0 %v9411_v52 }
 0x2bc   : > { %v2221_v60 = vadd.f32 %v2220_v56, %v1992_v11  ;;  %2812 = vmatmul.f32.vlgmr.msra.gmra.mxu1 %v13219_v50  ;;  %v13221_v56 = vand.u32 4294901760, %v9432_v5 }
 0x2bd   : > { %3232 = vmatmul.f32.gmra.mxu3 %v9398_v59 }
 0x2be   : > { %v9909_v13 = vadd.f32 %v2505_v12, %v2221_v60  ;;  %3071 = vmatmul.f32.gmra.mxu2 %v9398_v59 }
 0x2c0   : > { %v1838_v49 = vpop.f32.mrf.mxu0 }
 0x2c1   : > { %v1995_v54 = vpop.f32.mrf.mxu1  ;;  %v2228_v10 = vpop.f32.mrf.mxu2  ;;  %v1839_v59 = vadd.f32 %v1838_v49, %v9470_v30 }
 0x2c2   : > { %v1996_v3 = vadd.f32 %v1995_v54, %v1835_v62  ;;  %v2509_v61 = vpop.f32.mrf.mxu3  ;;  %v13222_v54 = vand.u32 4294901760, %v9447_v43 }
 0x2c3   : > { %2628 = vmatmul.f32.gmra.mxu0 %v9432_v5 }
 0x2c4   : > { %v2229_v2 = vadd.f32 %v2228_v10, %v1996_v3  ;;  %2818 = vmatmul.f32.gmra.mxu1 %v13220_v20 }
 0x2c5   : > { %3236 = vmatmul.f32.gmra.mxu3 %v9421_v38 }
 0x2c6   : > { %v9917_v37 = vadd.f32 %v2509_v61, %v2229_v2  ;;  %3075 = vmatmul.f32.gmra.mxu2 %v9421_v38 }
 0x2c8   : > { %v1842_v18 = vpop.f32.mrf.mxu0 }
 0x2c9   : > { %v1999_v6 = vpop.f32.mrf.mxu1  ;;  %v2236_v26 = vpop.f32.mrf.mxu2  ;;  %v1843_v38 = vadd.f32 %v1842_v18, %v9485_v32 }
 0x2ca   : > { %v2000_v24 = vadd.f32 %v1999_v6, %v1839_v59  ;;  %v2513_v44 = vpop.f32.mrf.mxu3  ;;  %v13223_v59 = vand.u32 4294901760, %v9462_v29 }
 0x2cb   : > { %2633 = vmatmul.f32.gmra.mxu0 %v9447_v43 }
 0x2cc   : > { %v2237_v11 = vadd.f32 %v2236_v26, %v2000_v24  ;;  %2824 = vmatmul.f32.gmra.mxu1 %v13221_v56 }
 0x2cd   : > { %3240 = vmatmul.f32.gmra.mxu3 %v9436_v16 }
 0x2ce   : > { %v9925_v52 = vadd.f32 %v2513_v44, %v2237_v11  ;;  %3079 = vmatmul.f32.gmra.mxu2 %v9436_v16  ;;  %v13224_v11 = vand.u32 4294901760, %v9477_v47 }
 0x2d0   : > { %v1846_v30 = vpop.f32.mrf.mxu0 }
 0x2d1   : > { %v2003_v12 = vpop.f32.mrf.mxu1  ;;  %v2244_v50 = vpop.f32.mrf.mxu2  ;;  %v1847_v16 = vadd.f32 %v1846_v30, %v9500_v63 }
 0x2d2   : > { %v2004_v60 = vadd.f32 %v2003_v12, %v1843_v38  ;;  %v2517_v62 = vpop.f32.mrf.mxu3 }
 0x2d3   : > { %2638 = vmatmul.f32.gmra.mxu0 %v9462_v29 }
 0x2d4   : > { %v2245_v49 = vadd.f32 %v2244_v50, %v2004_v60  ;;  %2830 = vmatmul.f32.gmra.mxu1 %v13222_v54  ;;  %v13225_v50 = vand.u32 4294901760, %v9492_v15 }
 0x2d5   : > { %3244 = vmatmul.f32.gmra.mxu3 %v9451_v0 }
 0x2d6   : > { %v9933_v5 = vadd.f32 %v2517_v62, %v2245_v49  ;;  %3083 = vmatmul.f32.gmra.mxu2 %v9451_v0 }
 0x2d8   : > { %v1850_v32 = vpop.f32.mrf.mxu0 }
 0x2d9   : > { %v2007_v3 = vpop.f32.mrf.mxu1  ;;  %v2252_v61 = vpop.f32.mrf.mxu2  ;;  %v1851_v0 = vadd.f32 %v1850_v32, %v9515_v4 }
 0x2da   : > { %v2008_v10 = vadd.f32 %v2007_v3, %v1847_v16  ;;  %v2521_v2 = vpop.f32.mrf.mxu3  ;;  %v13226_v3 = vand.u32 4294901760, %v9507_v46 }
 0x2db   : > { %2643 = vmatmul.f32.gmra.mxu0 %v9477_v47 }
 0x2dc   : > { %v2253_v20 = vadd.f32 %v2252_v61, %v2008_v10  ;;  %2836 = vmatmul.f32.gmra.mxu1 %v13223_v59 }
 0x2dd   : > { %3248 = vmatmul.f32.gmra.mxu3 %v9466_v25 }
 0x2de   : > { %v9941_v43 = vadd.f32 %v2521_v2, %v2253_v20  ;;  %3087 = vmatmul.f32.gmra.mxu2 %v9466_v25 }
 0x2e0   : > { %v1854_v63 = vpop.f32.mrf.mxu0 }
 0x2e1   : > { %v2011_v18 = vpop.f32.mrf.mxu1  ;;  %v2260_v24 = vpop.f32.mrf.mxu2  ;;  %v1855_v25 = vadd.f32 %v1854_v63, %v9530_v45 }
 0x2e2   : > { %v2012_v6 = vadd.f32 %v2011_v18, %v1851_v0  ;;  %v2525_v26 = vpop.f32.mrf.mxu3  ;;  %v13227_v0 = vand.u32 4294901760, %v9522_v7 }
 0x2e3   : > { %2648 = vmatmul.f32.gmra.mxu0 %v9492_v15 }
 0x2e4   : > { %v2261_v44 = vadd.f32 %v2260_v24, %v2012_v6  ;;  %2842 = vmatmul.f32.gmra.mxu1 %v13224_v11  ;;  %v13229_v11 = vld [vmem:[#allocation6_spill] sm:$0xff] }
 0x2e5   : > { %3252 = vmatmul.f32.gmra.mxu3 %v9481_v14 }
 0x2e6   : > { %v9949_v29 = vadd.f32 %v2525_v26, %v2261_v44  ;;  %3091 = vmatmul.f32.gmra.mxu2 %v9481_v14 }
 0x2e8   : > { %v1858_v4 = vpop.f32.mrf.mxu0 }
 0x2e9   : > { %v2015_v56 = vpop.f32.mrf.mxu1  ;;  %v2268_v30 = vpop.f32.mrf.mxu2  ;;  %v1859_v14 = vadd.f32 %v1858_v4, %v9545_v51  ;;  %v13231_v4 = vld [vmem:[#allocation33_spill] sm:$0xff] }
 0x2ea   : > { %v2016_v38 = vadd.f32 %v2015_v56, %v1855_v25  ;;  %v2529_v12 = vpop.f32.mrf.mxu3  ;;  %v13230_v25 = vand.u32 4294901760, %v9537_v8 }
 0x2eb   : > { %2653 = vmatmul.f32.gmra.mxu0 %v9507_v46 }
 0x2ec   : > { %v2269_v60 = vadd.f32 %v2268_v30, %v2016_v38  ;;  %2848 = vmatmul.f32.gmra.mxu1 %v13225_v50 }
 0x2ed   : > { %3256 = vmatmul.f32.gmra.mxu3 %v9496_v9 }
 0x2ee   : > { %v9957_v47 = vadd.f32 %v2529_v12, %v2269_v60  ;;  %3095 = vmatmul.f32.gmra.mxu2 %v9496_v9 }
 0x2f0   : > { %v1862_v45 = vpop.f32.mrf.mxu0 }
 0x2f1   : > { %v2019_v62 = vpop.f32.mrf.mxu1  ;;  %v2276_v54 = vpop.f32.mrf.mxu2  ;;  %v1863_v9 = vadd.f32 %v1862_v45, %v9560_v1  ;;  %v13233_v45 = vld [vmem:[#allocation7_spill] sm:$0xff] }
 0x2f2   : > { %v2020_v49 = vadd.f32 %v2019_v62, %v1859_v14  ;;  %v2533_v16 = vpop.f32.mrf.mxu3  ;;  %v13234_v62 = vand.u32 4294901760, %v13229_v11 }
 0x2f3   : > { %2658 = vmatmul.f32.gmra.mxu0 %v9522_v7 }
 0x2f4   : > { %v2277_v32 = vadd.f32 %v2276_v54, %v2020_v49  ;;  %2854 = vmatmul.f32.gmra.mxu1 %v13226_v3  ;;  %v13235_v49 = vld [vmem:[#allocation34_spill] sm:$0xff] }
 0x2f5   : > { %3260 = vmatmul.f32.gmra.mxu3 %v9511_v53  ;;  %v13236_v54 = vld [vmem:[#allocation10_spill] sm:$0xff] }
 0x2f6   : > { %v9965_v15 = vadd.f32 %v2533_v16, %v2277_v32  ;;  %3099 = vmatmul.f32.gmra.mxu2 %v9511_v53  ;;  %v13228_v53 = vld [vmem:[#allocation8_spill] sm:$0xff] }
 0x2f8   : > { %v1866_v51 = vpop.f32.mrf.mxu0 }
 0x2f9   : > { %v2023_v10 = vpop.f32.mrf.mxu1  ;;  %v2284_v2 = vpop.f32.mrf.mxu2  ;;  %v1867_v63 = vadd.f32 %v1866_v51, %v13228_v53  ;;  %v13240_v53 = vld [vmem:[#allocation11_spill] sm:$0xff] }
 0x2fa   : > { %v2024_v61 = vadd.f32 %v2023_v10, %v1863_v9  ;;  %v2537_v20 = vpop.f32.mrf.mxu3 }
 0x2fb   : > { %2663 = vmatmul.f32.gmra.mxu0 %v9537_v8 }
 0x2fc   : > { %v2285_v59 = vadd.f32 %v2284_v2, %v2024_v61  ;;  %2860 = vmatmul.f32.gmra.mxu1 %v13227_v0  ;;  %v13237_v2 = vld [vmem:[#allocation36_spill] sm:$0xff]  ;;  %v13239_v0 = vld [vmem:[#allocation35_spill] sm:$0xff] }
 0x2fd   : > { %3264 = vmatmul.f32.gmra.mxu3 %v9526_v42 }
 0x2fe   : > { %v9973_v46 = vadd.f32 %v2537_v20, %v2285_v59  ;;  %3103 = vmatmul.f32.gmra.mxu2 %v9526_v42  ;;  %v13232_v42 = vld [vmem:[#allocation9_spill] sm:$0xff]  ;;  %v13238_v20 = vand.u32 4294901760, %v13233_v45 }
 0x300   : > { %v1870_v1 = vpop.f32.mrf.mxu0 }
 0x301   : > { %v2027_v18 = vpop.f32.mrf.mxu1  ;;  %v2292_v24 = vpop.f32.mrf.mxu2  ;;  %v1871_v56 = vadd.f32 %v1870_v1, %v13232_v42  ;;  %v13243_v42 = vld [vmem:[#allocation37_spill] sm:$0xff] }
 0x302   : > { %v2028_v6 = vadd.f32 %v2027_v18, %v1867_v63  ;;  %v2541_v26 = vpop.f32.mrf.mxu3 }
 0x303   : > { %2668 = vmatmul.f32.gmra.mxu0 %v13229_v11  ;;  %v13241_v11 = vld [vmem:[#allocation38_spill] sm:$0xff] }
 0x304   : > { %v2293_v44 = vadd.f32 %v2292_v24, %v2028_v6  ;;  %2866 = vmatmul.f32.gmra.mxu1 %v13230_v25  ;;  %v13242_v25 = vand.u32 4294901760, %v13237_v2 }
 0x305   : > { %3268 = vmatmul.f32.gmra.mxu3 %v13231_v4 }
 0x306   : > { %v9981_v7 = vadd.f32 %v2541_v26, %v2293_v44  ;;  %3107 = vmatmul.f32.gmra.mxu2 %v13231_v4 }
 0x308   : > { %v1874_v38 = vpop.f32.mrf.mxu0 }
 0x309   : > { %v2031_v30 = vpop.f32.mrf.mxu1  ;;  %v2300_v60 = vpop.f32.mrf.mxu2  ;;  %v1875_v16 = vadd.f32 %v1874_v38, %v13236_v54 }
 0x30a   : > { %v2032_v12 = vadd.f32 %v2031_v30, %v1871_v56  ;;  %v2545_v50 = vpop.f32.mrf.mxu3  ;;  %v13244_v56 = vld [vmem:[#allocation12_spill] sm:$0xff] }
 0x30b   : > { %2673 = vmatmul.f32.gmra.mxu0 %v13233_v45 }
 0x30c   : > { %v2301_v14 = vadd.f32 %v2300_v60, %v2032_v12  ;;  %2872 = vmatmul.f32.gmra.mxu1 %v13234_v62  ;;  %v13245_v62 = vld [vmem:[#allocation40_spill] sm:$0xff] }
 0x30d   : > { %3272 = vmatmul.f32.gmra.mxu3 %v13235_v49 }
 0x30e   : > { %v9989_v8 = vadd.f32 %v2545_v50, %v2301_v14  ;;  %3111 = vmatmul.f32.gmra.mxu2 %v13235_v49  ;;  %v13246_v49 = vand.u32 4294901760, %v13241_v11 }
 0x310   : > { %v1878_v32 = vpop.f32.mrf.mxu0 }
 0x311   : > { %v2035_v3 = vpop.f32.mrf.mxu1  ;;  %v2308_v51 = vpop.f32.mrf.mxu2  ;;  %v1879_v63 = vadd.f32 %v1878_v32, %v13240_v53  ;;  %v13248_v32 = vld [vmem:[#allocation13_spill] sm:$0xff]  ;;  %v13250_v53 = vand.u32 4294901760, %v13245_v62 }
 0x312   : > { %v2036_v9 = vadd.f32 %v2035_v3, %v1875_v16  ;;  %v2549_v10 = vpop.f32.mrf.mxu3  ;;  %v13247_v16 = vld [vmem:[#allocation39_spill] sm:$0xff] }
 0x313   : > { %2678 = vmatmul.f32.gmra.mxu0 %v13237_v2 }
 0x314   : > { %v2309_v61 = vadd.f32 %v2308_v51, %v2036_v9  ;;  %2878 = vmatmul.f32.gmra.mxu1 %v13238_v20 }
 0x315   : > { %3276 = vmatmul.f32.gmra.mxu3 %v13239_v0 }
 0x316   : > { %v9997_v59 = vadd.f32 %v2549_v10, %v2309_v61  ;;  %3115 = vmatmul.f32.gmra.mxu2 %v13239_v0  ;;  %v13249_v0 = vld [vmem:[#allocation42_spill] sm:$0xff] }
 0x318   : > { %v1882_v1 = vpop.f32.mrf.mxu0 }
 0x319   : > { %v2039_v18 = vpop.f32.mrf.mxu1  ;;  %v2316_v24 = vpop.f32.mrf.mxu2  ;;  %v1883_v38 = vadd.f32 %v1882_v1, %v13244_v56  ;;  %v13251_v1 = vld [vmem:[#allocation41_spill] sm:$0xff]  ;;  %v13253_v56 = vld [vmem:[#allocation44_spill] sm:$0xff] }
 0x31a   : > { %v2040_v6 = vadd.f32 %v2039_v18, %v1879_v63  ;;  %v2553_v26 = vpop.f32.mrf.mxu3  ;;  %v13252_v18 = vld [vmem:[#allocation14_spill] sm:$0xff] }
 0x31b   : > { %2683 = vmatmul.f32.gmra.mxu0 %v13241_v11 }
 0x31c   : > { %v2317_v44 = vadd.f32 %v2316_v24, %v2040_v6  ;;  %2884 = vmatmul.f32.gmra.mxu1 %v13242_v25 }
 0x31d   : > { %3280 = vmatmul.f32.gmra.mxu3 %v13243_v42 }
 0x31e   : > { %v10005_v4 = vadd.f32 %v2553_v26, %v2317_v44  ;;  %3119 = vmatmul.f32.gmra.mxu2 %v13243_v42 }
 0x320   : > { %v1886_v30 = vpop.f32.mrf.mxu0 }
 0x321   : > { %v2043_v12 = vpop.f32.mrf.mxu1  ;;  %v2324_v50 = vpop.f32.mrf.mxu2  ;;  %v1887_v3 = vadd.f32 %v1886_v30, %v13248_v32 }
 0x322   : > { %v2044_v60 = vadd.f32 %v2043_v12, %v1883_v38  ;;  %v2557_v14 = vpop.f32.mrf.mxu3  ;;  %v13254_v38 = vand.u32 4294901760, %v13249_v0  ;;  %v13255_v12 = vld [vmem:[#allocation43_spill] sm:$0xff] }
 0x323   : > { %2688 = vmatmul.f32.gmra.mxu0 %v13245_v62 }
 0x324   : > { %v2325_v45 = vadd.f32 %v2324_v50, %v2044_v60  ;;  %2890 = vmatmul.f32.gmra.mxu1 %v13246_v49  ;;  %v13256_v60 = vld [vmem:[#allocation15_spill] sm:$0xff] }
 0x325   : > { %3284 = vmatmul.f32.gmra.mxu3 %v13247_v16 }
 0x326   : > { %v10013_v54 = vadd.f32 %v2557_v14, %v2325_v45  ;;  %3123 = vmatmul.f32.gmra.mxu2 %v13247_v16 }
 0x328   : > { %v1890_v9 = vpop.f32.mrf.mxu0 }
 0x329   : > { %v2047_v51 = vpop.f32.mrf.mxu1  ;;  %v2332_v61 = vpop.f32.mrf.mxu2  ;;  %v1891_v6 = vadd.f32 %v1890_v9, %v13252_v18  ;;  %v13258_v9 = vand.u32 4294901760, %v13253_v56 }
 0x32a   : > { %v2048_v10 = vadd.f32 %v2047_v51, %v1887_v3  ;;  %v2561_v2 = vpop.f32.mrf.mxu3  ;;  %v13257_v3 = vld [vmem:[#allocation46_spill] sm:$0xff] }
 0x32b   : > { %2693 = vmatmul.f32.gmra.mxu0 %v13249_v0  ;;  %v624_v51 = vld [vmem:[#allocation2] sm:$0xff] }
 0x32c   : > { %v2333_v20 = vadd.f32 %v2332_v61, %v2048_v10  ;;  %2896 = vmatmul.f32.gmra.mxu1 %v13250_v53  ;;  %v13259_v61 = vld [vmem:[#allocation45_spill] sm:$0xff] }
 0x32d   : > { %3288 = vmatmul.f32.gmra.mxu3 %v13251_v1 }
 0x32e   : > { %v10021_v63 = vadd.f32 %v2561_v2, %v2333_v20  ;;  %3127 = vmatmul.f32.gmra.mxu2 %v13251_v1  ;;  %v13260_v2 = vld [vmem:[#allocation16_spill] sm:$0xff] }
 0x330   : > { %v2619_v26 = vpop.f32.mrf.mxu0 }
 0x331   : > { %v2051_v24 = vpop.f32.mrf.mxu1  ;;  %v2340_v11 = vpop.f32.mrf.mxu2  ;;  %v2620_v50 = vadd.f32 %v2619_v26, %v13256_v60 }
 0x332   : > { %v2052_v44 = vadd.f32 %v2051_v24, %v1891_v6  ;;  %v2565_v25 = vpop.f32.mrf.mxu3 }
 0x333   : > { %2698 = vmatmul.f32.gmra.mxu0 %v13253_v56  ;;  %v13263_v56 = vld [vmem:[#allocation47_spill] sm:$0xff] }
 0x334   : > { %v2341_v42 = vadd.f32 %v2340_v11, %v2052_v44  ;;  %2902 = vmatmul.f32.gmra.mxu1 %v13254_v38  ;;  %v13261_v44 = vld [vmem:[#allocation48_spill] sm:$0xff]  ;;  %v13262_v11 = vand.u32 4294901760, %v13257_v3  ;;  %v13264_v38 = vld [vmem:[#allocation17_spill] sm:$0xff] }
 0x335   : > { %3292 = vmatmul.f32.gmra.mxu3 %v13255_v12 }
 0x336   : > { %v10029_v30 = vadd.f32 %v2565_v25, %v2341_v42  ;;  %3131 = vmatmul.f32.gmra.mxu2 %v13255_v12  ;;  %v625_v25 = vld [vmem:[#allocation2 + $0x8] sm:$0xff] }
 0x338   : > { %v2624_v14 = vpop.f32.mrf.mxu0 }
 0x339   : > { %v2813_v45 = vpop.f32.mrf.mxu1  ;;  %v3068_v49 = vpop.f32.mrf.mxu2  ;;  %v2625_v20 = vadd.f32 %v2624_v14, %v13260_v2 }
 0x33a   : > { %v2814_v62 = vadd.f32 %v2813_v45, %v2620_v50  ;;  %v3229_v16 = vpop.f32.mrf.mxu3 }
 0x33b   : > { %2703 = vmatmul.f32.gmra.mxu0 %v13257_v3  ;;  %v13266_v3 = vand.u32 4294901760, %v13261_v44 }
 0x33c   : > { %v3069_v32 = vadd.f32 %v3068_v49, %v2814_v62  ;;  %2908 = vmatmul.f32.gmra.mxu1 %v13258_v9  ;;  %v626_v9 = vld [vmem:[#allocation2 + $0x10] sm:$0xff] }
 0x33d   : > { %3296 = vmatmul.f32.gmra.mxu3 %v13259_v61 }
 0x33e   : > { %v3230_v10 = vadd.f32 %v3229_v16, %v3069_v32  ;;  %3135 = vmatmul.f32.gmra.mxu2 %v13259_v61  ;;  %v13265_v32 = vld [vmem:[#allocation49_spill] sm:$0xff]  ;;  %v13268_v61 = vld [vmem:[#allocation19_spill] sm:$0xff] }
 0x340   : > { %v3356_v0 = vadd.f32 %v3230_v10, %v624_v51  ;;  %v2629_v53 = vpop.f32.mrf.mxu0  ;;  %v13267_v10 = vld [vmem:[#allocation18_spill] sm:$0xff] }
 0x341   : > { %v2819_v1 = vpop.f32.mrf.mxu1  ;;  %v3072_v6 = vpop.f32.mrf.mxu2  ;;  %v2630_v12 = vadd.f32 %v2629_v53, %v13264_v38 }
 0x342   : > { %3389 = vst.msk [vmem:[#allocation2] sm:$0xff] %vm3388_vm1, %v3356_v0  ;;  %v2820_v18 = vadd.f32 %v2819_v1, %v2625_v20  ;;  %v3233_v24 = vpop.f32.mrf.mxu3 }
 0x343   : > { %2708 = vmatmul.f32.gmra.mxu0 %v13261_v44  ;;  %v13270_v44 = vand.u32 4294901760, %v13265_v32 }
 0x344   : > { %v3073_v26 = vadd.f32 %v3072_v6, %v2820_v18  ;;  %2914 = vmatmul.f32.gmra.mxu1 %v13262_v11  ;;  %v627_v11 = vld [vmem:[#allocation2 + $0x18] sm:$0xff] }
 0x345   : > { %3300 = vmatmul.f32.gmra.mxu3 %v13263_v56 }
 0x346   : > { %v3234_v42 = vadd.f32 %v3233_v24, %v3073_v26  ;;  %3139 = vmatmul.f32.gmra.mxu2 %v13263_v56  ;;  %v13269_v26 = vld [vmem:[#allocation50_spill] sm:$0xff]  ;;  %v13272_v56 = vld [vmem:[#allocation21_spill] sm:$0xff] }
 0x348   : > { %v3357_v60 = vadd.f32 %v3234_v42, %v625_v25  ;;  %v2634_v50 = vpop.f32.mrf.mxu0  ;;  %v13271_v42 = vld [vmem:[#allocation20_spill] sm:$0xff] }
 0x349   : > { %v2825_v14 = vpop.f32.mrf.mxu1  ;;  %v3076_v62 = vpop.f32.mrf.mxu2  ;;  %v2635_v2 = vadd.f32 %v2634_v50, %v13268_v61 }
 0x34a   : > { %3390 = vst.msk [vmem:[#allocation2 + $0x8] sm:$0xff] %vm3388_vm1, %v3357_v60  ;;  %v2826_v45 = vadd.f32 %v2825_v14, %v2630_v12  ;;  %v3237_v49 = vpop.f32.mrf.mxu3 }
 0x34b   : > { %2713 = vmatmul.f32.gmra.mxu0 %v13265_v32  ;;  %v13274_v32 = vand.u32 4294901760, %v13269_v26 }
 0x34c   : > { %v3077_v16 = vadd.f32 %v3076_v62, %v2826_v45  ;;  %2920 = vmatmul.f32.gmra.mxu1 %v13266_v3  ;;  %v628_v3 = vld [vmem:[#allocation2 + $0x20] sm:$0xff] }
 0x34d   : > { %3304 = vmatmul.f32.gmra.mxu3 %v13267_v10 }
 0x34e   : > { %v3238_v51 = vadd.f32 %v3237_v49, %v3077_v16  ;;  %3143 = vmatmul.f32.gmra.mxu2 %v13267_v10  ;;  %v13273_v16 = vld [vmem:[#allocation51_spill] sm:$0xff] }
 0x34f   : > { %v13276_v10 = vld [vmem:[#allocation23_spill] sm:$0xff] }
 0x350   : > { %v3358_v20 = vadd.f32 %v3238_v51, %v626_v9  ;;  %v2639_v0 = vpop.f32.mrf.mxu0  ;;  %v13275_v51 = vld [vmem:[#allocation22_spill] sm:$0xff] }
 0x351   : > { %v2831_v53 = vpop.f32.mrf.mxu1  ;;  %v3080_v18 = vpop.f32.mrf.mxu2  ;;  %v2640_v38 = vadd.f32 %v2639_v0, %v13272_v56 }
 0x352   : > { %3391 = vst.msk [vmem:[#allocation2 + $0x10] sm:$0xff] %vm3388_vm1, %v3358_v20  ;;  %v2832_v1 = vadd.f32 %v2831_v53, %v2635_v2  ;;  %v3241_v6 = vpop.f32.mrf.mxu3 }
 0x353   : > { %2718 = vmatmul.f32.gmra.mxu0 %v13269_v26  ;;  %v13278_v26 = vand.u32 4294901760, %v13273_v16 }
 0x354   : > { %v3081_v24 = vadd.f32 %v3080_v18, %v2832_v1  ;;  %2926 = vmatmul.f32.gmra.mxu1 %v13270_v44  ;;  %v629_v44 = vld [vmem:[#allocation2 + $0x28] sm:$0xff] }
 0x355   : > { %3308 = vmatmul.f32.gmra.mxu3 %v13271_v42 }
 0x356   : > { %v3242_v25 = vadd.f32 %v3241_v6, %v3081_v24  ;;  %3147 = vmatmul.f32.gmra.mxu2 %v13271_v42  ;;  %v13277_v24 = vld [vmem:[#allocation52_spill] sm:$0xff]  ;;  %v13280_v42 = vld [vmem:[#allocation25_spill] sm:$0xff] }
 0x358   : > { %v3359_v12 = vadd.f32 %v3242_v25, %v627_v11  ;;  %v2644_v60 = vpop.f32.mrf.mxu0  ;;  %v13279_v25 = vld [vmem:[#allocation24_spill] sm:$0xff] }
 0x359   : > { %v2837_v50 = vpop.f32.mrf.mxu1  ;;  %v3084_v45 = vpop.f32.mrf.mxu2  ;;  %v2645_v61 = vadd.f32 %v2644_v60, %v13276_v10 }
 0x35a   : > { %3392 = vst.msk [vmem:[#allocation2 + $0x18] sm:$0xff] %vm3388_vm1, %v3359_v12  ;;  %v2838_v14 = vadd.f32 %v2837_v50, %v2640_v38  ;;  %v3245_v62 = vpop.f32.mrf.mxu3 }
 0x35b   : > { %2723 = vmatmul.f32.gmra.mxu0 %v13273_v16  ;;  %v13282_v16 = vand.u32 4294901760, %v13277_v24 }
 0x35c   : > { %v3085_v49 = vadd.f32 %v3084_v45, %v2838_v14  ;;  %2932 = vmatmul.f32.gmra.mxu1 %v13274_v32  ;;  %v630_v32 = vld [vmem:[#allocation2 + $0x30] sm:$0xff] }
 0x35d   : > { %3312 = vmatmul.f32.gmra.mxu3 %v13275_v51 }
 0x35e   : > { %v3246_v9 = vadd.f32 %v3245_v62, %v3085_v49  ;;  %3151 = vmatmul.f32.gmra.mxu2 %v13275_v51  ;;  %v13281_v49 = vld [vmem:[#allocation53_spill] sm:$0xff] }
 0x360   : > { %v3360_v2 = vadd.f32 %v3246_v9, %v628_v3  ;;  %v2649_v20 = vpop.f32.mrf.mxu0  ;;  %v13283_v9 = vld [vmem:[#allocation26_spill] sm:$0xff] }
 0x361   : > { %v2843_v0 = vpop.f32.mrf.mxu1  ;;  %v3088_v1 = vpop.f32.mrf.mxu2  ;;  %v2650_v56 = vadd.f32 %v2649_v20, %v13280_v42 }
 0x362   : > { %3393 = vst.msk [vmem:[#allocation2 + $0x20] sm:$0xff] %vm3388_vm1, %v3360_v2  ;;  %v2844_v53 = vadd.f32 %v2843_v0, %v2645_v61  ;;  %v3249_v18 = vpop.f32.mrf.mxu3 }
 0x363   : > { %2728 = vmatmul.f32.gmra.mxu0 %v13277_v24  ;;  %v631_v24 = vld [vmem:[#allocation2 + $0x38] sm:$0xff] }
 0x364   : > { %v3089_v6 = vadd.f32 %v3088_v1, %v2844_v53  ;;  %2938 = vmatmul.f32.gmra.mxu1 %v13278_v26 }
 0x365   : > { %3316 = vmatmul.f32.gmra.mxu3 %v13279_v25 }
 0x366   : > { %v3250_v11 = vadd.f32 %v3249_v18, %v3089_v6  ;;  %3155 = vmatmul.f32.gmra.mxu2 %v13279_v25  ;;  %v13284_v18 = vld [vmem:[#allocation54_spill] sm:$0xff]  ;;  %v13285_v6 = vand.u32 4294901760, %v13281_v49 }
 0x368   : > { %v3361_v38 = vadd.f32 %v3250_v11, %v629_v44  ;;  %v2654_v12 = vpop.f32.mrf.mxu0  ;;  %v13286_v44 = vld [vmem:[#allocation28_spill] sm:$0xff] }
 0x369   : > { %v2849_v60 = vpop.f32.mrf.mxu1  ;;  %v3092_v14 = vpop.f32.mrf.mxu2  ;;  %v2655_v51 = vadd.f32 %v2654_v12, %v9793_v28 }
 0x36a   : > { %3394 = vst.msk [vmem:[#allocation2 + $0x28] sm:$0xff] %vm3388_vm1, %v3361_v38  ;;  %v2850_v50 = vadd.f32 %v2849_v60, %v2650_v56  ;;  %v3253_v45 = vpop.f32.mrf.mxu3 }
 0x36b   : > { %2733 = vmatmul.f32.gmra.mxu0 %v13281_v49  ;;  %v13289_v49 = vld [vmem:[#allocation29_spill] sm:$0xff] }
 0x36c   : > { %v3093_v62 = vadd.f32 %v3092_v14, %v2850_v50  ;;  %2944 = vmatmul.f32.gmra.mxu1 %v13282_v16  ;;  %v13287_v50 = vld [vmem:[#allocation55_spill] sm:$0xff]  ;;  %v13288_v14 = vand.u32 4294901760, %v13284_v18 }
 0x36d   : > { %3320 = vmatmul.f32.gmra.mxu3 %v13283_v9 }
 0x36e   : > { %v3254_v3 = vadd.f32 %v3253_v45, %v3093_v62  ;;  %3159 = vmatmul.f32.gmra.mxu2 %v13283_v9  ;;  %v632_v45 = vld [vmem:[#allocation2 + $0x40] sm:$0xff] }
 0x370   : > { %v3362_v10 = vadd.f32 %v3254_v3, %v630_v32  ;;  %v2659_v61 = vpop.f32.mrf.mxu0 }
 0x371   : > { %v2855_v2 = vpop.f32.mrf.mxu1  ;;  %v3096_v0 = vpop.f32.mrf.mxu2  ;;  %v2660_v28 = vadd.f32 %v2659_v61, %v9809_v27 }
 0x372   : > { %3395 = vst.msk [vmem:[#allocation2 + $0x30] sm:$0xff] %vm3388_vm1, %v3362_v10  ;;  %v2856_v20 = vadd.f32 %v2855_v2, %v2655_v51  ;;  %v3257_v53 = vpop.f32.mrf.mxu3  ;;  %v13290_v2 = vand.u32 4294901760, %v13287_v50 }
 0x373   : > { %2738 = vmatmul.f32.gmra.mxu0 %v13284_v18 }
 0x374   : > { %v3097_v1 = vadd.f32 %v3096_v0, %v2856_v20  ;;  %2950 = vmatmul.f32.gmra.mxu1 %v13285_v6  ;;  %v633_v20 = vld [vmem:[#allocation2 + $0x48] sm:$0xff] }
 0x375   : > { %3324 = vmatmul.f32.gmra.mxu3 %v13286_v44 }
 0x376   : > { %v3258_v26 = vadd.f32 %v3257_v53, %v3097_v1  ;;  %3163 = vmatmul.f32.gmra.mxu2 %v13286_v44  ;;  %v13291_v53 = vld [vmem:[#allocation31_spill] sm:$0xff] }
 0x378   : > { %v3363_v11 = vadd.f32 %v3258_v26, %v631_v24  ;;  %v2664_v25 = vpop.f32.mrf.mxu0 }
 0x379   : > { %v2861_v42 = vpop.f32.mrf.mxu1  ;;  %v3100_v38 = vpop.f32.mrf.mxu2  ;;  %v2665_v27 = vadd.f32 %v2664_v25, %v9825_v41  ;;  %v634_v25 = vld [vmem:[#allocation2 + $0x50] sm:$0xff] }
 0x37a   : > { %3396 = vst.msk [vmem:[#allocation2 + $0x38] sm:$0xff] %vm3388_vm1, %v3363_v11  ;;  %v2862_v56 = vadd.f32 %v2861_v42, %v2660_v28  ;;  %v3261_v12 = vpop.f32.mrf.mxu3  ;;  %v13292_v11 = vand.u32 4294901760, %v9800_v21 }
 0x37b   : > { %2743 = vmatmul.f32.gmra.mxu0 %v13287_v50 }
 0x37c   : > { %v3101_v60 = vadd.f32 %v3100_v38, %v2862_v56  ;;  %2956 = vmatmul.f32.gmra.mxu1 %v13288_v14  ;;  %v13293_v56 = vld [vmem:[#allocation27_spill] sm:$0xff] }
 0x37d   : > { %3328 = vmatmul.f32.gmra.mxu3 %v13289_v49 }
 0x37e   : > { %v3262_v62 = vadd.f32 %v3261_v12, %v3101_v60  ;;  %3167 = vmatmul.f32.gmra.mxu2 %v13289_v49  ;;  %v635_v49 = vld [vmem:[#allocation2 + $0x58] sm:$0xff] }
 0x380   : > { %v3364_v16 = vadd.f32 %v3262_v62, %v632_v45  ;;  %v2669_v32 = vpop.f32.mrf.mxu0 }
 0x381   : > { %v2867_v3 = vpop.f32.mrf.mxu1  ;;  %v3104_v51 = vpop.f32.mrf.mxu2  ;;  %v2670_v41 = vadd.f32 %v2669_v32, %v9841_v22 }
 0x382   : > { %3397 = vst.msk [vmem:[#allocation2 + $0x40] sm:$0xff] %vm3388_vm1, %v3364_v16  ;;  %v2868_v9 = vadd.f32 %v2867_v3, %v2665_v27  ;;  %v3265_v10 = vpop.f32.mrf.mxu3  ;;  %v13295_v16 = vld [vmem:[#allocation32_spill] sm:$0xff] }
 0x383   : > { %2748 = vmatmul.f32.gmra.mxu0 %v9800_v21  ;;  %v13294_v21 = vand.u32 4294901760, %v9816_v33 }
 0x384   : > { %v3105_v61 = vadd.f32 %v3104_v51, %v2868_v9  ;;  %2962 = vmatmul.f32.gmra.mxu1 %v13290_v2 }
 0x385   : > { %3332 = vmatmul.f32.gmra.mxu3 %v13291_v53 }
 0x386   : > { %v3266_v0 = vadd.f32 %v3265_v10, %v3105_v61  ;;  %3171 = vmatmul.f32.gmra.mxu2 %v13291_v53 }
 0x388   : > { %v3365_v1 = vadd.f32 %v3266_v0, %v633_v20  ;;  %v2674_v18 = vpop.f32.mrf.mxu0  ;;  %v636_v20 = vld [vmem:[#allocation2 + $0x60] sm:$0xff] }
 0x389   : > { %v2873_v6 = vpop.f32.mrf.mxu1  ;;  %v3108_v26 = vpop.f32.mrf.mxu2  ;;  %v2675_v22 = vadd.f32 %v2674_v18, %v9857_v17 }
 0x38a   : > { %3398 = vst.msk [vmem:[#allocation2 + $0x48] sm:$0xff] %vm3388_vm1, %v3365_v1  ;;  %v2874_v24 = vadd.f32 %v2873_v6, %v2670_v41  ;;  %v3269_v44 = vpop.f32.mrf.mxu3 }
 0x38b   : > { %2753 = vmatmul.f32.gmra.mxu0 %v9816_v33  ;;  %v13296_v33 = vand.u32 4294901760, %v9832_v40 }
 0x38c   : > { %v3109_v28 = vadd.f32 %v3108_v26, %v2874_v24  ;;  %2968 = vmatmul.f32.gmra.mxu1 %v13292_v11 }
 0x38d   : > { %3336 = vmatmul.f32.gmra.mxu3 %v13293_v56 }
 0x38e   : > { %v3270_v42 = vadd.f32 %v3269_v44, %v3109_v28  ;;  %3175 = vmatmul.f32.gmra.mxu2 %v13293_v56  ;;  %v637_v44 = vld [vmem:[#allocation2 + $0x68] sm:$0xff] }
 0x390   : > { %v3366_v38 = vadd.f32 %v3270_v42, %v634_v25  ;;  %v2679_v12 = vpop.f32.mrf.mxu0 }
 0x391   : > { %v2879_v60 = vpop.f32.mrf.mxu1  ;;  %v3112_v14 = vpop.f32.mrf.mxu2  ;;  %v2680_v17 = vadd.f32 %v2679_v12, %v9873_v48  ;;  %v638_v12 = vld [vmem:[#allocation2 + $0x70] sm:$0xff] }
 0x392   : > { %3399 = vst.msk [vmem:[#allocation2 + $0x50] sm:$0xff] %vm3388_vm1, %v3366_v38  ;;  %v2880_v50 = vadd.f32 %v2879_v60, %v2675_v22  ;;  %v3273_v45 = vpop.f32.mrf.mxu3 }
 0x393   : > { %2758 = vmatmul.f32.gmra.mxu0 %v9832_v40  ;;  %v13297_v40 = vand.u32 4294901760, %v9848_v35 }
 0x394   : > { %v3113_v62 = vadd.f32 %v3112_v14, %v2880_v50  ;;  %2974 = vmatmul.f32.gmra.mxu1 %v13294_v21 }
 0x395   : > { %3340 = vmatmul.f32.gmra.mxu3 %v13295_v16 }
 0x396   : > { %v3274_v27 = vadd.f32 %v3273_v45, %v3113_v62  ;;  %3179 = vmatmul.f32.gmra.mxu2 %v13295_v16 }
 0x398   : > { %v3367_v32 = vadd.f32 %v3274_v27, %v635_v49  ;;  %v2684_v3 = vpop.f32.mrf.mxu0 }
 0x399   : > { %v2885_v9 = vpop.f32.mrf.mxu1  ;;  %v3116_v10 = vpop.f32.mrf.mxu2  ;;  %v2685_v48 = vadd.f32 %v2684_v3, %v9886_v31 }
 0x39a   : > { %3400 = vst.msk [vmem:[#allocation2 + $0x58] sm:$0xff] %vm3388_vm1, %v3367_v32  ;;  %v2886_v51 = vadd.f32 %v2885_v9, %v2680_v17  ;;  %v3277_v61 = vpop.f32.mrf.mxu3 }
 0x39b   : > { %2763 = vmatmul.f32.gmra.mxu0 %v9848_v35  ;;  %v13298_v35 = vand.u32 4294901760, %v9864_v36 }
 0x39c   : > { %v3117_v2 = vadd.f32 %v3116_v10, %v2886_v51  ;;  %2980 = vmatmul.f32.gmra.mxu1 %v13296_v33  ;;  %v640_v10 = vld [vmem:[#allocation2 + $0x80] sm:$0xff] }
 0x39d   : > { %3344 = vmatmul.f32.gmra.mxu3 %v9837_v58 }
 0x39e   : > { %v3278_v0 = vadd.f32 %v3277_v61, %v3117_v2  ;;  %3183 = vmatmul.f32.gmra.mxu2 %v9837_v58 }
 0x3a0   : > { %v3368_v53 = vadd.f32 %v3278_v0, %v636_v20  ;;  %v2689_v41 = vpop.f32.mrf.mxu0 }
 0x3a1   : > { %v2891_v1 = vpop.f32.mrf.mxu1  ;;  %v3120_v6 = vpop.f32.mrf.mxu2  ;;  %v2690_v58 = vadd.f32 %v2689_v41, %v9895_v23 }
 0x3a2   : > { %3401 = vst.msk [vmem:[#allocation2 + $0x60] sm:$0xff] %vm3388_vm1, %v3368_v53  ;;  %v2892_v18 = vadd.f32 %v2891_v1, %v2685_v48  ;;  %v3281_v24 = vpop.f32.mrf.mxu3  ;;  %v641_v53 = vld [vmem:[#allocation2 + $0x88] sm:$0xff] }
 0x3a3   : > { %2768 = vmatmul.f32.gmra.mxu0 %v9864_v36  ;;  %v639_v36 = vld [vmem:[#allocation2 + $0x78] sm:$0xff] }
 0x3a4   : > { %v3121_v26 = vadd.f32 %v3120_v6, %v2892_v18  ;;  %2986 = vmatmul.f32.gmra.mxu1 %v13297_v40 }
 0x3a5   : > { %3348 = vmatmul.f32.gmra.mxu3 %v9853_v34 }
 0x3a6   : > { %v3282_v28 = vadd.f32 %v3281_v24, %v3121_v26  ;;  %3187 = vmatmul.f32.gmra.mxu2 %v9853_v34 }
 0x3a8   : > { %v3369_v31 = vadd.f32 %v3282_v28, %v637_v44  ;;  %v2694_v11 = vpop.f32.mrf.mxu0  ;;  %v642_v28 = vld [vmem:[#allocation2 + $0x90] sm:$0xff] }
 0x3a9   : > { %v2897_v25 = vpop.f32.mrf.mxu1  ;;  %v3124_v56 = vpop.f32.mrf.mxu2  ;;  %v2695_v34 = vadd.f32 %v2694_v11, %v9901_v57 }
 0x3aa   : > { %3402 = vst.msk [vmem:[#allocation2 + $0x68] sm:$0xff] %vm3388_vm1, %v3369_v31  ;;  %v2898_v42 = vadd.f32 %v2897_v25, %v2690_v58  ;;  %v3285_v22 = vpop.f32.mrf.mxu3 }
 0x3ab   : > { %2773 = vmatmul.f32.gmra.mxu0 %v9880_v19 }
 0x3ac   : > { %v3125_v38 = vadd.f32 %v3124_v56, %v2898_v42  ;;  %2992 = vmatmul.f32.gmra.mxu1 %v13298_v35  ;;  %v643_v35 = vld [vmem:[#allocation2 + $0x98] sm:$0xff] }
 0x3ad   : > { %3352 = vmatmul.f32.gmra.mxu3 %v9869_v39 }
 0x3ae   : > { %v3286_v60 = vadd.f32 %v3285_v22, %v3125_v38  ;;  %3191 = vmatmul.f32.gmra.mxu2 %v9869_v39 }
 0x3b0   : > { %v3370_v23 = vadd.f32 %v3286_v60, %v638_v12  ;;  %v2699_v50 = vpop.f32.mrf.mxu0 }
 0x3b1   : > { %v2903_v14 = vpop.f32.mrf.mxu1  ;;  %v3128_v62 = vpop.f32.mrf.mxu2  ;;  %v2700_v16 = vadd.f32 %v2699_v50, %v9909_v13 }
 0x3b2   : > { %3403 = vst.msk [vmem:[#allocation2 + $0x70] sm:$0xff] %vm3388_vm1, %v3370_v23  ;;  %v2904_v45 = vadd.f32 %v2903_v14, %v2695_v34  ;;  %v3289_v21 = vpop.f32.mrf.mxu3 }
 0x3b4   : > { %v3129_v49 = vadd.f32 %v3128_v62, %v2904_v45  ;;  %2998 = vmatmul.f32.gmra.mxu1 %v2336_v55 }
 0x3b6   : > { %v3290_v27 = vadd.f32 %v3289_v21, %v3129_v49  ;;  %v644_v21 = vld [vmem:[#allocation2 + $0xa0] sm:$0xff] }
 0x3b8   : > { %v3371_v17 = vadd.f32 %v3290_v27, %v639_v36  ;;  %v2704_v39 = vpop.f32.mrf.mxu0 }
 0x3b9   : > { %v2909_v32 = vpop.f32.mrf.mxu1  ;;  %v3132_v3 = vpop.f32.mrf.mxu2  ;;  %v2705_v2 = vadd.f32 %v2704_v39, %v9917_v37 }
 0x3ba   : > { %3404 = vst.msk [vmem:[#allocation2 + $0x78] sm:$0xff] %vm3388_vm1, %v3371_v17  ;;  %v2910_v57 = vadd.f32 %v2909_v32, %v2700_v16  ;;  %v3293_v9 = vpop.f32.mrf.mxu3 }
 0x3bc   : > { %v3133_v51 = vadd.f32 %v3132_v3, %v2910_v57  ;;  %v645_v3 = vld [vmem:[#allocation2 + $0xa8] sm:$0xff] }
 0x3be   : > { %v3294_v61 = vadd.f32 %v3293_v9, %v3133_v51 }
 0x3c0   : > { %v3372_v33 = vadd.f32 %v3294_v61, %v640_v10  ;;  %v2709_v19 = vpop.f32.mrf.mxu0 }
 0x3c1   : > { %v2915_v55 = vpop.f32.mrf.mxu1  ;;  %v3136_v13 = vpop.f32.mrf.mxu2  ;;  %v2710_v1 = vadd.f32 %v2709_v19, %v9925_v52 }
 0x3c2   : > { %3405 = vst.msk [vmem:[#allocation2 + $0x80] sm:$0xff] %vm3388_vm1, %v3372_v33  ;;  %v2916_v20 = vadd.f32 %v2915_v55, %v2705_v2  ;;  %v3297_v0 = vpop.f32.mrf.mxu3 }
 0x3c4   : > { %v3137_v48 = vadd.f32 %v3136_v13, %v2916_v20  ;;  %v646_v20 = vld [vmem:[#allocation2 + $0xb0] sm:$0xff] }
 0x3c6   : > { %v3298_v41 = vadd.f32 %v3297_v0, %v3137_v48 }
 0x3c8   : > { %v3373_v18 = vadd.f32 %v3298_v41, %v641_v53  ;;  %v2714_v6 = vpop.f32.mrf.mxu0 }
 0x3c9   : > { %v2921_v24 = vpop.f32.mrf.mxu1  ;;  %v3140_v37 = vpop.f32.mrf.mxu2  ;;  %v2715_v31 = vadd.f32 %v2714_v6, %v9933_v5 }
 0x3ca   : > { %3406 = vst.msk [vmem:[#allocation2 + $0x88] sm:$0xff] %vm3388_vm1, %v3373_v18  ;;  %v2922_v26 = vadd.f32 %v2921_v24, %v2710_v1  ;;  %v3301_v40 = vpop.f32.mrf.mxu3  ;;  %v647_v24 = vld [vmem:[#allocation2 + $0xb8] sm:$0xff] }
 0x3cc   : > { %v3141_v44 = vadd.f32 %v3140_v37, %v2922_v26 }
 0x3ce   : > { %v3302_v58 = vadd.f32 %v3301_v40, %v3141_v44 }
 0x3d0   : > { %v3374_v11 = vadd.f32 %v3302_v58, %v642_v28  ;;  %v2719_v25 = vpop.f32.mrf.mxu0 }
 0x3d1   : > { %v2927_v42 = vpop.f32.mrf.mxu1  ;;  %v3144_v52 = vpop.f32.mrf.mxu2  ;;  %v2720_v60 = vadd.f32 %v2719_v25, %v9941_v43  ;;  %v648_v25 = vld [vmem:[#allocation2 + $0xc0] sm:$0xff] }
 0x3d2   : > { %3407 = vst.msk [vmem:[#allocation2 + $0x90] sm:$0xff] %vm3388_vm1, %v3374_v11  ;;  %v2928_v56 = vadd.f32 %v2927_v42, %v2715_v31  ;;  %v3305_v22 = vpop.f32.mrf.mxu3 }
 0x3d4   : > { %v3145_v38 = vadd.f32 %v3144_v52, %v2928_v56 }
 0x3d6   : > { %v3306_v12 = vadd.f32 %v3305_v22, %v3145_v38 }
 0x3d8   : > { %v3375_v34 = vadd.f32 %v3306_v12, %v643_v35  ;;  %v2724_v23 = vpop.f32.mrf.mxu0 }
 0x3d9   : > { %v2933_v50 = vpop.f32.mrf.mxu1  ;;  %v3148_v5 = vpop.f32.mrf.mxu2  ;;  %v2725_v36 = vadd.f32 %v2724_v23, %v9949_v29 }
 0x3da   : > { %3408 = vst.msk [vmem:[#allocation2 + $0x98] sm:$0xff] %vm3388_vm1, %v3375_v34  ;;  %v2934_v14 = vadd.f32 %v2933_v50, %v2720_v60  ;;  %v3309_v45 = vpop.f32.mrf.mxu3  ;;  %v649_v34 = vld [vmem:[#allocation2 + $0xc8] sm:$0xff] }
 0x3dc   : > { %v3149_v62 = vadd.f32 %v3148_v5, %v2934_v14 }
 0x3de   : > { %v3310_v49 = vadd.f32 %v3309_v45, %v3149_v62 }
 0x3e0   : > { %v3376_v27 = vadd.f32 %v3310_v49, %v644_v21  ;;  %v2729_v16 = vpop.f32.mrf.mxu0 }
 0x3e1   : > { %v2939_v17 = vpop.f32.mrf.mxu1  ;;  %v3152_v43 = vpop.f32.mrf.mxu2  ;;  %v2730_v51 = vadd.f32 %v2729_v16, %v9957_v47 }
 0x3e2   : > { %3409 = vst.msk [vmem:[#allocation2 + $0xa0] sm:$0xff] %vm3388_vm1, %v3376_v27  ;;  %v2940_v39 = vadd.f32 %v2939_v17, %v2725_v36  ;;  %v3313_v32 = vpop.f32.mrf.mxu3  ;;  %v650_v36 = vld [vmem:[#allocation2 + $0xd0] sm:$0xff] }
 0x3e4   : > { %v3153_v57 = vadd.f32 %v3152_v43, %v2940_v39 }
 0x3e6   : > { %v3314_v9 = vadd.f32 %v3313_v32, %v3153_v57 }
 0x3e8   : > { %v3377_v10 = vadd.f32 %v3314_v9, %v645_v3  ;;  %v2734_v61 = vpop.f32.mrf.mxu0  ;;  %v651_v9 = vld [vmem:[#allocation2 + $0xd8] sm:$0xff] }
 0x3e9   : > { %v2945_v2 = vpop.f32.mrf.mxu1  ;;  %v3156_v29 = vpop.f32.mrf.mxu2  ;;  %v2735_v0 = vadd.f32 %v2734_v61, %v9965_v15 }
 0x3ea   : > { %3410 = vst.msk [vmem:[#allocation2 + $0xa8] sm:$0xff] %vm3388_vm1, %v3377_v10  ;;  %v2946_v33 = vadd.f32 %v2945_v2, %v2730_v51  ;;  %v3317_v19 = vpop.f32.mrf.mxu3 }
 0x3ec   : > { %v3157_v55 = vadd.f32 %v3156_v29, %v2946_v33 }
 0x3ee   : > { %v3318_v13 = vadd.f32 %v3317_v19, %v3157_v55 }
 0x3f0   : > { %v3378_v48 = vadd.f32 %v3318_v13, %v646_v20  ;;  %v2739_v53 = vpop.f32.mrf.mxu0  ;;  %v652_v20 = vld [vmem:[#allocation2 + $0xe0] sm:$0xff] }
 0x3f1   : > { %v2951_v41 = vpop.f32.mrf.mxu1  ;;  %v3160_v47 = vpop.f32.mrf.mxu2  ;;  %v2740_v37 = vadd.f32 %v2739_v53, %v9973_v46 }
 0x3f2   : > { %3411 = vst.msk [vmem:[#allocation2 + $0xb0] sm:$0xff] %vm3388_vm1, %v3378_v48  ;;  %v2952_v1 = vadd.f32 %v2951_v41, %v2735_v0  ;;  %v3321_v18 = vpop.f32.mrf.mxu3 }
 0x3f4   : > { %v3161_v6 = vadd.f32 %v3160_v47, %v2952_v1 }
 0x3f6   : > { %v3322_v26 = vadd.f32 %v3321_v18, %v3161_v6  ;;  %v653_v6 = vld [vmem:[#allocation2 + $0xe8] sm:$0xff] }
 0x3f8   : > { %v3379_v40 = vadd.f32 %v3322_v26, %v647_v24  ;;  %v2744_v44 = vpop.f32.mrf.mxu0 }
 0x3f9   : > { %v2957_v28 = vpop.f32.mrf.mxu1  ;;  %v3164_v15 = vpop.f32.mrf.mxu2  ;;  %v2745_v56 = vadd.f32 %v2744_v44, %v9981_v7 }
 0x3fa   : > { %3412 = vst.msk [vmem:[#allocation2 + $0xb8] sm:$0xff] %vm3388_vm1, %v3379_v40  ;;  %v2958_v58 = vadd.f32 %v2957_v28, %v2740_v37  ;;  %v3325_v31 = vpop.f32.mrf.mxu3 }
 0x3fc   : > { %v3165_v11 = vadd.f32 %v3164_v15, %v2958_v58 }
 0x3fe   : > { %v3326_v42 = vadd.f32 %v3325_v31, %v3165_v11  ;;  %v654_v31 = vld [vmem:[#allocation2 + $0xf0] sm:$0xff] }
 0x400   : > { %v3380_v52 = vadd.f32 %v3326_v42, %v648_v25  ;;  %v2749_v22 = vpop.f32.mrf.mxu0 }
 0x401   : > { %v2963_v38 = vpop.f32.mrf.mxu1  ;;  %v3168_v46 = vpop.f32.mrf.mxu2  ;;  %v2750_v50 = vadd.f32 %v2749_v22, %v9989_v8 }
 0x402   : > { %3413 = vst.msk [vmem:[#allocation2 + $0xc0] sm:$0xff] %vm3388_vm1, %v3380_v52  ;;  %v2964_v35 = vadd.f32 %v2963_v38, %v2745_v56  ;;  %v3329_v12 = vpop.f32.mrf.mxu3 }
 0x404   : > { %v3169_v60 = vadd.f32 %v3168_v46, %v2964_v35  ;;  %v655_v35 = vld [vmem:[#allocation2 + $0xf8] sm:$0xff] }
 0x406   : > { %v3330_v23 = vadd.f32 %v3329_v12, %v3169_v60 }
 0x408   : > { %v3381_v14 = vadd.f32 %v3330_v23, %v649_v34  ;;  %v2754_v5 = vpop.f32.mrf.mxu0 }
 0x409   : > { %v2969_v45 = vpop.f32.mrf.mxu1  ;;  %v3172_v7 = vpop.f32.mrf.mxu2  ;;  %v2755_v16 = vadd.f32 %v2754_v5, %v9997_v59 }
 0x40a   : > { %3414 = vst.msk [vmem:[#allocation2 + $0xc8] sm:$0xff] %vm3388_vm1, %v3381_v14  ;;  %v2970_v62 = vadd.f32 %v2969_v45, %v2750_v50  ;;  %v3333_v21 = vpop.f32.mrf.mxu3 }
 0x40c   : > { %v3173_v49 = vadd.f32 %v3172_v7, %v2970_v62 }
 0x40e   : > { %v3334_v27 = vadd.f32 %v3333_v21, %v3173_v49 }
 0x410   : > { %v3382_v17 = vadd.f32 %v3334_v27, %v650_v36  ;;  %v2759_v39 = vpop.f32.mrf.mxu0 }
 0x411   : > { %v2975_v43 = vpop.f32.mrf.mxu1  ;;  %v3176_v8 = vpop.f32.mrf.mxu2  ;;  %v2760_v10 = vadd.f32 %v2759_v39, %v10005_v4 }
 0x412   : > { %3415 = vst.msk [vmem:[#allocation2 + $0xd0] sm:$0xff] %vm3388_vm1, %v3382_v17  ;;  %v2976_v32 = vadd.f32 %v2975_v43, %v2755_v16  ;;  %v3337_v57 = vpop.f32.mrf.mxu3 }
 0x414   : > { %v3177_v3 = vadd.f32 %v3176_v8, %v2976_v32 }
 0x416   : > { %v3338_v51 = vadd.f32 %v3337_v57, %v3177_v3 }
 0x418   : > { %v3383_v61 = vadd.f32 %v3338_v51, %v651_v9  ;;  %v2764_v2 = vpop.f32.mrf.mxu0 }
 0x419   : > { %v2981_v33 = vpop.f32.mrf.mxu1  ;;  %v3180_v59 = vpop.f32.mrf.mxu2  ;;  %v2765_v0 = vadd.f32 %v2764_v2, %v10013_v54 }
 0x41a   : > { %3416 = vst.msk [vmem:[#allocation2 + $0xd8] sm:$0xff] %vm3388_vm1, %v3383_v61  ;;  %v2982_v29 = vadd.f32 %v2981_v33, %v2760_v10  ;;  %v3341_v19 = vpop.f32.mrf.mxu3 }
 0x41c   : > { %v3181_v55 = vadd.f32 %v3180_v59, %v2982_v29 }
 0x41e   : > { %v3342_v13 = vadd.f32 %v3341_v19, %v3181_v55 }
 0x420   : > { %v3384_v48 = vadd.f32 %v3342_v13, %v652_v20  ;;  %v2769_v47 = vpop.f32.mrf.mxu0 }
 0x421   : > { %v2987_v53 = vpop.f32.mrf.mxu1  ;;  %v3184_v1 = vpop.f32.mrf.mxu2  ;;  %v2770_v26 = vadd.f32 %v2769_v47, %v10021_v63 }
 0x422   : > { %3417 = vst.msk [vmem:[#allocation2 + $0xe0] sm:$0xff] %vm3388_vm1, %v3384_v48  ;;  %v2988_v41 = vadd.f32 %v2987_v53, %v2765_v0  ;;  %v3345_v4 = vpop.f32.mrf.mxu3 }
 0x424   : > { %v3185_v18 = vadd.f32 %v3184_v1, %v2988_v41 }
 0x426   : > { %v3346_v24 = vadd.f32 %v3345_v4, %v3185_v18 }
 0x428   : > { %v3385_v37 = vadd.f32 %v3346_v24, %v653_v6  ;;  %v2774_v15 = vpop.f32.mrf.mxu0 }
 0x429   : > { %v2993_v40 = vpop.f32.mrf.mxu1  ;;  %v3188_v28 = vpop.f32.mrf.mxu2  ;;  %v2775_v25 = vadd.f32 %v2774_v15, %v10029_v30 }
 0x42a   : > { %3418 = vst.msk [vmem:[#allocation2 + $0xe8] sm:$0xff] %vm3388_vm1, %v3385_v37  ;;  %v2994_v44 = vadd.f32 %v2993_v40, %v2770_v26  ;;  %v3349_v54 = vpop.f32.mrf.mxu3 }
 0x42c   : > { %v3189_v58 = vadd.f32 %v3188_v28, %v2994_v44 }
 0x42e   : > { %v3350_v11 = vadd.f32 %v3349_v54, %v3189_v58 }
 0x430   : > { %v3386_v42 = vadd.f32 %v3350_v11, %v654_v31 }
 0x431   : > { %v2999_v56 = vpop.f32.mrf.mxu1  ;;  %v3192_v22 = vpop.f32.mrf.mxu2 }
 0x432   : > { %3419 = vst.msk [vmem:[#allocation2 + $0xf0] sm:$0xff] %vm3388_vm1, %v3386_v42  ;;  %v3000_v52 = vadd.f32 %v2999_v56, %v2775_v25  ;;  %v3353_v63 = vpop.f32.mrf.mxu3 }
 0x434   : > { %v3193_v38 = vadd.f32 %v3192_v22, %v3000_v52 }
 0x436   : > { %v3354_v46 = vadd.f32 %v3353_v63, %v3193_v38  ;;  %3424 = sbr.rel (%p8215_p13) target bundleno = 2495 (0x9bf), region = 87 }
 0x438   : > { %v3387_v12 = vadd.f32 %v3354_v46, %v655_v35 }
 0x43a   : > { %3420 = vst.msk [vmem:[#allocation2 + $0xf8] sm:$0xff] %vm3388_vm1, %v3387_v12 }
 0x43b   : > { %v3949_v30 = vld [vmem:[%s12685_s7 + $0x18] sm:$0xff]  ;;  %v3948_v60 = vld [vmem:[%s12685_s7 + $0x10] sm:$0xff]  ;;  %v3947_v34 = vld [vmem:[%s12685_s7 + $0x8] sm:$0xff]  ;;  %s8383_s16 = smov 120   ;;  %vm7874_vm2 = vcmask 64512   ;;  %vm8035_vm3 = vcmask 130112  }
 0x43c   : > { %v10184_v23 = vand.u32 4294901760, %v3949_v30  ;;  %v10186_v50 = vand.u32 4294901760, %v3948_v60  ;;  %v10188_v14 = vand.u32 4294901760, %v3947_v34  ;;  %v3946_v5 = vld [vmem:[%s12685_s7] sm:$0xff]  ;;  %v3426_v36 = vld [vmem:[%s8640_s19 + $0x8] sm:$0xff]  ;;  %v3427_v41 = vld [vmem:[%s8640_s19 + $0x10] sm:$0xff] }
 0x43d   : > { %v3425_v45 = vld [vmem:[%s8640_s19] sm:$0xff]  ;;  %v10195_v7 = vand.u32 4294901760, %v3946_v5  ;;  %v3442_v27 = vld [vmem:[%s8640_s19 + $0x88] sm:$0xff]  ;;  %v3954_v57 = vsel %vm3388_vm1, %v3426_v36, 0  ;;  %v3443_v1 = vld [vmem:[%s8640_s19 + $0x90] sm:$0xff]  ;;  %v3957_v54 = vsel %vm3388_vm1, %v3427_v41, 0 }
 0x43e   : > { %v3441_v62 = vld [vmem:[%s8640_s19 + $0x80] sm:$0xff]  ;;  %v3951_v21 = vsel %vm3388_vm1, %v3425_v45, 0  ;;  %4059 = vmatpush.msra.mxu0 %v10184_v23  ;;  %8219 = vmatpush.msra.mxu2 %v10184_v23  ;;  %v4336_v16 = vsub.f32 %v3949_v30, %v10184_v23  ;;  %v4342_v43 = vsub.f32 %v3948_v60, %v10186_v50  ;;  %v4348_v32 = vsub.f32 %v3947_v34, %v10188_v14  ;;  %v3428_v40 = vld [vmem:[%s8640_s19 + $0x18] sm:$0xff] }
 0x43f   : > { %v3999_v49 = vsel %vm3388_vm1, %v3441_v62, 0  ;;  %v10204_v17 = vand.u32 4294901760, %v3951_v21  ;;  %v10211_v8 = vsub.f32 %v3946_v5, %v10195_v7  ;;  %v4002_v3 = vsel %vm3388_vm1, %v3442_v27, 0  ;;  %v3444_v15 = vld [vmem:[%s8640_s19 + $0x98] sm:$0xff]  ;;  %v3429_v45 = vld [vmem:[%s8640_s19 + $0x20] sm:$0xff] }
 0x440   : > { %v10206_v39 = vand.u32 4294901760, %v3999_v49  ;;  %4061 = vmatpush.msra.mxu0 %v10186_v50  ;;  %8220 = vmatpush.msra.mxu2 %v10186_v50  ;;  %v4337_v9 = vand.u32 4294901760, %v4336_v16  ;;  %v4343_v61 = vand.u32 4294901760, %v4342_v43  ;;  %v4349_v2 = vand.u32 4294901760, %v4348_v32  ;;  %v3445_v62 = vld [vmem:[%s8640_s19 + $0xa0] sm:$0xff] }
 0x441   : > { %v10218_v51 = vsub.f32 %v3951_v21, %v10204_v17  ;;  %v4355_v33 = vand.u32 4294901760, %v10211_v8  ;;  %v10224_v29 = vand.u32 4294901760, %v3954_v57  ;;  %v10226_v59 = vand.u32 4294901760, %v4002_v3 }
 0x442   : > { %v10221_v10 = vsub.f32 %v3999_v49, %v10206_v39  ;;  %4063 = vmatpush.msra.mxu0 %v10188_v14  ;;  %8221 = vmatpush.msra.mxu2 %v10188_v14  ;;  %v4338_v19 = vsub.f32 %v4336_v16, %v4337_v9  ;;  %v4344_v13 = vsub.f32 %v4342_v43, %v4343_v61  ;;  %v4005_v58 = vsel %vm3388_vm1, %v3443_v1, 0 }
 0x443   : > { %v12873_v55 = vand.u32 4294901760, %v10218_v51  ;;  %v4350_v0 = vsub.f32 %v4348_v32, %v4349_v2  ;;  %v10233_v48 = vsub.f32 %v3954_v57, %v10224_v29  ;;  %v10236_v53 = vsub.f32 %v4002_v3, %v10226_v59 }
 0x444   : > { %v12860_v20 = vand.u32 4294901760, %v10221_v10  ;;  %4065 = vmatpush.msra.mxu0 %v10195_v7  ;;  %8222 = vmatpush.msra.mxu2 %v10195_v7  ;;  %v4339_v4 = vand.u32 4294901760, %v4338_v19  ;;  %v4345_v6 = vand.u32 4294901760, %v4344_v13  ;;  %v4356_v24 = vsub.f32 %v10211_v8, %v4355_v33  ;;  %v3446_v19 = vld [vmem:[%s8640_s19 + $0xa8] sm:$0xff] }
 0x445   : > { %v4069_v47 = vsub.f32 %v10218_v51, %v12873_v55  ;;  %v12871_v26 = vand.u32 4294901760, %v10233_v48  ;;  %v12858_v37 = vand.u32 4294901760, %v10236_v53  ;;  %v4351_v31 = vand.u32 4294901760, %v4350_v0  ;;  %v3454_v55 = vld [vmem:[%s8640_s19 + $0xe8] sm:$0xff] }
 0x446   : > { %v4197_v18 = vsub.f32 %v10221_v10, %v12860_v20  ;;  %4502 = vmatpush.msrb.mxu2 %v4336_v16  ;;  %4901 = vmatpush.msrb.mxu0 %v4337_v9  ;;  %v10260_v25 = vand.u32 4294901760, %v3957_v54  ;;  %v10262_v42 = vand.u32 4294901760, %v4005_v58  ;;  %v3960_v52 = vsel %vm3388_vm1, %v3428_v40, 0 }
 0x447   : > { %4340 = vmatpush.msra.mxu1 %v4339_v4  ;;  %8223 = vmatpush.msra.mxu3 %v4339_v4  ;;  %v4070_v44 = vand.u32 4294901760, %v4069_v47  ;;  %v4077_v11 = vsub.f32 %v10233_v48, %v12871_v26  ;;  %v4205_v56 = vsub.f32 %v10236_v53, %v12858_v37  ;;  %v4357_v22 = vand.u32 4294901760, %v4356_v24  ;;  %v3447_v24 = vld [vmem:[%s8640_s19 + $0xb0] sm:$0xff] }
 0x448   : > { %v4198_v28 = vand.u32 4294901760, %v4197_v18  ;;  %4505 = vmatpush.msrb.mxu2 %v4342_v43  ;;  %4905 = vmatpush.msrb.mxu0 %v4343_v61  ;;  %v10269_v63 = vsub.f32 %v3957_v54, %v10260_v25  ;;  %v10272_v38 = vsub.f32 %v4005_v58, %v10262_v42  ;;  %v4008_v35 = vsel %vm3388_vm1, %v3444_v15, 0 }
 0x449   : > { %4071 = vmatmul.f32.vlgmr.msra.gmra.mxu0 %v4070_v44  ;;  %4346 = vmatpush.msra.mxu1 %v4345_v6  ;;  %v4078_v46 = vand.u32 4294901760, %v4077_v11  ;;  %v10275_v12 = vand.u32 4294901760, %v3960_v52  ;;  %v4206_v30 = vand.u32 4294901760, %v4205_v56  ;;  %v10279_v5 = vand.u32 4294901760, %v4008_v35 }
 0x44a   : > { %4199 = vmatmul.f32.vlgmr.msra.gmra.mxu2 %v4198_v28  ;;  %8224 = vmatpush.msra.mxu3 %v4345_v6  ;;  %v12870_v60 = vand.u32 4294901760, %v10269_v63  ;;  %v12857_v34 = vand.u32 4294901760, %v10272_v38  ;;  %v3963_v49 = vsel %vm3388_vm1, %v3429_v45, 0  ;;  %v4014_v13 = vsel %vm3388_vm1, %v3446_v19, 0  ;;  %v3431_v6 = vld [vmem:[%s8640_s19 + $0x30] sm:$0xff] }
 0x44b   : > { %4508 = vmatpush.msrb.mxu2 %v4348_v32  ;;  %4909 = vmatpush.msrb.mxu0 %v4349_v2  ;;  %v10289_v21 = vsub.f32 %v3960_v52, %v10275_v12  ;;  %v10299_v16 = vsub.f32 %v4008_v35, %v10279_v5  ;;  %v10306_v43 = vand.u32 4294901760, %v3963_v49  ;;  %v3430_v2 = vld [vmem:[%s8640_s19 + $0x28] sm:$0xff]  ;;  %v10336_v41 = vand.u32 4294901760, %v4014_v13 }
 0x44c   : > { %4352 = vmatpush.msra.mxu1 %v4351_v31  ;;  %8225 = vmatpush.msra.mxu3 %v4351_v31  ;;  %v4085_v36 = vsub.f32 %v10269_v63, %v12870_v60  ;;  %v4213_v27 = vsub.f32 %v10272_v38, %v12857_v34  ;;  %v3969_v58 = vsel %vm3388_vm1, %v3431_v6, 0  ;;  %v4017_v15 = vsel %vm3388_vm1, %v3447_v24, 0 }
 0x44d   : > { %4511 = vmatpush.msrb.mxu2 %v10211_v8  ;;  %4913 = vmatpush.msrb.mxu0 %v4355_v33  ;;  %v12869_v9 = vand.u32 4294901760, %v10289_v21  ;;  %v12856_v61 = vand.u32 4294901760, %v10299_v16  ;;  %v10348_v44 = vsub.f32 %v4014_v13, %v10336_v41  ;;  %v10362_v35 = vand.u32 4294901760, %v4017_v15  ;;  %v3449_v13 = vld [vmem:[%s8640_s19 + $0xc0] sm:$0xff] }
 0x44e   : > { %4358 = vmatpush.msra.mxu1 %v4357_v22  ;;  %8226 = vmatpush.msra.mxu3 %v4357_v22  ;;  %v4086_v57 = vand.u32 4294901760, %v4085_v36  ;;  %v4214_v3 = vand.u32 4294901760, %v4213_v27  ;;  %v10360_v22 = vand.u32 4294901760, %v3969_v58 }
 0x44f   : > { %4360 = vmatmul.f32.vlgmr.msra.gmra.mxu1 %v10204_v17  ;;  %4424 = vmatmul.f32.vlgmr.msra.gmra.mxu3 %v10206_v39  ;;  %v4093_v8 = vsub.f32 %v10289_v21, %v12869_v9  ;;  %v12853_v11 = vand.u32 4294901760, %v10348_v44  ;;  %13299 = vst [vmem:[#allocation56_spill] sm:$0xff] %v10362_v35  ;;  %v10378_v36 = vsub.f32 %v4017_v15, %v10362_v35 }
 0x450   : > { %4686 = vmatpush.msrb.mxu3 %v10184_v23  ;;  %5056 = vmatpush.msrb.mxu1 %v10184_v23  ;;  %v4011_v23 = vsel %vm3388_vm1, %v3445_v62, 0 }
 0x451   : > { %4079 = vmatmul.f32.gmra.mxu0 %v4078_v46  ;;  %v10308_v32 = vand.u32 4294901760, %v4011_v23  ;;  %v4094_v1 = vand.u32 4294901760, %v4093_v8  ;;  %v3432_v46 = vld [vmem:[%s8640_s19 + $0x38] sm:$0xff]  ;;  %v4237_v62 = vsub.f32 %v10348_v44, %v12853_v11  ;;  %v3435_v11 = vld [vmem:[%s8640_s19 + $0x50] sm:$0xff] }
 0x452   : > { %4207 = vmatmul.f32.gmra.mxu2 %v4206_v30  ;;  %4688 = vmatpush.msrb.mxu3 %v10186_v50  ;;  %v3448_v30 = vld [vmem:[%s8640_s19 + $0xb8] sm:$0xff]  ;;  %v3972_v27 = vsel %vm3388_vm1, %v3432_v46, 0 }
 0x453   : > { %5058 = vmatpush.msrb.mxu1 %v10186_v50  ;;  %v10321_v50 = vsub.f32 %v3963_v49, %v10306_v43  ;;  %v10331_v33 = vsub.f32 %v4011_v23, %v10308_v32  ;;  %v10375_v49 = vsub.f32 %v3969_v58, %v10360_v22  ;;  %v4020_v23 = vsel %vm3388_vm1, %v3448_v30, 0 }
 0x454   : > { %4690 = vmatpush.msrb.mxu3 %v10188_v14  ;;  %v10386_v8 = vand.u32 4294901760, %v4020_v23 }
 0x455   : > { %5060 = vmatpush.msrb.mxu1 %v10188_v14  ;;  %v3966_v14 = vsel %vm3388_vm1, %v3430_v2, 0  ;;  %v12867_v47 = vand.u32 4294901760, %v10321_v50  ;;  %v12855_v18 = vand.u32 4294901760, %v10331_v33  ;;  %v4238_v2 = vand.u32 4294901760, %v4237_v62  ;;  %v3450_v62 = vld [vmem:[%s8640_s19 + $0xc8] sm:$0xff] }
 0x456   : > { %4692 = vmatpush.msrb.mxu3 %v10195_v7  ;;  %v10334_v0 = vand.u32 4294901760, %v3966_v14  ;;  %v12864_v19 = vand.u32 4294901760, %v10375_v49  ;;  %13300 = vst [vmem:[#allocation57_spill] sm:$0xff] %v10386_v8  ;;  %v10402_v24 = vsub.f32 %v4020_v23, %v10386_v8 }
 0x457   : > { %5062 = vmatpush.msrb.mxu1 %v10195_v7  ;;  %4428 = vmatmul.f32.gmra.mxu3 %v10226_v59  ;;  %v4221_v7 = vsub.f32 %v10299_v16, %v12856_v61  ;;  %v4101_v28 = vsub.f32 %v10321_v50, %v12867_v47  ;;  %v4229_v54 = vsub.f32 %v10331_v33, %v12855_v18  ;;  %v3981_v61 = vsel %vm3388_vm1, %v3435_v11, 0  ;;  %v3452_v11 = vld [vmem:[%s8640_s19 + $0xd8] sm:$0xff]  ;;  %v3495_v47 = vld [vmem:[%s8645_s17 + $0x30] sm:$0xff] }
 0x458   : > { %4364 = vmatmul.f32.gmra.mxu1 %v10224_v29  ;;  %v10345_v40 = vsub.f32 %v3966_v14, %v10334_v0  ;;  %v12852_v14 = vand.u32 4294901760, %v10378_v36  ;;  %13301 = vst [vmem:[#allocation58_spill] sm:$0xff] %v10402_v24  ;;  %v12854_v46 = vand.u32 4294901760, %v10402_v24 }
 0x459   : > { %4087 = vmatmul.f32.gmra.mxu0 %v4086_v57  ;;  %v4222_v4 = vand.u32 4294901760, %v4221_v7  ;;  %v4102_v56 = vand.u32 4294901760, %v4101_v28  ;;  %v4230_v52 = vand.u32 4294901760, %v4229_v54  ;;  %v3433_v7 = vld [vmem:[%s8640_s19 + $0x40] sm:$0xff]  ;;  %v4023_v54 = vsel %vm3388_vm1, %v3449_v13, 0 }
 0x45a   : > { %4215 = vmatmul.f32.gmra.mxu2 %v4214_v3  ;;  %v12865_v31 = vand.u32 4294901760, %v10345_v40  ;;  %v10382_v3 = vand.u32 4294901760, %v3972_v27  ;;  %v4245_v6 = vsub.f32 %v10378_v36, %v12852_v14  ;;  %v3975_v28 = vsel %vm3388_vm1, %v3433_v7, 0 }
 0x45b   : > { %v10407_v15 = vand.u32 4294901760, %v3975_v28  ;;  %v10410_v30 = vand.u32 4294901760, %v4023_v54  ;;  %v4026_v13 = vsel %vm3388_vm1, %v3450_v62, 0  ;;  %v8382_v62 = vmov 0  }
 0x45c   : > { %v4109_v45 = vsub.f32 %v10345_v40, %v12865_v31  ;;  %8287 = vset.pattern.permute.xlu0 %v8382_v62  ;;  %8289 = vset.pattern.permute.xlu2 %v8382_v62 }
 0x45d   : > { %13302 = vst [vmem:[#allocation59_spill] sm:$0xff] %v10410_v30  ;;  %v10420_v23 = vsub.f32 %v3975_v28, %v10407_v15  ;;  %8288 = vset.pattern.permute.xlu1 %v8382_v62 }
 0x45e   : > { %v4110_v57 = vand.u32 4294901760, %v4109_v45  ;;  %v3434_v45 = vld [vmem:[%s8640_s19 + $0x48] sm:$0xff] }
 0x45f   : > { %4432 = vmatmul.f32.gmra.mxu3 %v10262_v42  ;;  %v3978_v7 = vsel %vm3388_vm1, %v3434_v45, 0 }
 0x460   : > { %4368 = vmatmul.f32.gmra.mxu1 %v10260_v25 }
 0x461   : > { %4095 = vmatmul.f32.gmra.mxu0 %v4094_v1  ;;  %v10393_v1 = vsub.f32 %v3972_v27, %v10382_v3 }
 0x462   : > { %4223 = vmatmul.f32.gmra.mxu2 %v4222_v4  ;;  %v4117_v4 = vsub.f32 %v10375_v49, %v12864_v19 }
 0x463   : > { %v12862_v58 = vand.u32 4294901760, %v10393_v1 }
 0x465   : > { %v4125_v27 = vsub.f32 %v10393_v1, %v12862_v58 }
 0x467   : > { %4436 = vmatmul.f32.gmra.mxu3 %v10279_v5 }
 0x468   : > { %4372 = vmatmul.f32.gmra.mxu1 %v10275_v12 }
 0x469   : > { %4103 = vmatmul.f32.gmra.mxu0 %v4102_v56  ;;  %v4118_v56 = vand.u32 4294901760, %v4117_v4  ;;  %v4126_v4 = vand.u32 4294901760, %v4125_v27 }
 0x46a   : > { %4231 = vmatmul.f32.gmra.mxu2 %v4230_v52  ;;  %v4246_v52 = vand.u32 4294901760, %v4245_v6  ;;  %v12861_v6 = vand.u32 4294901760, %v10420_v23 }
 0x46c   : > { %v4133_v45 = vsub.f32 %v10420_v23, %v12861_v6  ;;  %v3436_v6 = vld [vmem:[%s8640_s19 + $0x58] sm:$0xff] }
 0x46f   : > { %4440 = vmatmul.f32.gmra.mxu3 %v10308_v32 }
 0x470   : > { %4376 = vmatmul.f32.gmra.mxu1 %v10306_v43 }
 0x471   : > { %4111 = vmatmul.f32.gmra.mxu0 %v4110_v57  ;;  %v4253_v57 = vsub.f32 %v10402_v24, %v12854_v46  ;;  %v3489_v46 = vld [vmem:[%s8645_s17] sm:$0xff] }
 0x472   : > { %4239 = vmatmul.f32.gmra.mxu2 %v4238_v2  ;;  %v10426_v2 = vsub.f32 %v4023_v54, %v10410_v30  ;;  %v3451_v54 = vld [vmem:[%s8640_s19 + $0xd0] sm:$0xff]  ;;  %3523 = vperm.xlu0 %8287, %v3489_v46  }
 0x473   : > { %v4254_v28 = vand.u32 4294901760, %v4253_v57  ;;  %v4029_v34 = vsel %vm3388_vm1, %v3451_v54, 0 }
 0x474   : > { %13303 = vst [vmem:[#allocation60_spill] sm:$0xff] %v10426_v2  ;;  %v12859_v14 = vand.u32 4294901760, %v10426_v2 }
 0x476   : > { %v4261_v27 = vsub.f32 %v10426_v2, %v12859_v14 }
 0x477   : > { %4444 = vmatmul.f32.gmra.mxu3 %v10336_v41 }
 0x478   : > { %4380 = vmatmul.f32.gmra.mxu1 %v10334_v0  ;;  %v4262_v37 = vand.u32 4294901760, %v4261_v27  ;;  %v3984_v27 = vsel %vm3388_vm1, %v3436_v6, 0  ;;  %v3493_v6 = vld [vmem:[%s8645_s17 + $0x20] sm:$0xff] }
 0x479   : > { %4119 = vmatmul.f32.gmra.mxu0 %v4118_v56  ;;  %v10432_v56 = vand.u32 4294901760, %v3978_v7  ;;  %3543 = vperm.xlu2 %8289, %v3493_v6  }
 0x47a   : > { %4247 = vmatmul.f32.gmra.mxu2 %v4246_v52  ;;  %v10434_v52 = vand.u32 4294901760, %v4026_v13 }
 0x47b   : > { %v10448_v57 = vsub.f32 %v3978_v7, %v10432_v56  ;;  %v10459_v7 = vand.u32 4294901760, %v4029_v34 }
 0x47c   : > { %13304 = vst [vmem:[#allocation61_spill] sm:$0xff] %v10434_v52  ;;  %v10451_v18 = vsub.f32 %v4026_v13, %v10434_v52  ;;  %v3490_v13 = vld [vmem:[%s8645_s17 + $0x8] sm:$0xff] }
 0x47d   : > { %v12863_v14 = vand.u32 4294901760, %v10448_v57  ;;  %13306 = vst [vmem:[#allocation63_spill] sm:$0xff] %v10459_v7  ;;  %v10476_v62 = vsub.f32 %v4029_v34, %v10459_v7  ;;  %3528 = vperm.xlu0 %8287, %v3490_v13   ;;  %v3453_v34 = vld [vmem:[%s8640_s19 + $0xe0] sm:$0xff] }
 0x47e   : > { %13305 = vst [vmem:[#allocation62_spill] sm:$0xff] %v10451_v18  ;;  %v12866_v20 = vand.u32 4294901760, %v10451_v18  ;;  %v4035_v9 = vsel %vm3388_vm1, %v3453_v34, 0  ;;  %v3498_v34 = vld [vmem:[%s8645_s17 + $0x48] sm:$0xff] }
 0x47f   : > { %4448 = vmatmul.f32.gmra.mxu3 %v10362_v35  ;;  %v4141_v54 = vsub.f32 %v10448_v57, %v12863_v14  ;;  %13307 = vst [vmem:[#allocation64_spill] sm:$0xff] %v10476_v62  ;;  %v12872_v19 = vand.u32 4294901760, %v10476_v62  ;;  %v10510_v26 = vand.u32 4294901760, %v4035_v9 }
 0x480   : > { %4384 = vmatmul.f32.gmra.mxu1 %v10360_v22 }
 0x481   : > { %4127 = vmatmul.f32.gmra.mxu0 %v4126_v4  ;;  %v4134_v4 = vand.u32 4294901760, %v4133_v45  ;;  %v4269_v45 = vsub.f32 %v10451_v18, %v12866_v20  ;;  %v4142_v58 = vand.u32 4294901760, %v4141_v54  ;;  %v3437_v20 = vld [vmem:[%s8640_s19 + $0x60] sm:$0xff]  ;;  %v4277_v54 = vsub.f32 %v10476_v62, %v12872_v19  ;;  %13310 = vst [vmem:[#allocation67_spill] sm:$0xff] %v10510_v26  ;;  %v3438_v19 = vld [vmem:[%s8640_s19 + $0x68] sm:$0xff]  ;;  %v3455_v18 = vld [vmem:[%s8640_s19 + $0xf0] sm:$0xff] }
 0x482   : > { %4255 = vmatmul.f32.gmra.mxu2 %v4254_v28  ;;  %v10455_v28 = vand.u32 4294901760, %v3981_v61  ;;  %v10529_v62 = vsub.f32 %v4035_v9, %v10510_v26  ;;  %v3497_v9 = vld [vmem:[%s8645_s17 + $0x40] sm:$0xff] }
 0x483   : > { %v4270_v14 = vand.u32 4294901760, %v4269_v45 }
 0x484   : > { %v10467_v46 = vsub.f32 %v3981_v61, %v10455_v28  ;;  %v4032_v61 = vsel %vm3388_vm1, %v3452_v11, 0  ;;  %13311 = vst [vmem:[#allocation68_spill] sm:$0xff] %v10529_v62 }
 0x485   : > { %v10484_v31 = vand.u32 4294901760, %v4032_v61  ;;  %3553 = vperm.xlu0 %8287, %v3495_v47  }
 0x487   : > { %4452 = vmatmul.f32.gmra.mxu3 %v10386_v8  ;;  %13308 = vst [vmem:[#allocation65_spill] sm:$0xff] %v10484_v31  ;;  %v10502_v45 = vsub.f32 %v4032_v61, %v10484_v31  ;;  %v3491_v61 = vld [vmem:[%s8645_s17 + $0x10] sm:$0xff] }
 0x488   : > { %4388 = vmatmul.f32.gmra.mxu1 %v10382_v3  ;;  %3533 = vperm.xlu1 %8288, %v3491_v61   ;;  %v4038_v61 = vsel %vm3388_vm1, %v3454_v55, 0  ;;  %v3501_v55 = vld [vmem:[%s8645_s17 + $0x60] sm:$0xff] }
 0x489   : > { %4135 = vmatmul.f32.gmra.mxu0 %v4134_v4  ;;  %v10481_v4 = vand.u32 4294901760, %v3984_v27  ;;  %13309 = vst [vmem:[#allocation66_spill] sm:$0xff] %v10502_v45 }
 0x48a   : > { %4263 = vmatmul.f32.gmra.mxu2 %v4262_v37  ;;  %v12868_v37 = vand.u32 4294901760, %v10467_v46 }
 0x48b   : > { %v10496_v13 = vsub.f32 %v3984_v27, %v10481_v4 }
 0x48c   : > { %v4149_v11 = vsub.f32 %v10467_v46, %v12868_v37  ;;  %v3987_v37 = vsel %vm3388_vm1, %v3437_v20, 0  ;;  %v3494_v20 = vld [vmem:[%s8645_s17 + $0x28] sm:$0xff] }
 0x48d   : > { %v12876_v6 = vand.u32 4294901760, %v10496_v13  ;;  %v10508_v60 = vand.u32 4294901760, %v3987_v37  ;;  %3548 = vperm.xlu2 %8289, %v3494_v20   ;;  %v3990_v20 = vsel %vm3388_vm1, %v3438_v19, 0  ;;  %3568 = vperm.xlu0 %8287, %v3498_v34   ;;  %v3492_v19 = vld [vmem:[%s8645_s17 + $0x18] sm:$0xff] }
 0x48e   : > { %v4150_v27 = vand.u32 4294901760, %v4149_v11 }
 0x48f   : > { %4456 = vmatmul.f32.gmra.mxu3 %v10410_v30  ;;  %v4157_v47 = vsub.f32 %v10496_v13, %v12876_v6 }
 0x490   : > { %4392 = vmatmul.f32.gmra.mxu1 %v10407_v15  ;;  %3538 = vperm.xlu1 %8288, %v3492_v19  }
 0x491   : > { %4143 = vmatmul.f32.gmra.mxu0 %v4142_v58  ;;  %v4278_v58 = vand.u32 4294901760, %v4277_v54  ;;  %v10526_v54 = vsub.f32 %v3987_v37, %v10508_v60  ;;  %v10537_v37 = vand.u32 4294901760, %v4038_v61 }
 0x492   : > { %4271 = vmatmul.f32.gmra.mxu2 %v4270_v14  ;;  %v12877_v14 = vand.u32 4294901760, %v10502_v45 }
 0x494   : > { %v4285_v11 = vsub.f32 %v10502_v45, %v12877_v14  ;;  %v12886_v14 = vand.u32 4294901760, %v10526_v54  ;;  %v12891_v45 = vand.u32 4294901760, %v10529_v62 }
 0x495   : > { %3563 = vperm.xlu2 %8289, %v3497_v9   ;;  %v4041_v9 = vsel %vm3388_vm1, %v3455_v18, 0  ;;  %3583 = vperm.xlu0 %8287, %v3501_v55   ;;  %v3504_v18 = vld [vmem:[%s8645_s17 + $0x78] sm:$0xff] }
 0x496   : > { %v4286_v6 = vand.u32 4294901760, %v4285_v11  ;;  %v4293_v11 = vsub.f32 %v10529_v62, %v12891_v45  ;;  %v10564_v2 = vand.u32 4294901760, %v4041_v9  ;;  %v3440_v45 = vld [vmem:[%s8640_s19 + $0x78] sm:$0xff] }
 0x497   : > { %4460 = vmatmul.f32.gmra.mxu3 %v10434_v52  ;;  %v3439_v52 = vld [vmem:[%s8640_s19 + $0x70] sm:$0xff]  ;;  %v3456_v62 = vld [vmem:[%s8640_s19 + $0xf8] sm:$0xff]  ;;  %v3996_v8 = vsel %vm3388_vm1, %v3440_v45, 0 }
 0x498   : > { %4396 = vmatmul.f32.gmra.mxu1 %v10432_v56  ;;  %13313 = vst [vmem:[#allocation70_spill] sm:$0xff] %v10564_v2  ;;  %v3499_v45 = vld [vmem:[%s8645_s17 + $0x50] sm:$0xff] }
 0x499   : > { %4151 = vmatmul.f32.gmra.mxu0 %v4150_v27  ;;  %v4158_v27 = vand.u32 4294901760, %v4157_v47  ;;  %v4165_v47 = vsub.f32 %v10526_v54, %v12886_v14  ;;  %v4294_v14 = vand.u32 4294901760, %v4293_v11 }
 0x49a   : > { %4279 = vmatmul.f32.gmra.mxu2 %v4278_v58  ;;  %v10533_v58 = vand.u32 4294901760, %v3990_v20 }
 0x49b   : > { %v4166_v19 = vand.u32 4294901760, %v4165_v47 }
 0x49c   : > { %v10547_v34 = vsub.f32 %v3990_v20, %v10533_v58  ;;  %v3993_v20 = vsel %vm3388_vm1, %v3439_v52, 0  ;;  %v3500_v52 = vld [vmem:[%s8645_s17 + $0x58] sm:$0xff] }
 0x49d   : > { %3578 = vperm.xlu2 %8289, %v3500_v52   ;;  %3598 = vperm.xlu0 %8287, %v3504_v18   ;;  %v3507_v18 = vld [vmem:[%s8645_s17 + $0x90] sm:$0xff] }
 0x49f   : > { %4464 = vmatmul.f32.gmra.mxu3 %v10459_v7  ;;  %v10556_v7 = vsub.f32 %v4038_v61, %v10537_v37  ;;  %v3496_v61 = vld [vmem:[%s8645_s17 + $0x38] sm:$0xff] }
 0x4a0   : > { %4400 = vmatmul.f32.gmra.mxu1 %v10455_v28  ;;  %3558 = vperm.xlu1 %8288, %v3496_v61   ;;  %v10589_v61 = vand.u32 4294901760, %v3996_v8 }
 0x4a1   : > { %4159 = vmatmul.f32.gmra.mxu0 %v4158_v27  ;;  %13312 = vst [vmem:[#allocation69_spill] sm:$0xff] %v10556_v7  ;;  %v10561_v27 = vand.u32 4294901760, %v3993_v20  ;;  %v12901_v30 = vand.u32 4294901760, %v10556_v7 }
 0x4a2   : > { %4287 = vmatmul.f32.gmra.mxu2 %v4286_v6  ;;  %v12898_v6 = vand.u32 4294901760, %v10547_v34 }
 0x4a3   : > { %v10577_v47 = vsub.f32 %v3993_v20, %v10561_v27  ;;  %v4301_v11 = vsub.f32 %v10556_v7, %v12901_v30 }
 0x4a4   : > { %v4173_v55 = vsub.f32 %v10547_v34, %v12898_v6  ;;  %v4044_v6 = vsel %vm3388_vm1, %v3456_v62, 0  ;;  %v3503_v62 = vld [vmem:[%s8645_s17 + $0x70] sm:$0xff] }
 0x4a5   : > { %v12908_v52 = vand.u32 4294901760, %v10577_v47  ;;  %v10591_v24 = vand.u32 4294901760, %v4044_v6  ;;  %3593 = vperm.xlu2 %8289, %v3503_v62   ;;  %3613 = vperm.xlu0 %8287, %v3507_v18   ;;  %v3502_v18 = vld [vmem:[%s8645_s17 + $0x68] sm:$0xff] }
 0x4a6   : > { %v4174_v20 = vand.u32 4294901760, %v4173_v55 }
 0x4a7   : > { %4468 = vmatmul.f32.gmra.mxu3 %v10484_v31  ;;  %v10583_v31 = vsub.f32 %v4041_v9, %v10564_v2  ;;  %13315 = vst [vmem:[#allocation72_spill] sm:$0xff] %v10591_v24  ;;  %v3941_v9 = vld [vmem:[%s12683_s5 + $0x18] sm:$0xff]  ;;  %v4181_v55 = vsub.f32 %v10577_v47, %v12908_v52  ;;  %v10617_v35 = vsub.f32 %v4044_v6, %v10591_v24 }
 0x4a8   : > { %4404 = vmatmul.f32.gmra.mxu1 %v10481_v4  ;;  %v10596_v30 = vand.u32 4294901760, %v3941_v9  ;;  %3573 = vperm.xlu1 %8288, %v3499_v45   ;;  %v3506_v45 = vld [vmem:[%s8645_s17 + $0x88] sm:$0xff] }
 0x4a9   : > { %4167 = vmatmul.f32.gmra.mxu0 %v4166_v19  ;;  %13314 = vst [vmem:[#allocation71_spill] sm:$0xff] %v10583_v31  ;;  %v4302_v19 = vand.u32 4294901760, %v4301_v11  ;;  %v12911_v6 = vand.u32 4294901760, %v10617_v35 }
 0x4aa   : > { %4295 = vmatmul.f32.gmra.mxu2 %v4294_v14  ;;  %v12909_v14 = vand.u32 4294901760, %v10583_v31  ;;  %v10608_v11 = vsub.f32 %v3941_v9, %v10596_v30  ;;  %13316 = vst [vmem:[#allocation73_spill] sm:$0xff] %v10617_v35  ;;  %5931 = vmatpush.msra.mxu1 %v10596_v30 }
 0x4ab   : > { %5304 = vmatpush.msra.mxu2 %v10596_v30 }
 0x4ac   : > { %v4309_v7 = vsub.f32 %v10583_v31, %v12909_v14  ;;  %v12910_v52 = vand.u32 4294901760, %v10608_v11  ;;  %5747 = vmatpush.msra.mxu0 %v10608_v11  ;;  %v3510_v14 = vld [vmem:[%s8645_s17 + $0xa8] sm:$0xff]  ;;  %v13344_v31 = vand.u32 4294901760, %v10547_v34 }
 0x4ad   : > { %3608 = vperm.xlu2 %8289, %v3506_v45   ;;  %3628 = vperm.xlu0 %8287, %v3510_v14   ;;  %v3512_v14 = vld [vmem:[%s8645_s17 + $0xb8] sm:$0xff] }
 0x4af   : > { %4472 = vmatmul.f32.gmra.mxu3 %v10510_v26  ;;  %v10614_v26 = vsub.f32 %v3996_v8, %v10589_v61  ;;  %v4310_v8 = vand.u32 4294901760, %v4309_v7 }
 0x4b0   : > { %4408 = vmatmul.f32.gmra.mxu1 %v10508_v60  ;;  %3588 = vperm.xlu1 %8288, %v3502_v18   ;;  %v3508_v18 = vld [vmem:[%s8645_s17 + $0x98] sm:$0xff] }
 0x4b1   : > { %4175 = vmatmul.f32.gmra.mxu0 %v4174_v20  ;;  %v5583_v20 = vsub.f32 %v10608_v11, %v12910_v52  ;;  %v12912_v9 = vand.u32 4294901760, %v10614_v26 }
 0x4b2   : > { %4303 = vmatmul.f32.gmra.mxu2 %v4302_v19  ;;  %v4182_v19 = vand.u32 4294901760, %v4181_v55  ;;  %v4317_v55 = vsub.f32 %v10617_v35, %v12911_v6  ;;  %v13319_v6 = vand.u32 4294901760, %v10233_v48 }
 0x4b3   : > { %v5584_v62 = vand.u32 4294901760, %v5583_v20  ;;  %v4189_v7 = vsub.f32 %v10614_v26, %v12912_v9  ;;  %v3514_v9 = vld [vmem:[%s8645_s17 + $0xc8] sm:$0xff] }
 0x4b4   : > { %v4318_v52 = vand.u32 4294901760, %v4317_v55 }
 0x4b5   : > { %5585 = vmatpush.msra.mxu3 %v5584_v62  ;;  %v4190_v20 = vand.u32 4294901760, %v4189_v7  ;;  %v3513_v62 = vld [vmem:[%s8645_s17 + $0xc0] sm:$0xff]  ;;  %v3516_v7 = vld [vmem:[%s8645_s17 + $0xd8] sm:$0xff] }
 0x4b6   : > { %3643 = vperm.xlu0 %8287, %v3513_v62   ;;  %v3511_v62 = vld [vmem:[%s8645_s17 + $0xb0] sm:$0xff] }
 0x4b7   : > { %4476 = vmatmul.f32.gmra.mxu3 %v10537_v37 }
 0x4b8   : > { %4412 = vmatmul.f32.gmra.mxu1 %v10533_v58 }
 0x4b9   : > { %4183 = vmatmul.f32.gmra.mxu0 %v4182_v19  ;;  %v3509_v19 = vld [vmem:[%s8645_s17 + $0xa0] sm:$0xff] }
 0x4ba   : > { %4311 = vmatmul.f32.gmra.mxu2 %v4310_v8  ;;  %v3505_v8 = vld [vmem:[%s8645_s17 + $0x80] sm:$0xff]  ;;  %3623 = vperm.xlu2 %8289, %v3509_v19   ;;  %v13317_v19 = vand.u32 4294901760, %v10218_v51 }
 0x4bb   : > { %3603 = vperm.xlu1 %8288, %v3505_v8   ;;  %v3515_v8 = vld [vmem:[%s8645_s17 + $0xd0] sm:$0xff] }
 0x4be   : > { %3658 = vperm.xlu0 %8287, %v3516_v7  }
 0x4bf   : > { %4480 = vmatmul.f32.gmra.mxu3 %v10564_v2  ;;  %v13327_v2 = vand.u32 4294901760, %v10345_v40 }
 0x4c0   : > { %4416 = vmatmul.f32.gmra.mxu1 %v10561_v27 }
 0x4c1   : > { %4191 = vmatmul.f32.gmra.mxu0 %v4190_v20 }
 0x4c2   : > { %4319 = vmatmul.f32.gmra.mxu2 %v4318_v52  ;;  %3638 = vperm.xlu2 %8289, %v3512_v14   ;;  %v3519_v14 = vld [vmem:[%s8645_s17 + $0xf0] sm:$0xff] }
 0x4c3   : > { %3618 = vperm.xlu1 %8288, %v3508_v18  }
 0x4c6   : > { %v10643_v45 = vpop.f32.mrf.mxu0  ;;  %3673 = vperm.xlu0 %8287, %v3519_v14   ;;  %v13321_v14 = vand.u32 4294901760, %v10269_v63 }
 0x4c7   : > { %4484 = vmatmul.f32.gmra.mxu3 %v10591_v24  ;;  %v3714_v24 = vld [vmem:[%s8650_s20 + $0x8] sm:$0xff] }
 0x4c8   : > { %4420 = vmatmul.f32.gmra.mxu1 %v10589_v61 }
 0x4c9   : > { %4915 = vmatmul.f32.vlgmr.msrb.gmra.mxu0 %v10204_v17 }
 0x4ca   : > { %4514 = vmatmul.f32.vlgmr.msrb.gmra.mxu2 %v10218_v51  ;;  %3653 = vperm.xlu2 %8289, %v3515_v8   ;;  %v3518_v8 = vld [vmem:[%s8645_s17 + $0xe8] sm:$0xff] }
 0x4cb   : > { %3633 = vperm.xlu1 %8288, %v3511_v62  }
 0x4cc   : > { %v10652_v55 = vpop.f32.mrf.mxu1 }
 0x4cd   : > { %v4200_v52 = vpop.f32.mrf.mxu2 }
 0x4ce   : > { %v10654_v20 = vpop.f32.mrf.mxu0  ;;  %3752 = vperm.xlu0 %8287, %v3714_v24  }
 0x4cf   : > { %4696 = vmatmul.f32.vlgmr.msrb.gmra.mxu3 %v13317_v19 }
 0x4d0   : > { %5064 = vmatmul.f32.vlgmr.msrb.gmra.mxu1 %v10204_v17 }
 0x4d1   : > { %4919 = vmatmul.f32.gmra.mxu0 %v10224_v29 }
 0x4d2   : > { %4519 = vmatmul.f32.gmra.mxu2 %v10233_v48  ;;  %v4425_v18 = vpop.f32.mrf.mxu3  ;;  %3668 = vperm.xlu2 %8289, %v3518_v8   ;;  %v3517_v8 = vld [vmem:[%s8645_s17 + $0xe0] sm:$0xff] }
 0x4d3   : > { %v10664_v7 = vadd.f32 %v4425_v18, %v4200_v52  ;;  %3648 = vperm.xlu1 %8288, %v3514_v9   ;;  %v3713_v18 = vld [vmem:[%s8650_s20] sm:$0xff] }
 0x4d5   : > { %13318 = vst [vmem:[#allocation74_spill] sm:$0xff] %v10664_v7  ;;  %v4208_v51 = vpop.f32.mrf.mxu2  ;;  %v10666_v19 = vpop.f32.mrf.mxu1  ;;  %v3717_v7 = vld [vmem:[%s8650_s20 + $0x20] sm:$0xff] }
 0x4d6   : > { %v10668_v17 = vpop.f32.mrf.mxu0  ;;  %3767 = vperm.xlu0 %8287, %v3717_v7  }
 0x4d7   : > { %4702 = vmatmul.f32.gmra.mxu3 %v13319_v6 }
 0x4d8   : > { %5068 = vmatmul.f32.gmra.mxu1 %v10224_v29 }
 0x4d9   : > { %4923 = vmatmul.f32.gmra.mxu0 %v10260_v25 }
 0x4da   : > { %4524 = vmatmul.f32.gmra.mxu2 %v10269_v63  ;;  %v4429_v52 = vpop.f32.mrf.mxu3  ;;  %3747 = vperm.xlu2 %8289, %v3713_v18   ;;  %v3520_v18 = vld [vmem:[%s8645_s17 + $0xf8] sm:$0xff] }
 0x4db   : > { %v10678_v62 = vadd.f32 %v4429_v52, %v4208_v51  ;;  %3663 = vperm.xlu1 %8288, %v3517_v8   ;;  %v13323_v52 = vand.u32 4294901760, %v10289_v21 }
 0x4dd   : > { %13320 = vst [vmem:[#allocation75_spill] sm:$0xff] %v10678_v62  ;;  %v4216_v48 = vpop.f32.mrf.mxu2  ;;  %v10680_v6 = vpop.f32.mrf.mxu1  ;;  %v3720_v62 = vld [vmem:[%s8650_s20 + $0x38] sm:$0xff] }
 0x4de   : > { %v10682_v29 = vpop.f32.mrf.mxu0  ;;  %3782 = vperm.xlu0 %8287, %v3720_v62   ;;  %v3715_v62 = vld [vmem:[%s8650_s20 + $0x10] sm:$0xff] }
 0x4df   : > { %4708 = vmatmul.f32.gmra.mxu3 %v13321_v14  ;;  %v3716_v14 = vld [vmem:[%s8650_s20 + $0x18] sm:$0xff] }
 0x4e0   : > { %5072 = vmatmul.f32.gmra.mxu1 %v10260_v25 }
 0x4e1   : > { %4927 = vmatmul.f32.gmra.mxu0 %v10275_v12 }
 0x4e2   : > { %4529 = vmatmul.f32.gmra.mxu2 %v10289_v21  ;;  %v4433_v24 = vpop.f32.mrf.mxu3  ;;  %3762 = vperm.xlu2 %8289, %v3716_v14   ;;  %v13325_v14 = vand.u32 4294901760, %v10321_v50 }
 0x4e3   : > { %v10692_v9 = vadd.f32 %v4433_v24, %v4216_v48  ;;  %3678 = vperm.xlu1 %8288, %v3520_v18   ;;  %v3719_v18 = vld [vmem:[%s8650_s20 + $0x30] sm:$0xff] }
 0x4e5   : > { %13322 = vst [vmem:[#allocation76_spill] sm:$0xff] %v10692_v9  ;;  %v4224_v63 = vpop.f32.mrf.mxu2  ;;  %v10694_v51 = vpop.f32.mrf.mxu1 }
 0x4e6   : > { %v10696_v25 = vpop.f32.mrf.mxu0 }
 0x4e7   : > { %4714 = vmatmul.f32.gmra.mxu3 %v13323_v52 }
 0x4e8   : > { %5076 = vmatmul.f32.gmra.mxu1 %v10275_v12  ;;  %v3940_v12 = vld [vmem:[%s12683_s5 + $0x10] sm:$0xff] }
 0x4e9   : > { %4931 = vmatmul.f32.gmra.mxu0 %v10306_v43  ;;  %v10715_v52 = vand.u32 4294901760, %v3940_v12 }
 0x4ea   : > { %4534 = vmatmul.f32.gmra.mxu2 %v10321_v50  ;;  %v4437_v7 = vpop.f32.mrf.mxu3  ;;  %3777 = vperm.xlu2 %8289, %v3719_v18  }
 0x4eb   : > { %v10706_v48 = vadd.f32 %v4437_v7, %v4224_v63  ;;  %v3723_v63 = vld [vmem:[%s8650_s20 + $0x50] sm:$0xff]  ;;  %5306 = vmatpush.msra.mxu2 %v10715_v52  ;;  %v10725_v7 = vsub.f32 %v3940_v12, %v10715_v52  ;;  %3757 = vperm.xlu1 %8288, %v3715_v62   ;;  %v3726_v62 = vld [vmem:[%s8650_s20 + $0x68] sm:$0xff] }
 0x4ec   : > { %3797 = vperm.xlu0 %8287, %v3723_v63   ;;  %5933 = vmatpush.msra.mxu1 %v10715_v52 }
 0x4ed   : > { %13324 = vst [vmem:[#allocation77_spill] sm:$0xff] %v10706_v48  ;;  %v4232_v21 = vpop.f32.mrf.mxu2  ;;  %v10708_v8 = vpop.f32.mrf.mxu1  ;;  %v12919_v50 = vand.u32 4294901760, %v10725_v7  ;;  %5750 = vmatpush.msra.mxu0 %v10725_v7 }
 0x4ee   : > { %v10713_v24 = vpop.f32.mrf.mxu0 }
 0x4ef   : > { %4720 = vmatmul.f32.gmra.mxu3 %v13325_v14  ;;  %v5589_v18 = vsub.f32 %v10725_v7, %v12919_v50  ;;  %v13329_v50 = vand.u32 4294901760, %v10375_v49 }
 0x4f0   : > { %5080 = vmatmul.f32.gmra.mxu1 %v10306_v43 }
 0x4f1   : > { %4935 = vmatmul.f32.gmra.mxu0 %v10334_v0  ;;  %v5590_v35 = vand.u32 4294901760, %v5589_v18 }
 0x4f2   : > { %4539 = vmatmul.f32.gmra.mxu2 %v10345_v40  ;;  %v4441_v48 = vpop.f32.mrf.mxu3 }
 0x4f3   : > { %v10730_v43 = vadd.f32 %v4441_v48, %v4232_v21  ;;  %v3722_v48 = vld [vmem:[%s8650_s20 + $0x48] sm:$0xff]  ;;  %5591 = vmatpush.msra.mxu3 %v5590_v35  ;;  %v3725_v35 = vld [vmem:[%s8650_s20 + $0x60] sm:$0xff] }
 0x4f4   : > { %v3718_v21 = vld [vmem:[%s8650_s20 + $0x28] sm:$0xff]  ;;  %3792 = vperm.xlu2 %8289, %v3722_v48   ;;  %3812 = vperm.xlu0 %8287, %v3726_v62   ;;  %v3721_v48 = vld [vmem:[%s8650_s20 + $0x40] sm:$0xff]  ;;  %v13331_v62 = vand.u32 4294901760, %v10393_v1 }
 0x4f5   : > { %13326 = vst [vmem:[#allocation78_spill] sm:$0xff] %v10730_v43  ;;  %v4240_v12 = vpop.f32.mrf.mxu2  ;;  %v10734_v14 = vpop.f32.mrf.mxu1  ;;  %3772 = vperm.xlu1 %8288, %v3718_v21   ;;  %v3729_v43 = vld [vmem:[%s8650_s20 + $0x80] sm:$0xff] }
 0x4f6   : > { %v10739_v9 = vpop.f32.mrf.mxu0 }
 0x4f7   : > { %4726 = vmatmul.f32.gmra.mxu3 %v13327_v2 }
 0x4f8   : > { %5084 = vmatmul.f32.gmra.mxu1 %v10334_v0 }
 0x4f9   : > { %4939 = vmatmul.f32.gmra.mxu0 %v10360_v22 }
 0x4fa   : > { %4544 = vmatmul.f32.gmra.mxu2 %v10375_v49  ;;  %v4445_v63 = vpop.f32.mrf.mxu3 }
 0x4fb   : > { %v10749_v18 = vadd.f32 %v4445_v63, %v4240_v12  ;;  %v3728_v63 = vld [vmem:[%s8650_s20 + $0x78] sm:$0xff] }
 0x4fc   : > { %3807 = vperm.xlu2 %8289, %v3725_v35   ;;  %3827 = vperm.xlu0 %8287, %v3729_v43   ;;  %v3724_v35 = vld [vmem:[%s8650_s20 + $0x58] sm:$0xff] }
 0x4fd   : > { %13328 = vst [vmem:[#allocation79_spill] sm:$0xff] %v10749_v18  ;;  %v4248_v40 = vpop.f32.mrf.mxu2  ;;  %v10751_v2 = vpop.f32.mrf.mxu1  ;;  %3787 = vperm.xlu1 %8288, %v3721_v48   ;;  %v3732_v18 = vld [vmem:[%s8650_s20 + $0x98] sm:$0xff] }
 0x4fe   : > { %v10753_v0 = vpop.f32.mrf.mxu0 }
 0x4ff   : > { %4732 = vmatmul.f32.gmra.mxu3 %v13329_v50 }
 0x500   : > { %5088 = vmatmul.f32.gmra.mxu1 %v10360_v22 }
 0x501   : > { %4943 = vmatmul.f32.gmra.mxu0 %v10382_v3 }
 0x502   : > { %4549 = vmatmul.f32.gmra.mxu2 %v10393_v1  ;;  %v4449_v12 = vpop.f32.mrf.mxu3 }
 0x503   : > { %v10763_v21 = vadd.f32 %v4449_v12, %v4248_v40  ;;  %v13333_v12 = vand.u32 4294901760, %v10420_v23 }
 0x504   : > { %3822 = vperm.xlu2 %8289, %v3728_v63   ;;  %3842 = vperm.xlu0 %8287, %v3732_v18   ;;  %v3727_v63 = vld [vmem:[%s8650_s20 + $0x70] sm:$0xff] }
 0x505   : > { %13330 = vst [vmem:[#allocation80_spill] sm:$0xff] %v10763_v21  ;;  %v4256_v49 = vpop.f32.mrf.mxu2  ;;  %v10765_v50 = vpop.f32.mrf.mxu1  ;;  %3802 = vperm.xlu1 %8288, %v3724_v35   ;;  %v3735_v21 = vld [vmem:[%s8650_s20 + $0xb0] sm:$0xff] }
 0x506   : > { %v10767_v22 = vpop.f32.mrf.mxu0 }
 0x507   : > { %4738 = vmatmul.f32.gmra.mxu3 %v13331_v62  ;;  %v3731_v62 = vld [vmem:[%s8650_s20 + $0x90] sm:$0xff] }
 0x508   : > { %5092 = vmatmul.f32.gmra.mxu1 %v10382_v3 }
 0x509   : > { %4947 = vmatmul.f32.gmra.mxu0 %v10407_v15 }
 0x50a   : > { %4554 = vmatmul.f32.gmra.mxu2 %v10420_v23  ;;  %v4453_v43 = vpop.f32.mrf.mxu3 }
 0x50b   : > { %v10777_v40 = vadd.f32 %v4453_v43, %v4256_v49  ;;  %v13335_v43 = vand.u32 4294901760, %v10448_v57 }
 0x50c   : > { %3837 = vperm.xlu2 %8289, %v3731_v62   ;;  %3857 = vperm.xlu0 %8287, %v3735_v21   ;;  %v3730_v62 = vld [vmem:[%s8650_s20 + $0x88] sm:$0xff] }
 0x50d   : > { %13332 = vst [vmem:[#allocation81_spill] sm:$0xff] %v10777_v40  ;;  %v4264_v1 = vpop.f32.mrf.mxu2  ;;  %v10779_v48 = vpop.f32.mrf.mxu1  ;;  %3817 = vperm.xlu1 %8288, %v3727_v63   ;;  %v3738_v40 = vld [vmem:[%s8650_s20 + $0xc8] sm:$0xff] }
 0x50e   : > { %v10781_v3 = vpop.f32.mrf.mxu0 }
 0x50f   : > { %4744 = vmatmul.f32.gmra.mxu3 %v13333_v12  ;;  %v3734_v12 = vld [vmem:[%s8650_s20 + $0xa8] sm:$0xff] }
 0x510   : > { %5096 = vmatmul.f32.gmra.mxu1 %v10407_v15 }
 0x511   : > { %4951 = vmatmul.f32.gmra.mxu0 %v10432_v56 }
 0x512   : > { %4559 = vmatmul.f32.gmra.mxu2 %v10448_v57  ;;  %v4457_v18 = vpop.f32.mrf.mxu3 }
 0x513   : > { %v10791_v49 = vadd.f32 %v4457_v18, %v4264_v1  ;;  %v13337_v18 = vand.u32 4294901760, %v10467_v46 }
 0x514   : > { %3852 = vperm.xlu2 %8289, %v3734_v12   ;;  %3872 = vperm.xlu0 %8287, %v3738_v40   ;;  %v3733_v12 = vld [vmem:[%s8650_s20 + $0xa0] sm:$0xff] }
 0x515   : > { %13334 = vst [vmem:[#allocation82_spill] sm:$0xff] %v10791_v49  ;;  %v4272_v23 = vpop.f32.mrf.mxu2  ;;  %v10793_v35 = vpop.f32.mrf.mxu1  ;;  %3832 = vperm.xlu1 %8288, %v3730_v62   ;;  %v3741_v49 = vld [vmem:[%s8650_s20 + $0xe0] sm:$0xff] }
 0x516   : > { %v10795_v15 = vpop.f32.mrf.mxu0 }
 0x517   : > { %4750 = vmatmul.f32.gmra.mxu3 %v13335_v43  ;;  %v3737_v43 = vld [vmem:[%s8650_s20 + $0xc0] sm:$0xff] }
 0x518   : > { %5100 = vmatmul.f32.gmra.mxu1 %v10432_v56 }
 0x519   : > { %4955 = vmatmul.f32.gmra.mxu0 %v10455_v28 }
 0x51a   : > { %4564 = vmatmul.f32.gmra.mxu2 %v10467_v46  ;;  %v4461_v21 = vpop.f32.mrf.mxu3 }
 0x51b   : > { %v10805_v1 = vadd.f32 %v4461_v21, %v4272_v23  ;;  %v13339_v21 = vand.u32 4294901760, %v10496_v13 }
 0x51c   : > { %3867 = vperm.xlu2 %8289, %v3737_v43   ;;  %3887 = vperm.xlu0 %8287, %v3741_v49   ;;  %v3736_v43 = vld [vmem:[%s8650_s20 + $0xb8] sm:$0xff] }
 0x51d   : > { %13336 = vst [vmem:[#allocation83_spill] sm:$0xff] %v10805_v1  ;;  %v4280_v57 = vpop.f32.mrf.mxu2  ;;  %v10807_v63 = vpop.f32.mrf.mxu1  ;;  %3847 = vperm.xlu1 %8288, %v3733_v12   ;;  %v3744_v1 = vld [vmem:[%s8650_s20 + $0xf8] sm:$0xff] }
 0x51e   : > { %v10809_v56 = vpop.f32.mrf.mxu0 }
 0x51f   : > { %4756 = vmatmul.f32.gmra.mxu3 %v13337_v18  ;;  %v3740_v18 = vld [vmem:[%s8650_s20 + $0xd8] sm:$0xff] }
 0x520   : > { %5104 = vmatmul.f32.gmra.mxu1 %v10455_v28 }
 0x521   : > { %4959 = vmatmul.f32.gmra.mxu0 %v10481_v4 }
 0x522   : > { %4569 = vmatmul.f32.gmra.mxu2 %v10496_v13  ;;  %v4465_v40 = vpop.f32.mrf.mxu3 }
 0x523   : > { %v10819_v23 = vadd.f32 %v4465_v40, %v4280_v57 }
 0x524   : > { %3882 = vperm.xlu2 %8289, %v3740_v18   ;;  %3902 = vperm.xlu0 %8287, %v3744_v1   ;;  %v13341_v18 = vand.u32 4294901760, %v10526_v54  ;;  %v3739_v1 = vld [vmem:[%s8650_s20 + $0xd0] sm:$0xff] }
 0x525   : > { %13338 = vst [vmem:[#allocation84_spill] sm:$0xff] %v10819_v23  ;;  %v4288_v46 = vpop.f32.mrf.mxu2  ;;  %v10821_v62 = vpop.f32.mrf.mxu1  ;;  %3862 = vperm.xlu1 %8288, %v3736_v43   ;;  %v3743_v43 = vld [vmem:[%s8650_s20 + $0xf0] sm:$0xff] }
 0x526   : > { %v10823_v28 = vpop.f32.mrf.mxu0 }
 0x527   : > { %4762 = vmatmul.f32.gmra.mxu3 %v13339_v21 }
 0x528   : > { %5108 = vmatmul.f32.gmra.mxu1 %v10481_v4  ;;  %v3939_v4 = vld [vmem:[%s12683_s5 + $0x8] sm:$0xff] }
 0x529   : > { %4963 = vmatmul.f32.gmra.mxu0 %v10508_v60  ;;  %v10842_v21 = vand.u32 4294901760, %v3939_v4 }
 0x52a   : > { %4574 = vmatmul.f32.gmra.mxu2 %v10526_v54  ;;  %v4469_v49 = vpop.f32.mrf.mxu3 }
 0x52b   : > { %v10833_v57 = vadd.f32 %v4469_v49, %v4288_v46  ;;  %5308 = vmatpush.msra.mxu2 %v10842_v21  ;;  %v10851_v46 = vsub.f32 %v3939_v4, %v10842_v21  ;;  %5935 = vmatpush.msra.mxu1 %v10842_v21 }
 0x52c   : > { %3897 = vperm.xlu2 %8289, %v3743_v43  }
 0x52d   : > { %13340 = vst [vmem:[#allocation85_spill] sm:$0xff] %v10833_v57  ;;  %v4296_v12 = vpop.f32.mrf.mxu2  ;;  %v10835_v13 = vpop.f32.mrf.mxu1  ;;  %v12922_v57 = vand.u32 4294901760, %v10851_v46  ;;  %3877 = vperm.xlu1 %8288, %v3739_v1   ;;  %5753 = vmatpush.msra.mxu0 %v10851_v46  ;;  %v3742_v1 = vld [vmem:[%s8650_s20 + $0xe8] sm:$0xff] }
 0x52e   : > { %v10840_v40 = vpop.f32.mrf.mxu0 }
 0x52f   : > { %4768 = vmatmul.f32.gmra.mxu3 %v13341_v18  ;;  %v5595_v4 = vsub.f32 %v10851_v46, %v12922_v57 }
 0x530   : > { %5112 = vmatmul.f32.gmra.mxu1 %v10508_v60 }
 0x531   : > { %4967 = vmatmul.f32.gmra.mxu0 %v10533_v58  ;;  %v5596_v23 = vand.u32 4294901760, %v5595_v4 }
 0x532   : > { %4579 = vmatmul.f32.gmra.mxu2 %v10547_v34  ;;  %v4473_v49 = vpop.f32.mrf.mxu3  ;;  %v13346_v34 = vand.u32 4294901760, %v10577_v47 }
 0x533   : > { %v10857_v60 = vadd.f32 %v4473_v49, %v4296_v12  ;;  %5597 = vmatpush.msra.mxu3 %v5596_v23 }
 0x535   : > { %13342 = vst [vmem:[#allocation86_spill] sm:$0xff] %v10857_v60  ;;  %v4304_v54 = vpop.f32.mrf.mxu2  ;;  %v10860_v18 = vpop.f32.mrf.mxu1  ;;  %3892 = vperm.xlu1 %8288, %v3742_v1  }
 0x536   : > { %v10865_v43 = vpop.f32.mrf.mxu0 }
 0x537   : > { %13343 = vst [vmem:[#allocation87_spill] sm:$0xff] %v10865_v43  ;;  %4774 = vmatmul.f32.gmra.mxu3 %v13344_v31  ;;  %v8290_v31 = vld [vmem:[%s12686_s8] ss:$0 sm:$0xff] }
 0x538   : > { %5116 = vmatmul.f32.gmra.mxu1 %v10533_v58 }
 0x539   : > { %4971 = vmatmul.f32.gmra.mxu0 %v10561_v27 }
 0x53a   : > { %4584 = vmatmul.f32.gmra.mxu2 %v10577_v47  ;;  %v4477_v12 = vpop.f32.mrf.mxu3 }
 0x53b   : > { %v10873_v49 = vadd.f32 %v4477_v12, %v4304_v54 }
 0x53d   : > { %13345 = vst [vmem:[#allocation88_spill] sm:$0xff] %v10873_v49  ;;  %v4312_v60 = vpop.f32.mrf.mxu2  ;;  %v10875_v57 = vpop.f32.mrf.mxu1  ;;  %6437 = vrot.lane.b32.xlu1 %v8290_v31, %s8383_s16 }
 0x53e   : > { %v10877_v43 = vpop.f32.mrf.mxu0 }
 0x53f   : > { %4780 = vmatmul.f32.gmra.mxu3 %v13346_v34 }
 0x540   : > { %5120 = vmatmul.f32.gmra.mxu1 %v10561_v27  ;;  %v13349_v27 = vand.u32 4294901760, %v10614_v26 }
 0x541   : > { %4975 = vmatmul.f32.gmra.mxu0 %v10589_v61 }
 0x542   : > { %4589 = vmatmul.f32.gmra.mxu2 %v10614_v26  ;;  %v4481_v58 = vpop.f32.mrf.mxu3 }
 0x543   : > { %v10888_v23 = vadd.f32 %v4481_v58, %v4312_v60  ;;  %v4362_v58 = vadd.f32 %v10652_v55, %v10643_v45  ;;  %v13352_v45 = vand.u32 4294901760, %v10236_v53 }
 0x545   : > { %13347 = vst [vmem:[#allocation89_spill] sm:$0xff] %v10888_v23  ;;  %v4320_v54 = vpop.f32.mrf.mxu2  ;;  %v10890_v4 = vpop.f32.mrf.mxu1  ;;  %v13351_v23 = vand.u32 4294901760, %v10221_v10 }
 0x546   : > { %13348 = vst [vmem:[#allocation90_spill] sm:$0xff] %v10890_v4  ;;  %v4916_v47 = vpop.f32.mrf.mxu0  ;;  %v4366_v4 = vadd.f32 %v10666_v19, %v10654_v20 }
 0x547   : > { %4786 = vmatmul.f32.gmra.mxu3 %v13349_v27 }
 0x548   : > { %5124 = vmatmul.f32.gmra.mxu1 %v10589_v61 }
 0x549   : > { %4979 = vmatmul.f32.gmra.mxu0 %v10206_v39 }
 0x54a   : > { %4594 = vmatmul.f32.gmra.mxu2 %v10221_v10  ;;  %v4485_v1 = vpop.f32.mrf.mxu3 }
 0x54b   : > { %v10897_v12 = vadd.f32 %v4485_v1, %v4320_v54 }
 0x54d   : > { %13350 = vst [vmem:[#allocation91_spill] sm:$0xff] %v10897_v12  ;;  %v4515_v34 = vpop.f32.mrf.mxu2  ;;  %v5065_v31 = vpop.f32.mrf.mxu1 }
 0x54e   : > { %v4920_v60 = vpop.f32.mrf.mxu0  ;;  %v4516_v26 = vadd.f32 %v4515_v34, %v4362_v58 }
 0x54f   : > { %4792 = vmatmul.f32.gmra.mxu3 %v13351_v23 }
 0x550   : > { %5128 = vmatmul.f32.gmra.mxu1 %v10206_v39 }
 0x551   : > { %4983 = vmatmul.f32.gmra.mxu0 %v10226_v59 }
 0x552   : > { %4599 = vmatmul.f32.gmra.mxu2 %v10236_v53  ;;  %v4697_v61 = vpop.f32.mrf.mxu3  ;;  %v4370_v53 = vadd.f32 %v10680_v6, %v10668_v17 }
 0x553   : > { %v4698_v27 = vadd.f32 %v4697_v61, %v4516_v26 }
 0x555   : > { %v4520_v54 = vpop.f32.mrf.mxu2  ;;  %v5069_v1 = vpop.f32.mrf.mxu1  ;;  %v4917_v12 = vadd.f32 %v4916_v47, %v4698_v27 }
 0x556   : > { %v4924_v49 = vpop.f32.mrf.mxu0  ;;  %v4521_v10 = vadd.f32 %v4520_v54, %v4366_v4 }
 0x557   : > { %4798 = vmatmul.f32.gmra.mxu3 %v13352_v45  ;;  %v10911_v39 = vadd.f32 %v5065_v31, %v4917_v12 }
 0x558   : > { %5132 = vmatmul.f32.gmra.mxu1 %v10226_v59  ;;  %v13353_v59 = vand.u32 4294901760, %v10272_v38 }
 0x559   : > { %4987 = vmatmul.f32.gmra.mxu0 %v10262_v42  ;;  %7746 = vrot.lane.b32.xlu2 %v10911_v39, %s8383_s16 }
 0x55a   : > { %4604 = vmatmul.f32.gmra.mxu2 %v10272_v38  ;;  %v4703_v55 = vpop.f32.mrf.mxu3  ;;  %v4374_v38 = vadd.f32 %v10694_v51, %v10682_v29 }
 0x55b   : > { %v4704_v23 = vadd.f32 %v4703_v55, %v4521_v10  ;;  %v4378_v10 = vadd.f32 %v10708_v8, %v10696_v25  ;;  %v13355_v55 = vand.u32 4294901760, %v10331_v33  ;;  %v13357_v8 = vand.u32 4294901760, %v10608_v11 }
 0x55c   : > { %v13361_v11 = vand.u32 4294901760, %v10851_v46 }
 0x55d   : > { %v4525_v47 = vpop.f32.mrf.mxu2  ;;  %v5073_v34 = vpop.f32.mrf.mxu1  ;;  %v4921_v20 = vadd.f32 %v4920_v60, %v4704_v23 }
 0x55e   : > { %v4928_v19 = vpop.f32.mrf.mxu0  ;;  %v4526_v12 = vadd.f32 %v4525_v47, %v4370_v53 }
 0x55f   : > { %4804 = vmatmul.f32.gmra.mxu3 %v13353_v59  ;;  %v10922_v4 = vadd.f32 %v5069_v1, %v4921_v20 }
 0x560   : > { %5136 = vmatmul.f32.gmra.mxu1 %v10262_v42  ;;  %v13354_v42 = vand.u32 4294901760, %v10299_v16 }
 0x561   : > { %4991 = vmatmul.f32.gmra.mxu0 %v10279_v5  ;;  %7748 = vrot.lane.b32.xlu0 %v10922_v4, %s8383_s16 }
 0x562   : > { %4609 = vmatmul.f32.gmra.mxu2 %v10299_v16  ;;  %v4709_v31 = vpop.f32.mrf.mxu3  ;;  %v3938_v16 = vld [vmem:[%s12683_s5] sm:$0xff] }
 0x563   : > { %v4710_v60 = vadd.f32 %v4709_v31, %v4526_v12  ;;  %v5309_v51 = vand.u32 4294901760, %v3938_v16  ;;  %v13358_v12 = vand.u32 4294901760, %v10725_v7  ;;  %v13362_v7 = vld [vmem:[#allocation56_spill] sm:$0xff] }
 0x565   : > { %v4530_v58 = vpop.f32.mrf.mxu2  ;;  %v5077_v26 = vpop.f32.mrf.mxu1  ;;  %v4925_v17 = vadd.f32 %v4924_v49, %v4710_v60  ;;  %5310 = vmatpush.msra.mxu2 %v5309_v51  ;;  %v5599_v47 = vsub.f32 %v3938_v16, %v5309_v51  ;;  %5937 = vmatpush.msra.mxu1 %v5309_v51 }
 0x566   : > { %v4932_v6 = vpop.f32.mrf.mxu0  ;;  %v4531_v27 = vadd.f32 %v4530_v58, %v4374_v38  ;;  %v4382_v58 = vadd.f32 %v10734_v14, %v10713_v24 }
 0x567   : > { %4810 = vmatmul.f32.gmra.mxu3 %v13354_v42  ;;  %v10933_v61 = vadd.f32 %v5073_v34, %v4925_v17  ;;  %v5600_v25 = vand.u32 4294901760, %v5599_v47  ;;  %5756 = vmatpush.msra.mxu0 %v5599_v47  ;;  %v4386_v42 = vadd.f32 %v10751_v2, %v10739_v9 }
 0x568   : > { %5140 = vmatmul.f32.gmra.mxu1 %v10279_v5  ;;  %6146 = vmatpush.msrb.mxu2 %v13357_v8 }
 0x569   : > { %4995 = vmatmul.f32.gmra.mxu0 %v10308_v32  ;;  %7750 = vrot.lane.b32.xlu1 %v10933_v61, %s8383_s16  ;;  %v5601_v53 = vsub.f32 %v5599_v47, %v5600_v25 }
 0x56a   : > { %4614 = vmatmul.f32.gmra.mxu2 %v10331_v33  ;;  %v4715_v49 = vpop.f32.mrf.mxu3 }
 0x56b   : > { %v4716_v54 = vadd.f32 %v4715_v49, %v4531_v27  ;;  %6150 = vmatpush.msrb.mxu2 %v13358_v12  ;;  %v5602_v60 = vand.u32 4294901760, %v5601_v53  ;;  %v13363_v27 = vand.u32 4294901760, %v10378_v36  ;;  %v13373_v53 = vld [vmem:[#allocation62_spill] sm:$0xff] }
 0x56d   : > { %v4535_v1 = vpop.f32.mrf.mxu2  ;;  %v5081_v45 = vpop.f32.mrf.mxu1  ;;  %v4929_v29 = vadd.f32 %v4928_v19, %v4716_v54  ;;  %5603 = vmatpush.msra.mxu3 %v5602_v60  ;;  %6154 = vmatpush.msrb.mxu2 %v13361_v11  ;;  %v13365_v54 = vld [vmem:[#allocation58_spill] sm:$0xff]  ;;  %v13375_v11 = vand.u32 4294901760, %v13373_v53 }
 0x56e   : > { %v4936_v5 = vpop.f32.mrf.mxu0  ;;  %v4536_v34 = vadd.f32 %v4535_v1, %v4378_v10  ;;  %v13366_v1 = vld [vmem:[#allocation57_spill] sm:$0xff]  ;;  %v13367_v16 = vand.u32 4294901760, %v13365_v54  ;;  %v13369_v10 = vld [vmem:[#allocation60_spill] sm:$0xff] }
 0x56f   : > { %4816 = vmatmul.f32.gmra.mxu3 %v13355_v55  ;;  %v10947_v23 = vadd.f32 %v5077_v26, %v4929_v29  ;;  %v13359_v26 = vand.u32 4294901760, %v10348_v44  ;;  %6158 = vmatpush.msrb.mxu2 %v5600_v25  ;;  %v4390_v29 = vadd.f32 %v10765_v50, %v10753_v0  ;;  %v13370_v55 = vld [vmem:[#allocation59_spill] sm:$0xff]  ;;  %v13371_v8 = vand.u32 4294901760, %v13369_v10 }
 0x570   : > { %5144 = vmatmul.f32.gmra.mxu1 %v10308_v32  ;;  %6301 = vmatpush.msrb.mxu3 %v10596_v30 }
 0x571   : > { %13356 = vst [vmem:[#allocation92_spill] sm:$0xff] %v10947_v23  ;;  %4999 = vmatmul.f32.gmra.mxu0 %v10336_v41  ;;  %7752 = vrot.lane.b32.xlu2 %v10947_v23, %s8383_s16 }
 0x572   : > { %4619 = vmatmul.f32.gmra.mxu2 %v10348_v44  ;;  %v4721_v20 = vpop.f32.mrf.mxu3  ;;  %6303 = vmatpush.msrb.mxu3 %v10715_v52 }
 0x573   : > { %v4722_v33 = vadd.f32 %v4721_v20, %v4536_v34 }
 0x574   : > { %6305 = vmatpush.msrb.mxu3 %v10842_v21 }
 0x575   : > { %v4540_v32 = vpop.f32.mrf.mxu2  ;;  %v5085_v19 = vpop.f32.mrf.mxu1  ;;  %v4933_v59 = vadd.f32 %v4932_v6, %v4722_v33  ;;  %v4394_v33 = vadd.f32 %v10779_v48, %v10767_v22 }
 0x576   : > { %v4940_v31 = vpop.f32.mrf.mxu0  ;;  %v4541_v6 = vadd.f32 %v4540_v32, %v4382_v58  ;;  %6307 = vmatpush.msrb.mxu3 %v5309_v51 }
 0x577   : > { %4822 = vmatmul.f32.gmra.mxu3 %v13359_v26  ;;  %v10962_v17 = vadd.f32 %v5081_v45, %v4933_v59  ;;  %v13374_v59 = vld [vmem:[#allocation61_spill] sm:$0xff]  ;;  %v4398_v26 = vadd.f32 %v10793_v35, %v10781_v3 }
 0x578   : > { %5148 = vmatmul.f32.gmra.mxu1 %v10336_v41 }
 0x579   : > { %13360 = vst [vmem:[#allocation93_spill] sm:$0xff] %v10962_v17  ;;  %5003 = vmatmul.f32.gmra.mxu0 %v13362_v7  ;;  %7754 = vrot.lane.b32.xlu0 %v10962_v17, %s8383_s16 }
 0x57a   : > { %4624 = vmatmul.f32.gmra.mxu2 %v10378_v36  ;;  %v4727_v24 = vpop.f32.mrf.mxu3 }
 0x57b   : > { %v4728_v44 = vadd.f32 %v4727_v24, %v4541_v6  ;;  %v13377_v24 = vld [vmem:[#allocation64_spill] sm:$0xff] }
 0x57d   : > { %v4545_v41 = vpop.f32.mrf.mxu2  ;;  %v5089_v14 = vpop.f32.mrf.mxu1  ;;  %v4937_v38 = vadd.f32 %v4936_v5, %v4728_v44  ;;  %v13378_v44 = vld [vmem:[#allocation63_spill] sm:$0xff] }
 0x57e   : > { %v4944_v46 = vpop.f32.mrf.mxu0  ;;  %v4546_v30 = vadd.f32 %v4545_v41, %v4386_v42  ;;  %v4402_v42 = vadd.f32 %v10807_v63, %v10795_v15 }
 0x57f   : > { %4828 = vmatmul.f32.gmra.mxu3 %v13363_v27  ;;  %v10978_v49 = vadd.f32 %v5085_v19, %v4937_v38  ;;  %v13379_v27 = vand.u32 4294901760, %v13377_v24 }
 0x580   : > { %5152 = vmatmul.f32.gmra.mxu1 %v13362_v7 }
 0x581   : > { %13364 = vst [vmem:[#allocation56_spill] sm:$0xff] %v10978_v49  ;;  %5007 = vmatmul.f32.gmra.mxu0 %v13366_v1  ;;  %7756 = vrot.lane.b32.xlu1 %v10978_v49, %s8383_s16 }
 0x582   : > { %4629 = vmatmul.f32.gmra.mxu2 %v13365_v54  ;;  %v4733_v52 = vpop.f32.mrf.mxu3 }
 0x583   : > { %v4734_v21 = vadd.f32 %v4733_v52, %v4546_v30  ;;  %v13382_v52 = vld [vmem:[#allocation65_spill] sm:$0xff] }
 0x585   : > { %v4550_v45 = vpop.f32.mrf.mxu2  ;;  %v5093_v9 = vpop.f32.mrf.mxu1  ;;  %v4941_v2 = vadd.f32 %v4940_v31, %v4734_v21 }
 0x586   : > { %v4948_v36 = vpop.f32.mrf.mxu0  ;;  %v4551_v51 = vadd.f32 %v4550_v45, %v4390_v29 }
 0x587   : > { %4834 = vmatmul.f32.gmra.mxu3 %v13367_v16  ;;  %v10989_v5 = vadd.f32 %v5089_v14, %v4941_v2 }
 0x588   : > { %5156 = vmatmul.f32.gmra.mxu1 %v13366_v1  ;;  %v13381_v1 = vld [vmem:[#allocation66_spill] sm:$0xff] }
 0x589   : > { %13368 = vst [vmem:[#allocation58_spill] sm:$0xff] %v10989_v5  ;;  %5011 = vmatmul.f32.gmra.mxu0 %v13370_v55  ;;  %7758 = vrot.lane.b32.xlu2 %v10989_v5, %s8383_s16  ;;  %v13383_v29 = vand.u32 4294901760, %v13381_v1 }
 0x58a   : > { %4634 = vmatmul.f32.gmra.mxu2 %v13369_v10  ;;  %v4739_v47 = vpop.f32.mrf.mxu3  ;;  %v13385_v10 = vld [vmem:[#allocation68_spill] sm:$0xff] }
 0x58b   : > { %v4740_v34 = vadd.f32 %v4739_v47, %v4551_v51 }
 0x58d   : > { %v4555_v20 = vpop.f32.mrf.mxu2  ;;  %v5097_v25 = vpop.f32.mrf.mxu1  ;;  %v4945_v0 = vadd.f32 %v4944_v46, %v4740_v34  ;;  %v3457_v34 = vld [vmem:[#allocation2] sm:$0xff] }
 0x58e   : > { %v4952_v50 = vpop.f32.mrf.mxu0  ;;  %v4556_v19 = vadd.f32 %v4555_v20, %v4394_v33 }
 0x58f   : > { %4840 = vmatmul.f32.gmra.mxu3 %v13371_v8  ;;  %v11000_v32 = vadd.f32 %v5093_v9, %v4945_v0  ;;  %v4410_v8 = vadd.f32 %v10835_v13, %v10823_v28 }
 0x590   : > { %5160 = vmatmul.f32.gmra.mxu1 %v13370_v55  ;;  %v13386_v55 = vld [vmem:[#allocation67_spill] sm:$0xff] }
 0x591   : > { %13372 = vst [vmem:[#allocation57_spill] sm:$0xff] %v11000_v32  ;;  %5015 = vmatmul.f32.gmra.mxu0 %v13374_v59  ;;  %7760 = vrot.lane.b32.xlu0 %v11000_v32, %s8383_s16 }
 0x592   : > { %4639 = vmatmul.f32.gmra.mxu2 %v13373_v53  ;;  %v4745_v12 = vpop.f32.mrf.mxu3 }
 0x593   : > { %v4746_v31 = vadd.f32 %v4745_v12, %v4556_v19  ;;  %v13387_v19 = vand.u32 4294901760, %v13385_v10  ;;  %v13389_v12 = vld [vmem:[#allocation69_spill] sm:$0xff] }
 0x595   : > { %v4560_v60 = vpop.f32.mrf.mxu2  ;;  %v5101_v58 = vpop.f32.mrf.mxu1  ;;  %v4949_v22 = vadd.f32 %v4948_v36, %v4746_v31  ;;  %v4406_v36 = vadd.f32 %v10821_v62, %v10809_v56 }
 0x596   : > { %v4956_v48 = vpop.f32.mrf.mxu0  ;;  %v4561_v7 = vadd.f32 %v4560_v60, %v4398_v26  ;;  %v3524_v62 = vpop.permute.xlu0 %3523 }
 0x597   : > { %4846 = vmatmul.f32.gmra.mxu3 %v13375_v11  ;;  %v11011_v6 = vadd.f32 %v5097_v25, %v4949_v22  ;;  %v3458_v22 = vld [vmem:[#allocation2 + $0x8] sm:$0xff] }
 0x598   : > { %5164 = vmatmul.f32.gmra.mxu1 %v13374_v59 }
 0x599   : > { %13376 = vst [vmem:[#allocation60_spill] sm:$0xff] %v11011_v6  ;;  %5019 = vmatmul.f32.gmra.mxu0 %v13378_v44  ;;  %7762 = vrot.lane.b32.xlu1 %v11011_v6, %s8383_s16 }
 0x59a   : > { %4644 = vmatmul.f32.gmra.mxu2 %v13377_v24  ;;  %v4751_v41 = vpop.f32.mrf.mxu3  ;;  %v4414_v24 = vadd.f32 %v10860_v18, %v10840_v40  ;;  %v13393_v40 = vld [vmem:[#allocation70_spill] sm:$0xff] }
 0x59b   : > { %v4752_v14 = vadd.f32 %v4751_v41, %v4561_v7 }
 0x59d   : > { %v4565_v38 = vpop.f32.mrf.mxu2  ;;  %v5105_v46 = vpop.f32.mrf.mxu1  ;;  %v4953_v3 = vadd.f32 %v4952_v50, %v4752_v14  ;;  %v3681_v50 = vmul.f32 %v3524_v62, %v3457_v34  ;;  %v3945_v14 = vld [vmem:[%s12684_s6 + $0x18] sm:$0xff] }
 0x59e   : > { %v4960_v35 = vpop.f32.mrf.mxu0  ;;  %v4566_v54 = vadd.f32 %v4565_v38, %v4402_v42  ;;  %v3529_v7 = vpop.permute.xlu0 %3528  ;;  %v13392_v42 = vld [vmem:[#allocation71_spill] sm:$0xff]  ;;  %v13397_v62 = vld [vmem:[#allocation73_spill] sm:$0xff] }
 0x59f   : > { %4852 = vmatmul.f32.gmra.mxu3 %v13379_v27  ;;  %v11022_v30 = vadd.f32 %v5101_v58, %v4953_v3  ;;  %v5196_v31 = vsel %vm3388_vm1, %v3681_v50, 0  ;;  %v3682_v38 = vmul.f32 %v3529_v7, %v3458_v22  ;;  %v3459_v27 = vld [vmem:[#allocation2 + $0x10] sm:$0xff]  ;;  %v13400_v7 = vand.u32 4294901760, %v13397_v62 }
 0x5a0   : > { %5168 = vmatmul.f32.gmra.mxu1 %v13378_v44  ;;  %v11051_v13 = vand.u32 4294901760, %v5196_v31  ;;  %v13390_v44 = vand.u32 4294901760, %v13389_v12 }
 0x5a1   : > { %13380 = vst [vmem:[#allocation59_spill] sm:$0xff] %v11022_v30  ;;  %5023 = vmatmul.f32.gmra.mxu0 %v13382_v52  ;;  %7764 = vrot.lane.b32.xlu2 %v11022_v30, %s8383_s16 }
 0x5a2   : > { %4649 = vmatmul.f32.gmra.mxu2 %v13381_v1  ;;  %v4757_v21 = vpop.f32.mrf.mxu3  ;;  %v11066_v3 = vsub.f32 %v5196_v31, %v11051_v13  ;;  %v5199_v1 = vsel %vm3388_vm1, %v3682_v38, 0  ;;  %v3460_v31 = vld [vmem:[#allocation2 + $0x18] sm:$0xff] }
 0x5a3   : > { %v4758_v45 = vadd.f32 %v4757_v21, %v4566_v54 }
 0x5a5   : > { %v4570_v9 = vpop.f32.mrf.mxu2  ;;  %v5109_v2 = vpop.f32.mrf.mxu1  ;;  %v4957_v15 = vadd.f32 %v4956_v48, %v4758_v45  ;;  %v5313_v45 = vand.u32 4294901760, %v11066_v3 }
 0x5a6   : > { %v4964_v63 = vpop.f32.mrf.mxu0  ;;  %v4571_v51 = vadd.f32 %v4570_v9, %v4406_v36  ;;  %v3534_v9 = vpop.permute.xlu1 %3533 }
 0x5a7   : > { %4858 = vmatmul.f32.gmra.mxu3 %v13383_v29  ;;  %v11033_v16 = vadd.f32 %v5105_v46, %v4957_v15  ;;  %v11063_v46 = vand.u32 4294901760, %v3945_v14 }
 0x5a8   : > { %5172 = vmatmul.f32.gmra.mxu1 %v13382_v52 }
 0x5a9   : > { %13384 = vst [vmem:[#allocation62_spill] sm:$0xff] %v11033_v16  ;;  %5027 = vmatmul.f32.gmra.mxu0 %v13386_v55  ;;  %7766 = vrot.lane.b32.xlu0 %v11033_v16, %s8383_s16  ;;  %v11074_v18 = vsub.f32 %v3945_v14, %v11063_v46  ;;  %v3479_v16 = vld [vmem:[#allocation2 + $0xb0] sm:$0xff] }
 0x5aa   : > { %4654 = vmatmul.f32.gmra.mxu2 %v13385_v10  ;;  %v4763_v47 = vpop.f32.mrf.mxu3  ;;  %6549 = vmatpush.msrb.mxu0 %v11063_v46  ;;  %v13394_v10 = vld [vmem:[#allocation87_spill] sm:$0xff] }
 0x5ab   : > { %v4764_v20 = vadd.f32 %v4763_v47, %v4571_v51  ;;  %v12924_v21 = vand.u32 4294901760, %v11074_v18  ;;  %v11082_v51 = vand.u32 4294901760, %v5199_v1  ;;  %v13395_v47 = vand.u32 4294901760, %v13392_v42 }
 0x5ad   : > { %v4575_v25 = vpop.f32.mrf.mxu2  ;;  %v5113_v56 = vpop.f32.mrf.mxu1  ;;  %v4961_v0 = vadd.f32 %v4960_v35, %v4764_v20  ;;  %v6828_v29 = vsub.f32 %v11074_v18, %v12924_v21 }
 0x5ae   : > { %v4968_v33 = vpop.f32.mrf.mxu0  ;;  %v4576_v59 = vadd.f32 %v4575_v25, %v4410_v8  ;;  %v5314_v25 = vsub.f32 %v11066_v3, %v5313_v45  ;;  %v3539_v22 = vpop.permute.xlu1 %3538 }
 0x5af   : > { %4864 = vmatmul.f32.gmra.mxu3 %v13387_v19  ;;  %v11044_v53 = vadd.f32 %v5109_v2, %v4961_v0  ;;  %v6829_v20 = vand.u32 4294901760, %v6828_v29  ;;  %v13398_v0 = vld [vmem:[#allocation72_spill] sm:$0xff]  ;;  %v3684_v14 = vmul.f32 %v3539_v22, %v3460_v31  ;;  %v13405_v22 = vld [vmem:[#allocation75_spill] sm:$0xff] }
 0x5b0   : > { %5176 = vmatmul.f32.gmra.mxu1 %v13386_v55  ;;  %v4418_v55 = vadd.f32 %v10875_v57, %v13394_v10  ;;  %v13403_v10 = vld [vmem:[#allocation74_spill] sm:$0xff] }
 0x5b1   : > { %13388 = vst [vmem:[#allocation61_spill] sm:$0xff] %v11044_v53  ;;  %5031 = vmatmul.f32.gmra.mxu0 %v10537_v37  ;;  %7768 = vrot.lane.b32.xlu1 %v11044_v53, %s8383_s16 }
 0x5b2   : > { %4659 = vmatmul.f32.gmra.mxu2 %v13389_v12  ;;  %v4769_v60 = vpop.f32.mrf.mxu3  ;;  %6830 = vmatpush.msrb.mxu1 %v6829_v20 }
 0x5b3   : > { %v4770_v58 = vadd.f32 %v4769_v60, %v4576_v59  ;;  %v5315_v59 = vand.u32 4294901760, %v5314_v25 }
 0x5b5   : > { %v4580_v28 = vpop.f32.mrf.mxu2  ;;  %v4965_v48 = vadd.f32 %v4964_v63, %v4770_v58  ;;  %v5117_v26 = vpop.f32.mrf.mxu1  ;;  %v3683_v63 = vmul.f32 %v3534_v9, %v3459_v27 }
 0x5b6   : > { %v4972_v11 = vpop.f32.mrf.mxu0  ;;  %v4581_v35 = vadd.f32 %v4580_v28, %v4414_v24 }
 0x5b7   : > { %4870 = vmatmul.f32.gmra.mxu3 %v13390_v44  ;;  %v11058_v41 = vadd.f32 %v5113_v56, %v4965_v48  ;;  %v5202_v50 = vsel %vm3388_vm1, %v3683_v63, 0  ;;  %v13399_v48 = vld [vmem:[#allocation90_spill] sm:$0xff] }
 0x5b8   : > { %5180 = vmatmul.f32.gmra.mxu1 %v10537_v37  ;;  %v11098_v12 = vand.u32 4294901760, %v5202_v50 }
 0x5b9   : > { %13391 = vst [vmem:[#allocation64_spill] sm:$0xff] %v11058_v41  ;;  %5035 = vmatmul.f32.gmra.mxu0 %v13393_v40  ;;  %7770 = vrot.lane.b32.xlu2 %v11058_v41, %s8383_s16 }
 0x5ba   : > { %4664 = vmatmul.f32.gmra.mxu2 %v13392_v42  ;;  %v4775_v37 = vpop.f32.mrf.mxu3  ;;  %v11108_v38 = vsub.f32 %v5202_v50, %v11098_v12 }
 0x5bb   : > { %v4776_v54 = vadd.f32 %v4775_v37, %v4581_v35  ;;  %v5205_v37 = vsel %vm3388_vm1, %v3684_v14, 0 }
 0x5bc   : > { %v5329_v9 = vand.u32 4294901760, %v11108_v38 }
 0x5bd   : > { %v4585_v52 = vpop.f32.mrf.mxu2  ;;  %v4969_v2 = vadd.f32 %v4968_v33, %v4776_v54  ;;  %v5121_v15 = vpop.f32.mrf.mxu1  ;;  %v5320_v33 = vsub.f32 %v5199_v1, %v11082_v51 }
 0x5be   : > { %v4976_v36 = vpop.f32.mrf.mxu0  ;;  %v4586_v56 = vadd.f32 %v4585_v52, %v4418_v55  ;;  %v3544_v54 = vpop.permute.xlu2 %3543 }
 0x5bf   : > { %4876 = vmatmul.f32.gmra.mxu3 %v13395_v47  ;;  %v11089_v34 = vadd.f32 %v5117_v26, %v4969_v2  ;;  %v4422_v26 = vadd.f32 %v13399_v48, %v10877_v43  ;;  %v5321_v44 = vand.u32 4294901760, %v5320_v33 }
 0x5c0   : > { %5184 = vmatmul.f32.gmra.mxu1 %v13393_v40 }
 0x5c1   : > { %13396 = vst [vmem:[#allocation63_spill] sm:$0xff] %v11089_v34  ;;  %5039 = vmatmul.f32.gmra.mxu0 %v13398_v0  ;;  %7772 = vrot.lane.b32.xlu0 %v11089_v34, %s8383_s16  ;;  %v5322_v40 = vsub.f32 %v5320_v33, %v5321_v44 }
 0x5c2   : > { %4669 = vmatmul.f32.gmra.mxu2 %v13397_v62  ;;  %v4781_v57 = vpop.f32.mrf.mxu3 }
 0x5c3   : > { %v4782_v8 = vadd.f32 %v4781_v57, %v4586_v56  ;;  %v5323_v63 = vand.u32 4294901760, %v5322_v40 }
 0x5c5   : > { %v4590_v19 = vpop.f32.mrf.mxu2  ;;  %v4973_v60 = vadd.f32 %v4972_v11, %v4782_v8  ;;  %v5125_v58 = vpop.f32.mrf.mxu1  ;;  %v3461_v11 = vld [vmem:[#allocation2 + $0x20] sm:$0xff] }
 0x5c6   : > { %v4980_v28 = vpop.f32.mrf.mxu0  ;;  %v4591_v35 = vadd.f32 %v4590_v19, %v4422_v26  ;;  %v3685_v2 = vmul.f32 %v3544_v54, %v3461_v11 }
 0x5c7   : > { %4882 = vmatmul.f32.gmra.mxu3 %v13400_v7  ;;  %v11105_v24 = vadd.f32 %v5121_v15, %v4973_v60 }
 0x5c8   : > { %5188 = vmatmul.f32.gmra.mxu1 %v13398_v0  ;;  %v5208_v47 = vsel %vm3388_vm1, %v3685_v2, 0  ;;  %v3462_v0 = vld [vmem:[#allocation2 + $0x28] sm:$0xff] }
 0x5c9   : > { %13401 = vst [vmem:[#allocation66_spill] sm:$0xff] %v11105_v24  ;;  %5759 = vmatmul.f32.vlgmr.msra.gmra.mxu0 %v11066_v3  ;;  %7774 = vrot.lane.b32.xlu1 %v11105_v24, %s8383_s16  ;;  %v11116_v3 = vand.u32 4294901760, %v5205_v37  ;;  %v11128_v62 = vand.u32 4294901760, %v5208_v47 }
 0x5ca   : > { %5316 = vmatmul.f32.vlgmr.msra.gmra.mxu2 %v5315_v59  ;;  %v4787_v43 = vpop.f32.mrf.mxu3 }
 0x5cb   : > { %6992 = vmatpush.msra.mxu2 %v11074_v18  ;;  %v4788_v42 = vadd.f32 %v4787_v43, %v4591_v35  ;;  %v5336_v25 = vsub.f32 %v5205_v37, %v11116_v3  ;;  %v3463_v35 = vld [vmem:[#allocation2 + $0x30] sm:$0xff] }
 0x5cd   : > { %v4595_v27 = vpop.f32.mrf.mxu2  ;;  %v4977_v1 = vadd.f32 %v4976_v36, %v4788_v42  ;;  %v5129_v52 = vpop.f32.mrf.mxu1  ;;  %v5330_v36 = vsub.f32 %v11108_v38, %v5329_v9  ;;  %v5337_v31 = vand.u32 4294901760, %v5336_v25 }
 0x5ce   : > { %v4984_v15 = vpop.f32.mrf.mxu0  ;;  %v4596_v55 = vadd.f32 %v4595_v27, %v13403_v10  ;;  %v3554_v27 = vpop.permute.xlu0 %3553 }
 0x5cf   : > { %5605 = vmatmul.f32.vlgmr.msra.gmra.mxu3 %v11051_v13  ;;  %v11119_v29 = vadd.f32 %v5125_v58, %v4977_v1  ;;  %v5331_v8 = vand.u32 4294901760, %v5330_v36  ;;  %v5344_v58 = vsub.f32 %v5208_v47, %v11128_v62  ;;  %v5338_v7 = vsub.f32 %v5336_v25, %v5337_v31 }
 0x5d0   : > { %5941 = vmatmul.f32.vlgmr.msra.gmra.mxu1 %v5313_v45  ;;  %7176 = vmatpush.msra.mxu3 %v11063_v46  ;;  %v3687_v1 = vmul.f32 %v3554_v27, %v3463_v35 }
 0x5d1   : > { %13402 = vst [vmem:[#allocation65_spill] sm:$0xff] %v11119_v29  ;;  %5764 = vmatmul.f32.gmra.mxu0 %v5320_v33  ;;  %7776 = vrot.lane.b32.xlu2 %v11119_v29, %s8383_s16  ;;  %v3549_v33 = vpop.permute.xlu2 %3548  ;;  %v5345_v42 = vand.u32 4294901760, %v5344_v58 }
 0x5d2   : > { %5324 = vmatmul.f32.gmra.mxu2 %v5323_v63  ;;  %v4793_v20 = vpop.f32.mrf.mxu3  ;;  %v3686_v60 = vmul.f32 %v3549_v33, %v3462_v0  ;;  %v5214_v36 = vsel %vm3388_vm1, %v3687_v1, 0 }
 0x5d3   : > { %v4794_v45 = vadd.f32 %v4793_v20, %v4596_v55  ;;  %v5346_v63 = vsub.f32 %v5344_v58, %v5345_v42 }
 0x5d4   : > { %v5211_v14 = vsel %vm3388_vm1, %v3686_v60, 0  ;;  %v13409_v60 = vld [vmem:[#allocation77_spill] sm:$0xff] }
 0x5d5   : > { %v4600_v56 = vpop.f32.mrf.mxu2  ;;  %v4981_v50 = vadd.f32 %v4980_v28, %v4794_v45  ;;  %v5133_v57 = vpop.f32.mrf.mxu1  ;;  %v11139_v37 = vand.u32 4294901760, %v5211_v14 }
 0x5d6   : > { %v4988_v19 = vpop.f32.mrf.mxu0  ;;  %v4601_v48 = vadd.f32 %v4600_v56, %v13405_v22  ;;  %v5347_v56 = vand.u32 4294901760, %v5346_v63 }
 0x5d7   : > { %5609 = vmatmul.f32.gmra.mxu3 %v11082_v51  ;;  %v11131_v59 = vadd.f32 %v5129_v52, %v4981_v50  ;;  %v13407_v52 = vld [vmem:[#allocation76_spill] sm:$0xff]  ;;  %v5352_v10 = vsub.f32 %v5211_v14, %v11139_v37  ;;  %v11149_v50 = vand.u32 4294901760, %v5214_v36  ;;  %v3465_v14 = vld [vmem:[#allocation2 + $0x40] sm:$0xff] }
 0x5d8   : > { %5947 = vmatmul.f32.gmra.mxu1 %v5321_v44 }
 0x5d9   : > { %13404 = vst [vmem:[#allocation68_spill] sm:$0xff] %v11131_v59  ;;  %5769 = vmatmul.f32.gmra.mxu0 %v11108_v38  ;;  %7778 = vrot.lane.b32.xlu0 %v11131_v59, %s8383_s16  ;;  %v5339_v38 = vand.u32 4294901760, %v5338_v7  ;;  %v13431_v59 = vld [vmem:[#allocation89_spill] sm:$0xff] }
 0x5da   : > { %5332 = vmatmul.f32.gmra.mxu2 %v5331_v8  ;;  %v4799_v28 = vpop.f32.mrf.mxu3  ;;  %v5353_v8 = vand.u32 4294901760, %v5352_v10 }
 0x5db   : > { %v4800_v26 = vadd.f32 %v4799_v28, %v4601_v48  ;;  %v11158_v48 = vsub.f32 %v5214_v36, %v11149_v50 }
 0x5dd   : > { %v4605_v44 = vpop.f32.mrf.mxu2  ;;  %v4985_v43 = vadd.f32 %v4984_v15, %v4800_v26  ;;  %v5137_v11 = vpop.f32.mrf.mxu1  ;;  %v5354_v26 = vsub.f32 %v5352_v10, %v5353_v8  ;;  %v5361_v1 = vand.u32 4294901760, %v11158_v48 }
 0x5de   : > { %v4992_v40 = vpop.f32.mrf.mxu0  ;;  %v4606_v2 = vadd.f32 %v4605_v44, %v13407_v52 }
 0x5df   : > { %5613 = vmatmul.f32.gmra.mxu3 %v11098_v12  ;;  %v11142_v54 = vadd.f32 %v5133_v57, %v4985_v43  ;;  %v3559_v57 = vpop.permute.xlu1 %3558 }
 0x5e0   : > { %5953 = vmatmul.f32.gmra.mxu1 %v5329_v9  ;;  %v3464_v9 = vld [vmem:[#allocation2 + $0x38] sm:$0xff] }
 0x5e1   : > { %13406 = vst [vmem:[#allocation67_spill] sm:$0xff] %v11142_v54  ;;  %5774 = vmatmul.f32.gmra.mxu0 %v5336_v25  ;;  %7780 = vrot.lane.b32.xlu1 %v11142_v54, %s8383_s16  ;;  %v3688_v33 = vmul.f32 %v3559_v57, %v3464_v9  ;;  %v3466_v9 = vld [vmem:[#allocation2 + $0x48] sm:$0xff] }
 0x5e2   : > { %5340 = vmatmul.f32.gmra.mxu2 %v5339_v38  ;;  %v4805_v15 = vpop.f32.mrf.mxu3 }
 0x5e3   : > { %v4806_v55 = vadd.f32 %v4805_v15, %v4606_v2  ;;  %v5217_v7 = vsel %vm3388_vm1, %v3688_v33, 0  ;;  %v13411_v2 = vld [vmem:[#allocation78_spill] sm:$0xff] }
 0x5e4   : > { %v11161_v27 = vand.u32 4294901760, %v5217_v7 }
 0x5e5   : > { %v4610_v47 = vpop.f32.mrf.mxu2  ;;  %v4989_v20 = vadd.f32 %v4988_v19, %v4806_v55  ;;  %v5141_v45 = vpop.f32.mrf.mxu1 }
 0x5e6   : > { %v4996_v0 = vpop.f32.mrf.mxu0  ;;  %v4611_v22 = vadd.f32 %v4610_v47, %v13409_v60  ;;  %v11171_v15 = vsub.f32 %v5217_v7, %v11161_v27 }
 0x5e7   : > { %5617 = vmatmul.f32.gmra.mxu3 %v11116_v3  ;;  %v11152_v25 = vadd.f32 %v5137_v11, %v4989_v20  ;;  %v3564_v11 = vpop.permute.xlu2 %3563 }
 0x5e8   : > { %5959 = vmatmul.f32.gmra.mxu1 %v5337_v31  ;;  %v3689_v52 = vmul.f32 %v3564_v11, %v3465_v14 }
 0x5e9   : > { %13408 = vst [vmem:[#allocation69_spill] sm:$0xff] %v11152_v25  ;;  %5779 = vmatmul.f32.gmra.mxu0 %v5344_v58  ;;  %7782 = vrot.lane.b32.xlu2 %v11152_v25, %s8383_s16  ;;  %v5355_v58 = vand.u32 4294901760, %v5354_v26 }
 0x5ea   : > { %5348 = vmatmul.f32.gmra.mxu2 %v5347_v56  ;;  %v4811_v19 = vpop.f32.mrf.mxu3  ;;  %v5220_v36 = vsel %vm3388_vm1, %v3689_v52, 0  ;;  %v3467_v52 = vld [vmem:[#allocation2 + $0x50] sm:$0xff] }
 0x5eb   : > { %v4812_v28 = vadd.f32 %v4811_v19, %v4611_v22  ;;  %v11175_v57 = vand.u32 4294901760, %v5220_v36  ;;  %v5369_v22 = vand.u32 4294901760, %v11171_v15  ;;  %v3944_v19 = vld [vmem:[%s12684_s6 + $0x10] sm:$0xff] }
 0x5ec   : > { %v11184_v26 = vand.u32 4294901760, %v3944_v19 }
 0x5ed   : > { %v4615_v31 = vpop.f32.mrf.mxu2  ;;  %v4993_v44 = vadd.f32 %v4992_v40, %v4812_v28  ;;  %v5145_v35 = vpop.f32.mrf.mxu1  ;;  %v5376_v14 = vsub.f32 %v5220_v36, %v11175_v57 }
 0x5ee   : > { %v5000_v43 = vpop.f32.mrf.mxu0  ;;  %v4616_v63 = vadd.f32 %v4615_v31, %v13411_v2  ;;  %6551 = vmatpush.msrb.mxu0 %v11184_v26  ;;  %v11192_v31 = vsub.f32 %v3944_v19, %v11184_v26  ;;  %7178 = vmatpush.msra.mxu3 %v11184_v26  ;;  %v3574_v36 = vpop.permute.xlu1 %3573  ;;  %v13415_v19 = vld [vmem:[#allocation80_spill] sm:$0xff] }
 0x5ef   : > { %5621 = vmatmul.f32.gmra.mxu3 %v11128_v62  ;;  %v11164_v38 = vadd.f32 %v5141_v45, %v4993_v44 }
 0x5f0   : > { %5965 = vmatmul.f32.gmra.mxu1 %v5345_v42  ;;  %v5362_v42 = vsub.f32 %v11158_v48, %v5361_v1  ;;  %6995 = vmatpush.msra.mxu2 %v11192_v31 }
 0x5f1   : > { %13410 = vst [vmem:[#allocation71_spill] sm:$0xff] %v11164_v38  ;;  %5784 = vmatmul.f32.gmra.mxu0 %v5352_v10  ;;  %7784 = vrot.lane.b32.xlu0 %v11164_v38, %s8383_s16  ;;  %v3569_v10 = vpop.permute.xlu0 %3568 }
 0x5f2   : > { %5356 = vmatmul.f32.gmra.mxu2 %v5355_v58  ;;  %v4817_v40 = vpop.f32.mrf.mxu3  ;;  %v5363_v33 = vand.u32 4294901760, %v5362_v42  ;;  %v3690_v28 = vmul.f32 %v3569_v10, %v3466_v9  ;;  %v3691_v10 = vmul.f32 %v3574_v36, %v3467_v52 }
 0x5f3   : > { %v4818_v55 = vadd.f32 %v4817_v40, %v4616_v63 }
 0x5f4   : > { %v5223_v11 = vsel %vm3388_vm1, %v3690_v28, 0 }
 0x5f5   : > { %v4620_v47 = vpop.f32.mrf.mxu2  ;;  %v4997_v20 = vadd.f32 %v4996_v0, %v4818_v55  ;;  %v5149_v45 = vpop.f32.mrf.mxu1  ;;  %v13413_v0 = vld [vmem:[#allocation79_spill] sm:$0xff]  ;;  %v11203_v42 = vand.u32 4294901760, %v5223_v11 }
 0x5f6   : > { %v5004_v56 = vpop.f32.mrf.mxu0  ;;  %v4621_v7 = vadd.f32 %v4620_v47, %v13413_v0 }
 0x5f7   : > { %5625 = vmatmul.f32.gmra.mxu3 %v11139_v37  ;;  %v11178_v60 = vadd.f32 %v5145_v35, %v4997_v20  ;;  %v5370_v35 = vsub.f32 %v11171_v15, %v5369_v22  ;;  %v5377_v20 = vand.u32 4294901760, %v5376_v14  ;;  %v5384_v0 = vsub.f32 %v5223_v11, %v11203_v42 }
 0x5f8   : > { %5971 = vmatmul.f32.gmra.mxu1 %v5353_v8 }
 0x5f9   : > { %13412 = vst [vmem:[#allocation70_spill] sm:$0xff] %v11178_v60  ;;  %5789 = vmatmul.f32.gmra.mxu0 %v11158_v48  ;;  %7786 = vrot.lane.b32.xlu1 %v11178_v60, %s8383_s16  ;;  %v12923_v48 = vand.u32 4294901760, %v11192_v31  ;;  %v5371_v47 = vand.u32 4294901760, %v5370_v35 }
 0x5fa   : > { %5364 = vmatmul.f32.gmra.mxu2 %v5363_v33  ;;  %v4823_v8 = vpop.f32.mrf.mxu3 }
 0x5fb   : > { %v4824_v44 = vadd.f32 %v4823_v8, %v4621_v7  ;;  %v6834_v55 = vsub.f32 %v11192_v31, %v12923_v48 }
 0x5fd   : > { %v4625_v58 = vpop.f32.mrf.mxu2  ;;  %v5001_v2 = vadd.f32 %v5000_v43, %v4824_v44  ;;  %v5153_v63 = vpop.f32.mrf.mxu1  ;;  %v6835_v33 = vand.u32 4294901760, %v6834_v55  ;;  %v3468_v44 = vld [vmem:[#allocation2 + $0x58] sm:$0xff] }
 0x5fe   : > { %v5008_v40 = vpop.f32.mrf.mxu0  ;;  %v4626_v43 = vadd.f32 %v4625_v58, %v13415_v19  ;;  %v3579_v58 = vpop.permute.xlu2 %3578 }
 0x5ff   : > { %5629 = vmatmul.f32.gmra.mxu3 %v11149_v50  ;;  %v11206_v9 = vadd.f32 %v5149_v45, %v5001_v2  ;;  %6836 = vmatpush.msrb.mxu1 %v6835_v33  ;;  %v5226_v45 = vsel %vm3388_vm1, %v3691_v10, 0  ;;  %v3692_v11 = vmul.f32 %v3579_v58, %v3468_v44  ;;  %v13417_v33 = vld [vmem:[#allocation81_spill] sm:$0xff] }
 0x600   : > { %5977 = vmatmul.f32.gmra.mxu1 %v5361_v1  ;;  %v5378_v1 = vsub.f32 %v5376_v14, %v5377_v20  ;;  %v11214_v55 = vand.u32 4294901760, %v5226_v45 }
 0x601   : > { %13414 = vst [vmem:[#allocation87_spill] sm:$0xff] %v11206_v9  ;;  %5794 = vmatmul.f32.gmra.mxu0 %v11171_v15  ;;  %7788 = vrot.lane.b32.xlu2 %v11206_v9, %s8383_s16 }
 0x602   : > { %5372 = vmatmul.f32.gmra.mxu2 %v5371_v47  ;;  %v4829_v28 = vpop.f32.mrf.mxu3  ;;  %v5379_v15 = vand.u32 4294901760, %v5378_v1  ;;  %v5385_v47 = vand.u32 4294901760, %v5384_v0  ;;  %v5392_v10 = vsub.f32 %v5226_v45, %v11214_v55  ;;  %v3469_v1 = vld [vmem:[#allocation2 + $0x60] sm:$0xff] }
 0x603   : > { %v4830_v7 = vadd.f32 %v4829_v28, %v4626_v43 }
 0x604   : > { %v5386_v28 = vsub.f32 %v5384_v0, %v5385_v47 }
 0x605   : > { %v4630_v8 = vpop.f32.mrf.mxu2  ;;  %v5005_v35 = vadd.f32 %v5004_v56, %v4830_v7  ;;  %v5157_v52 = vpop.f32.mrf.mxu1  ;;  %v5229_v7 = vsel %vm3388_vm1, %v3692_v11, 0 }
 0x606   : > { %v5012_v2 = vpop.f32.mrf.mxu0  ;;  %v4631_v19 = vadd.f32 %v4630_v8, %v13417_v33  ;;  %v11224_v44 = vand.u32 4294901760, %v5229_v7  ;;  %v3584_v8 = vpop.permute.xlu0 %3583  ;;  %v13419_v33 = vld [vmem:[#allocation82_spill] sm:$0xff] }
 0x607   : > { %5633 = vmatmul.f32.gmra.mxu3 %v11161_v27  ;;  %v11217_v36 = vadd.f32 %v5153_v63, %v5005_v35  ;;  %v3693_v45 = vmul.f32 %v3584_v8, %v3469_v1 }
 0x608   : > { %5983 = vmatmul.f32.gmra.mxu1 %v5369_v22  ;;  %v5400_v11 = vsub.f32 %v5229_v7, %v11224_v44 }
 0x609   : > { %13416 = vst [vmem:[#allocation73_spill] sm:$0xff] %v11217_v36  ;;  %5799 = vmatmul.f32.gmra.mxu0 %v5376_v14  ;;  %7790 = vrot.lane.b32.xlu0 %v11217_v36, %s8383_s16  ;;  %v5387_v14 = vand.u32 4294901760, %v5386_v28  ;;  %v5232_v21 = vsel %vm3388_vm1, %v3693_v45, 0  ;;  %v3470_v28 = vld [vmem:[#allocation2 + $0x68] sm:$0xff] }
 0x60a   : > { %5380 = vmatmul.f32.gmra.mxu2 %v5379_v15  ;;  %v4835_v56 = vpop.f32.mrf.mxu3  ;;  %v5393_v15 = vand.u32 4294901760, %v5392_v10  ;;  %v11234_v1 = vand.u32 4294901760, %v5232_v21 }
 0x60b   : > { %v4836_v43 = vadd.f32 %v4835_v56, %v4631_v19 }
 0x60c   : > { %v5408_v45 = vsub.f32 %v5232_v21, %v11234_v1 }
 0x60d   : > { %v4635_v22 = vpop.f32.mrf.mxu2  ;;  %v5009_v63 = vadd.f32 %v5008_v40, %v4836_v43  ;;  %v5161_v35 = vpop.f32.mrf.mxu1  ;;  %v5394_v43 = vsub.f32 %v5392_v10, %v5393_v15 }
 0x60e   : > { %v5016_v48 = vpop.f32.mrf.mxu0  ;;  %v4636_v19 = vadd.f32 %v4635_v22, %v13419_v33  ;;  %v3589_v22 = vpop.permute.xlu1 %3588  ;;  %v13421_v33 = vld [vmem:[#allocation83_spill] sm:$0xff] }
 0x60f   : > { %5637 = vmatmul.f32.gmra.mxu3 %v11175_v57  ;;  %v11227_v58 = vadd.f32 %v5157_v52, %v5009_v63  ;;  %v3694_v7 = vmul.f32 %v3589_v22, %v3470_v28  ;;  %v3594_v28 = vpop.permute.xlu2 %3593 }
 0x610   : > { %5989 = vmatmul.f32.gmra.mxu1 %v5377_v20 }
 0x611   : > { %13418 = vst [vmem:[#allocation72_spill] sm:$0xff] %v11227_v58  ;;  %5804 = vmatmul.f32.gmra.mxu0 %v5384_v0  ;;  %7792 = vrot.lane.b32.xlu1 %v11227_v58, %s8383_s16  ;;  %v5395_v0 = vand.u32 4294901760, %v5394_v43  ;;  %v5235_v58 = vsel %vm3388_vm1, %v3694_v7, 0  ;;  %v3471_v43 = vld [vmem:[#allocation2 + $0x70] sm:$0xff] }
 0x612   : > { %5388 = vmatmul.f32.gmra.mxu2 %v5387_v14  ;;  %v4841_v40 = vpop.f32.mrf.mxu3  ;;  %v5401_v14 = vand.u32 4294901760, %v5400_v11  ;;  %v11244_v22 = vand.u32 4294901760, %v5235_v58  ;;  %v3695_v21 = vmul.f32 %v3594_v28, %v3471_v43 }
 0x613   : > { %v4842_v56 = vadd.f32 %v4841_v40, %v4636_v19 }
 0x614   : > { %v5416_v7 = vsub.f32 %v5235_v58, %v11244_v22 }
 0x615   : > { %v4640_v20 = vpop.f32.mrf.mxu2  ;;  %v5013_v52 = vadd.f32 %v5012_v2, %v4842_v56  ;;  %v5165_v63 = vpop.f32.mrf.mxu1  ;;  %v5402_v56 = vsub.f32 %v5400_v11, %v5401_v14 }
 0x616   : > { %v5020_v36 = vpop.f32.mrf.mxu0  ;;  %v4641_v19 = vadd.f32 %v4640_v20, %v13421_v33  ;;  %v13423_v33 = vld [vmem:[#allocation84_spill] sm:$0xff] }
 0x617   : > { %5641 = vmatmul.f32.gmra.mxu3 %v11203_v42  ;;  %v11237_v8 = vadd.f32 %v5161_v35, %v5013_v52 }
 0x618   : > { %5995 = vmatmul.f32.gmra.mxu1 %v5385_v47 }
 0x619   : > { %13420 = vst [vmem:[#allocation90_spill] sm:$0xff] %v11237_v8  ;;  %5809 = vmatmul.f32.gmra.mxu0 %v5392_v10  ;;  %7794 = vrot.lane.b32.xlu2 %v11237_v8, %s8383_s16  ;;  %v5403_v10 = vand.u32 4294901760, %v5402_v56  ;;  %v5238_v8 = vsel %vm3388_vm1, %v3695_v21, 0  ;;  %v3472_v56 = vld [vmem:[#allocation2 + $0x78] sm:$0xff] }
 0x61a   : > { %5396 = vmatmul.f32.gmra.mxu2 %v5395_v0  ;;  %v4847_v2 = vpop.f32.mrf.mxu3  ;;  %v5409_v0 = vand.u32 4294901760, %v5408_v45  ;;  %v11254_v43 = vand.u32 4294901760, %v5238_v8 }
 0x61b   : > { %v4848_v40 = vadd.f32 %v4847_v2, %v4641_v19 }
 0x61c   : > { %v11263_v21 = vsub.f32 %v5238_v8, %v11254_v43 }
 0x61d   : > { %v4645_v47 = vpop.f32.mrf.mxu2  ;;  %v5017_v35 = vadd.f32 %v5016_v48, %v4848_v40  ;;  %v5169_v52 = vpop.f32.mrf.mxu1  ;;  %v5410_v40 = vsub.f32 %v5408_v45, %v5409_v0 }
 0x61e   : > { %v5024_v9 = vpop.f32.mrf.mxu0  ;;  %v4646_v19 = vadd.f32 %v4645_v47, %v13423_v33  ;;  %v3599_v47 = vpop.permute.xlu0 %3598  ;;  %v13425_v33 = vld [vmem:[#allocation85_spill] sm:$0xff]  ;;  %v5425_v8 = vand.u32 4294901760, %v11263_v21 }
 0x61f   : > { %5645 = vmatmul.f32.gmra.mxu3 %v11214_v55  ;;  %v11247_v20 = vadd.f32 %v5165_v63, %v5017_v35  ;;  %v3696_v58 = vmul.f32 %v3599_v47, %v3472_v56 }
 0x620   : > { %6001 = vmatmul.f32.gmra.mxu1 %v5393_v15 }
 0x621   : > { %13422 = vst [vmem:[#allocation74_spill] sm:$0xff] %v11247_v20  ;;  %5814 = vmatmul.f32.gmra.mxu0 %v5400_v11  ;;  %7796 = vrot.lane.b32.xlu0 %v11247_v20, %s8383_s16  ;;  %v5411_v11 = vand.u32 4294901760, %v5410_v40 }
 0x622   : > { %5404 = vmatmul.f32.gmra.mxu2 %v5403_v10  ;;  %v4853_v48 = vpop.f32.mrf.mxu3  ;;  %v5417_v10 = vand.u32 4294901760, %v5416_v7 }
 0x623   : > { %v4854_v2 = vadd.f32 %v4853_v48, %v4646_v19 }
 0x625   : > { %v4650_v15 = vpop.f32.mrf.mxu2  ;;  %v5021_v63 = vadd.f32 %v5020_v36, %v4854_v2  ;;  %v5173_v35 = vpop.f32.mrf.mxu1  ;;  %v5418_v2 = vsub.f32 %v5416_v7, %v5417_v10 }
 0x626   : > { %v5028_v60 = vpop.f32.mrf.mxu0  ;;  %v4651_v19 = vadd.f32 %v4650_v15, %v13425_v33  ;;  %v3604_v15 = vpop.permute.xlu1 %3603 }
 0x627   : > { %5649 = vmatmul.f32.gmra.mxu3 %v11224_v44  ;;  %v11257_v28 = vadd.f32 %v5169_v52, %v5021_v63  ;;  %v3473_v52 = vld [vmem:[#allocation2 + $0x80] sm:$0xff] }
 0x628   : > { %6007 = vmatmul.f32.gmra.mxu1 %v5401_v14  ;;  %v5241_v14 = vsel %vm3388_vm1, %v3696_v58, 0  ;;  %v3697_v33 = vmul.f32 %v3604_v15, %v3473_v52 }
 0x629   : > { %13424 = vst [vmem:[#allocation75_spill] sm:$0xff] %v11257_v28  ;;  %5819 = vmatmul.f32.gmra.mxu0 %v5408_v45  ;;  %7798 = vrot.lane.b32.xlu1 %v11257_v28, %s8383_s16  ;;  %v11266_v47 = vand.u32 4294901760, %v5241_v14  ;;  %v5419_v45 = vand.u32 4294901760, %v5418_v2 }
 0x62a   : > { %5412 = vmatmul.f32.gmra.mxu2 %v5411_v11  ;;  %v4859_v36 = vpop.f32.mrf.mxu3 }
 0x62b   : > { %v4860_v48 = vadd.f32 %v4859_v36, %v4651_v19  ;;  %v13427_v19 = vld [vmem:[#allocation86_spill] sm:$0xff]  ;;  %v11276_v58 = vsub.f32 %v5241_v14, %v11266_v47 }
 0x62d   : > { %v4655_v40 = vpop.f32.mrf.mxu2  ;;  %v5025_v63 = vadd.f32 %v5024_v9, %v4860_v48  ;;  %v5177_v20 = vpop.f32.mrf.mxu1  ;;  %v5433_v14 = vand.u32 4294901760, %v11276_v58 }
 0x62e   : > { %v5032_v56 = vpop.f32.mrf.mxu0  ;;  %v4656_v36 = vadd.f32 %v4655_v40, %v13427_v19  ;;  %v3609_v40 = vpop.permute.xlu2 %3608 }
 0x62f   : > { %5653 = vmatmul.f32.gmra.mxu3 %v11234_v1  ;;  %v11269_v11 = vadd.f32 %v5173_v35, %v5025_v63  ;;  %v5244_v35 = vsel %vm3388_vm1, %v3697_v33, 0  ;;  %v3474_v63 = vld [vmem:[#allocation2 + $0x88] sm:$0xff] }
 0x630   : > { %6013 = vmatmul.f32.gmra.mxu1 %v5409_v0  ;;  %v5426_v0 = vsub.f32 %v11263_v21, %v5425_v8  ;;  %v3943_v33 = vld [vmem:[%s12684_s6 + $0x8] sm:$0xff] }
 0x631   : > { %13426 = vst [vmem:[#allocation76_spill] sm:$0xff] %v11269_v11  ;;  %5824 = vmatmul.f32.gmra.mxu0 %v5416_v7  ;;  %7800 = vrot.lane.b32.xlu2 %v11269_v11, %s8383_s16 }
 0x632   : > { %5420 = vmatmul.f32.gmra.mxu2 %v5419_v45  ;;  %v4865_v9 = vpop.f32.mrf.mxu3  ;;  %v11280_v45 = vand.u32 4294901760, %v5244_v35  ;;  %v5427_v7 = vand.u32 4294901760, %v5426_v0 }
 0x633   : > { %v4866_v48 = vadd.f32 %v4865_v9, %v4656_v36  ;;  %v3698_v36 = vmul.f32 %v3609_v40, %v3474_v63  ;;  %v11289_v9 = vand.u32 4294901760, %v3943_v33  ;;  %v5434_v63 = vsub.f32 %v11276_v58, %v5433_v14 }
 0x635   : > { %v4660_v2 = vpop.f32.mrf.mxu2  ;;  %v5029_v28 = vadd.f32 %v5028_v60, %v4866_v48  ;;  %v5181_v52 = vpop.f32.mrf.mxu1  ;;  %v13429_v60 = vld [vmem:[#allocation88_spill] sm:$0xff]  ;;  %6553 = vmatpush.msrb.mxu0 %v11289_v9  ;;  %7180 = vmatpush.msra.mxu3 %v11289_v9 }
 0x636   : > { %v5036_v15 = vpop.f32.mrf.mxu0  ;;  %v4661_v48 = vadd.f32 %v4660_v2, %v13429_v60  ;;  %v5247_v2 = vsel %vm3388_vm1, %v3698_v36, 0  ;;  %v5435_v36 = vand.u32 4294901760, %v5434_v63 }
 0x637   : > { %5657 = vmatmul.f32.gmra.mxu3 %v11244_v22  ;;  %v11283_v19 = vadd.f32 %v5177_v20, %v5029_v28  ;;  %v11297_v20 = vsub.f32 %v3943_v33, %v11289_v9  ;;  %v5440_v28 = vsub.f32 %v5244_v35, %v11280_v45  ;;  %v11308_v33 = vand.u32 4294901760, %v5247_v2 }
 0x638   : > { %6019 = vmatmul.f32.gmra.mxu1 %v5417_v10 }
 0x639   : > { %13428 = vst [vmem:[#allocation77_spill] sm:$0xff] %v11283_v19  ;;  %5829 = vmatmul.f32.gmra.mxu0 %v11263_v21  ;;  %7802 = vrot.lane.b32.xlu0 %v11283_v19, %s8383_s16  ;;  %v12938_v21 = vand.u32 4294901760, %v11297_v20  ;;  %v5441_v38 = vand.u32 4294901760, %v5440_v28 }
 0x63a   : > { %5428 = vmatmul.f32.gmra.mxu2 %v5427_v7  ;;  %v4871_v10 = vpop.f32.mrf.mxu3  ;;  %v3475_v7 = vld [vmem:[#allocation2 + $0x90] sm:$0xff] }
 0x63b   : > { %v4872_v0 = vadd.f32 %v4871_v10, %v4661_v48  ;;  %6998 = vmatpush.msra.mxu2 %v11297_v20  ;;  %v6840_v35 = vsub.f32 %v11297_v20, %v12938_v21  ;;  %v3614_v48 = vpop.permute.xlu0 %3613  ;;  %v5448_v21 = vsub.f32 %v5247_v2, %v11308_v33 }
 0x63c   : > { %v3699_v25 = vmul.f32 %v3614_v48, %v3475_v7 }
 0x63d   : > { %v4665_v40 = vpop.f32.mrf.mxu2  ;;  %v5033_v60 = vadd.f32 %v5032_v56, %v4872_v0  ;;  %v5185_v19 = vpop.f32.mrf.mxu1  ;;  %v6841_v54 = vand.u32 4294901760, %v6840_v35 }
 0x63e   : > { %v5040_v11 = vpop.f32.mrf.mxu0  ;;  %v4666_v56 = vadd.f32 %v4665_v40, %v13431_v59  ;;  %v3619_v40 = vpop.permute.xlu1 %3618 }
 0x63f   : > { %5661 = vmatmul.f32.gmra.mxu3 %v11254_v43  ;;  %v11311_v10 = vadd.f32 %v5181_v52, %v5033_v60  ;;  %6842 = vmatpush.msrb.mxu1 %v6841_v54  ;;  %v5250_v52 = vsel %vm3388_vm1, %v3699_v25, 0  ;;  %v3476_v60 = vld [vmem:[#allocation2 + $0x98] sm:$0xff]  ;;  %v5449_v54 = vand.u32 4294901760, %v5448_v21 }
 0x640   : > { %6025 = vmatmul.f32.gmra.mxu1 %v5425_v8  ;;  %v5442_v8 = vsub.f32 %v5440_v28, %v5441_v38  ;;  %v11319_v59 = vand.u32 4294901760, %v5250_v52  ;;  %v3700_v2 = vmul.f32 %v3619_v40, %v3476_v60  ;;  %v3624_v60 = vpop.permute.xlu2 %3623 }
 0x641   : > { %13430 = vst [vmem:[#allocation78_spill] sm:$0xff] %v11311_v10  ;;  %5834 = vmatmul.f32.gmra.mxu0 %v11276_v58  ;;  %7804 = vrot.lane.b32.xlu1 %v11311_v10, %s8383_s16  ;;  %v5450_v10 = vsub.f32 %v5448_v21, %v5449_v54 }
 0x642   : > { %5436 = vmatmul.f32.gmra.mxu2 %v5435_v36  ;;  %v4877_v0 = vpop.f32.mrf.mxu3  ;;  %v5443_v58 = vand.u32 4294901760, %v5442_v8  ;;  %v5456_v25 = vsub.f32 %v5250_v52, %v11319_v59  ;;  %v5253_v24 = vsel %vm3388_vm1, %v3700_v2, 0  ;;  %v3477_v8 = vld [vmem:[#allocation2 + $0xa0] sm:$0xff] }
 0x643   : > { %v4878_v29 = vadd.f32 %v4877_v0, %v4666_v56  ;;  %v13433_v56 = vld [vmem:[#allocation91_spill] sm:$0xff]  ;;  %v11329_v40 = vand.u32 4294901760, %v5253_v24  ;;  %v3701_v52 = vmul.f32 %v3624_v60, %v3477_v8  ;;  %v11337_v2 = vld [vmem:[%s12686_s8] ss:$0 sm:$0xff] }
 0x645   : > { %v4670_v63 = vpop.f32.mrf.mxu2  ;;  %v5037_v7 = vadd.f32 %v5036_v15, %v4878_v29  ;;  %v5189_v35 = vpop.f32.mrf.mxu1 }
 0x646   : > { %v5760_v48 = vpop.f32.mrf.mxu0  ;;  %v4671_v0 = vadd.f32 %v4670_v63, %v13433_v56 }
 0x647   : > { %5665 = vmatmul.f32.gmra.mxu3 %v11266_v47  ;;  %v11322_v36 = vadd.f32 %v5185_v19, %v5037_v7 }
 0x648   : > { %6031 = vmatmul.f32.gmra.mxu1 %v5433_v14  ;;  %v3639_v5 = vpop.permute.xlu2 %3638 }
 0x649   : > { %13432 = vst [vmem:[#allocation79_spill] sm:$0xff] %v11322_v36  ;;  %5839 = vmatmul.f32.gmra.mxu0 %v5440_v28  ;;  %7806 = vrot.lane.b32.xlu2 %v11322_v36, %s8383_s16  ;;  %v5451_v28 = vand.u32 4294901760, %v5450_v10 }
 0x64a   : > { %5444 = vmatmul.f32.gmra.mxu2 %v5443_v58  ;;  %v4883_v29 = vpop.f32.mrf.mxu3  ;;  %v5457_v58 = vand.u32 4294901760, %v5456_v25 }
 0x64b   : > { %v4884_v15 = vadd.f32 %v4883_v29, %v4671_v0  ;;  %v5256_v0 = vsel %vm3388_vm1, %v3701_v52, 0 }
 0x64c   : > { %v11344_v36 = vand.u32 4294901760, %v5256_v0 }
 0x64d   : > { %v5317_v14 = vpop.f32.mrf.mxu2  ;;  %v5041_v19 = vadd.f32 %v5040_v11, %v4884_v15  ;;  %v5942_v7 = vpop.f32.mrf.mxu1  ;;  %v3478_v15 = vld [vmem:[#allocation2 + $0xa8] sm:$0xff] }
 0x64e   : > { %v5765_v34 = vpop.f32.mrf.mxu0  ;;  %v5318_v11 = vadd.f32 %v11337_v2, %v5317_v14  ;;  %v3629_v14 = vpop.permute.xlu0 %3628 }
 0x64f   : > { %5669 = vmatmul.f32.gmra.mxu3 %v11280_v45  ;;  %v11332_v63 = vadd.f32 %v5189_v35, %v5041_v19  ;;  %v5458_v35 = vsub.f32 %v5456_v25, %v5457_v58 }
 0x650   : > { %6037 = vmatmul.f32.gmra.mxu1 %v5441_v38  ;;  %v5464_v38 = vsub.f32 %v5253_v24, %v11329_v40  ;;  %v3702_v24 = vmul.f32 %v3629_v14, %v3478_v15 }
 0x651   : > { %13434 = vst [vmem:[#allocation80_spill] sm:$0xff] %v11332_v63  ;;  %5844 = vmatmul.f32.gmra.mxu0 %v5448_v21  ;;  %7808 = vrot.lane.b32.xlu0 %v11332_v63, %s8383_s16  ;;  %v5459_v21 = vand.u32 4294901760, %v5458_v35 }
 0x652   : > { %5452 = vmatmul.f32.gmra.mxu2 %v5451_v28  ;;  %v5606_v56 = vpop.f32.mrf.mxu3  ;;  %v5465_v28 = vand.u32 4294901760, %v5464_v38  ;;  %v5259_v41 = vsel %vm3388_vm1, %v3702_v24, 0 }
 0x653   : > { %v5607_v10 = vadd.f32 %v5606_v56, %v5318_v11  ;;  %v11352_v6 = vand.u32 4294901760, %v5259_v41 }
 0x655   : > { %v5325_v29 = vpop.f32.mrf.mxu2  ;;  %v5761_v8 = vadd.f32 %v5760_v48, %v5607_v10  ;;  %v5948_v19 = vpop.f32.mrf.mxu1  ;;  %v5472_v48 = vsub.f32 %v5256_v0, %v11344_v36  ;;  %v5466_v10 = vsub.f32 %v5464_v38, %v5465_v28  ;;  %13435 = vst [vmem:[#allocation81_spill] sm:$0xff] %v11352_v6 }
 0x656   : > { %v5770_v60 = vpop.f32.mrf.mxu0  ;;  %v5326_v11 = vadd.f32 %v11337_v2, %v5325_v29 }
 0x657   : > { %5673 = vmatmul.f32.gmra.mxu3 %v11308_v33  ;;  %v11347_v63 = vadd.f32 %v5942_v7, %v5761_v8  ;;  %v3634_v7 = vpop.permute.xlu1 %3633  ;;  %v5467_v29 = vand.u32 4294901760, %v5466_v10 }
 0x658   : > { %6043 = vmatmul.f32.gmra.mxu1 %v5449_v54  ;;  %v3703_v0 = vmul.f32 %v3634_v7, %v3479_v16 }
 0x659   : > { %5849 = vmatmul.f32.gmra.mxu0 %v5456_v25  ;;  %v5473_v25 = vand.u32 4294901760, %v5472_v48 }
 0x65a   : > { %5460 = vmatmul.f32.gmra.mxu2 %v5459_v21  ;;  %v5610_v52 = vpop.f32.mrf.mxu3 }
 0x65b   : > { %v5611_v56 = vadd.f32 %v5610_v52, %v5326_v11  ;;  %v5474_v24 = vsub.f32 %v5472_v48, %v5473_v25  ;;  %v5262_v11 = vsel %vm3388_vm1, %v3703_v0, 0 }
 0x65d   : > { %v5333_v53 = vpop.f32.mrf.mxu2  ;;  %v5766_v30 = vadd.f32 %v5765_v34, %v5611_v56  ;;  %v5954_v54 = vpop.f32.mrf.mxu1  ;;  %v5480_v34 = vsub.f32 %v5259_v41, %v11352_v6  ;;  %v3480_v56 = vld [vmem:[#allocation2 + $0xb8] sm:$0xff]  ;;  %v5475_v16 = vand.u32 4294901760, %v5474_v24 }
 0x65e   : > { %v5775_v35 = vpop.f32.mrf.mxu0  ;;  %v5334_v8 = vadd.f32 %v11337_v2, %v5333_v53  ;;  %v3704_v41 = vmul.f32 %v3639_v5, %v3480_v56  ;;  %v3644_v5 = vpop.permute.xlu0 %3643 }
 0x65f   : > { %5677 = vmatmul.f32.gmra.mxu3 %v11319_v59  ;;  %v11355_v15 = vadd.f32 %v5948_v19, %v5766_v30  ;;  %v11360_v30 = vand.u32 4294901760, %v5262_v11  ;;  %v5481_v53 = vand.u32 4294901760, %v5480_v34 }
 0x660   : > { %6049 = vmatmul.f32.gmra.mxu1 %v5457_v58 }
 0x661   : > { %5854 = vmatmul.f32.gmra.mxu0 %v5464_v38  ;;  %v5482_v0 = vsub.f32 %v5480_v34, %v5481_v53 }
 0x662   : > { %5468 = vmatmul.f32.gmra.mxu2 %v5467_v29  ;;  %v5614_v14 = vpop.f32.mrf.mxu3 }
 0x663   : > { %v5615_v21 = vadd.f32 %v5614_v14, %v5334_v8  ;;  %v5265_v8 = vsel %vm3388_vm1, %v3704_v41, 0 }
 0x665   : > { %v5341_v52 = vpop.f32.mrf.mxu2  ;;  %v5771_v32 = vadd.f32 %v5770_v60, %v5615_v21  ;;  %v5960_v58 = vpop.f32.mrf.mxu1  ;;  %v11367_v60 = vsub.f32 %v5262_v11, %v11360_v30  ;;  %v3481_v21 = vld [vmem:[#allocation2 + $0xc0] sm:$0xff] }
 0x666   : > { %v5780_v10 = vpop.f32.mrf.mxu0  ;;  %v5342_v19 = vadd.f32 %v11337_v2, %v5341_v52  ;;  %v3705_v52 = vmul.f32 %v3644_v5, %v3481_v21  ;;  %v3649_v21 = vpop.permute.xlu1 %3648 }
 0x667   : > { %5681 = vmatmul.f32.gmra.mxu3 %v11329_v40  ;;  %v11363_v38 = vadd.f32 %v5954_v54, %v5771_v32  ;;  %v11370_v32 = vand.u32 4294901760, %v5265_v8  ;;  %v5489_v54 = vand.u32 4294901760, %v11367_v60 }
 0x668   : > { %6055 = vmatmul.f32.gmra.mxu1 %v5465_v28 }
 0x669   : > { %5859 = vmatmul.f32.gmra.mxu0 %v5472_v48  ;;  %v5483_v48 = vand.u32 4294901760, %v5482_v0 }
 0x66a   : > { %5476 = vmatmul.f32.gmra.mxu2 %v5475_v16  ;;  %v5618_v7 = vpop.f32.mrf.mxu3 }
 0x66b   : > { %v5619_v29 = vadd.f32 %v5618_v7, %v5342_v19  ;;  %v5490_v19 = vsub.f32 %v11367_v60, %v5489_v54  ;;  %v5268_v7 = vsel %vm3388_vm1, %v3705_v52, 0 }
 0x66d   : > { %v5349_v14 = vpop.f32.mrf.mxu2  ;;  %v5776_v28 = vadd.f32 %v5775_v35, %v5619_v29  ;;  %v5966_v24 = vpop.f32.mrf.mxu1  ;;  %v11378_v35 = vsub.f32 %v5265_v8, %v11370_v32  ;;  %v3482_v29 = vld [vmem:[#allocation2 + $0xc8] sm:$0xff] }
 0x66e   : > { %v5785_v49 = vpop.f32.mrf.mxu0  ;;  %v5350_v56 = vadd.f32 %v11337_v2, %v5349_v14  ;;  %v3942_v14 = vld [vmem:[%s12684_s6] sm:$0xff] }
 0x66f   : > { %5685 = vmatmul.f32.gmra.mxu3 %v11344_v36  ;;  %v11374_v11 = vadd.f32 %v5960_v58, %v5776_v28  ;;  %v11382_v28 = vand.u32 4294901760, %v5268_v7  ;;  %v5497_v8 = vand.u32 4294901760, %v11378_v35  ;;  %v6554_v52 = vand.u32 4294901760, %v3942_v14 }
 0x670   : > { %6061 = vmatmul.f32.gmra.mxu1 %v5473_v25 }
 0x671   : > { %5864 = vmatmul.f32.gmra.mxu0 %v5480_v34  ;;  %13436 = vst [vmem:[#allocation82_spill] sm:$0xff] %v11382_v28  ;;  %v5491_v34 = vand.u32 4294901760, %v5490_v19  ;;  %7182 = vmatpush.msra.mxu3 %v6554_v52  ;;  %v5498_v19 = vsub.f32 %v11378_v35, %v5497_v8 }
 0x672   : > { %5484 = vmatmul.f32.gmra.mxu2 %v5483_v48  ;;  %v5622_v16 = vpop.f32.mrf.mxu3  ;;  %v3706_v48 = vmul.f32 %v3649_v21, %v3482_v29  ;;  %6555 = vmatpush.msrb.mxu0 %v6554_v52  ;;  %v3483_v21 = vld [vmem:[#allocation2 + $0xd0] sm:$0xff] }
 0x673   : > { %v5623_v41 = vadd.f32 %v5622_v16, %v5350_v56  ;;  %v6844_v16 = vsub.f32 %v3942_v14, %v6554_v52  ;;  %v13439_v14 = vand.u32 4294901760, %v11192_v31 }
 0x674   : > { %v5271_v29 = vsel %vm3388_vm1, %v3706_v48, 0 }
 0x675   : > { %v5357_v25 = vpop.f32.mrf.mxu2  ;;  %v5781_v0 = vadd.f32 %v5780_v10, %v5623_v41  ;;  %v5972_v17 = vpop.f32.mrf.mxu1  ;;  %7001 = vmatpush.msra.mxu2 %v6844_v16 }
 0x676   : > { %v5790_v58 = vpop.f32.mrf.mxu0  ;;  %v5358_v10 = vadd.f32 %v11337_v2, %v5357_v25  ;;  %v6845_v25 = vand.u32 4294901760, %v6844_v16 }
 0x677   : > { %5689 = vmatmul.f32.gmra.mxu3 %v11352_v6  ;;  %v11389_v5 = vadd.f32 %v5966_v24, %v5781_v0  ;;  %v13438_v24 = vand.u32 4294901760, %v11074_v18  ;;  %v5499_v18 = vand.u32 4294901760, %v5498_v19 }
 0x678   : > { %6067 = vmatmul.f32.gmra.mxu1 %v5481_v53  ;;  %v11394_v53 = vsub.f32 %v5268_v7, %v11382_v28  ;;  %v6846_v7 = vsub.f32 %v6844_v16, %v6845_v25 }
 0x679   : > { %13437 = vst [vmem:[#allocation83_spill] sm:$0xff] %v11389_v5  ;;  %5869 = vmatmul.f32.gmra.mxu0 %v11367_v60  ;;  %v3654_v5 = vpop.permute.xlu2 %3653 }
 0x67a   : > { %5492 = vmatmul.f32.gmra.mxu2 %v5491_v34  ;;  %v5626_v56 = vpop.f32.mrf.mxu3  ;;  %7391 = vmatpush.msra.mxu0 %v13438_v24  ;;  %v5505_v48 = vand.u32 4294901760, %v11394_v53  ;;  %v3707_v24 = vmul.f32 %v3654_v5, %v3483_v21  ;;  %v6847_v23 = vand.u32 4294901760, %v6846_v7 }
 0x67b   : > { %v5627_v41 = vadd.f32 %v5626_v56, %v5358_v10  ;;  %v11402_v10 = vand.u32 4294901760, %v5271_v29 }
 0x67c   : > { %7395 = vmatpush.msra.mxu0 %v13439_v14  ;;  %6848 = vmatpush.msrb.mxu1 %v6847_v23  ;;  %v5506_v19 = vsub.f32 %v11394_v53, %v5505_v48  ;;  %v3659_v23 = vpop.permute.xlu0 %3658 }
 0x67d   : > { %v5365_v0 = vpop.f32.mrf.mxu2  ;;  %v5786_v60 = vadd.f32 %v5785_v49, %v5627_v41  ;;  %v5978_v34 = vpop.f32.mrf.mxu1  ;;  %13440 = vst [vmem:[#allocation84_spill] sm:$0xff] %v11402_v10  ;;  %v13441_v49 = vand.u32 4294901760, %v11297_v20  ;;  %v3484_v20 = vld [vmem:[#allocation2 + $0xd8] sm:$0xff] }
 0x67e   : > { %v5795_v6 = vpop.f32.mrf.mxu0  ;;  %v5366_v31 = vadd.f32 %v11337_v2, %v5365_v0  ;;  %7546 = vmatpush.msra.mxu1 %v11063_v46  ;;  %v3708_v46 = vmul.f32 %v3659_v23, %v3484_v20 }
 0x67f   : > { %5693 = vmatmul.f32.gmra.mxu3 %v11360_v30  ;;  %v11406_v56 = vadd.f32 %v5972_v17, %v5786_v60  ;;  %7399 = vmatpush.msra.mxu0 %v13441_v49  ;;  %v5274_v17 = vsel %vm3388_vm1, %v3707_v24, 0 }
 0x680   : > { %6073 = vmatmul.f32.gmra.mxu1 %v5489_v54  ;;  %v5512_v54 = vsub.f32 %v5271_v29, %v11402_v10  ;;  %v5507_v29 = vand.u32 4294901760, %v5506_v19 }
 0x681   : > { %5874 = vmatmul.f32.gmra.mxu0 %v11378_v35  ;;  %7548 = vmatpush.msra.mxu1 %v11184_v26  ;;  %v11417_v35 = vand.u32 4294901760, %v5274_v17 }
 0x682   : > { %5500 = vmatmul.f32.gmra.mxu2 %v5499_v18  ;;  %v5630_v16 = vpop.f32.mrf.mxu3  ;;  %7403 = vmatpush.msra.mxu0 %v6845_v25  ;;  %v5513_v25 = vand.u32 4294901760, %v5512_v54 }
 0x683   : > { %v5631_v41 = vadd.f32 %v5630_v16, %v5366_v31  ;;  %13442 = vst [vmem:[#allocation85_spill] sm:$0xff] %v11417_v35  ;;  %7550 = vmatpush.msra.mxu1 %v11289_v9  ;;  %v3485_v31 = vld [vmem:[#allocation2 + $0xe0] sm:$0xff]  ;;  %v3664_v9 = vpop.permute.xlu1 %3663 }
 0x684   : > { %v5514_v24 = vsub.f32 %v5512_v54, %v5513_v25 }
 0x685   : > { %v5373_v5 = vpop.f32.mrf.mxu2  ;;  %v5791_v21 = vadd.f32 %v5790_v58, %v5631_v41  ;;  %v5984_v60 = vpop.f32.mrf.mxu1  ;;  %7552 = vmatpush.msra.mxu1 %v6554_v52  ;;  %v5520_v58 = vsub.f32 %v5274_v17, %v11417_v35  ;;  %v3709_v17 = vmul.f32 %v3664_v9, %v3485_v31 }
 0x686   : > { %v5800_v0 = vpop.f32.mrf.mxu0  ;;  %v5374_v7 = vadd.f32 %v11337_v2, %v5373_v5 }
 0x687   : > { %5697 = vmatmul.f32.gmra.mxu3 %v11370_v32  ;;  %v11420_v14 = vadd.f32 %v5978_v34, %v5791_v21  ;;  %v5521_v5 = vand.u32 4294901760, %v5520_v58 }
 0x688   : > { %6079 = vmatmul.f32.gmra.mxu1 %v5497_v8  ;;  %v5277_v8 = vsel %vm3388_vm1, %v3708_v46, 0  ;;  %v5280_v46 = vsel %vm3388_vm1, %v3709_v17, 0 }
 0x689   : > { %5879 = vmatmul.f32.gmra.mxu0 %v11394_v53  ;;  %v11427_v19 = vand.u32 4294901760, %v5277_v8  ;;  %v5515_v53 = vand.u32 4294901760, %v5514_v24 }
 0x68a   : > { %5508 = vmatmul.f32.gmra.mxu2 %v5507_v29  ;;  %v5634_v26 = vpop.f32.mrf.mxu3  ;;  %v5522_v29 = vsub.f32 %v5520_v58, %v5521_v5 }
 0x68b   : > { %v5635_v18 = vadd.f32 %v5634_v26, %v5374_v7  ;;  %13443 = vst [vmem:[#allocation86_spill] sm:$0xff] %v11427_v19  ;;  %v3486_v26 = vld [vmem:[#allocation2 + $0xe8] sm:$0xff] }
 0x68d   : > { %v5381_v49 = vpop.f32.mrf.mxu2  ;;  %v5796_v34 = vadd.f32 %v5795_v6, %v5635_v18  ;;  %v5990_v16 = vpop.f32.mrf.mxu1  ;;  %v5528_v6 = vsub.f32 %v5277_v8, %v11427_v19 }
 0x68e   : > { %v5805_v41 = vpop.f32.mrf.mxu0  ;;  %v5382_v20 = vadd.f32 %v11337_v2, %v5381_v49  ;;  %v5523_v49 = vand.u32 4294901760, %v5522_v29 }
 0x68f   : > { %5701 = vmatmul.f32.gmra.mxu3 %v11382_v28  ;;  %v11430_v52 = vadd.f32 %v5984_v60, %v5796_v34  ;;  %v3669_v28 = vpop.permute.xlu2 %3668  ;;  %v11435_v60 = vand.u32 4294901760, %v5280_v46 }
 0x690   : > { %6085 = vmatmul.f32.gmra.mxu1 %v5505_v48  ;;  %v3710_v8 = vmul.f32 %v3669_v28, %v3486_v26 }
 0x691   : > { %13444 = vst [vmem:[#allocation88_spill] sm:$0xff] %v11430_v52  ;;  %5884 = vmatmul.f32.gmra.mxu0 %v5512_v54  ;;  %v5529_v54 = vand.u32 4294901760, %v5528_v6 }
 0x692   : > { %5516 = vmatmul.f32.gmra.mxu2 %v5515_v53  ;;  %v5638_v21 = vpop.f32.mrf.mxu3  ;;  %13445 = vst [vmem:[#allocation89_spill] sm:$0xff] %v11435_v60 }
 0x693   : > { %v5639_v23 = vadd.f32 %v5638_v21, %v5382_v20  ;;  %v5530_v17 = vsub.f32 %v5528_v6, %v5529_v54  ;;  %v5283_v20 = vsel %vm3388_vm1, %v3710_v8, 0 }
 0x694   : > { %v11443_v52 = vand.u32 4294901760, %v5283_v20 }
 0x695   : > { %v5389_v7 = vpop.f32.mrf.mxu2  ;;  %v5801_v18 = vadd.f32 %v5800_v0, %v5639_v23  ;;  %v5996_v48 = vpop.f32.mrf.mxu1  ;;  %v5536_v0 = vsub.f32 %v5280_v46, %v11435_v60  ;;  %v3487_v23 = vld [vmem:[#allocation2 + $0xf0] sm:$0xff]  ;;  %v5531_v28 = vand.u32 4294901760, %v5530_v17 }
 0x696   : > { %v5810_v24 = vpop.f32.mrf.mxu0  ;;  %v5390_v34 = vadd.f32 %v11337_v2, %v5389_v7  ;;  %13447 = vst [vmem:[#allocation94_spill] sm:$0xff] %v11443_v52 }
 0x697   : > { %5705 = vmatmul.f32.gmra.mxu3 %v11402_v10  ;;  %v11438_v31 = vadd.f32 %v5990_v16, %v5801_v18  ;;  %v3674_v16 = vpop.permute.xlu0 %3673 }
 0x698   : > { %6091 = vmatmul.f32.gmra.mxu1 %v5513_v25  ;;  %v3711_v46 = vmul.f32 %v3674_v16, %v3487_v23 }
 0x699   : > { %13446 = vst [vmem:[#allocation91_spill] sm:$0xff] %v11438_v31  ;;  %5889 = vmatmul.f32.gmra.mxu0 %v5520_v58  ;;  %v5537_v58 = vand.u32 4294901760, %v5536_v0 }
 0x69a   : > { %5524 = vmatmul.f32.gmra.mxu2 %v5523_v49  ;;  %v5642_v9 = vpop.f32.mrf.mxu3 }
 0x69b   : > { %v5643_v53 = vadd.f32 %v5642_v9, %v5390_v34  ;;  %v5538_v8 = vsub.f32 %v5536_v0, %v5537_v58  ;;  %v5286_v34 = vsel %vm3388_vm1, %v3711_v46, 0 }
 0x69c   : > { %v11451_v31 = vand.u32 4294901760, %v5286_v34 }
 0x69d   : > { %v5397_v21 = vpop.f32.mrf.mxu2  ;;  %v5806_v10 = vadd.f32 %v5805_v41, %v5643_v53  ;;  %v6002_v25 = vpop.f32.mrf.mxu1  ;;  %v5544_v41 = vsub.f32 %v5283_v20, %v11443_v52  ;;  %v3488_v53 = vld [vmem:[#allocation2 + $0xf8] sm:$0xff] }
 0x69e   : > { %v5815_v29 = vpop.f32.mrf.mxu0  ;;  %v5398_v26 = vadd.f32 %v11337_v2, %v5397_v21 }
 0x69f   : > { %5709 = vmatmul.f32.gmra.mxu3 %v11417_v35  ;;  %v11446_v7 = vadd.f32 %v5996_v48, %v5806_v10  ;;  %v3679_v10 = vpop.permute.xlu1 %3678  ;;  %v5539_v48 = vand.u32 4294901760, %v5538_v8 }
 0x6a0   : > { %6097 = vmatmul.f32.gmra.mxu1 %v5521_v5  ;;  %v3712_v20 = vmul.f32 %v3679_v10, %v3488_v53  ;;  %v8292_v53 = vld [vmem:[%s8640_s19] sm:$0xff] }
 0x6a1   : > { %5894 = vmatmul.f32.gmra.mxu0 %v5528_v6  ;;  %v5545_v6 = vand.u32 4294901760, %v5544_v41 }
 0x6a2   : > { %5532 = vmatmul.f32.gmra.mxu2 %v5531_v28  ;;  %v5646_v18 = vpop.f32.mrf.mxu3 }
 0x6a3   : > { %v5647_v49 = vadd.f32 %v5646_v18, %v5398_v26  ;;  %v5546_v46 = vsub.f32 %v5544_v41, %v5545_v6  ;;  %v5289_v26 = vsel %vm3388_vm1, %v3712_v20, 0 }
 0x6a5   : > { %v5405_v9 = vpop.f32.mrf.mxu2  ;;  %v5811_v35 = vadd.f32 %v5810_v24, %v5647_v49  ;;  %v6008_v5 = vpop.f32.mrf.mxu1  ;;  %v5552_v24 = vsub.f32 %v5286_v34, %v11451_v31 }
 0x6a6   : > { %v5820_v17 = vpop.f32.mrf.mxu0  ;;  %v5406_v23 = vadd.f32 %v11337_v2, %v5405_v9 }
 0x6a7   : > { %5713 = vmatmul.f32.gmra.mxu3 %v11427_v19  ;;  %v11454_v21 = vadd.f32 %v6002_v25, %v5811_v35  ;;  %v3748_v19 = vpop.permute.xlu2 %3747  ;;  %v11459_v35 = vand.u32 4294901760, %v5289_v26  ;;  %v5547_v25 = vand.u32 4294901760, %v5546_v46 }
 0x6a8   : > { %6103 = vmatmul.f32.gmra.mxu1 %v5529_v54  ;;  %v3905_v34 = vmul.f32 %v8292_v53, %v3748_v19 }
 0x6a9   : > { %5899 = vmatmul.f32.gmra.mxu0 %v5536_v0  ;;  %v5553_v0 = vand.u32 4294901760, %v5552_v24 }
 0x6aa   : > { %5540 = vmatmul.f32.gmra.mxu2 %v5539_v48  ;;  %v5650_v16 = vpop.f32.mrf.mxu3 }
 0x6ab   : > { %v5651_v28 = vadd.f32 %v5650_v16, %v5406_v23  ;;  %v5554_v23 = vsub.f32 %v5552_v24, %v5553_v0  ;;  %v6441_v16 = vsel %vm3388_vm1, %v3905_v34, 0 }
 0x6ad   : > { %v5413_v18 = vpop.f32.mrf.mxu2  ;;  %v5816_v49 = vadd.f32 %v5815_v29, %v5651_v28  ;;  %v6014_v54 = vpop.f32.mrf.mxu1  ;;  %v5560_v29 = vsub.f32 %v5289_v26, %v11459_v35  ;;  %v5555_v19 = vand.u32 4294901760, %v5554_v23 }
 0x6ae   : > { %v5825_v8 = vpop.f32.mrf.mxu0  ;;  %v5414_v10 = vadd.f32 %v11337_v2, %v5413_v18 }
 0x6af   : > { %5717 = vmatmul.f32.gmra.mxu3 %v11435_v60  ;;  %v11462_v9 = vadd.f32 %v6008_v5, %v5816_v49  ;;  %v11468_v5 = vand.u32 4294901760, %v6441_v16  ;;  %v3753_v49 = vpop.permute.xlu0 %3752 }
 0x6b0   : > { %6109 = vmatmul.f32.gmra.mxu1 %v5537_v58 }
 0x6b1   : > { %5904 = vmatmul.f32.gmra.mxu0 %v5544_v41  ;;  %13448 = vst [vmem:[#allocation95_spill] sm:$0xff] %v11468_v5  ;;  %v5561_v41 = vand.u32 4294901760, %v5560_v29 }
 0x6b2   : > { %5548 = vmatmul.f32.gmra.mxu2 %v5547_v25  ;;  %v5654_v48 = vpop.f32.mrf.mxu3  ;;  %v8293_v25 = vld [vmem:[%s8640_s19 + $0x8] sm:$0xff] }
 0x6b3   : > { %v5655_v20 = vadd.f32 %v5654_v48, %v5414_v10  ;;  %v3906_v26 = vmul.f32 %v8293_v25, %v3753_v49  ;;  %v5562_v48 = vsub.f32 %v5560_v29, %v5561_v41 }
 0x6b5   : > { %v5421_v28 = vpop.f32.mrf.mxu2  ;;  %v5821_v58 = vadd.f32 %v5820_v17, %v5655_v20  ;;  %v6020_v46 = vpop.f32.mrf.mxu1  ;;  %v11476_v17 = vsub.f32 %v6441_v16, %v11468_v5  ;;  %v6444_v20 = vsel %vm3388_vm1, %v3906_v26, 0  ;;  %v8294_v16 = vld [vmem:[%s8640_s19 + $0x10] sm:$0xff] }
 0x6b6   : > { %v5830_v60 = vpop.f32.mrf.mxu0  ;;  %v5422_v53 = vadd.f32 %v11337_v2, %v5421_v28  ;;  %v11480_v49 = vand.u32 4294901760, %v6444_v20  ;;  %v3758_v28 = vpop.permute.xlu1 %3757 }
 0x6b7   : > { %5721 = vmatmul.f32.gmra.mxu3 %v11443_v52  ;;  %v11471_v18 = vadd.f32 %v6014_v54, %v5821_v58  ;;  %13449 = vst [vmem:[#allocation96_spill] sm:$0xff] %v11476_v17  ;;  %v12969_v58 = vand.u32 4294901760, %v11476_v17  ;;  %v3907_v25 = vmul.f32 %v8294_v16, %v3758_v28 }
 0x6b8   : > { %6115 = vmatmul.f32.gmra.mxu1 %v5545_v6  ;;  %13450 = vst [vmem:[#allocation97_spill] sm:$0xff] %v11480_v49 }
 0x6b9   : > { %5909 = vmatmul.f32.gmra.mxu0 %v5552_v24  ;;  %v5563_v24 = vand.u32 4294901760, %v5562_v48  ;;  %v6559_v26 = vsub.f32 %v11476_v17, %v12969_v58 }
 0x6ba   : > { %5556 = vmatmul.f32.gmra.mxu2 %v5555_v19  ;;  %v5658_v34 = vpop.f32.mrf.mxu3 }
 0x6bb   : > { %v5659_v10 = vadd.f32 %v5658_v34, %v5422_v53  ;;  %v11491_v34 = vsub.f32 %v6444_v20, %v11480_v49  ;;  %v6560_v16 = vand.u32 4294901760, %v6559_v26  ;;  %v8295_v20 = vld [vmem:[%s8640_s19 + $0x18] sm:$0xff] }
 0x6bd   : > { %v5429_v6 = vpop.f32.mrf.mxu2  ;;  %v5826_v23 = vadd.f32 %v5825_v8, %v5659_v10  ;;  %v6026_v52 = vpop.f32.mrf.mxu1  ;;  %13451 = vst [vmem:[#allocation98_spill] sm:$0xff] %v11491_v34 }
 0x6be   : > { %v5835_v54 = vpop.f32.mrf.mxu0  ;;  %v5430_v53 = vadd.f32 %v11337_v2, %v5429_v6  ;;  %v3763_v6 = vpop.permute.xlu2 %3762 }
 0x6bf   : > { %5725 = vmatmul.f32.gmra.mxu3 %v11451_v31  ;;  %v11483_v19 = vadd.f32 %v6020_v46, %v5826_v23  ;;  %v3908_v17 = vmul.f32 %v8295_v20, %v3763_v6  ;;  %v3768_v20 = vpop.permute.xlu0 %3767 }
 0x6c0   : > { %6121 = vmatmul.f32.gmra.mxu1 %v5553_v0  ;;  %v6447_v0 = vsel %vm3388_vm1, %v3907_v25, 0 }
 0x6c1   : > { %5914 = vmatmul.f32.gmra.mxu0 %v5560_v29  ;;  %v12972_v29 = vand.u32 4294901760, %v11491_v34 }
 0x6c2   : > { %5564 = vmatmul.f32.gmra.mxu2 %v5563_v24  ;;  %v5662_v8 = vpop.f32.mrf.mxu3  ;;  %v11494_v24 = vand.u32 4294901760, %v6447_v0 }
 0x6c3   : > { %v5663_v10 = vadd.f32 %v5662_v8, %v5430_v53 }
 0x6c4   : > { %13452 = vst [vmem:[#allocation99_spill] sm:$0xff] %v11494_v24  ;;  %v11504_v25 = vsub.f32 %v6447_v0, %v11494_v24 }
 0x6c5   : > { %v5437_v46 = vpop.f32.mrf.mxu2  ;;  %v5831_v48 = vadd.f32 %v5830_v60, %v5663_v10  ;;  %v6032_v23 = vpop.f32.mrf.mxu1 }
 0x6c6   : > { %v5840_v28 = vpop.f32.mrf.mxu0  ;;  %v5438_v53 = vadd.f32 %v11337_v2, %v5437_v46  ;;  %13453 = vst [vmem:[#allocation100_spill] sm:$0xff] %v11504_v25 }
 0x6c7   : > { %5729 = vmatmul.f32.gmra.mxu3 %v11459_v35  ;;  %v11498_v58 = vadd.f32 %v6026_v52, %v5831_v48  ;;  %v6450_v52 = vsel %vm3388_vm1, %v3908_v17, 0 }
 0x6c8   : > { %6127 = vmatmul.f32.gmra.mxu1 %v5561_v41  ;;  %v6567_v41 = vsub.f32 %v11491_v34, %v12972_v29  ;;  %v11510_v46 = vand.u32 4294901760, %v6450_v52 }
 0x6c9   : > { %6561 = vmatmul.f32.vlgmr.msrb.gmra.mxu0 %v6560_v16  ;;  %v12977_v16 = vand.u32 4294901760, %v11504_v25 }
 0x6ca   : > { %6160 = vmatmul.f32.vlgmr.msrb.gmra.mxu2 %v11051_v13  ;;  %v5666_v60 = vpop.f32.mrf.mxu3  ;;  %13454 = vst [vmem:[#allocation101_spill] sm:$0xff] %v11510_v46  ;;  %v6568_v0 = vand.u32 4294901760, %v6567_v41 }
 0x6cb   : > { %v5667_v8 = vadd.f32 %v5666_v60, %v5438_v53  ;;  %v8296_v60 = vld [vmem:[%s8640_s19 + $0x20] sm:$0xff]  ;;  %v6575_v41 = vsub.f32 %v11504_v25, %v12977_v16 }
 0x6cc   : > { %v3909_v29 = vmul.f32 %v8296_v60, %v3768_v20 }
 0x6cd   : > { %v5445_v26 = vpop.f32.mrf.mxu2  ;;  %v5836_v10 = vadd.f32 %v5835_v54, %v5667_v8  ;;  %v6038_v48 = vpop.f32.mrf.mxu1  ;;  %v11521_v8 = vsub.f32 %v6450_v52, %v11510_v46  ;;  %v6576_v52 = vand.u32 4294901760, %v6575_v41 }
 0x6ce   : > { %v5845_v6 = vpop.f32.mrf.mxu0  ;;  %v5446_v17 = vadd.f32 %v11337_v2, %v5445_v26 }
 0x6cf   : > { %6309 = vmatmul.f32.vlgmr.msrb.gmra.mxu3 %v11051_v13  ;;  %v11515_v53 = vadd.f32 %v6032_v23, %v5836_v10  ;;  %13455 = vst [vmem:[#allocation102_spill] sm:$0xff] %v11521_v8  ;;  %v6453_v23 = vsel %vm3388_vm1, %v3909_v29, 0 }
 0x6d0   : > { %6850 = vmatmul.f32.vlgmr.msrb.gmra.mxu1 %v11468_v5  ;;  %v11527_v26 = vand.u32 4294901760, %v6453_v23  ;;  %v3773_v5 = vpop.permute.xlu1 %3772 }
 0x6d1   : > { %6569 = vmatmul.f32.gmra.mxu0 %v6568_v0  ;;  %v12982_v0 = vand.u32 4294901760, %v11521_v8 }
 0x6d2   : > { %6164 = vmatmul.f32.gmra.mxu2 %v11082_v51  ;;  %v5670_v54 = vpop.f32.mrf.mxu3  ;;  %13456 = vst [vmem:[#allocation103_spill] sm:$0xff] %v11527_v26 }
 0x6d3   : > { %v5671_v13 = vadd.f32 %v5670_v54, %v5446_v17  ;;  %v8297_v54 = vld [vmem:[%s8640_s19 + $0x28] sm:$0xff]  ;;  %v6583_v41 = vsub.f32 %v11521_v8, %v12982_v0 }
 0x6d4   : > { %v3910_v16 = vmul.f32 %v8297_v54, %v3773_v5 }
 0x6d5   : > { %v5453_v10 = vpop.f32.mrf.mxu2  ;;  %v5841_v34 = vadd.f32 %v5840_v28, %v5671_v13  ;;  %v6044_v20 = vpop.f32.mrf.mxu1  ;;  %v11538_v13 = vsub.f32 %v6453_v23, %v11527_v26  ;;  %v6584_v23 = vand.u32 4294901760, %v6583_v41 }
 0x6d6   : > { %v5850_v60 = vpop.f32.mrf.mxu0  ;;  %v5454_v29 = vadd.f32 %v11337_v2, %v5453_v10  ;;  %v3778_v10 = vpop.permute.xlu2 %3777 }
 0x6d7   : > { %6313 = vmatmul.f32.gmra.mxu3 %v11082_v51  ;;  %v11532_v17 = vadd.f32 %v6038_v48, %v5841_v34  ;;  %13457 = vst [vmem:[#allocation104_spill] sm:$0xff] %v11538_v13  ;;  %v6456_v34 = vsel %vm3388_vm1, %v3910_v16, 0 }
 0x6d8   : > { %6854 = vmatmul.f32.gmra.mxu1 %v11480_v49  ;;  %v11544_v49 = vand.u32 4294901760, %v6456_v34 }
 0x6d9   : > { %6577 = vmatmul.f32.gmra.mxu0 %v6576_v52  ;;  %v12987_v52 = vand.u32 4294901760, %v11538_v13 }
 0x6da   : > { %6168 = vmatmul.f32.gmra.mxu2 %v11098_v12  ;;  %v5674_v28 = vpop.f32.mrf.mxu3  ;;  %13458 = vst [vmem:[#allocation105_spill] sm:$0xff] %v11544_v49 }
 0x6db   : > { %v5675_v51 = vadd.f32 %v5674_v28, %v5454_v29  ;;  %v8298_v28 = vld [vmem:[%s8640_s19 + $0x30] sm:$0xff]  ;;  %v6591_v41 = vsub.f32 %v11538_v13, %v12987_v52 }
 0x6dc   : > { %v3911_v0 = vmul.f32 %v8298_v28, %v3778_v10 }
 0x6dd   : > { %v5461_v48 = vpop.f32.mrf.mxu2  ;;  %v5846_v25 = vadd.f32 %v5845_v6, %v5675_v51  ;;  %v6050_v5 = vpop.f32.mrf.mxu1  ;;  %v11555_v51 = vsub.f32 %v6456_v34, %v11544_v49  ;;  %v6592_v34 = vand.u32 4294901760, %v6591_v41 }
 0x6de   : > { %v5855_v54 = vpop.f32.mrf.mxu0  ;;  %v5462_v16 = vadd.f32 %v11337_v2, %v5461_v48 }
 0x6df   : > { %6317 = vmatmul.f32.gmra.mxu3 %v11098_v12  ;;  %v11549_v29 = vadd.f32 %v6044_v20, %v5846_v25  ;;  %13459 = vst [vmem:[#allocation106_spill] sm:$0xff] %v11555_v51  ;;  %v6459_v25 = vsel %vm3388_vm1, %v3911_v0, 0 }
 0x6e0   : > { %6858 = vmatmul.f32.gmra.mxu1 %v11494_v24  ;;  %v11561_v48 = vand.u32 4294901760, %v6459_v25  ;;  %v3783_v24 = vpop.permute.xlu0 %3782 }
 0x6e1   : > { %6585 = vmatmul.f32.gmra.mxu0 %v6584_v23  ;;  %v12992_v23 = vand.u32 4294901760, %v11555_v51 }
 0x6e2   : > { %6172 = vmatmul.f32.gmra.mxu2 %v11116_v3  ;;  %v5678_v6 = vpop.f32.mrf.mxu3  ;;  %13460 = vst [vmem:[#allocation107_spill] sm:$0xff] %v11561_v48 }
 0x6e3   : > { %v5679_v12 = vadd.f32 %v5678_v6, %v5462_v16  ;;  %v8299_v6 = vld [vmem:[%s8640_s19 + $0x38] sm:$0xff]  ;;  %v6599_v41 = vsub.f32 %v11555_v51, %v12992_v23 }
 0x6e4   : > { %v3912_v52 = vmul.f32 %v8299_v6, %v3783_v24 }
 0x6e5   : > { %v5469_v20 = vpop.f32.mrf.mxu2  ;;  %v5851_v8 = vadd.f32 %v5850_v60, %v5679_v12  ;;  %v6056_v10 = vpop.f32.mrf.mxu1  ;;  %v11572_v12 = vsub.f32 %v6459_v25, %v11561_v48  ;;  %v6600_v25 = vand.u32 4294901760, %v6599_v41 }
 0x6e6   : > { %v5860_v28 = vpop.f32.mrf.mxu0  ;;  %v5470_v0 = vadd.f32 %v11337_v2, %v5469_v20 }
 0x6e7   : > { %6321 = vmatmul.f32.gmra.mxu3 %v11116_v3  ;;  %v11566_v16 = vadd.f32 %v6050_v5, %v5851_v8  ;;  %13461 = vst [vmem:[#allocation108_spill] sm:$0xff] %v11572_v12  ;;  %v6462_v8 = vsel %vm3388_vm1, %v3912_v52, 0 }
 0x6e8   : > { %6862 = vmatmul.f32.gmra.mxu1 %v11510_v46  ;;  %v11578_v20 = vand.u32 4294901760, %v6462_v8  ;;  %v3788_v46 = vpop.permute.xlu1 %3787 }
 0x6e9   : > { %6593 = vmatmul.f32.gmra.mxu0 %v6592_v34  ;;  %v12997_v34 = vand.u32 4294901760, %v11572_v12 }
 0x6ea   : > { %6176 = vmatmul.f32.gmra.mxu2 %v11128_v62  ;;  %v5682_v60 = vpop.f32.mrf.mxu3  ;;  %13462 = vst [vmem:[#allocation109_spill] sm:$0xff] %v11578_v20 }
 0x6eb   : > { %v5683_v3 = vadd.f32 %v5682_v60, %v5470_v0  ;;  %v8300_v60 = vld [vmem:[%s8640_s19 + $0x40] sm:$0xff]  ;;  %v6607_v41 = vsub.f32 %v11572_v12, %v12997_v34 }
 0x6ec   : > { %v3913_v23 = vmul.f32 %v8300_v60, %v3788_v46 }
 0x6ed   : > { %v5477_v5 = vpop.f32.mrf.mxu2  ;;  %v5856_v13 = vadd.f32 %v5855_v54, %v5683_v3  ;;  %v6062_v24 = vpop.f32.mrf.mxu1  ;;  %v11589_v3 = vsub.f32 %v6462_v8, %v11578_v20  ;;  %v6608_v8 = vand.u32 4294901760, %v6607_v41 }
 0x6ee   : > { %v5865_v6 = vpop.f32.mrf.mxu0  ;;  %v5478_v52 = vadd.f32 %v11337_v2, %v5477_v5  ;;  %v3793_v5 = vpop.permute.xlu2 %3792 }
 0x6ef   : > { %6325 = vmatmul.f32.gmra.mxu3 %v11128_v62  ;;  %v11583_v0 = vadd.f32 %v6056_v10, %v5856_v13  ;;  %13463 = vst [vmem:[#allocation110_spill] sm:$0xff] %v11589_v3  ;;  %v6465_v13 = vsel %vm3388_vm1, %v3913_v23, 0 }
 0x6f0   : > { %6866 = vmatmul.f32.gmra.mxu1 %v11527_v26  ;;  %v11595_v26 = vand.u32 4294901760, %v6465_v13 }
 0x6f1   : > { %6601 = vmatmul.f32.gmra.mxu0 %v6600_v25  ;;  %v13002_v25 = vand.u32 4294901760, %v11589_v3 }
 0x6f2   : > { %6180 = vmatmul.f32.gmra.mxu2 %v11139_v37  ;;  %v5686_v54 = vpop.f32.mrf.mxu3 }
 0x6f3   : > { %v5687_v62 = vadd.f32 %v5686_v54, %v5478_v52  ;;  %v8301_v54 = vld [vmem:[%s8640_s19 + $0x48] sm:$0xff]  ;;  %v6615_v41 = vsub.f32 %v11589_v3, %v13002_v25 }
 0x6f4   : > { %v3914_v34 = vmul.f32 %v8301_v54, %v3793_v5 }
 0x6f5   : > { %v5485_v10 = vpop.f32.mrf.mxu2  ;;  %v5861_v51 = vadd.f32 %v5860_v28, %v5687_v62  ;;  %v6068_v46 = vpop.f32.mrf.mxu1  ;;  %v11606_v62 = vsub.f32 %v6465_v13, %v11595_v26  ;;  %v6616_v13 = vand.u32 4294901760, %v6615_v41 }
 0x6f6   : > { %v5870_v60 = vpop.f32.mrf.mxu0  ;;  %v5486_v23 = vadd.f32 %v11337_v2, %v5485_v10 }
 0x6f7   : > { %6329 = vmatmul.f32.gmra.mxu3 %v11139_v37  ;;  %v11600_v52 = vadd.f32 %v6062_v24, %v5861_v51  ;;  %13464 = vst [vmem:[#allocation111_spill] sm:$0xff] %v11606_v62  ;;  %v6468_v51 = vsel %vm3388_vm1, %v3914_v34, 0 }
 0x6f8   : > { %6870 = vmatmul.f32.gmra.mxu1 %v11544_v49  ;;  %v11612_v10 = vand.u32 4294901760, %v6468_v51  ;;  %v3798_v49 = vpop.permute.xlu0 %3797 }
 0x6f9   : > { %6609 = vmatmul.f32.gmra.mxu0 %v6608_v8  ;;  %v13007_v8 = vand.u32 4294901760, %v11606_v62 }
 0x6fa   : > { %6184 = vmatmul.f32.gmra.mxu2 %v11149_v50  ;;  %v5690_v28 = vpop.f32.mrf.mxu3  ;;  %13465 = vst [vmem:[#allocation112_spill] sm:$0xff] %v11612_v10 }
 0x6fb   : > { %v5691_v37 = vadd.f32 %v5690_v28, %v5486_v23  ;;  %v8302_v28 = vld [vmem:[%s8640_s19 + $0x50] sm:$0xff]  ;;  %v6623_v41 = vsub.f32 %v11606_v62, %v13007_v8 }
 0x6fc   : > { %v3915_v25 = vmul.f32 %v8302_v28, %v3798_v49 }
 0x6fd   : > { %v5493_v24 = vpop.f32.mrf.mxu2  ;;  %v5866_v12 = vadd.f32 %v5865_v6, %v5691_v37  ;;  %v6074_v5 = vpop.f32.mrf.mxu1  ;;  %v11623_v37 = vsub.f32 %v6468_v51, %v11612_v10  ;;  %v6624_v51 = vand.u32 4294901760, %v6623_v41 }
 0x6fe   : > { %v5875_v54 = vpop.f32.mrf.mxu0  ;;  %v5494_v34 = vadd.f32 %v11337_v2, %v5493_v24 }
 0x6ff   : > { %6333 = vmatmul.f32.gmra.mxu3 %v11149_v50  ;;  %v11617_v23 = vadd.f32 %v6068_v46, %v5866_v12  ;;  %13466 = vst [vmem:[#allocation113_spill] sm:$0xff] %v11623_v37  ;;  %v6471_v12 = vsel %vm3388_vm1, %v3915_v25, 0 }
 0x700   : > { %6874 = vmatmul.f32.gmra.mxu1 %v11561_v48  ;;  %v11629_v24 = vand.u32 4294901760, %v6471_v12  ;;  %v3803_v48 = vpop.permute.xlu1 %3802 }
 0x701   : > { %6617 = vmatmul.f32.gmra.mxu0 %v6616_v13  ;;  %v13012_v13 = vand.u32 4294901760, %v11623_v37 }
 0x702   : > { %6188 = vmatmul.f32.gmra.mxu2 %v11161_v27  ;;  %v5694_v6 = vpop.f32.mrf.mxu3  ;;  %13467 = vst [vmem:[#allocation114_spill] sm:$0xff] %v11629_v24 }
 0x703   : > { %v5695_v50 = vadd.f32 %v5694_v6, %v5494_v34  ;;  %v8303_v6 = vld [vmem:[%s8640_s19 + $0x58] sm:$0xff]  ;;  %v6631_v41 = vsub.f32 %v11623_v37, %v13012_v13 }
 0x704   : > { %v3916_v8 = vmul.f32 %v8303_v6, %v3803_v48 }
 0x705   : > { %v5501_v46 = vpop.f32.mrf.mxu2  ;;  %v5871_v3 = vadd.f32 %v5870_v60, %v5695_v50  ;;  %v6080_v49 = vpop.f32.mrf.mxu1  ;;  %v11640_v50 = vsub.f32 %v6471_v12, %v11629_v24  ;;  %v6632_v12 = vand.u32 4294901760, %v6631_v41 }
 0x706   : > { %v5880_v28 = vpop.f32.mrf.mxu0  ;;  %v5502_v25 = vadd.f32 %v11337_v2, %v5501_v46  ;;  %v3808_v46 = vpop.permute.xlu2 %3807 }
 0x707   : > { %6337 = vmatmul.f32.gmra.mxu3 %v11161_v27  ;;  %v11634_v34 = vadd.f32 %v6074_v5, %v5871_v3  ;;  %13468 = vst [vmem:[#allocation115_spill] sm:$0xff] %v11640_v50  ;;  %v6474_v3 = vsel %vm3388_vm1, %v3916_v8, 0 }
 0x708   : > { %6878 = vmatmul.f32.gmra.mxu1 %v11578_v20  ;;  %v11646_v20 = vand.u32 4294901760, %v6474_v3 }
 0x709   : > { %6625 = vmatmul.f32.gmra.mxu0 %v6624_v51  ;;  %v13015_v51 = vand.u32 4294901760, %v11640_v50 }
 0x70a   : > { %6192 = vmatmul.f32.gmra.mxu2 %v11175_v57  ;;  %v5698_v60 = vpop.f32.mrf.mxu3  ;;  %13469 = vst [vmem:[#allocation116_spill] sm:$0xff] %v11646_v20 }
 0x70b   : > { %v5699_v27 = vadd.f32 %v5698_v60, %v5502_v25  ;;  %v8304_v60 = vld [vmem:[%s8640_s19 + $0x60] sm:$0xff]  ;;  %v6639_v41 = vsub.f32 %v11640_v50, %v13015_v51 }
 0x70c   : > { %v3917_v13 = vmul.f32 %v8304_v60, %v3808_v46 }
 0x70d   : > { %v5509_v5 = vpop.f32.mrf.mxu2  ;;  %v5876_v62 = vadd.f32 %v5875_v54, %v5699_v27  ;;  %v6086_v48 = vpop.f32.mrf.mxu1  ;;  %v11657_v27 = vsub.f32 %v6474_v3, %v11646_v20  ;;  %v6640_v3 = vand.u32 4294901760, %v6639_v41 }
 0x70e   : > { %v5885_v6 = vpop.f32.mrf.mxu0  ;;  %v5510_v8 = vadd.f32 %v11337_v2, %v5509_v5  ;;  %v3813_v5 = vpop.permute.xlu0 %3812 }
 0x70f   : > { %6341 = vmatmul.f32.gmra.mxu3 %v11175_v57  ;;  %v11651_v25 = vadd.f32 %v6080_v49, %v5876_v62  ;;  %13470 = vst [vmem:[#allocation117_spill] sm:$0xff] %v11657_v27  ;;  %v6477_v62 = vsel %vm3388_vm1, %v3917_v13, 0 }
 0x710   : > { %6882 = vmatmul.f32.gmra.mxu1 %v11595_v26  ;;  %v11663_v2 = vand.u32 4294901760, %v6477_v62 }
 0x711   : > { %6633 = vmatmul.f32.gmra.mxu0 %v6632_v12  ;;  %v13020_v12 = vand.u32 4294901760, %v11657_v27 }
 0x712   : > { %6196 = vmatmul.f32.gmra.mxu2 %v11203_v42  ;;  %v5702_v54 = vpop.f32.mrf.mxu3  ;;  %13471 = vst [vmem:[#allocation118_spill] sm:$0xff] %v11663_v2 }
 0x713   : > { %v5703_v57 = vadd.f32 %v5702_v54, %v5510_v8  ;;  %v8305_v54 = vld [vmem:[%s8640_s19 + $0x68] sm:$0xff] }
 0x714   : > { %v3918_v51 = vmul.f32 %v8305_v54, %v3813_v5 }
 0x715   : > { %v5517_v49 = vpop.f32.mrf.mxu2  ;;  %v5881_v37 = vadd.f32 %v5880_v28, %v5703_v57  ;;  %v6092_v46 = vpop.f32.mrf.mxu1  ;;  %v11674_v28 = vld [vmem:[%s12686_s8] ss:$0 sm:$0xff]  ;;  %v11679_v57 = vsub.f32 %v6477_v62, %v11663_v2 }
 0x716   : > { %v5890_v60 = vpop.f32.mrf.mxu0  ;;  %v5518_v13 = vadd.f32 %v11674_v28, %v5517_v49 }
 0x717   : > { %6345 = vmatmul.f32.gmra.mxu3 %v11203_v42  ;;  %v11668_v8 = vadd.f32 %v6086_v48, %v5881_v37  ;;  %13473 = vst [vmem:[#allocation120_spill] sm:$0xff] %v11679_v57  ;;  %v6647_v37 = vsub.f32 %v11657_v27, %v13020_v12  ;;  %v6480_v48 = vsel %vm3388_vm1, %v3918_v51, 0 }
 0x718   : > { %6886 = vmatmul.f32.gmra.mxu1 %v11612_v10  ;;  %v11685_v49 = vand.u32 4294901760, %v6480_v48 }
 0x719   : > { %13472 = vst [vmem:[#allocation119_spill] sm:$0xff] %v11668_v8  ;;  %6641 = vmatmul.f32.gmra.mxu0 %v6640_v3  ;;  %v3818_v8 = vpop.permute.xlu1 %3817  ;;  %v6648_v62 = vand.u32 4294901760, %v6647_v37  ;;  %v13025_v3 = vand.u32 4294901760, %v11679_v57 }
 0x71a   : > { %6200 = vmatmul.f32.gmra.mxu2 %v11214_v55  ;;  %v5706_v42 = vpop.f32.mrf.mxu3  ;;  %13474 = vst [vmem:[#allocation121_spill] sm:$0xff] %v11685_v49 }
 0x71b   : > { %v5707_v41 = vadd.f32 %v5706_v42, %v5518_v13  ;;  %v8307_v42 = vld [vmem:[%s8640_s19 + $0x70] sm:$0xff]  ;;  %v6655_v37 = vsub.f32 %v11679_v57, %v13025_v3 }
 0x71c   : > { %v3919_v12 = vmul.f32 %v8307_v42, %v3818_v8 }
 0x71d   : > { %v5525_v5 = vpop.f32.mrf.mxu2  ;;  %v5886_v54 = vadd.f32 %v5885_v6, %v5707_v41  ;;  %v6098_v50 = vpop.f32.mrf.mxu1  ;;  %v11696_v41 = vsub.f32 %v6480_v48, %v11685_v49  ;;  %v6656_v48 = vand.u32 4294901760, %v6655_v37 }
 0x71e   : > { %v5895_v10 = vpop.f32.mrf.mxu0  ;;  %v5526_v51 = vadd.f32 %v11674_v28, %v5525_v5  ;;  %v3823_v5 = vpop.permute.xlu2 %3822 }
 0x71f   : > { %6349 = vmatmul.f32.gmra.mxu3 %v11214_v55  ;;  %v11690_v13 = vadd.f32 %v6092_v46, %v5886_v54  ;;  %13475 = vst [vmem:[#allocation122_spill] sm:$0xff] %v11696_v41  ;;  %v6483_v46 = vsel %vm3388_vm1, %v3919_v12, 0 }
 0x720   : > { %6890 = vmatmul.f32.gmra.mxu1 %v11629_v24  ;;  %v11702_v24 = vand.u32 4294901760, %v6483_v46 }
 0x721   : > { %6649 = vmatmul.f32.gmra.mxu0 %v6648_v62  ;;  %v13030_v62 = vand.u32 4294901760, %v11696_v41 }
 0x722   : > { %6204 = vmatmul.f32.gmra.mxu2 %v11224_v44  ;;  %v5710_v6 = vpop.f32.mrf.mxu3 }
 0x723   : > { %v5711_v55 = vadd.f32 %v5710_v6, %v5526_v51  ;;  %v8308_v6 = vld [vmem:[%s8640_s19 + $0x78] sm:$0xff]  ;;  %v6663_v37 = vsub.f32 %v11696_v41, %v13030_v62 }
 0x724   : > { %v3920_v3 = vmul.f32 %v8308_v6, %v3823_v5 }
 0x725   : > { %v5533_v54 = vpop.f32.mrf.mxu2  ;;  %v5891_v27 = vadd.f32 %v5890_v60, %v5711_v55  ;;  %v6104_v8 = vpop.f32.mrf.mxu1  ;;  %v11713_v55 = vsub.f32 %v6483_v46, %v11702_v24  ;;  %v6664_v46 = vand.u32 4294901760, %v6663_v37 }
 0x726   : > { %v5900_v42 = vpop.f32.mrf.mxu0  ;;  %v5534_v12 = vadd.f32 %v11674_v28, %v5533_v54 }
 0x727   : > { %6353 = vmatmul.f32.gmra.mxu3 %v11224_v44  ;;  %v11707_v51 = vadd.f32 %v6098_v50, %v5891_v27  ;;  %13476 = vst [vmem:[#allocation123_spill] sm:$0xff] %v11713_v55  ;;  %v6486_v50 = vsel %vm3388_vm1, %v3920_v3, 0 }
 0x728   : > { %6894 = vmatmul.f32.gmra.mxu1 %v11646_v20  ;;  %v11719_v54 = vand.u32 4294901760, %v6486_v50  ;;  %v3828_v20 = vpop.permute.xlu0 %3827 }
 0x729   : > { %6657 = vmatmul.f32.gmra.mxu0 %v6656_v48  ;;  %v13035_v48 = vand.u32 4294901760, %v11713_v55 }
 0x72a   : > { %6208 = vmatmul.f32.gmra.mxu2 %v11234_v1  ;;  %v5714_v60 = vpop.f32.mrf.mxu3 }
 0x72b   : > { %v5715_v44 = vadd.f32 %v5714_v60, %v5534_v12  ;;  %v8309_v60 = vld [vmem:[%s8640_s19 + $0x80] sm:$0xff]  ;;  %v6671_v37 = vsub.f32 %v11713_v55, %v13035_v48 }
 0x72c   : > { %v3921_v62 = vmul.f32 %v8309_v60, %v3828_v20 }
 0x72d   : > { %v5541_v27 = vpop.f32.mrf.mxu2  ;;  %v5896_v57 = vadd.f32 %v5895_v10, %v5715_v44  ;;  %v6110_v5 = vpop.f32.mrf.mxu1  ;;  %v11730_v44 = vsub.f32 %v6486_v50, %v11719_v54  ;;  %v6672_v50 = vand.u32 4294901760, %v6671_v37 }
 0x72e   : > { %v5905_v6 = vpop.f32.mrf.mxu0  ;;  %v5542_v3 = vadd.f32 %v11674_v28, %v5541_v27 }
 0x72f   : > { %6357 = vmatmul.f32.gmra.mxu3 %v11234_v1  ;;  %v11724_v12 = vadd.f32 %v6104_v8, %v5896_v57  ;;  %13477 = vst [vmem:[#allocation124_spill] sm:$0xff] %v11730_v44  ;;  %v6489_v57 = vsel %vm3388_vm1, %v3921_v62, 0 }
 0x730   : > { %6898 = vmatmul.f32.gmra.mxu1 %v11663_v2  ;;  %v11736_v27 = vand.u32 4294901760, %v6489_v57  ;;  %v3833_v2 = vpop.permute.xlu1 %3832 }
 0x731   : > { %6665 = vmatmul.f32.gmra.mxu0 %v6664_v46  ;;  %v13040_v46 = vand.u32 4294901760, %v11730_v44 }
 0x732   : > { %6212 = vmatmul.f32.gmra.mxu2 %v11244_v22  ;;  %v5718_v10 = vpop.f32.mrf.mxu3 }
 0x733   : > { %v5719_v1 = vadd.f32 %v5718_v10, %v5542_v3  ;;  %v8310_v10 = vld [vmem:[%s8640_s19 + $0x88] sm:$0xff]  ;;  %v6679_v37 = vsub.f32 %v11730_v44, %v13040_v46 }
 0x734   : > { %v3922_v48 = vmul.f32 %v8310_v10, %v3833_v2 }
 0x735   : > { %v5549_v8 = vpop.f32.mrf.mxu2  ;;  %v5901_v41 = vadd.f32 %v5900_v42, %v5719_v1  ;;  %v6116_v20 = vpop.f32.mrf.mxu1  ;;  %v11747_v1 = vsub.f32 %v6489_v57, %v11736_v27  ;;  %v6680_v57 = vand.u32 4294901760, %v6679_v37 }
 0x736   : > { %v5910_v60 = vpop.f32.mrf.mxu0  ;;  %v5550_v62 = vadd.f32 %v11674_v28, %v5549_v8  ;;  %v3838_v8 = vpop.permute.xlu2 %3837 }
 0x737   : > { %6361 = vmatmul.f32.gmra.mxu3 %v11244_v22  ;;  %v11741_v3 = vadd.f32 %v6110_v5, %v5901_v41  ;;  %13478 = vst [vmem:[#allocation125_spill] sm:$0xff] %v11747_v1  ;;  %v6492_v41 = vsel %vm3388_vm1, %v3922_v48, 0 }
 0x738   : > { %6902 = vmatmul.f32.gmra.mxu1 %v11685_v49  ;;  %v11753_v49 = vand.u32 4294901760, %v6492_v41 }
 0x739   : > { %6673 = vmatmul.f32.gmra.mxu0 %v6672_v50  ;;  %v13043_v50 = vand.u32 4294901760, %v11747_v1 }
 0x73a   : > { %6216 = vmatmul.f32.gmra.mxu2 %v11254_v43  ;;  %v5722_v42 = vpop.f32.mrf.mxu3 }
 0x73b   : > { %v5723_v22 = vadd.f32 %v5722_v42, %v5550_v62  ;;  %v8311_v42 = vld [vmem:[%s8640_s19 + $0x90] sm:$0xff]  ;;  %v6687_v37 = vsub.f32 %v11747_v1, %v13043_v50  ;;  %v8312_v50 = vld [vmem:[%s8640_s19 + $0x98] sm:$0xff] }
 0x73c   : > { %v3923_v46 = vmul.f32 %v8311_v42, %v3838_v8 }
 0x73d   : > { %v5557_v5 = vpop.f32.mrf.mxu2  ;;  %v5906_v55 = vadd.f32 %v5905_v6, %v5723_v22  ;;  %v6122_v2 = vpop.f32.mrf.mxu1  ;;  %v11764_v22 = vsub.f32 %v6492_v41, %v11753_v49  ;;  %v6688_v41 = vand.u32 4294901760, %v6687_v37 }
 0x73e   : > { %v5915_v10 = vpop.f32.mrf.mxu0  ;;  %v5558_v48 = vadd.f32 %v11674_v28, %v5557_v5 }
 0x73f   : > { %6365 = vmatmul.f32.gmra.mxu3 %v11254_v43  ;;  %v11758_v62 = vadd.f32 %v6116_v20, %v5906_v55  ;;  %v6495_v55 = vsel %vm3388_vm1, %v3923_v46, 0 }
 0x740   : > { %6906 = vmatmul.f32.gmra.mxu1 %v11702_v24  ;;  %v11772_v5 = vand.u32 4294901760, %v6495_v55 }
 0x741   : > { %6681 = vmatmul.f32.gmra.mxu0 %v6680_v57  ;;  %v3843_v57 = vpop.permute.xlu0 %3842 }
 0x742   : > { %6220 = vmatmul.f32.gmra.mxu2 %v11266_v47  ;;  %v5726_v6 = vpop.f32.mrf.mxu3  ;;  %v3924_v1 = vmul.f32 %v8312_v50, %v3843_v57  ;;  %v3848_v57 = vpop.permute.xlu1 %3847 }
 0x743   : > { %v5727_v43 = vadd.f32 %v5726_v6, %v5558_v48  ;;  %v13046_v48 = vand.u32 4294901760, %v11764_v22 }
 0x745   : > { %v5565_v20 = vpop.f32.mrf.mxu2  ;;  %v5911_v44 = vadd.f32 %v5910_v60, %v5727_v43  ;;  %v6128_v8 = vpop.f32.mrf.mxu1  ;;  %v11783_v43 = vsub.f32 %v6495_v55, %v11772_v5  ;;  %v6695_v37 = vsub.f32 %v11764_v22, %v13046_v48 }
 0x746   : > { %v11770_v42 = vpop.f32.mrf.mxu0  ;;  %v5566_v46 = vadd.f32 %v11674_v28, %v5565_v20 }
 0x747   : > { %13479 = vst [vmem:[#allocation126_spill] sm:$0xff] %v11770_v42  ;;  %6369 = vmatmul.f32.gmra.mxu3 %v11266_v47  ;;  %v11777_v6 = vadd.f32 %v6122_v2, %v5911_v44  ;;  %v6498_v44 = vsel %vm3388_vm1, %v3924_v1, 0  ;;  %v6696_v55 = vand.u32 4294901760, %v6695_v37 }
 0x748   : > { %6910 = vmatmul.f32.gmra.mxu1 %v11719_v54  ;;  %v11793_v20 = vand.u32 4294901760, %v6498_v44 }
 0x749   : > { %6689 = vmatmul.f32.gmra.mxu0 %v6688_v41  ;;  %v13047_v41 = vand.u32 4294901760, %v11783_v43 }
 0x74a   : > { %6224 = vmatmul.f32.gmra.mxu2 %v11280_v45  ;;  %v5730_v60 = vpop.f32.mrf.mxu3  ;;  %v11804_v48 = vsub.f32 %v6498_v44, %v11793_v20 }
 0x74b   : > { %v5731_v47 = vadd.f32 %v5730_v60, %v5566_v46  ;;  %v8313_v60 = vld [vmem:[%s8640_s19 + $0xa0] sm:$0xff]  ;;  %v6703_v37 = vsub.f32 %v11783_v43, %v13047_v41 }
 0x74c   : > { %v3925_v1 = vmul.f32 %v8313_v60, %v3848_v57 }
 0x74d   : > { %v6161_v2 = vpop.f32.mrf.mxu2  ;;  %v5916_v42 = vadd.f32 %v5915_v10, %v5731_v47  ;;  %v11789_v50 = vpop.f32.mrf.mxu1  ;;  %v6704_v44 = vand.u32 4294901760, %v6703_v37 }
 0x74e   : > { %v11791_v28 = vpop.f32.mrf.mxu0  ;;  %v6162_v10 = vadd.f32 %v6161_v2, %v11347_v63 }
 0x74f   : > { %6373 = vmatmul.f32.gmra.mxu3 %v11280_v45  ;;  %v11798_v46 = vadd.f32 %v6128_v8, %v5916_v42  ;;  %v6501_v8 = vsel %vm3388_vm1, %v3925_v1, 0  ;;  %v8314_v1 = vld [vmem:[%s8640_s19 + $0xa8] sm:$0xff] }
 0x750   : > { %6914 = vmatmul.f32.gmra.mxu1 %v11736_v27  ;;  %v11815_v60 = vand.u32 4294901760, %v6501_v8 }
 0x751   : > { %6697 = vmatmul.f32.gmra.mxu0 %v6696_v55  ;;  %v3853_v55 = vpop.permute.xlu2 %3852 }
 0x752   : > { %6228 = vmatmul.f32.gmra.mxu2 %v11308_v33  ;;  %v6310_v47 = vpop.f32.mrf.mxu3  ;;  %13481 = vst [vmem:[#allocation128_spill] sm:$0xff] %v11815_v60  ;;  %v11826_v41 = vsub.f32 %v6501_v8, %v11815_v60 }
 0x753   : > { %v6311_v45 = vadd.f32 %v6310_v47, %v6162_v10  ;;  %v13048_v10 = vand.u32 4294901760, %v11804_v48  ;;  %v3926_v47 = vmul.f32 %v8314_v1, %v3853_v55  ;;  %v3858_v1 = vpop.permute.xlu0 %3857 }
 0x754   : > { %13482 = vst [vmem:[#allocation129_spill] sm:$0xff] %v11826_v41 }
 0x755   : > { %v6165_v42 = vpop.f32.mrf.mxu2  ;;  %v7682_v63 = vadd.f32 %v6311_v45, %v10911_v39  ;;  %v11811_v2 = vpop.f32.mrf.mxu1  ;;  %v6711_v37 = vsub.f32 %v11804_v48, %v13048_v10 }
 0x756   : > { %v11813_v57 = vpop.f32.mrf.mxu0  ;;  %v6166_v39 = vadd.f32 %v6165_v42, %v11355_v15 }
 0x757   : > { %13480 = vst [vmem:[#allocation127_spill] sm:$0xff] %v11813_v57  ;;  %6377 = vmatmul.f32.gmra.mxu3 %v11308_v33  ;;  %v6712_v8 = vand.u32 4294901760, %v6711_v37 }
 0x758   : > { %6918 = vmatmul.f32.gmra.mxu1 %v11753_v49  ;;  %7875 = vst.msk [vmem:[%s8655_s26] sm:$0xff] %vm7874_vm2, %v7682_v63  ;;  %v6504_v63 = vsel %vm3388_vm1, %v3926_v47, 0  ;;  %v8315_v47 = vld [vmem:[%s8640_s19 + $0xb0] sm:$0xff] }
 0x759   : > { %6705 = vmatmul.f32.gmra.mxu0 %v6704_v44  ;;  %v11837_v44 = vand.u32 4294901760, %v6504_v63 }
 0x75a   : > { %6232 = vmatmul.f32.gmra.mxu2 %v11319_v59  ;;  %v6314_v45 = vpop.f32.mrf.mxu3 }
 0x75b   : > { %v6315_v33 = vadd.f32 %v6314_v45, %v6166_v39  ;;  %v13049_v39 = vand.u32 4294901760, %v11826_v41  ;;  %v3927_v45 = vmul.f32 %v8315_v47, %v3858_v1  ;;  %v11848_v10 = vsub.f32 %v6504_v63, %v11837_v44  ;;  %v3863_v47 = vpop.permute.xlu1 %3862 }
 0x75d   : > { %v6169_v57 = vpop.f32.mrf.mxu2  ;;  %v7683_v55 = vadd.f32 %v6315_v33, %v10922_v4  ;;  %v11833_v15 = vpop.f32.mrf.mxu1  ;;  %13484 = vst [vmem:[#allocation131_spill] sm:$0xff] %v11848_v10  ;;  %v6719_v37 = vsub.f32 %v11826_v41, %v13049_v39 }
 0x75e   : > { %v11835_v42 = vpop.f32.mrf.mxu0  ;;  %v6170_v4 = vadd.f32 %v6169_v57, %v11363_v38 }
 0x75f   : > { %13483 = vst [vmem:[#allocation130_spill] sm:$0xff] %v11835_v42  ;;  %6381 = vmatmul.f32.gmra.mxu3 %v11319_v59  ;;  %v6720_v63 = vand.u32 4294901760, %v6719_v37 }
 0x760   : > { %6922 = vmatmul.f32.gmra.mxu1 %v11772_v5  ;;  %7876 = vst.msk [vmem:[%s8655_s26 + $0x8] sm:$0xff] %vm7874_vm2, %v7683_v55  ;;  %v6507_v55 = vsel %vm3388_vm1, %v3927_v45, 0  ;;  %v8316_v45 = vld [vmem:[%s8640_s19 + $0xb8] sm:$0xff] }
 0x761   : > { %6713 = vmatmul.f32.gmra.mxu0 %v6712_v8  ;;  %v11859_v8 = vand.u32 4294901760, %v6507_v55 }
 0x762   : > { %6236 = vmatmul.f32.gmra.mxu2 %v11329_v40  ;;  %v6318_v33 = vpop.f32.mrf.mxu3 }
 0x763   : > { %v6319_v59 = vadd.f32 %v6318_v33, %v6170_v4  ;;  %v13052_v4 = vand.u32 4294901760, %v11848_v10  ;;  %v3928_v33 = vmul.f32 %v8316_v45, %v3863_v47  ;;  %v11870_v39 = vsub.f32 %v6507_v55, %v11859_v8  ;;  %v13487_v47 = vld [vmem:[#allocation92_spill] sm:$0xff] }
 0x765   : > { %v6173_v42 = vpop.f32.mrf.mxu2  ;;  %v7684_v1 = vadd.f32 %v6319_v59, %v10933_v61  ;;  %v11855_v38 = vpop.f32.mrf.mxu1  ;;  %13486 = vst [vmem:[#allocation133_spill] sm:$0xff] %v11870_v39  ;;  %v6727_v37 = vsub.f32 %v11848_v10, %v13052_v4  ;;  %v13491_v4 = vld [vmem:[#allocation83_spill] sm:$0xff] }
 0x766   : > { %v11857_v57 = vpop.f32.mrf.mxu0  ;;  %v6174_v61 = vadd.f32 %v6173_v42, %v11374_v11 }
 0x767   : > { %13485 = vst [vmem:[#allocation132_spill] sm:$0xff] %v11857_v57  ;;  %6385 = vmatmul.f32.gmra.mxu3 %v11329_v40  ;;  %v6728_v55 = vand.u32 4294901760, %v6727_v37 }
 0x768   : > { %6926 = vmatmul.f32.gmra.mxu1 %v11793_v20  ;;  %7877 = vst.msk [vmem:[%s8655_s26 + $0x10] sm:$0xff] %vm7874_vm2, %v7684_v1  ;;  %v6510_v1 = vsel %vm3388_vm1, %v3928_v33, 0  ;;  %v8317_v33 = vld [vmem:[%s8640_s19 + $0xc0] sm:$0xff] }
 0x769   : > { %6721 = vmatmul.f32.gmra.mxu0 %v6720_v63  ;;  %v3868_v63 = vpop.permute.xlu2 %3867  ;;  %v11881_v41 = vand.u32 4294901760, %v6510_v1 }
 0x76a   : > { %6240 = vmatmul.f32.gmra.mxu2 %v11344_v36  ;;  %v6322_v59 = vpop.f32.mrf.mxu3 }
 0x76b   : > { %v6323_v40 = vadd.f32 %v6322_v59, %v6174_v61  ;;  %13490 = vst [vmem:[#allocation135_spill] sm:$0xff] %v11881_v41  ;;  %v13057_v61 = vand.u32 4294901760, %v11870_v39  ;;  %v3929_v59 = vmul.f32 %v8317_v33, %v3868_v63  ;;  %v11892_v10 = vsub.f32 %v6510_v1, %v11881_v41  ;;  %v13494_v63 = vld [vmem:[#allocation93_spill] sm:$0xff] }
 0x76d   : > { %v6177_v57 = vpop.f32.mrf.mxu2  ;;  %v7685_v45 = vadd.f32 %v6323_v40, %v13487_v47  ;;  %v11877_v11 = vpop.f32.mrf.mxu1  ;;  %v13492_v47 = vld [vmem:[#allocation81_spill] sm:$0xff]  ;;  %13493 = vst [vmem:[#allocation83_spill] sm:$0xff] %v11892_v10  ;;  %v6735_v37 = vsub.f32 %v11870_v39, %v13057_v61 }
 0x76e   : > { %13488 = vst [vmem:[#allocation92_spill] sm:$0xff] %v11877_v11  ;;  %v11879_v42 = vpop.f32.mrf.mxu0  ;;  %v6178_v40 = vadd.f32 %v6177_v57, %v13491_v4  ;;  %v3878_v39 = vpop.permute.xlu1 %3877 }
 0x76f   : > { %13489 = vst [vmem:[#allocation134_spill] sm:$0xff] %v11879_v42  ;;  %6389 = vmatmul.f32.gmra.mxu3 %v11344_v36  ;;  %v6736_v1 = vand.u32 4294901760, %v6735_v37 }
 0x770   : > { %6930 = vmatmul.f32.gmra.mxu1 %v11815_v60  ;;  %7878 = vst.msk [vmem:[%s8655_s26 + $0x18] sm:$0xff] %vm7874_vm2, %v7685_v45  ;;  %v6513_v45 = vsel %vm3388_vm1, %v3929_v59, 0  ;;  %v3873_v60 = vpop.permute.xlu0 %3872  ;;  %v8318_v59 = vld [vmem:[%s8640_s19 + $0xc8] sm:$0xff] }
 0x771   : > { %6729 = vmatmul.f32.gmra.mxu0 %v6728_v55  ;;  %v11903_v55 = vand.u32 4294901760, %v6513_v45 }
 0x772   : > { %6244 = vmatmul.f32.gmra.mxu2 %v13492_v47  ;;  %v6326_v42 = vpop.f32.mrf.mxu3 }
 0x773   : > { %v6327_v36 = vadd.f32 %v6326_v42, %v6178_v40  ;;  %13496 = vst [vmem:[#allocation93_spill] sm:$0xff] %v11903_v55  ;;  %v13060_v42 = vand.u32 4294901760, %v11892_v10  ;;  %v3930_v40 = vmul.f32 %v8318_v59, %v3873_v60  ;;  %v11914_v61 = vsub.f32 %v6513_v45, %v11903_v55  ;;  %v13498_v60 = vld [vmem:[#allocation56_spill] sm:$0xff] }
 0x775   : > { %v6181_v11 = vpop.f32.mrf.mxu2  ;;  %v7686_v33 = vadd.f32 %v6327_v36, %v13494_v63  ;;  %v11899_v57 = vpop.f32.mrf.mxu1  ;;  %13497 = vst [vmem:[#allocation136_spill] sm:$0xff] %v11914_v61  ;;  %v6743_v37 = vsub.f32 %v11892_v10, %v13060_v42 }
 0x776   : > { %v11901_v4 = vpop.f32.mrf.mxu0  ;;  %v6182_v36 = vadd.f32 %v6181_v11, %v11406_v56 }
 0x777   : > { %13495 = vst [vmem:[#allocation81_spill] sm:$0xff] %v11901_v4  ;;  %6393 = vmatmul.f32.gmra.mxu3 %v13492_v47  ;;  %v6744_v45 = vand.u32 4294901760, %v6743_v37 }
 0x778   : > { %6934 = vmatmul.f32.gmra.mxu1 %v11837_v44  ;;  %7879 = vst.msk [vmem:[%s8655_s26 + $0x20] sm:$0xff] %vm7874_vm2, %v7686_v33  ;;  %v6516_v33 = vsel %vm3388_vm1, %v3930_v40, 0  ;;  %v8319_v40 = vld [vmem:[%s8640_s19 + $0xd0] sm:$0xff] }
 0x779   : > { %6737 = vmatmul.f32.gmra.mxu0 %v6736_v1  ;;  %v11925_v1 = vand.u32 4294901760, %v6516_v33 }
 0x77a   : > { %6248 = vmatmul.f32.gmra.mxu2 %v11360_v30  ;;  %v6330_v63 = vpop.f32.mrf.mxu3 }
 0x77b   : > { %v6331_v47 = vadd.f32 %v6330_v63, %v6182_v36  ;;  %v13063_v36 = vand.u32 4294901760, %v11914_v61  ;;  %v3931_v63 = vmul.f32 %v8319_v40, %v3878_v39  ;;  %v11936_v42 = vsub.f32 %v6516_v33, %v11925_v1  ;;  %v13501_v39 = vld [vmem:[#allocation58_spill] sm:$0xff] }
 0x77d   : > { %v6185_v4 = vpop.f32.mrf.mxu2  ;;  %v7687_v59 = vadd.f32 %v6331_v47, %v13498_v60  ;;  %v11921_v56 = vpop.f32.mrf.mxu1  ;;  %13500 = vst [vmem:[#allocation137_spill] sm:$0xff] %v11936_v42  ;;  %v6751_v37 = vsub.f32 %v11914_v61, %v13063_v36  ;;  %v13504_v36 = vld [vmem:[#allocation88_spill] sm:$0xff] }
 0x77e   : > { %v11923_v11 = vpop.f32.mrf.mxu0  ;;  %v6186_v47 = vadd.f32 %v6185_v4, %v11420_v14 }
 0x77f   : > { %13499 = vst [vmem:[#allocation56_spill] sm:$0xff] %v11923_v11  ;;  %6397 = vmatmul.f32.gmra.mxu3 %v11360_v30  ;;  %v6752_v33 = vand.u32 4294901760, %v6751_v37 }
 0x780   : > { %6938 = vmatmul.f32.gmra.mxu1 %v11859_v8  ;;  %7880 = vst.msk [vmem:[%s8655_s26 + $0x28] sm:$0xff] %vm7874_vm2, %v7687_v59  ;;  %v6519_v59 = vsel %vm3388_vm1, %v3931_v63, 0  ;;  %v8320_v63 = vld [vmem:[%s8640_s19 + $0xd8] sm:$0xff] }
 0x781   : > { %6745 = vmatmul.f32.gmra.mxu0 %v6744_v45  ;;  %v3883_v45 = vpop.permute.xlu2 %3882  ;;  %v11947_v10 = vand.u32 4294901760, %v6519_v59 }
 0x782   : > { %6252 = vmatmul.f32.gmra.mxu2 %v11370_v32  ;;  %v6334_v60 = vpop.f32.mrf.mxu3 }
 0x783   : > { %v6335_v30 = vadd.f32 %v6334_v60, %v6186_v47  ;;  %v13068_v47 = vand.u32 4294901760, %v11936_v42  ;;  %v3932_v60 = vmul.f32 %v8320_v63, %v3883_v45  ;;  %v11958_v61 = vsub.f32 %v6519_v59, %v11947_v10  ;;  %v13507_v45 = vld [vmem:[#allocation57_spill] sm:$0xff] }
 0x785   : > { %v6189_v11 = vpop.f32.mrf.mxu2  ;;  %v7688_v40 = vadd.f32 %v6335_v30, %v13501_v39  ;;  %v11943_v14 = vpop.f32.mrf.mxu1  ;;  %v13505_v39 = vld [vmem:[#allocation82_spill] sm:$0xff]  ;;  %13506 = vst [vmem:[#allocation88_spill] sm:$0xff] %v11958_v61  ;;  %v6759_v37 = vsub.f32 %v11936_v42, %v13068_v47  ;;  %v13510_v47 = vld [vmem:[#allocation91_spill] sm:$0xff] }
 0x786   : > { %13502 = vst [vmem:[#allocation58_spill] sm:$0xff] %v11943_v14  ;;  %v11945_v4 = vpop.f32.mrf.mxu0  ;;  %v6190_v30 = vadd.f32 %v6189_v11, %v13504_v36 }
 0x787   : > { %13503 = vst [vmem:[#allocation138_spill] sm:$0xff] %v11945_v4  ;;  %6401 = vmatmul.f32.gmra.mxu3 %v11370_v32  ;;  %v6760_v59 = vand.u32 4294901760, %v6759_v37 }
 0x788   : > { %6942 = vmatmul.f32.gmra.mxu1 %v11881_v41  ;;  %7881 = vst.msk [vmem:[%s8655_s26 + $0x30] sm:$0xff] %vm7874_vm2, %v7688_v40  ;;  %v6522_v40 = vsel %vm3388_vm1, %v3932_v60, 0  ;;  %v3888_v41 = vpop.permute.xlu0 %3887  ;;  %v8321_v60 = vld [vmem:[%s8640_s19 + $0xe0] sm:$0xff] }
 0x789   : > { %6753 = vmatmul.f32.gmra.mxu0 %v6752_v33  ;;  %v11969_v33 = vand.u32 4294901760, %v6522_v40 }
 0x78a   : > { %6256 = vmatmul.f32.gmra.mxu2 %v13505_v39  ;;  %v6338_v4 = vpop.f32.mrf.mxu3 }
 0x78b   : > { %v6339_v32 = vadd.f32 %v6338_v4, %v6190_v30  ;;  %v13073_v4 = vand.u32 4294901760, %v11958_v61  ;;  %v3933_v30 = vmul.f32 %v8321_v60, %v3888_v41  ;;  %v11980_v42 = vsub.f32 %v6522_v40, %v11969_v33  ;;  %v3893_v41 = vpop.permute.xlu1 %3892  ;;  %v13513_v60 = vld [vmem:[#allocation60_spill] sm:$0xff] }
 0x78d   : > { %v6193_v14 = vpop.f32.mrf.mxu2  ;;  %v7689_v63 = vadd.f32 %v6339_v32, %v13507_v45  ;;  %v11965_v11 = vpop.f32.mrf.mxu1  ;;  %v13511_v45 = vld [vmem:[#allocation84_spill] sm:$0xff]  ;;  %13512 = vst [vmem:[#allocation91_spill] sm:$0xff] %v11980_v42  ;;  %v6767_v37 = vsub.f32 %v11958_v61, %v13073_v4 }
 0x78e   : > { %13508 = vst [vmem:[#allocation82_spill] sm:$0xff] %v11965_v11  ;;  %v11967_v36 = vpop.f32.mrf.mxu0  ;;  %v6194_v32 = vadd.f32 %v6193_v14, %v13510_v47 }
 0x78f   : > { %13509 = vst [vmem:[#allocation57_spill] sm:$0xff] %v11967_v36  ;;  %6405 = vmatmul.f32.gmra.mxu3 %v13505_v39  ;;  %v6768_v40 = vand.u32 4294901760, %v6767_v37 }
 0x790   : > { %6946 = vmatmul.f32.gmra.mxu1 %v11903_v55  ;;  %7882 = vst.msk [vmem:[%s8655_s26 + $0x38] sm:$0xff] %vm7874_vm2, %v7689_v63  ;;  %v6525_v63 = vsel %vm3388_vm1, %v3933_v30, 0  ;;  %v8322_v30 = vld [vmem:[%s8640_s19 + $0xe8] sm:$0xff] }
 0x791   : > { %6761 = vmatmul.f32.gmra.mxu0 %v6760_v59  ;;  %v11991_v55 = vand.u32 4294901760, %v6525_v63 }
 0x792   : > { %6260 = vmatmul.f32.gmra.mxu2 %v13511_v45  ;;  %v6342_v36 = vpop.f32.mrf.mxu3 }
 0x793   : > { %v6343_v39 = vadd.f32 %v6342_v36, %v6194_v32  ;;  %v13076_v36 = vand.u32 4294901760, %v11980_v42  ;;  %v3934_v32 = vmul.f32 %v8322_v30, %v3893_v41  ;;  %v13518_v41 = vld [vmem:[#allocation59_spill] sm:$0xff] }
 0x795   : > { %v6197_v11 = vpop.f32.mrf.mxu2  ;;  %v7690_v14 = vadd.f32 %v6343_v39, %v13513_v60  ;;  %v11987_v47 = vpop.f32.mrf.mxu1  ;;  %v13516_v39 = vld [vmem:[#allocation85_spill] sm:$0xff]  ;;  %v6775_v37 = vsub.f32 %v11980_v42, %v13076_v36 }
 0x796   : > { %13514 = vst [vmem:[#allocation84_spill] sm:$0xff] %v11987_v47  ;;  %v11989_v59 = vpop.f32.mrf.mxu0  ;;  %v6198_v4 = vadd.f32 %v6197_v11, %v11446_v7 }
 0x797   : > { %13515 = vst [vmem:[#allocation60_spill] sm:$0xff] %v11989_v59  ;;  %6409 = vmatmul.f32.gmra.mxu3 %v13511_v45  ;;  %v12002_v59 = vsub.f32 %v6525_v63, %v11991_v55 }
 0x798   : > { %6950 = vmatmul.f32.gmra.mxu1 %v11925_v1  ;;  %7883 = vst.msk [vmem:[%s8655_s26 + $0x40] sm:$0xff] %vm7874_vm2, %v7690_v14  ;;  %v6528_v14 = vsel %vm3388_vm1, %v3934_v32, 0  ;;  %v8323_v32 = vld [vmem:[%s8640_s19 + $0xf0] sm:$0xff] }
 0x799   : > { %6769 = vmatmul.f32.gmra.mxu0 %v6768_v40  ;;  %13517 = vst [vmem:[#allocation85_spill] sm:$0xff] %v12002_v59  ;;  %v3898_v40 = vpop.permute.xlu2 %3897  ;;  %v12013_v47 = vand.u32 4294901760, %v6528_v14  ;;  %v13079_v63 = vand.u32 4294901760, %v12002_v59 }
 0x79a   : > { %6264 = vmatmul.f32.gmra.mxu2 %v13516_v39  ;;  %v6346_v60 = vpop.f32.mrf.mxu3 }
 0x79b   : > { %v6347_v45 = vadd.f32 %v6346_v60, %v6198_v4  ;;  %v6776_v4 = vand.u32 4294901760, %v6775_v37  ;;  %v3935_v60 = vmul.f32 %v8323_v32, %v3898_v40  ;;  %v6783_v37 = vsub.f32 %v12002_v59, %v13079_v63  ;;  %v3903_v40 = vpop.permute.xlu0 %3902  ;;  %v13523_v32 = vld [vmem:[#allocation62_spill] sm:$0xff] }
 0x79d   : > { %v6201_v61 = vpop.f32.mrf.mxu2  ;;  %v7691_v30 = vadd.f32 %v6347_v45, %v13518_v41  ;;  %v12009_v7 = vpop.f32.mrf.mxu1  ;;  %v13521_v41 = vld [vmem:[#allocation86_spill] sm:$0xff] }
 0x79e   : > { %13519 = vst [vmem:[#allocation59_spill] sm:$0xff] %v12009_v7  ;;  %v12011_v11 = vpop.f32.mrf.mxu0  ;;  %v6202_v45 = vadd.f32 %v6201_v61, %v11454_v21 }
 0x79f   : > { %13520 = vst [vmem:[#allocation139_spill] sm:$0xff] %v12011_v11  ;;  %6413 = vmatmul.f32.gmra.mxu3 %v13516_v39  ;;  %v12024_v11 = vsub.f32 %v6528_v14, %v12013_v47 }
 0x7a0   : > { %6954 = vmatmul.f32.gmra.mxu1 %v11947_v10  ;;  %7884 = vst.msk [vmem:[%s8655_s26 + $0x48] sm:$0xff] %vm7874_vm2, %v7691_v30  ;;  %v6531_v30 = vsel %vm3388_vm1, %v3935_v60, 0  ;;  %v8324_v60 = vld [vmem:[%s8640_s19 + $0xf8] sm:$0xff]  ;;  %s8384_s19 = smov 8  }
 0x7a1   : > { %6777 = vmatmul.f32.gmra.mxu0 %v6776_v4  ;;  %13522 = vst [vmem:[#allocation86_spill] sm:$0xff] %v12024_v11  ;;  %v12035_v7 = vand.u32 4294901760, %v6531_v30  ;;  %v13082_v14 = vand.u32 4294901760, %v12024_v11 }
 0x7a2   : > { %6268 = vmatmul.f32.gmra.mxu2 %v13521_v41  ;;  %v6350_v36 = vpop.f32.mrf.mxu3 }
 0x7a3   : > { %v6351_v39 = vadd.f32 %v6350_v36, %v6202_v45  ;;  %v6784_v36 = vand.u32 4294901760, %v6783_v37  ;;  %v3936_v45 = vmul.f32 %v8324_v60, %v3903_v40  ;;  %v6791_v37 = vsub.f32 %v12024_v11, %v13082_v14  ;;  %v13530_v14 = vld [vmem:[#allocation64_spill] sm:$0xff] }
 0x7a5   : > { %v6205_v42 = vpop.f32.mrf.mxu2  ;;  %v7692_v21 = vadd.f32 %v6351_v39, %v13523_v32  ;;  %v12031_v61 = vpop.f32.mrf.mxu1  ;;  %v13526_v39 = vld [vmem:[#allocation89_spill] sm:$0xff]  ;;  %v6534_v59 = vsel %vm3388_vm1, %v3936_v45, 0  ;;  %v13529_v45 = vld [vmem:[#allocation94_spill] sm:$0xff] }
 0x7a6   : > { %13524 = vst [vmem:[#allocation62_spill] sm:$0xff] %v12031_v61  ;;  %v12033_v4 = vpop.f32.mrf.mxu0  ;;  %v6206_v63 = vadd.f32 %v6205_v42, %v11462_v9  ;;  %v13527_v61 = vld [vmem:[#allocation61_spill] sm:$0xff]  ;;  %v12057_v42 = vand.u32 4294901760, %v6534_v59 }
 0x7a7   : > { %13525 = vst [vmem:[#allocation140_spill] sm:$0xff] %v12033_v4  ;;  %6417 = vmatmul.f32.gmra.mxu3 %v13521_v41  ;;  %v12046_v4 = vsub.f32 %v6531_v30, %v12035_v7 }
 0x7a8   : > { %6958 = vmatmul.f32.gmra.mxu1 %v11969_v33  ;;  %7885 = vst.msk [vmem:[%s8655_s26 + $0x50] sm:$0xff] %vm7874_vm2, %v7692_v21 }
 0x7a9   : > { %6785 = vmatmul.f32.gmra.mxu0 %v6784_v36  ;;  %v13085_v30 = vand.u32 4294901760, %v12046_v4 }
 0x7aa   : > { %6272 = vmatmul.f32.gmra.mxu2 %v13526_v39  ;;  %v6354_v32 = vpop.f32.mrf.mxu3 }
 0x7ab   : > { %v6355_v41 = vadd.f32 %v6354_v32, %v6206_v63  ;;  %v6792_v63 = vand.u32 4294901760, %v6791_v37  ;;  %v12067_v32 = vsub.f32 %v6534_v59, %v12057_v42 }
 0x7ad   : > { %v6209_v21 = vpop.f32.mrf.mxu2  ;;  %v7693_v40 = vadd.f32 %v6355_v41, %v13527_v61  ;;  %v12053_v60 = vpop.f32.mrf.mxu1  ;;  %v13086_v59 = vand.u32 4294901760, %v12067_v32 }
 0x7ae   : > { %v12055_v9 = vpop.f32.mrf.mxu0  ;;  %v6210_v36 = vadd.f32 %v6209_v21, %v11471_v18 }
 0x7af   : > { %13528 = vst [vmem:[#allocation89_spill] sm:$0xff] %v12055_v9  ;;  %6421 = vmatmul.f32.gmra.mxu3 %v13526_v39  ;;  %v6799_v39 = vsub.f32 %v12046_v4, %v13085_v30 }
 0x7b0   : > { %6962 = vmatmul.f32.gmra.mxu1 %v11991_v55  ;;  %7886 = vst.msk [vmem:[%s8655_s26 + $0x58] sm:$0xff] %vm7874_vm2, %v7693_v40 }
 0x7b1   : > { %6793 = vmatmul.f32.gmra.mxu0 %v6792_v63  ;;  %v6800_v18 = vand.u32 4294901760, %v6799_v39 }
 0x7b2   : > { %6276 = vmatmul.f32.gmra.mxu2 %v13529_v45  ;;  %v6358_v61 = vpop.f32.mrf.mxu3 }
 0x7b3   : > { %v6359_v41 = vadd.f32 %v6358_v61, %v6210_v36  ;;  %v6807_v36 = vsub.f32 %v12067_v32, %v13086_v59  ;;  %v13531_v61 = vld [vmem:[#allocation63_spill] sm:$0xff] }
 0x7b5   : > { %v6213_v37 = vpop.f32.mrf.mxu2  ;;  %v7694_v9 = vadd.f32 %v6359_v41, %v13530_v14  ;;  %v12073_v11 = vpop.f32.mrf.mxu1 }
 0x7b6   : > { %v12075_v40 = vpop.f32.mrf.mxu0  ;;  %v6214_v21 = vadd.f32 %v6213_v37, %v11483_v19  ;;  %v6808_v19 = vand.u32 4294901760, %v6807_v36  ;;  %v13535_v36 = vld [vmem:[#allocation95_spill] sm:$0xff] }
 0x7b7   : > { %6425 = vmatmul.f32.gmra.mxu3 %v13529_v45  ;;  %7887 = vst.msk [vmem:[%s8655_s26 + $0x60] sm:$0xff] %vm7874_vm2, %v7694_v9 }
 0x7b8   : > { %6966 = vmatmul.f32.gmra.mxu1 %v12013_v47 }
 0x7b9   : > { %6801 = vmatmul.f32.gmra.mxu0 %v6800_v18 }
 0x7ba   : > { %6280 = vmatmul.f32.gmra.mxu2 %v11451_v31  ;;  %v6362_v14 = vpop.f32.mrf.mxu3 }
 0x7bb   : > { %v6363_v63 = vadd.f32 %v6362_v14, %v6214_v21  ;;  %v13532_v14 = vld [vmem:[#allocation66_spill] sm:$0xff] }
 0x7bd   : > { %v6217_v45 = vpop.f32.mrf.mxu2  ;;  %v7695_v41 = vadd.f32 %v6363_v63, %v13531_v61  ;;  %v12088_v39 = vpop.f32.mrf.mxu1 }
 0x7be   : > { %v12090_v30 = vpop.f32.mrf.mxu0  ;;  %v6218_v9 = vadd.f32 %v6217_v45, %v11498_v58  ;;  %v13534_v58 = vld [vmem:[#allocation96_spill] sm:$0xff] }
 0x7bf   : > { %6429 = vmatmul.f32.gmra.mxu3 %v11451_v31  ;;  %7888 = vst.msk [vmem:[%s8655_s26 + $0x68] sm:$0xff] %vm7874_vm2, %v7695_v41 }
 0x7c0   : > { %6970 = vmatmul.f32.gmra.mxu1 %v12035_v7 }
 0x7c1   : > { %6809 = vmatmul.f32.gmra.mxu0 %v6808_v19 }
 0x7c2   : > { %6284 = vmatmul.f32.gmra.mxu2 %v11459_v35  ;;  %v6366_v37 = vpop.f32.mrf.mxu3 }
 0x7c3   : > { %v6367_v18 = vadd.f32 %v6366_v37, %v6218_v9  ;;  %v13536_v9 = vld [vmem:[#allocation65_spill] sm:$0xff] }
 0x7c5   : > { %v6221_v21 = vpop.f32.mrf.mxu2  ;;  %v7696_v63 = vadd.f32 %v6367_v18, %v13532_v14  ;;  %v12099_v61 = vpop.f32.mrf.mxu1 }
 0x7c6   : > { %v12101_v59 = vpop.f32.mrf.mxu0  ;;  %v6222_v31 = vadd.f32 %v6221_v21, %v11515_v53  ;;  %v13539_v21 = vld [vmem:[#allocation98_spill] sm:$0xff] }
 0x7c7   : > { %13533 = vst [vmem:[#allocation61_spill] sm:$0xff] %v12101_v59  ;;  %6433 = vmatmul.f32.gmra.mxu3 %v11459_v35  ;;  %v13538_v35 = vand.u32 4294901760, %v13534_v58 }
 0x7c8   : > { %6974 = vmatmul.f32.gmra.mxu1 %v12057_v42  ;;  %7889 = vst.msk [vmem:[%s8655_s26 + $0x70] sm:$0xff] %vm7874_vm2, %v7696_v63  ;;  %v13540_v63 = vld [vmem:[#allocation97_spill] sm:$0xff] }
 0x7c9   : > { %7405 = vmatmul.f32.vlgmr.msra.gmra.mxu0 %v13535_v36 }
 0x7ca   : > { %7004 = vmatmul.f32.vlgmr.msra.gmra.mxu2 %v13534_v58  ;;  %v6370_v45 = vpop.f32.mrf.mxu3 }
 0x7cb   : > { %v6371_v41 = vadd.f32 %v6370_v45, %v6222_v31 }
 0x7cd   : > { %v6225_v19 = vpop.f32.mrf.mxu2  ;;  %v7697_v37 = vadd.f32 %v6371_v41, %v13536_v9  ;;  %v12111_v18 = vpop.f32.mrf.mxu1  ;;  %v13541_v9 = vld [vmem:[#allocation68_spill] sm:$0xff] }
 0x7ce   : > { %13537 = vst [vmem:[#allocation94_spill] sm:$0xff] %v12111_v18  ;;  %v12113_v14 = vpop.f32.mrf.mxu0  ;;  %v6226_v53 = vadd.f32 %v6225_v19, %v11532_v17  ;;  %v13544_v19 = vld [vmem:[#allocation100_spill] sm:$0xff] }
 0x7cf   : > { %7186 = vmatmul.f32.vlgmr.msra.gmra.mxu3 %v13538_v35  ;;  %7890 = vst.msk [vmem:[%s8655_s26 + $0x78] sm:$0xff] %vm7874_vm2, %v7697_v37  ;;  %v13545_v37 = vld [vmem:[#allocation99_spill] sm:$0xff] }
 0x7d0   : > { %7554 = vmatmul.f32.vlgmr.msra.gmra.mxu1 %v13535_v36  ;;  %v13543_v36 = vand.u32 4294901760, %v13539_v21 }
 0x7d1   : > { %7409 = vmatmul.f32.gmra.mxu0 %v13540_v63 }
 0x7d2   : > { %7009 = vmatmul.f32.gmra.mxu2 %v13539_v21  ;;  %v6374_v31 = vpop.f32.mrf.mxu3 }
 0x7d3   : > { %v6375_v45 = vadd.f32 %v6374_v31, %v6226_v53 }
 0x7d5   : > { %v6229_v41 = vpop.f32.mrf.mxu2  ;;  %v7698_v18 = vadd.f32 %v6375_v45, %v13541_v9  ;;  %v12124_v59 = vpop.f32.mrf.mxu1  ;;  %v13546_v45 = vld [vmem:[#allocation67_spill] sm:$0xff] }
 0x7d6   : > { %13542 = vst [vmem:[#allocation64_spill] sm:$0xff] %v12124_v59  ;;  %v12126_v58 = vpop.f32.mrf.mxu0  ;;  %v6230_v17 = vadd.f32 %v6229_v41, %v11549_v29  ;;  %v13550_v41 = vld [vmem:[#allocation101_spill] sm:$0xff] }
 0x7d7   : > { %7192 = vmatmul.f32.gmra.mxu3 %v13543_v36  ;;  %7891 = vst.msk [vmem:[%s8655_s26 + $0x80] sm:$0xff] %vm7874_vm2, %v7698_v18  ;;  %v13549_v18 = vld [vmem:[#allocation102_spill] sm:$0xff] }
 0x7d8   : > { %7558 = vmatmul.f32.gmra.mxu1 %v13540_v63  ;;  %v13548_v63 = vand.u32 4294901760, %v13544_v19 }
 0x7d9   : > { %7413 = vmatmul.f32.gmra.mxu0 %v13545_v37 }
 0x7da   : > { %7014 = vmatmul.f32.gmra.mxu2 %v13544_v19  ;;  %v6378_v35 = vpop.f32.mrf.mxu3 }
 0x7db   : > { %v6379_v53 = vadd.f32 %v6378_v35, %v6230_v17 }
 0x7dd   : > { %v6233_v31 = vpop.f32.mrf.mxu2  ;;  %v7699_v9 = vadd.f32 %v6379_v53, %v13546_v45  ;;  %v12137_v59 = vpop.f32.mrf.mxu1  ;;  %v13551_v53 = vld [vmem:[#allocation69_spill] sm:$0xff] }
 0x7de   : > { %13547 = vst [vmem:[#allocation63_spill] sm:$0xff] %v12137_v59  ;;  %v12139_v21 = vpop.f32.mrf.mxu0  ;;  %v6234_v29 = vadd.f32 %v6233_v31, %v11566_v16  ;;  %v13554_v31 = vld [vmem:[#allocation104_spill] sm:$0xff] }
 0x7df   : > { %7198 = vmatmul.f32.gmra.mxu3 %v13548_v63  ;;  %7892 = vst.msk [vmem:[%s8655_s26 + $0x88] sm:$0xff] %vm7874_vm2, %v7699_v9  ;;  %v13555_v9 = vld [vmem:[#allocation103_spill] sm:$0xff] }
 0x7e0   : > { %7562 = vmatmul.f32.gmra.mxu1 %v13545_v37  ;;  %v13553_v37 = vand.u32 4294901760, %v13549_v18 }
 0x7e1   : > { %7417 = vmatmul.f32.gmra.mxu0 %v13550_v41 }
 0x7e2   : > { %7019 = vmatmul.f32.gmra.mxu2 %v13549_v18  ;;  %v6382_v36 = vpop.f32.mrf.mxu3 }
 0x7e3   : > { %v6383_v17 = vadd.f32 %v6382_v36, %v6234_v29 }
 0x7e5   : > { %v6237_v35 = vpop.f32.mrf.mxu2  ;;  %v7700_v45 = vadd.f32 %v6383_v17, %v13551_v53  ;;  %v12150_v59 = vpop.f32.mrf.mxu1  ;;  %v13556_v17 = vld [vmem:[#allocation71_spill] sm:$0xff] }
 0x7e6   : > { %13552 = vst [vmem:[#allocation66_spill] sm:$0xff] %v12150_v59  ;;  %v12152_v19 = vpop.f32.mrf.mxu0  ;;  %v6238_v16 = vadd.f32 %v6237_v35, %v11583_v0  ;;  %v13559_v35 = vld [vmem:[#allocation106_spill] sm:$0xff] }
 0x7e7   : > { %7204 = vmatmul.f32.gmra.mxu3 %v13553_v37  ;;  %7893 = vst.msk [vmem:[%s8655_s26 + $0x90] sm:$0xff] %vm7874_vm2, %v7700_v45  ;;  %v13560_v45 = vld [vmem:[#allocation105_spill] sm:$0xff] }
 0x7e8   : > { %7566 = vmatmul.f32.gmra.mxu1 %v13550_v41  ;;  %v13558_v41 = vand.u32 4294901760, %v13554_v31 }
 0x7e9   : > { %7421 = vmatmul.f32.gmra.mxu0 %v13555_v9 }
 0x7ea   : > { %7024 = vmatmul.f32.gmra.mxu2 %v13554_v31  ;;  %v6386_v63 = vpop.f32.mrf.mxu3 }
 0x7eb   : > { %v6387_v29 = vadd.f32 %v6386_v63, %v6238_v16 }
 0x7ed   : > { %v6241_v36 = vpop.f32.mrf.mxu2  ;;  %v7701_v53 = vadd.f32 %v6387_v29, %v13556_v17  ;;  %v12163_v59 = vpop.f32.mrf.mxu1  ;;  %v13561_v29 = vld [vmem:[#allocation70_spill] sm:$0xff] }
 0x7ee   : > { %13557 = vst [vmem:[#allocation96_spill] sm:$0xff] %v12163_v59  ;;  %v12165_v18 = vpop.f32.mrf.mxu0  ;;  %v6242_v0 = vadd.f32 %v6241_v36, %v11600_v52  ;;  %v13564_v36 = vld [vmem:[#allocation108_spill] sm:$0xff] }
 0x7ef   : > { %7210 = vmatmul.f32.gmra.mxu3 %v13558_v41  ;;  %7894 = vst.msk [vmem:[%s8655_s26 + $0x98] sm:$0xff] %vm7874_vm2, %v7701_v53  ;;  %v13565_v53 = vld [vmem:[#allocation107_spill] sm:$0xff] }
 0x7f0   : > { %7570 = vmatmul.f32.gmra.mxu1 %v13555_v9  ;;  %v13563_v9 = vand.u32 4294901760, %v13559_v35 }
 0x7f1   : > { %7425 = vmatmul.f32.gmra.mxu0 %v13560_v45 }
 0x7f2   : > { %7029 = vmatmul.f32.gmra.mxu2 %v13559_v35  ;;  %v6390_v37 = vpop.f32.mrf.mxu3 }
 0x7f3   : > { %v6391_v16 = vadd.f32 %v6390_v37, %v6242_v0 }
 0x7f5   : > { %v6245_v63 = vpop.f32.mrf.mxu2  ;;  %v7702_v17 = vadd.f32 %v6391_v16, %v13561_v29  ;;  %v12176_v59 = vpop.f32.mrf.mxu1  ;;  %v13566_v16 = vld [vmem:[#allocation87_spill] sm:$0xff] }
 0x7f6   : > { %13562 = vst [vmem:[#allocation95_spill] sm:$0xff] %v12176_v59  ;;  %v12178_v31 = vpop.f32.mrf.mxu0  ;;  %v6246_v52 = vadd.f32 %v6245_v63, %v11617_v23  ;;  %v13569_v63 = vld [vmem:[#allocation110_spill] sm:$0xff] }
 0x7f7   : > { %7216 = vmatmul.f32.gmra.mxu3 %v13563_v9  ;;  %7895 = vst.msk [vmem:[%s8655_s26 + $0xa0] sm:$0xff] %vm7874_vm2, %v7702_v17  ;;  %v13570_v17 = vld [vmem:[#allocation109_spill] sm:$0xff] }
 0x7f8   : > { %7574 = vmatmul.f32.gmra.mxu1 %v13560_v45  ;;  %v13568_v45 = vand.u32 4294901760, %v13564_v36 }
 0x7f9   : > { %7429 = vmatmul.f32.gmra.mxu0 %v13565_v53 }
 0x7fa   : > { %7034 = vmatmul.f32.gmra.mxu2 %v13564_v36  ;;  %v6394_v41 = vpop.f32.mrf.mxu3 }
 0x7fb   : > { %v6395_v0 = vadd.f32 %v6394_v41, %v6246_v52 }
 0x7fd   : > { %v6249_v37 = vpop.f32.mrf.mxu2  ;;  %v7703_v29 = vadd.f32 %v6395_v0, %v13566_v16  ;;  %v12189_v59 = vpop.f32.mrf.mxu1  ;;  %v13571_v0 = vld [vmem:[#allocation73_spill] sm:$0xff] }
 0x7fe   : > { %13567 = vst [vmem:[#allocation65_spill] sm:$0xff] %v12189_v59  ;;  %v12191_v35 = vpop.f32.mrf.mxu0  ;;  %v6250_v23 = vadd.f32 %v6249_v37, %v11634_v34  ;;  %v13574_v37 = vld [vmem:[#allocation111_spill] sm:$0xff] }
 0x7ff   : > { %7222 = vmatmul.f32.gmra.mxu3 %v13568_v45  ;;  %7896 = vst.msk [vmem:[%s8655_s26 + $0xa8] sm:$0xff] %vm7874_vm2, %v7703_v29 }
 0x800   : > { %7578 = vmatmul.f32.gmra.mxu1 %v13565_v53  ;;  %v13573_v53 = vand.u32 4294901760, %v13569_v63 }
 0x801   : > { %7433 = vmatmul.f32.gmra.mxu0 %v13570_v17 }
 0x802   : > { %7039 = vmatmul.f32.gmra.mxu2 %v13569_v63  ;;  %v6398_v9 = vpop.f32.mrf.mxu3 }
 0x803   : > { %v6399_v52 = vadd.f32 %v6398_v9, %v6250_v23  ;;  %v13575_v9 = vld [vmem:[#allocation72_spill] sm:$0xff] }
 0x805   : > { %v6253_v41 = vpop.f32.mrf.mxu2  ;;  %v7704_v16 = vadd.f32 %v6399_v52, %v13571_v0  ;;  %v12202_v59 = vpop.f32.mrf.mxu1 }
 0x806   : > { %v12204_v36 = vpop.f32.mrf.mxu0  ;;  %v6254_v34 = vadd.f32 %v6253_v41, %v11651_v25  ;;  %v13578_v25 = vld [vmem:[#allocation119_spill] sm:$0xff] }
 0x807   : > { %13572 = vst [vmem:[#allocation98_spill] sm:$0xff] %v12204_v36  ;;  %7228 = vmatmul.f32.gmra.mxu3 %v13573_v53  ;;  %v13580_v53 = vld [vmem:[#allocation112_spill] sm:$0xff] }
 0x808   : > { %7582 = vmatmul.f32.gmra.mxu1 %v13570_v17  ;;  %7897 = vst.msk [vmem:[%s8655_s26 + $0xb0] sm:$0xff] %vm7874_vm2, %v7704_v16  ;;  %v13577_v17 = vand.u32 4294901760, %v13574_v37  ;;  %v13579_v16 = vld [vmem:[#allocation113_spill] sm:$0xff] }
 0x809   : > { %7437 = vmatmul.f32.gmra.mxu0 %v11595_v26 }
 0x80a   : > { %7044 = vmatmul.f32.gmra.mxu2 %v13574_v37  ;;  %v6402_v29 = vpop.f32.mrf.mxu3 }
 0x80b   : > { %v6403_v45 = vadd.f32 %v6402_v29, %v6254_v34 }
 0x80d   : > { %v6257_v23 = vpop.f32.mrf.mxu2  ;;  %v7705_v52 = vadd.f32 %v6403_v45, %v13575_v9  ;;  %v12215_v0 = vpop.f32.mrf.mxu1  ;;  %v13581_v9 = vld [vmem:[#allocation90_spill] sm:$0xff] }
 0x80e   : > { %13576 = vst [vmem:[#allocation97_spill] sm:$0xff] %v12215_v0  ;;  %v12217_v63 = vpop.f32.mrf.mxu0  ;;  %v6258_v41 = vadd.f32 %v6257_v23, %v13578_v25 }
 0x80f   : > { %7234 = vmatmul.f32.gmra.mxu3 %v13577_v17  ;;  %7898 = vst.msk [vmem:[%s8655_s26 + $0xb8] sm:$0xff] %vm7874_vm2, %v7705_v52  ;;  %v13584_v52 = vld [vmem:[#allocation115_spill] sm:$0xff]  ;;  %v13585_v17 = vld [vmem:[#allocation114_spill] sm:$0xff] }
 0x810   : > { %7586 = vmatmul.f32.gmra.mxu1 %v11595_v26  ;;  %v13583_v26 = vand.u32 4294901760, %v13579_v16 }
 0x811   : > { %7441 = vmatmul.f32.gmra.mxu0 %v13580_v53 }
 0x812   : > { %7049 = vmatmul.f32.gmra.mxu2 %v13579_v16  ;;  %v6406_v34 = vpop.f32.mrf.mxu3 }
 0x813   : > { %v6407_v29 = vadd.f32 %v6406_v34, %v6258_v41 }
 0x815   : > { %v6261_v45 = vpop.f32.mrf.mxu2  ;;  %v7706_v0 = vadd.f32 %v6407_v29, %v13581_v9  ;;  %v12228_v36 = vpop.f32.mrf.mxu1  ;;  %v13586_v29 = vld [vmem:[#allocation74_spill] sm:$0xff] }
 0x816   : > { %13582 = vst [vmem:[#allocation68_spill] sm:$0xff] %v12228_v36  ;;  %v12230_v37 = vpop.f32.mrf.mxu0  ;;  %v6262_v23 = vadd.f32 %v6261_v45, %v11690_v13  ;;  %v13590_v45 = vld [vmem:[#allocation116_spill] sm:$0xff] }
 0x817   : > { %7240 = vmatmul.f32.gmra.mxu3 %v13583_v26  ;;  %7899 = vst.msk [vmem:[%s8655_s26 + $0xc0] sm:$0xff] %vm7874_vm2, %v7706_v0  ;;  %v13589_v0 = vld [vmem:[#allocation117_spill] sm:$0xff] }
 0x818   : > { %7590 = vmatmul.f32.gmra.mxu1 %v13580_v53  ;;  %v13588_v53 = vand.u32 4294901760, %v13584_v52 }
 0x819   : > { %7445 = vmatmul.f32.gmra.mxu0 %v13585_v17 }
 0x81a   : > { %7054 = vmatmul.f32.gmra.mxu2 %v13584_v52  ;;  %v6410_v25 = vpop.f32.mrf.mxu3 }
 0x81b   : > { %v6411_v41 = vadd.f32 %v6410_v25, %v6262_v23 }
 0x81d   : > { %v6265_v34 = vpop.f32.mrf.mxu2  ;;  %v7707_v9 = vadd.f32 %v6411_v41, %v13586_v29  ;;  %v12241_v36 = vpop.f32.mrf.mxu1  ;;  %v13591_v41 = vld [vmem:[#allocation75_spill] sm:$0xff] }
 0x81e   : > { %13587 = vst [vmem:[#allocation100_spill] sm:$0xff] %v12241_v36  ;;  %v12243_v16 = vpop.f32.mrf.mxu0  ;;  %v6266_v13 = vadd.f32 %v6265_v34, %v11707_v51  ;;  %v13594_v34 = vld [vmem:[#allocation120_spill] sm:$0xff] }
 0x81f   : > { %7246 = vmatmul.f32.gmra.mxu3 %v13588_v53  ;;  %7900 = vst.msk [vmem:[%s8655_s26 + $0xc8] sm:$0xff] %vm7874_vm2, %v7707_v9  ;;  %v13595_v9 = vld [vmem:[#allocation118_spill] sm:$0xff] }
 0x820   : > { %7594 = vmatmul.f32.gmra.mxu1 %v13585_v17  ;;  %v13593_v17 = vand.u32 4294901760, %v13589_v0 }
 0x821   : > { %7449 = vmatmul.f32.gmra.mxu0 %v13590_v45 }
 0x822   : > { %7059 = vmatmul.f32.gmra.mxu2 %v13589_v0  ;;  %v6414_v26 = vpop.f32.mrf.mxu3 }
 0x823   : > { %v6415_v23 = vadd.f32 %v6414_v26, %v6266_v13 }
 0x825   : > { %v6269_v25 = vpop.f32.mrf.mxu2  ;;  %v7708_v29 = vadd.f32 %v6415_v23, %v13591_v41  ;;  %v12254_v36 = vpop.f32.mrf.mxu1  ;;  %v13596_v23 = vld [vmem:[#allocation76_spill] sm:$0xff] }
 0x826   : > { %13592 = vst [vmem:[#allocation99_spill] sm:$0xff] %v12254_v36  ;;  %v12256_v52 = vpop.f32.mrf.mxu0  ;;  %v6270_v51 = vadd.f32 %v6269_v25, %v11724_v12  ;;  %v13599_v25 = vld [vmem:[#allocation122_spill] sm:$0xff] }
 0x827   : > { %7252 = vmatmul.f32.gmra.mxu3 %v13593_v17  ;;  %7901 = vst.msk [vmem:[%s8655_s26 + $0xd0] sm:$0xff] %vm7874_vm2, %v7708_v29  ;;  %v13600_v29 = vld [vmem:[#allocation121_spill] sm:$0xff] }
 0x828   : > { %7598 = vmatmul.f32.gmra.mxu1 %v13590_v45  ;;  %v13598_v45 = vand.u32 4294901760, %v13594_v34 }
 0x829   : > { %7453 = vmatmul.f32.gmra.mxu0 %v13595_v9 }
 0x82a   : > { %7064 = vmatmul.f32.gmra.mxu2 %v13594_v34  ;;  %v6418_v53 = vpop.f32.mrf.mxu3 }
 0x82b   : > { %v6419_v13 = vadd.f32 %v6418_v53, %v6270_v51 }
 0x82d   : > { %v6273_v26 = vpop.f32.mrf.mxu2  ;;  %v7709_v41 = vadd.f32 %v6419_v13, %v13596_v23  ;;  %v12267_v36 = vpop.f32.mrf.mxu1  ;;  %v13601_v13 = vld [vmem:[#allocation77_spill] sm:$0xff] }
 0x82e   : > { %13597 = vst [vmem:[#allocation67_spill] sm:$0xff] %v12267_v36  ;;  %v12269_v0 = vpop.f32.mrf.mxu0  ;;  %v6274_v12 = vadd.f32 %v6273_v26, %v11741_v3  ;;  %v13603_v26 = vld [vmem:[#allocation123_spill] sm:$0xff] }
 0x82f   : > { %7258 = vmatmul.f32.gmra.mxu3 %v13598_v45  ;;  %7902 = vst.msk [vmem:[%s8655_s26 + $0xd8] sm:$0xff] %vm7874_vm2, %v7709_v41 }
 0x830   : > { %7602 = vmatmul.f32.gmra.mxu1 %v13595_v9  ;;  %v13602_v9 = vand.u32 4294901760, %v13599_v25 }
 0x831   : > { %7457 = vmatmul.f32.gmra.mxu0 %v13600_v29 }
 0x832   : > { %7069 = vmatmul.f32.gmra.mxu2 %v13599_v25  ;;  %v6422_v17 = vpop.f32.mrf.mxu3 }
 0x833   : > { %v6423_v51 = vadd.f32 %v6422_v17, %v6274_v12  ;;  %v13604_v17 = vld [vmem:[#allocation78_spill] sm:$0xff] }
 0x835   : > { %v6277_v53 = vpop.f32.mrf.mxu2  ;;  %v7710_v23 = vadd.f32 %v6423_v51, %v13601_v13  ;;  %v12280_v36 = vpop.f32.mrf.mxu1 }
 0x836   : > { %v12282_v34 = vpop.f32.mrf.mxu0  ;;  %v6278_v3 = vadd.f32 %v6277_v53, %v11758_v62  ;;  %v13607_v53 = vld [vmem:[#allocation124_spill] sm:$0xff] }
 0x837   : > { %7264 = vmatmul.f32.gmra.mxu3 %v13602_v9  ;;  %7903 = vst.msk [vmem:[%s8655_s26 + $0xe0] sm:$0xff] %vm7874_vm2, %v7710_v23 }
 0x838   : > { %7606 = vmatmul.f32.gmra.mxu1 %v13600_v29  ;;  %v13606_v29 = vand.u32 4294901760, %v13603_v26 }
 0x839   : > { %7461 = vmatmul.f32.gmra.mxu0 %v11702_v24 }
 0x83a   : > { %7074 = vmatmul.f32.gmra.mxu2 %v13603_v26  ;;  %v6426_v41 = vpop.f32.mrf.mxu3  ;;  %v13609_v26 = vand.u32 4294901760, %v13607_v53 }
 0x83b   : > { %v6427_v45 = vadd.f32 %v6426_v41, %v6278_v3  ;;  %v13608_v41 = vld [vmem:[#allocation79_spill] sm:$0xff] }
 0x83d   : > { %v6281_v12 = vpop.f32.mrf.mxu2  ;;  %v7711_v51 = vadd.f32 %v6427_v45, %v13604_v17  ;;  %v12293_v13 = vpop.f32.mrf.mxu1 }
 0x83e   : > { %v12295_v25 = vpop.f32.mrf.mxu0  ;;  %v6282_v62 = vadd.f32 %v6281_v12, %v11777_v6  ;;  %v13610_v6 = vld [vmem:[#allocation125_spill] sm:$0xff] }
 0x83f   : > { %13605 = vst [vmem:[#allocation102_spill] sm:$0xff] %v12295_v25  ;;  %7270 = vmatmul.f32.gmra.mxu3 %v13606_v29  ;;  %v12316_v29 = vpop.permute.xlu1 %6437 }
 0x840   : > { %7610 = vmatmul.f32.gmra.mxu1 %v11702_v24  ;;  %7904 = vst.msk [vmem:[%s8655_s26 + $0xe8] sm:$0xff] %vm7874_vm2, %v7711_v51 }
 0x841   : > { %7465 = vmatmul.f32.gmra.mxu0 %v11719_v54 }
 0x842   : > { %7079 = vmatmul.f32.gmra.mxu2 %v13607_v53  ;;  %v6430_v23 = vpop.f32.mrf.mxu3 }
 0x843   : > { %v6431_v9 = vadd.f32 %v6430_v23, %v6282_v62  ;;  %v13611_v23 = vld [vmem:[#allocation126_spill] sm:$0xff] }
 0x844   : > { %v6563_v53 = vadd.f32 %v13611_v23, %v12316_v29 }
 0x845   : > { %v6285_v3 = vpop.f32.mrf.mxu2  ;;  %v7712_v45 = vadd.f32 %v6431_v9, %v13608_v41  ;;  %v12306_v17 = vpop.f32.mrf.mxu1  ;;  %v13612_v9 = vld [vmem:[#allocation80_spill] sm:$0xff] }
 0x846   : > { %v7406_v25 = vpop.f32.mrf.mxu0  ;;  %v6286_v24 = vadd.f32 %v6285_v3, %v11798_v46  ;;  %v13613_v46 = vand.u32 4294901760, %v13610_v6 }
 0x847   : > { %7276 = vmatmul.f32.gmra.mxu3 %v13609_v26  ;;  %7905 = vst.msk [vmem:[%s8655_s26 + $0xf0] sm:$0xff] %vm7874_vm2, %v7712_v45  ;;  %v6852_v45 = vadd.f32 %v11789_v50, %v6563_v53 }
 0x848   : > { %7614 = vmatmul.f32.gmra.mxu1 %v11719_v54 }
 0x849   : > { %7469 = vmatmul.f32.gmra.mxu0 %v11736_v27 }
 0x84a   : > { %7084 = vmatmul.f32.gmra.mxu2 %v13610_v6  ;;  %v6434_v12 = vpop.f32.mrf.mxu3 }
 0x84b   : > { %v6435_v51 = vadd.f32 %v6434_v12, %v6286_v24 }
 0x84d   : > { %v7005_v62 = vpop.f32.mrf.mxu2  ;;  %v7713_v41 = vadd.f32 %v6435_v51, %v13612_v9  ;;  %v7555_v54 = vpop.f32.mrf.mxu1  ;;  %v6571_v51 = vadd.f32 %v11791_v28, %v12316_v29 }
 0x84e   : > { %v7410_v26 = vpop.f32.mrf.mxu0  ;;  %v7006_v3 = vadd.f32 %v7005_v62, %v6852_v45  ;;  %v7747_v62 = vpop.permute.xlu2 %7746 }
 0x84f   : > { %7282 = vmatmul.f32.gmra.mxu3 %v13613_v46  ;;  %7906 = vst.msk [vmem:[%s8655_s26 + $0xf8] sm:$0xff] %vm7874_vm2, %v7713_v41  ;;  %v6856_v6 = vadd.f32 %v11811_v2, %v6571_v51  ;;  %v13615_v2 = vld [vmem:[#allocation127_spill] sm:$0xff]  ;;  %v13616_v51 = vand.u32 4294901760, %v11783_v43 }
 0x850   : > { %7618 = vmatmul.f32.gmra.mxu1 %v11736_v27  ;;  %v13614_v27 = vand.u32 4294901760, %v11764_v22 }
 0x851   : > { %7473 = vmatmul.f32.gmra.mxu0 %v11753_v49 }
 0x852   : > { %7089 = vmatmul.f32.gmra.mxu2 %v11764_v22  ;;  %v7187_v24 = vpop.f32.mrf.mxu3 }
 0x853   : > { %v7188_v12 = vadd.f32 %v7187_v24, %v7006_v3 }
 0x855   : > { %v7010_v23 = vpop.f32.mrf.mxu2  ;;  %v7407_v9 = vadd.f32 %v7406_v25, %v7188_v12  ;;  %v7559_v50 = vpop.f32.mrf.mxu1 }
 0x856   : > { %v7414_v53 = vpop.f32.mrf.mxu0  ;;  %v7011_v41 = vadd.f32 %v7010_v23, %v6856_v6 }
 0x857   : > { %v7556_v46 = vadd.f32 %v7555_v54, %v7407_v9  ;;  %7288 = vmatmul.f32.gmra.mxu3 %v13614_v27  ;;  %v6579_v54 = vadd.f32 %v13615_v2, %v12316_v29  ;;  %v7749_v9 = vpop.permute.xlu0 %7748 }
 0x858   : > { %7622 = vmatmul.f32.gmra.mxu1 %v11753_v49 }
 0x859   : > { %7477 = vmatmul.f32.gmra.mxu0 %v11772_v5  ;;  %v7842_v45 = vadd.f32 %v7747_v62, %v7556_v46  ;;  %v6860_v49 = vadd.f32 %v11833_v15, %v6579_v54  ;;  %v13617_v15 = vld [vmem:[#allocation130_spill] sm:$0xff]  ;;  %v13619_v54 = vld [vmem:[#allocation129_spill] sm:$0xff] }
 0x85a   : > { %7094 = vmatmul.f32.gmra.mxu2 %v11783_v43  ;;  %v7193_v3 = vpop.f32.mrf.mxu3 }
 0x85b   : > { %v7194_v28 = vadd.f32 %v7193_v3, %v7011_v41  ;;  %7939 = vrot.lane.b32.xlu1 %v7842_v45, %s8384_s19 }
 0x85d   : > { %v7015_v25 = vpop.f32.mrf.mxu2  ;;  %v7411_v22 = vadd.f32 %v7410_v26, %v7194_v28  ;;  %v7563_v24 = vpop.f32.mrf.mxu1  ;;  %v13618_v28 = vand.u32 4294901760, %v11804_v48 }
 0x85e   : > { %v7418_v12 = vpop.f32.mrf.mxu0  ;;  %v7016_v6 = vadd.f32 %v7015_v25, %v6860_v49  ;;  %v7751_v25 = vpop.permute.xlu1 %7750 }
 0x85f   : > { %v7560_v23 = vadd.f32 %v7559_v50, %v7411_v22  ;;  %7294 = vmatmul.f32.gmra.mxu3 %v13616_v51  ;;  %v6587_v50 = vadd.f32 %v13617_v15, %v12316_v29  ;;  %v13620_v22 = vld [vmem:[#allocation128_spill] sm:$0xff] }
 0x860   : > { %7626 = vmatmul.f32.gmra.mxu1 %v11772_v5 }
 0x861   : > { %7481 = vmatmul.f32.gmra.mxu0 %v11793_v20  ;;  %v7843_v46 = vadd.f32 %v7749_v9, %v7560_v23  ;;  %v6864_v5 = vadd.f32 %v11855_v38, %v6587_v50  ;;  %v7753_v9 = vpop.permute.xlu2 %7752  ;;  %v13621_v38 = vld [vmem:[#allocation132_spill] sm:$0xff]  ;;  %v13624_v50 = vld [vmem:[#allocation131_spill] sm:$0xff] }
 0x862   : > { %7099 = vmatmul.f32.gmra.mxu2 %v11804_v48  ;;  %v7199_v27 = vpop.f32.mrf.mxu3 }
 0x863   : > { %v7200_v62 = vadd.f32 %v7199_v27, %v7016_v6  ;;  %7941 = vrot.lane.b32.xlu2 %v7843_v46, %s8384_s19 }
 0x865   : > { %v7020_v26 = vpop.f32.mrf.mxu2  ;;  %v7415_v41 = vadd.f32 %v7414_v53, %v7200_v62  ;;  %v7567_v43 = vpop.f32.mrf.mxu1 }
 0x866   : > { %v7422_v45 = vpop.f32.mrf.mxu0  ;;  %v7021_v2 = vadd.f32 %v7020_v26, %v6864_v5  ;;  %v13623_v26 = vand.u32 4294901760, %v13619_v54 }
 0x867   : > { %v7564_v3 = vadd.f32 %v7563_v24, %v7415_v41  ;;  %7300 = vmatmul.f32.gmra.mxu3 %v13618_v28  ;;  %v6595_v24 = vadd.f32 %v13621_v38, %v12316_v29  ;;  %v13627_v38 = vld [vmem:[#allocation133_spill] sm:$0xff] }
 0x868   : > { %7630 = vmatmul.f32.gmra.mxu1 %v11793_v20  ;;  %v13622_v20 = vld [vmem:[#allocation92_spill] sm:$0xff] }
 0x869   : > { %7485 = vmatmul.f32.gmra.mxu0 %v13620_v22  ;;  %v7844_v49 = vadd.f32 %v7751_v25, %v7564_v3  ;;  %v6868_v27 = vadd.f32 %v13622_v20, %v6595_v24  ;;  %v7759_v28 = vpop.permute.xlu2 %7758  ;;  %v13625_v25 = vld [vmem:[#allocation134_spill] sm:$0xff] }
 0x86a   : > { %7104 = vmatmul.f32.gmra.mxu2 %v13619_v54  ;;  %v7205_v23 = vpop.f32.mrf.mxu3 }
 0x86b   : > { %v7206_v51 = vadd.f32 %v7205_v23, %v7021_v2  ;;  %7943 = vrot.lane.b32.xlu0 %v7844_v49, %s8384_s19 }
 0x86d   : > { %v7025_v53 = vpop.f32.mrf.mxu2  ;;  %v7419_v48 = vadd.f32 %v7418_v12, %v7206_v51  ;;  %v7571_v6 = vpop.f32.mrf.mxu1  ;;  %v13626_v51 = vand.u32 4294901760, %v13624_v50 }
 0x86e   : > { %v7426_v46 = vpop.f32.mrf.mxu0  ;;  %v7026_v15 = vadd.f32 %v7025_v53, %v6868_v27  ;;  %v7755_v53 = vpop.permute.xlu0 %7754 }
 0x86f   : > { %v7568_v62 = vadd.f32 %v7567_v43, %v7419_v48  ;;  %7306 = vmatmul.f32.gmra.mxu3 %v13623_v26  ;;  %v6603_v43 = vadd.f32 %v13625_v25, %v12316_v29  ;;  %v13631_v25 = vld [vmem:[#allocation135_spill] sm:$0xff] }
 0x870   : > { %7634 = vmatmul.f32.gmra.mxu1 %v13620_v22 }
 0x871   : > { %7489 = vmatmul.f32.gmra.mxu0 %v11837_v44  ;;  %v7845_v41 = vadd.f32 %v7753_v9, %v7568_v62  ;;  %v6872_v22 = vadd.f32 %v11899_v57, %v6603_v43  ;;  %v12374_v27 = vpop.permute.xlu2 %7764  ;;  %v13628_v57 = vld [vmem:[#allocation81_spill] sm:$0xff] }
 0x872   : > { %7109 = vmatmul.f32.gmra.mxu2 %v13624_v50  ;;  %v7211_v5 = vpop.f32.mrf.mxu3 }
 0x873   : > { %v7212_v3 = vadd.f32 %v7211_v5, %v7026_v15  ;;  %7945 = vrot.lane.b32.xlu1 %v7845_v41, %s8384_s19  ;;  %v13629_v41 = vand.u32 4294901760, %v13627_v38  ;;  %v7757_v5 = vpop.permute.xlu1 %7756 }
 0x875   : > { %v7030_v12 = vpop.f32.mrf.mxu2  ;;  %v7423_v2 = vadd.f32 %v7422_v45, %v7212_v3  ;;  %v7575_v54 = vpop.f32.mrf.mxu1 }
 0x876   : > { %v7430_v49 = vpop.f32.mrf.mxu0  ;;  %v7031_v9 = vadd.f32 %v7030_v12, %v6872_v22  ;;  %v13630_v12 = vld [vmem:[#allocation83_spill] sm:$0xff] }
 0x877   : > { %v7572_v23 = vadd.f32 %v7571_v6, %v7423_v2  ;;  %7312 = vmatmul.f32.gmra.mxu3 %v13626_v51  ;;  %v6611_v6 = vadd.f32 %v13628_v57, %v12316_v29  ;;  %v13636_v57 = vld [vmem:[#allocation93_spill] sm:$0xff] }
 0x878   : > { %7638 = vmatmul.f32.gmra.mxu1 %v11837_v44 }
 0x879   : > { %7493 = vmatmul.f32.gmra.mxu0 %v11859_v8  ;;  %v7846_v24 = vadd.f32 %v7755_v53, %v7572_v23  ;;  %v6876_v15 = vadd.f32 %v11921_v56, %v6611_v6  ;;  %v12385_v23 = vpop.permute.xlu2 %7770  ;;  %v13632_v56 = vld [vmem:[#allocation56_spill] sm:$0xff] }
 0x87a   : > { %7114 = vmatmul.f32.gmra.mxu2 %v13627_v38  ;;  %v7217_v48 = vpop.f32.mrf.mxu3 }
 0x87b   : > { %v7218_v20 = vadd.f32 %v7217_v48, %v7031_v9  ;;  %7947 = vrot.lane.b32.xlu2 %v7846_v24, %s8384_s19  ;;  %v13633_v9 = vld [vmem:[#allocation58_spill] sm:$0xff]  ;;  %v13634_v48 = vand.u32 4294901760, %v13630_v12 }
 0x87d   : > { %v7035_v45 = vpop.f32.mrf.mxu2  ;;  %v7427_v62 = vadd.f32 %v7426_v46, %v7218_v20  ;;  %v7579_v26 = vpop.f32.mrf.mxu1 }
 0x87e   : > { %v7434_v44 = vpop.f32.mrf.mxu0  ;;  %v7036_v3 = vadd.f32 %v7035_v45, %v6876_v15  ;;  %v13635_v45 = vld [vmem:[#allocation136_spill] sm:$0xff] }
 0x87f   : > { %v7576_v50 = vadd.f32 %v7575_v54, %v7427_v62  ;;  %7318 = vmatmul.f32.gmra.mxu3 %v13629_v41  ;;  %v6619_v54 = vadd.f32 %v13632_v56, %v12316_v29 }
 0x880   : > { %7642 = vmatmul.f32.gmra.mxu1 %v11859_v8 }
 0x881   : > { %7497 = vmatmul.f32.gmra.mxu0 %v13631_v25  ;;  %v7847_v43 = vadd.f32 %v7757_v5, %v7576_v50  ;;  %v6880_v38 = vadd.f32 %v13633_v9, %v6619_v54  ;;  %v12396_v41 = vpop.permute.xlu2 %7776  ;;  %v13640_v54 = vld [vmem:[#allocation137_spill] sm:$0xff] }
 0x882   : > { %7119 = vmatmul.f32.gmra.mxu2 %v13630_v12  ;;  %v7223_v2 = vpop.f32.mrf.mxu3 }
 0x883   : > { %v7224_v22 = vadd.f32 %v7223_v2, %v7036_v3  ;;  %7949 = vrot.lane.b32.xlu0 %v7847_v43, %s8384_s19  ;;  %v13638_v43 = vld [vmem:[#allocation82_spill] sm:$0xff] }
 0x885   : > { %v7040_v46 = vpop.f32.mrf.mxu2  ;;  %v7431_v51 = vadd.f32 %v7430_v49, %v7224_v22  ;;  %v7583_v53 = vpop.f32.mrf.mxu1 }
 0x886   : > { %v7438_v8 = vpop.f32.mrf.mxu0  ;;  %v7041_v20 = vadd.f32 %v7040_v46, %v6880_v38  ;;  %v7763_v49 = vpop.permute.xlu1 %7762  ;;  %v13639_v46 = vand.u32 4294901760, %v13635_v45 }
 0x887   : > { %v7580_v24 = vadd.f32 %v7579_v26, %v7431_v51  ;;  %7324 = vmatmul.f32.gmra.mxu3 %v13634_v48  ;;  %v13637_v26 = vld [vmem:[#allocation138_spill] sm:$0xff]  ;;  %v13641_v48 = vld [vmem:[#allocation57_spill] sm:$0xff] }
 0x888   : > { %7646 = vmatmul.f32.gmra.mxu1 %v13631_v25  ;;  %v6627_v5 = vadd.f32 %v13637_v26, %v12316_v29  ;;  %v13643_v26 = vand.u32 4294901760, %v13640_v54 }
 0x889   : > { %7501 = vmatmul.f32.gmra.mxu0 %v13636_v57  ;;  %v7848_v6 = vadd.f32 %v7759_v28, %v7580_v24  ;;  %v7761_v28 = vpop.permute.xlu0 %7760 }
 0x88a   : > { %7124 = vmatmul.f32.gmra.mxu2 %v13635_v45  ;;  %v7229_v62 = vpop.f32.mrf.mxu3  ;;  %v6884_v2 = vadd.f32 %v13638_v43, %v6627_v5 }
 0x88b   : > { %v7230_v15 = vadd.f32 %v7229_v62, %v7041_v20  ;;  %7951 = vrot.lane.b32.xlu1 %v7848_v6, %s8384_s19  ;;  %v6635_v20 = vadd.f32 %v13641_v48, %v12316_v29  ;;  %v13642_v62 = vld [vmem:[#allocation84_spill] sm:$0xff] }
 0x88d   : > { %v7045_v50 = vpop.f32.mrf.mxu2  ;;  %v7435_v3 = vadd.f32 %v7434_v44, %v7230_v15  ;;  %v7587_v12 = vpop.f32.mrf.mxu1  ;;  %v6888_v15 = vadd.f32 %v13642_v62, %v6635_v20 }
 0x88e   : > { %v7442_v25 = vpop.f32.mrf.mxu0  ;;  %v7046_v56 = vadd.f32 %v7045_v50, %v6884_v2  ;;  %v12407_v44 = vpop.permute.xlu1 %7768 }
 0x88f   : > { %v7584_v22 = vadd.f32 %v7583_v53, %v7435_v3  ;;  %7330 = vmatmul.f32.gmra.mxu3 %v13639_v46  ;;  %v12409_v53 = vpop.permute.xlu2 %7782  ;;  %v13644_v3 = vld [vmem:[#allocation88_spill] sm:$0xff] }
 0x890   : > { %7650 = vmatmul.f32.gmra.mxu1 %v13636_v57 }
 0x891   : > { %7505 = vmatmul.f32.gmra.mxu0 %v11925_v1  ;;  %v7849_v51 = vadd.f32 %v7761_v28, %v7584_v22  ;;  %v7767_v22 = vpop.permute.xlu0 %7766 }
 0x892   : > { %7129 = vmatmul.f32.gmra.mxu2 %v13640_v54  ;;  %v7235_v9 = vpop.f32.mrf.mxu3 }
 0x893   : > { %v7236_v38 = vadd.f32 %v7235_v9, %v7046_v56  ;;  %7953 = vrot.lane.b32.xlu2 %v7849_v51, %s8384_s19  ;;  %v13645_v56 = vld [vmem:[#allocation60_spill] sm:$0xff] }
 0x894   : > { %v6643_v54 = vadd.f32 %v13645_v56, %v12316_v29 }
 0x895   : > { %v7050_v24 = vpop.f32.mrf.mxu2  ;;  %v7439_v45 = vadd.f32 %v7438_v8, %v7236_v38  ;;  %v7591_v57 = vpop.f32.mrf.mxu1  ;;  %v13646_v38 = vld [vmem:[#allocation59_spill] sm:$0xff] }
 0x896   : > { %v7446_v6 = vpop.f32.mrf.mxu0  ;;  %v7051_v5 = vadd.f32 %v7050_v24, %v6888_v15  ;;  %v12420_v8 = vpop.permute.xlu1 %7774  ;;  %v6892_v24 = vadd.f32 %v13646_v38, %v6643_v54  ;;  %v13652_v38 = vld [vmem:[#allocation85_spill] sm:$0xff] }
 0x897   : > { %v7588_v50 = vadd.f32 %v7587_v12, %v7439_v45  ;;  %7336 = vmatmul.f32.gmra.mxu3 %v13643_v26  ;;  %v12422_v12 = vpop.permute.xlu2 %7788  ;;  %v13648_v45 = vld [vmem:[#allocation91_spill] sm:$0xff] }
 0x898   : > { %7654 = vmatmul.f32.gmra.mxu1 %v11925_v1  ;;  %v13651_v54 = vand.u32 4294901760, %v13648_v45 }
 0x899   : > { %7509 = vmatmul.f32.gmra.mxu0 %v11947_v10  ;;  %v7850_v43 = vadd.f32 %v7763_v49, %v7588_v50  ;;  %v13647_v49 = vand.u32 4294901760, %v13644_v3  ;;  %v12433_v50 = vpop.permute.xlu0 %7772 }
 0x89a   : > { %7134 = vmatmul.f32.gmra.mxu2 %v13644_v3  ;;  %v7241_v2 = vpop.f32.mrf.mxu3 }
 0x89b   : > { %v7242_v46 = vadd.f32 %v7241_v2, %v7051_v5  ;;  %7955 = vrot.lane.b32.xlu0 %v7850_v43, %s8384_s19 }
 0x89d   : > { %v7055_v28 = vpop.f32.mrf.mxu2  ;;  %v7443_v1 = vadd.f32 %v7442_v25, %v7242_v46  ;;  %v7595_v51 = vpop.f32.mrf.mxu1 }
 0x89e   : > { %v7450_v9 = vpop.f32.mrf.mxu0  ;;  %v7056_v20 = vadd.f32 %v7055_v28, %v6892_v24  ;;  %v12436_v26 = vpop.permute.xlu1 %7780  ;;  %v13650_v28 = vld [vmem:[#allocation62_spill] sm:$0xff] }
 0x89f   : > { %v7592_v48 = vadd.f32 %v7591_v57, %v7443_v1  ;;  %7342 = vmatmul.f32.gmra.mxu3 %v13647_v49  ;;  %v12438_v5 = vpop.permute.xlu2 %7794 }
 0x8a0   : > { %7658 = vmatmul.f32.gmra.mxu1 %v11947_v10  ;;  %v13649_v10 = vld [vmem:[#allocation139_spill] sm:$0xff] }
 0x8a1   : > { %7513 = vmatmul.f32.gmra.mxu0 %v11969_v33  ;;  %v7851_v62 = vadd.f32 %v12374_v27, %v7592_v48  ;;  %v6651_v3 = vadd.f32 %v13649_v10, %v12316_v29  ;;  %v12448_v49 = vpop.permute.xlu0 %7778 }
 0x8a2   : > { %7139 = vmatmul.f32.gmra.mxu2 %v13648_v45  ;;  %v7247_v15 = vpop.f32.mrf.mxu3  ;;  %v13653_v45 = vld [vmem:[#allocation140_spill] sm:$0xff] }
 0x8a3   : > { %v7248_v25 = vadd.f32 %v7247_v15, %v7056_v20  ;;  %7957 = vrot.lane.b32.xlu1 %v7851_v62, %s8384_s19  ;;  %v6896_v56 = vadd.f32 %v13650_v28, %v6651_v3  ;;  %v13654_v3 = vand.u32 4294901760, %v13652_v38  ;;  %v13655_v28 = vld [vmem:[#allocation86_spill] sm:$0xff] }
 0x8a5   : > { %v7060_v57 = vpop.f32.mrf.mxu2  ;;  %v7447_v43 = vadd.f32 %v7446_v6, %v7248_v25  ;;  %v7599_v2 = vpop.f32.mrf.mxu1 }
 0x8a6   : > { %v7454_v46 = vpop.f32.mrf.mxu0  ;;  %v7061_v1 = vadd.f32 %v7060_v57, %v6896_v56  ;;  %v12451_v20 = vpop.permute.xlu1 %7786 }
 0x8a7   : > { %v7596_v27 = vadd.f32 %v7595_v51, %v7447_v43  ;;  %7348 = vmatmul.f32.gmra.mxu3 %v13651_v54  ;;  %v12453_v62 = vpop.permute.xlu2 %7800 }
 0x8a8   : > { %7662 = vmatmul.f32.gmra.mxu1 %v11969_v33  ;;  %v6659_v33 = vadd.f32 %v13653_v45, %v12316_v29  ;;  %v13657_v45 = vand.u32 4294901760, %v13655_v28 }
 0x8a9   : > { %7517 = vmatmul.f32.gmra.mxu0 %v11991_v55  ;;  %v7852_v24 = vadd.f32 %v7767_v22, %v7596_v27  ;;  %v12464_v54 = vpop.permute.xlu0 %7784 }
 0x8aa   : > { %7144 = vmatmul.f32.gmra.mxu2 %v13652_v38  ;;  %v7253_v48 = vpop.f32.mrf.mxu3  ;;  %v6900_v10 = vadd.f32 %v12053_v60, %v6659_v33 }
 0x8ab   : > { %v7254_v6 = vadd.f32 %v7253_v48, %v7061_v1  ;;  %7959 = vrot.lane.b32.xlu2 %v7852_v24, %s8384_s19 }
 0x8ad   : > { %v7065_v51 = vpop.f32.mrf.mxu2  ;;  %v7451_v15 = vadd.f32 %v7450_v9, %v7254_v6  ;;  %v7603_v25 = vpop.f32.mrf.mxu1 }
 0x8ae   : > { %v7458_v57 = vpop.f32.mrf.mxu0  ;;  %v7066_v43 = vadd.f32 %v7065_v51, %v6900_v10  ;;  %v12467_v60 = vpop.permute.xlu1 %7792 }
 0x8af   : > { %v7600_v22 = vadd.f32 %v7599_v2, %v7451_v15  ;;  %7354 = vmatmul.f32.gmra.mxu3 %v13654_v3  ;;  %v12469_v1 = vpop.permute.xlu2 %7806 }
 0x8b0   : > { %7666 = vmatmul.f32.gmra.mxu1 %v11991_v55  ;;  %v13656_v55 = vld [vmem:[#allocation89_spill] sm:$0xff] }
 0x8b1   : > { %7521 = vmatmul.f32.gmra.mxu0 %v12013_v47  ;;  %v7853_v56 = vadd.f32 %v12407_v44, %v7600_v22  ;;  %v6667_v38 = vadd.f32 %v13656_v55, %v12316_v29 }
 0x8b2   : > { %7149 = vmatmul.f32.gmra.mxu2 %v13655_v28  ;;  %v7259_v27 = vpop.f32.mrf.mxu3 }
 0x8b3   : > { %v7260_v9 = vadd.f32 %v7259_v27, %v7066_v43  ;;  %7961 = vrot.lane.b32.xlu0 %v7853_v56, %s8384_s19  ;;  %v6904_v51 = vadd.f32 %v12073_v11, %v6667_v38 }
 0x8b5   : > { %v7070_v2 = vpop.f32.mrf.mxu2  ;;  %v7455_v24 = vadd.f32 %v7454_v46, %v7260_v9  ;;  %v7607_v48 = vpop.f32.mrf.mxu1  ;;  %v13658_v9 = vand.u32 4294901760, %v12046_v4 }
 0x8b6   : > { %v7462_v6 = vpop.f32.mrf.mxu0  ;;  %v7071_v33 = vadd.f32 %v7070_v2, %v6904_v51  ;;  %v12480_v46 = vpop.permute.xlu0 %7790 }
 0x8b7   : > { %v7604_v44 = vadd.f32 %v7603_v25, %v7455_v24  ;;  %7360 = vmatmul.f32.gmra.mxu3 %v13657_v45  ;;  %v12483_v11 = vpop.permute.xlu1 %7798 }
 0x8b8   : > { %7670 = vmatmul.f32.gmra.mxu1 %v12013_v47  ;;  %v6675_v47 = vadd.f32 %v12075_v40, %v12316_v29 }
 0x8b9   : > { %7525 = vmatmul.f32.gmra.mxu0 %v12035_v7  ;;  %v7854_v15 = vadd.f32 %v12385_v23, %v7604_v44 }
 0x8ba   : > { %7154 = vmatmul.f32.gmra.mxu2 %v12046_v4  ;;  %v7265_v10 = vpop.f32.mrf.mxu3  ;;  %v6908_v23 = vadd.f32 %v12088_v39, %v6675_v47  ;;  %v6683_v4 = vadd.f32 %v12090_v30, %v12316_v29 }
 0x8bb   : > { %v7266_v22 = vadd.f32 %v7265_v10, %v7071_v33  ;;  %7963 = vrot.lane.b32.xlu1 %v7854_v15, %s8384_s19 }
 0x8bc   : > { %v6912_v44 = vadd.f32 %v12099_v61, %v6683_v4 }
 0x8bd   : > { %v7075_v25 = vpop.f32.mrf.mxu2  ;;  %v7459_v3 = vadd.f32 %v7458_v57, %v7266_v22  ;;  %v7611_v43 = vpop.f32.mrf.mxu1 }
 0x8be   : > { %v7942_v28 = vpop.permute.xlu2 %7941  ;;  %v7466_v56 = vpop.f32.mrf.mxu0  ;;  %v7076_v2 = vadd.f32 %v7075_v25, %v6908_v23  ;;  %v13660_v25 = vld [vmem:[#allocation61_spill] sm:$0xff] }
 0x8bf   : > { %8037 = vst.msk [vmem:[%s8655_s26 + $0x8] sm:$0xff] %vm8035_vm3, %v7942_v28  ;;  %v7608_v27 = vadd.f32 %v7607_v48, %v7459_v3  ;;  %7366 = vmatmul.f32.gmra.mxu3 %v13658_v9  ;;  %v12497_v38 = vpop.permute.xlu0 %7796  ;;  %v12499_v24 = vpop.permute.xlu1 %7804  ;;  %v6691_v47 = vadd.f32 %v13660_v25, %v12316_v29 }
 0x8c0   : > { %7674 = vmatmul.f32.gmra.mxu1 %v12035_v7 }
 0x8c1   : > { %7529 = vmatmul.f32.gmra.mxu0 %v12057_v42  ;;  %v7855_v40 = vadd.f32 %v12433_v50, %v7608_v27  ;;  %v13659_v50 = vand.u32 4294901760, %v12067_v32 }
 0x8c2   : > { %7159 = vmatmul.f32.gmra.mxu2 %v12067_v32  ;;  %v7271_v57 = vpop.f32.mrf.mxu3  ;;  %v13661_v32 = vld [vmem:[#allocation94_spill] sm:$0xff] }
 0x8c3   : > { %v7272_v55 = vadd.f32 %v7271_v57, %v7076_v2  ;;  %7965 = vrot.lane.b32.xlu2 %v7855_v40, %s8384_s19  ;;  %v6916_v28 = vadd.f32 %v13661_v32, %v6691_v47  ;;  %v13663_v47 = vld [vmem:[#allocation63_spill] sm:$0xff] }
 0x8c5   : > { %v7080_v39 = vpop.f32.mrf.mxu2  ;;  %v7463_v7 = vadd.f32 %v7462_v6, %v7272_v55  ;;  %v7615_v48 = vpop.f32.mrf.mxu1 }
 0x8c6   : > { %v7470_v51 = vpop.f32.mrf.mxu0  ;;  %v7081_v33 = vadd.f32 %v7080_v39, %v6912_v44 }
 0x8c7   : > { %v7612_v45 = vadd.f32 %v7611_v43, %v7463_v7  ;;  %7372 = vmatmul.f32.gmra.mxu3 %v13659_v50  ;;  %v12509_v30 = vpop.permute.xlu0 %7802 }
 0x8c8   : > { %7678 = vmatmul.f32.gmra.mxu1 %v12057_v42 }
 0x8c9   : > { %v7856_v15 = vadd.f32 %v12420_v8, %v7612_v45 }
 0x8ca   : > { %v7277_v10 = vpop.f32.mrf.mxu3 }
 0x8cb   : > { %v7278_v22 = vadd.f32 %v7277_v10, %v7081_v33  ;;  %7967 = vrot.lane.b32.xlu0 %v7856_v15, %s8384_s19 }
 0x8cd   : > { %v7085_v6 = vpop.f32.mrf.mxu2  ;;  %v7467_v61 = vadd.f32 %v7466_v56, %v7278_v22  ;;  %v7619_v3 = vpop.f32.mrf.mxu1  ;;  %v6699_v56 = vadd.f32 %v12113_v14, %v12316_v29  ;;  %v6707_v14 = vadd.f32 %v12126_v58, %v12316_v29  ;;  %v6715_v58 = vadd.f32 %v12139_v21, %v12316_v29 }
 0x8ce   : > { %v7940_v43 = vpop.permute.xlu1 %7939  ;;  %v7474_v42 = vpop.f32.mrf.mxu0  ;;  %v7086_v23 = vadd.f32 %v7085_v6, %v6916_v28  ;;  %v6723_v21 = vadd.f32 %v12152_v19, %v12316_v29  ;;  %v6731_v19 = vadd.f32 %v12165_v18, %v12316_v29  ;;  %v6739_v18 = vadd.f32 %v12178_v31, %v12316_v29 }
 0x8cf   : > { %8036 = vst.msk [vmem:[%s8655_s26] sm:$0xff] %vm8035_vm3, %v7940_v43  ;;  %v7616_v8 = vadd.f32 %v7615_v48, %v7467_v61  ;;  %v12518_v40 = vpop.permute.xlu0 %7808  ;;  %v13662_v48 = vld [vmem:[#allocation64_spill] sm:$0xff]  ;;  %v6924_v61 = vadd.f32 %v13663_v47, %v6707_v14  ;;  %v6747_v31 = vadd.f32 %v12191_v35, %v12316_v29  ;;  %v13668_v35 = vld [vmem:[#allocation98_spill] sm:$0xff] }
 0x8d0   : > { %v6920_v44 = vadd.f32 %v13662_v48, %v6699_v56 }
 0x8d1   : > { %v7857_v27 = vadd.f32 %v12396_v41, %v7616_v8 }
 0x8d2   : > { %v7283_v9 = vpop.f32.mrf.mxu3 }
 0x8d3   : > { %v7284_v2 = vadd.f32 %v7283_v9, %v7086_v23  ;;  %7969 = vrot.lane.b32.xlu1 %v7857_v27, %s8384_s19 }
 0x8d5   : > { %v7090_v57 = vpop.f32.mrf.mxu2  ;;  %v7471_v55 = vadd.f32 %v7470_v51, %v7284_v2  ;;  %v7623_v39 = vpop.f32.mrf.mxu1  ;;  %v13664_v2 = vld [vmem:[#allocation66_spill] sm:$0xff] }
 0x8d6   : > { %v7948_v4 = vpop.permute.xlu2 %7947  ;;  %v7478_v7 = vpop.f32.mrf.mxu0  ;;  %v7091_v45 = vadd.f32 %v7090_v57, %v6920_v44  ;;  %v6928_v57 = vadd.f32 %v13664_v2, %v6715_v58  ;;  %v13667_v2 = vld [vmem:[#allocation65_spill] sm:$0xff] }
 0x8d7   : > { %8040 = vst.msk [vmem:[%s8655_s26 + $0x20] sm:$0xff] %vm8035_vm3, %v7948_v4  ;;  %v7620_v41 = vadd.f32 %v7619_v3, %v7471_v55 }
 0x8d9   : > { %v7858_v50 = vadd.f32 %v12448_v49, %v7620_v41 }
 0x8da   : > { %v7289_v33 = vpop.f32.mrf.mxu3 }
 0x8db   : > { %v7290_v15 = vadd.f32 %v7289_v33, %v7091_v45  ;;  %7971 = vrot.lane.b32.xlu2 %v7858_v50, %s8384_s19  ;;  %v13665_v50 = vld [vmem:[#allocation96_spill] sm:$0xff] }
 0x8dc   : > { %v6932_v33 = vadd.f32 %v13665_v50, %v6723_v21 }
 0x8dd   : > { %v7095_v10 = vpop.f32.mrf.mxu2  ;;  %v7475_v51 = vadd.f32 %v7474_v42, %v7290_v15  ;;  %v7627_v22 = vpop.f32.mrf.mxu1 }
 0x8de   : > { %v7944_v6 = vpop.permute.xlu0 %7943  ;;  %v7482_v25 = vpop.f32.mrf.mxu0  ;;  %v7096_v43 = vadd.f32 %v7095_v10, %v6924_v61 }
 0x8df   : > { %8038 = vst.msk [vmem:[%s8655_s26 + $0x10] sm:$0xff] %vm8035_vm3, %v7944_v6  ;;  %v7624_v3 = vadd.f32 %v7623_v39, %v7475_v51 }
 0x8e1   : > { %v7859_v49 = vadd.f32 %v12436_v26, %v7624_v3  ;;  %v13666_v3 = vld [vmem:[#allocation95_spill] sm:$0xff] }
 0x8e2   : > { %v7295_v32 = vpop.f32.mrf.mxu3 }
 0x8e3   : > { %v7296_v28 = vadd.f32 %v7295_v32, %v7096_v43  ;;  %7973 = vrot.lane.b32.xlu0 %v7859_v49, %s8384_s19  ;;  %v6936_v43 = vadd.f32 %v13666_v3, %v6731_v19  ;;  %v13669_v19 = vld [vmem:[#allocation97_spill] sm:$0xff] }
 0x8e5   : > { %v7100_v8 = vpop.f32.mrf.mxu2  ;;  %v7479_v42 = vadd.f32 %v7478_v7, %v7296_v28  ;;  %v7631_v23 = vpop.f32.mrf.mxu1 }
 0x8e6   : > { %v7946_v27 = vpop.permute.xlu1 %7945  ;;  %v7486_v9 = vpop.f32.mrf.mxu0  ;;  %v7101_v55 = vadd.f32 %v7100_v8, %v6928_v57  ;;  %v6940_v57 = vadd.f32 %v13667_v2, %v6739_v18 }
 0x8e7   : > { %8039 = vst.msk [vmem:[%s8655_s26 + $0x18] sm:$0xff] %vm8035_vm3, %v7946_v27  ;;  %v7628_v56 = vadd.f32 %v7627_v22, %v7479_v42 }
 0x8e9   : > { %v7860_v26 = vadd.f32 %v12409_v53, %v7628_v56 }
 0x8ea   : > { %v7301_v39 = vpop.f32.mrf.mxu3 }
 0x8eb   : > { %v7302_v4 = vadd.f32 %v7301_v39, %v7101_v55  ;;  %7975 = vrot.lane.b32.xlu1 %v7860_v26, %s8384_s19 }
 0x8ed   : > { %v7105_v48 = vpop.f32.mrf.mxu2  ;;  %v7483_v7 = vadd.f32 %v7482_v25, %v7302_v4  ;;  %v7635_v44 = vpop.f32.mrf.mxu1 }
 0x8ee   : > { %v7954_v41 = vpop.permute.xlu2 %7953  ;;  %v7490_v45 = vpop.f32.mrf.mxu0  ;;  %v7106_v10 = vadd.f32 %v7105_v48, %v6932_v33 }
 0x8ef   : > { %8043 = vst.msk [vmem:[%s8655_s26 + $0x38] sm:$0xff] %vm8035_vm3, %v7954_v41  ;;  %v7632_v15 = vadd.f32 %v7631_v23, %v7483_v7  ;;  %v6944_v41 = vadd.f32 %v12202_v59, %v6747_v31 }
 0x8f1   : > { %v7861_v53 = vadd.f32 %v12464_v54, %v7632_v15 }
 0x8f2   : > { %v7307_v14 = vpop.f32.mrf.mxu3 }
 0x8f3   : > { %v7308_v51 = vadd.f32 %v7307_v14, %v7106_v10  ;;  %7977 = vrot.lane.b32.xlu2 %v7861_v53, %s8384_s19  ;;  %v6755_v53 = vadd.f32 %v13668_v35, %v12316_v29 }
 0x8f5   : > { %v7110_v22 = vpop.f32.mrf.mxu2  ;;  %v7487_v6 = vadd.f32 %v7486_v9, %v7308_v51  ;;  %v7639_v25 = vpop.f32.mrf.mxu1  ;;  %v6948_v59 = vadd.f32 %v13669_v19, %v6755_v53  ;;  %v13673_v19 = vld [vmem:[#allocation67_spill] sm:$0xff] }
 0x8f6   : > { %v7950_v47 = vpop.permute.xlu0 %7949  ;;  %v7494_v61 = vpop.f32.mrf.mxu0  ;;  %v7111_v32 = vadd.f32 %v7110_v22, %v6936_v43 }
 0x8f7   : > { %8041 = vst.msk [vmem:[%s8655_s26 + $0x28] sm:$0xff] %vm8035_vm3, %v7950_v47  ;;  %v7636_v49 = vadd.f32 %v7635_v44, %v7487_v6 }
 0x8f9   : > { %v7862_v54 = vadd.f32 %v12451_v20, %v7636_v49  ;;  %v6763_v49 = vadd.f32 %v12217_v63, %v12316_v29  ;;  %v6771_v63 = vadd.f32 %v12230_v37, %v12316_v29  ;;  %v6779_v37 = vadd.f32 %v12243_v16, %v12316_v29 }
 0x8fa   : > { %v7313_v28 = vpop.f32.mrf.mxu3  ;;  %v6787_v16 = vadd.f32 %v12256_v52, %v12316_v29  ;;  %v6795_v52 = vadd.f32 %v12269_v0, %v12316_v29  ;;  %v6803_v0 = vadd.f32 %v12282_v34, %v12316_v29 }
 0x8fb   : > { %v7314_v8 = vadd.f32 %v7313_v28, %v7111_v32  ;;  %7979 = vrot.lane.b32.xlu0 %v7862_v54, %s8384_s19 }
 0x8fd   : > { %v7115_v58 = vpop.f32.mrf.mxu2  ;;  %v7491_v42 = vadd.f32 %v7490_v45, %v7314_v8  ;;  %v7643_v23 = vpop.f32.mrf.mxu1  ;;  %v13670_v8 = vld [vmem:[#allocation68_spill] sm:$0xff] }
 0x8fe   : > { %v7952_v27 = vpop.permute.xlu1 %7951  ;;  %v7498_v9 = vpop.f32.mrf.mxu0  ;;  %v7116_v55 = vadd.f32 %v7115_v58, %v6940_v57  ;;  %v6952_v58 = vadd.f32 %v13670_v8, %v6763_v49 }
 0x8ff   : > { %8042 = vst.msk [vmem:[%s8655_s26 + $0x30] sm:$0xff] %vm8035_vm3, %v7952_v27  ;;  %v7640_v56 = vadd.f32 %v7639_v25, %v7491_v42 }
 0x901   : > { %v7863_v20 = vadd.f32 %v12422_v12, %v7640_v56 }
 0x902   : > { %v7319_v26 = vpop.f32.mrf.mxu3 }
 0x903   : > { %v7320_v39 = vadd.f32 %v7319_v26, %v7116_v55  ;;  %7981 = vrot.lane.b32.xlu1 %v7863_v20, %s8384_s19  ;;  %v13671_v20 = vld [vmem:[#allocation100_spill] sm:$0xff] }
 0x904   : > { %v6956_v26 = vadd.f32 %v13671_v20, %v6771_v63  ;;  %v13674_v20 = vld [vmem:[#allocation102_spill] sm:$0xff] }
 0x905   : > { %v7120_v4 = vpop.f32.mrf.mxu2  ;;  %v7495_v48 = vadd.f32 %v7494_v61, %v7320_v39  ;;  %v7647_v21 = vpop.f32.mrf.mxu1  ;;  %v6811_v34 = vadd.f32 %v13674_v20, %v12316_v29 }
 0x906   : > { %v7960_v7 = vpop.permute.xlu2 %7959  ;;  %v7502_v44 = vpop.f32.mrf.mxu0  ;;  %v7121_v50 = vadd.f32 %v7120_v4, %v6944_v41 }
 0x907   : > { %8046 = vst.msk [vmem:[%s8655_s26 + $0x50] sm:$0xff] %vm8035_vm3, %v7960_v7  ;;  %v7644_v45 = vadd.f32 %v7643_v23, %v7495_v48 }
 0x909   : > { %v7864_v12 = vadd.f32 %v12480_v46, %v7644_v45 }
 0x90a   : > { %v7325_v33 = vpop.f32.mrf.mxu3 }
 0x90b   : > { %v7326_v15 = vadd.f32 %v7325_v33, %v7121_v50  ;;  %7983 = vrot.lane.b32.xlu2 %v7864_v12, %s8384_s19  ;;  %v13672_v50 = vld [vmem:[#allocation99_spill] sm:$0xff] }
 0x90c   : > { %v6960_v12 = vadd.f32 %v13672_v50, %v6779_v37 }
 0x90d   : > { %v7125_v10 = vpop.f32.mrf.mxu2  ;;  %v7499_v14 = vadd.f32 %v7498_v9, %v7326_v15  ;;  %v7651_v51 = vpop.f32.mrf.mxu1 }
 0x90e   : > { %v7956_v22 = vpop.permute.xlu0 %7955  ;;  %v7506_v25 = vpop.f32.mrf.mxu0  ;;  %v7126_v47 = vadd.f32 %v7125_v10, %v6948_v59  ;;  %v6964_v59 = vadd.f32 %v13673_v19, %v6787_v16 }
 0x90f   : > { %8044 = vst.msk [vmem:[%s8655_s26 + $0x40] sm:$0xff] %vm8035_vm3, %v7956_v22  ;;  %v7648_v6 = vadd.f32 %v7647_v21, %v7499_v14 }
 0x911   : > { %v7865_v46 = vadd.f32 %v12467_v60, %v7648_v6 }
 0x912   : > { %v7331_v61 = vpop.f32.mrf.mxu3 }
 0x913   : > { %v7332_v3 = vadd.f32 %v7331_v61, %v7126_v47  ;;  %7985 = vrot.lane.b32.xlu0 %v7865_v46, %s8384_s19 }
 0x915   : > { %v7130_v43 = vpop.f32.mrf.mxu2  ;;  %v7503_v32 = vadd.f32 %v7502_v44, %v7332_v3  ;;  %v7655_v54 = vpop.f32.mrf.mxu1 }
 0x916   : > { %v7958_v28 = vpop.permute.xlu1 %7957  ;;  %v7131_v42 = vadd.f32 %v7130_v43, %v6952_v58  ;;  %v7510_v23 = vpop.f32.mrf.mxu0 }
 0x917   : > { %8045 = vst.msk [vmem:[%s8655_s26 + $0x48] sm:$0xff] %vm8035_vm3, %v7958_v28  ;;  %v7652_v18 = vadd.f32 %v7651_v51, %v7503_v32  ;;  %v6968_v32 = vadd.f32 %v12280_v36, %v6795_v52  ;;  %v6972_v36 = vadd.f32 %v12293_v13, %v6803_v0  ;;  %v6976_v13 = vadd.f32 %v12306_v17, %v6811_v34 }
 0x919   : > { %v7866_v60 = vadd.f32 %v12438_v5, %v7652_v18 }
 0x91a   : > { %v7337_v27 = vpop.f32.mrf.mxu3 }
 0x91b   : > { %v7338_v9 = vadd.f32 %v7337_v27, %v7131_v42  ;;  %7987 = vrot.lane.b32.xlu1 %v7866_v60, %s8384_s19 }
 0x91d   : > { %v7135_v2 = vpop.f32.mrf.mxu2  ;;  %v7507_v57 = vadd.f32 %v7506_v25, %v7338_v9  ;;  %v7659_v56 = vpop.f32.mrf.mxu1 }
 0x91e   : > { %v7966_v55 = vpop.permute.xlu2 %7965  ;;  %v7136_v4 = vadd.f32 %v7135_v2, %v6956_v26  ;;  %v7514_v21 = vpop.f32.mrf.mxu0 }
 0x91f   : > { %8049 = vst.msk [vmem:[%s8655_s26 + $0x68] sm:$0xff] %vm8035_vm3, %v7966_v55  ;;  %v7656_v39 = vadd.f32 %v7655_v54, %v7507_v57 }
 0x921   : > { %v7867_v5 = vadd.f32 %v12497_v38, %v7656_v39 }
 0x922   : > { %v7343_v31 = vpop.f32.mrf.mxu3 }
 0x923   : > { %v7344_v48 = vadd.f32 %v7343_v31, %v7136_v4  ;;  %7989 = vrot.lane.b32.xlu2 %v7867_v5, %s8384_s19 }
 0x925   : > { %v7140_v7 = vpop.f32.mrf.mxu2  ;;  %v7511_v44 = vadd.f32 %v7510_v23, %v7344_v48  ;;  %v7962_v41 = vpop.permute.xlu0 %7961 }
 0x926   : > { %v7663_v45 = vpop.f32.mrf.mxu1  ;;  %8047 = vst.msk [vmem:[%s8655_s26 + $0x58] sm:$0xff] %vm8035_vm3, %v7962_v41  ;;  %v7141_v15 = vadd.f32 %v7140_v7, %v6960_v12  ;;  %v7518_v22 = vpop.f32.mrf.mxu0 }
 0x927   : > { %v7660_v33 = vadd.f32 %v7659_v56, %v7511_v44 }
 0x929   : > { %v7868_v38 = vadd.f32 %v12483_v11, %v7660_v33 }
 0x92a   : > { %v7349_v10 = vpop.f32.mrf.mxu3 }
 0x92b   : > { %v7350_v35 = vadd.f32 %v7349_v10, %v7141_v15  ;;  %7991 = vrot.lane.b32.xlu0 %v7868_v38, %s8384_s19 }
 0x92d   : > { %v7145_v53 = vpop.f32.mrf.mxu2  ;;  %v7515_v14 = vadd.f32 %v7514_v21, %v7350_v35  ;;  %v7964_v51 = vpop.permute.xlu1 %7963 }
 0x92e   : > { %8048 = vst.msk [vmem:[%s8655_s26 + $0x60] sm:$0xff] %vm8035_vm3, %v7964_v51  ;;  %v7667_v25 = vpop.f32.mrf.mxu1  ;;  %v7146_v47 = vadd.f32 %v7145_v53, %v6964_v59  ;;  %v7522_v28 = vpop.f32.mrf.mxu0 }
 0x92f   : > { %v7664_v6 = vadd.f32 %v7663_v45, %v7515_v14 }
 0x931   : > { %v7869_v11 = vadd.f32 %v12453_v62, %v7664_v6 }
 0x932   : > { %v7355_v46 = vpop.f32.mrf.mxu3 }
 0x933   : > { %v7356_v61 = vadd.f32 %v7355_v46, %v7146_v47  ;;  %7993 = vrot.lane.b32.xlu1 %v7869_v11, %s8384_s19 }
 0x935   : > { %v7150_v3 = vpop.f32.mrf.mxu2  ;;  %v7519_v43 = vadd.f32 %v7518_v22, %v7356_v61  ;;  %v7972_v49 = vpop.permute.xlu2 %7971 }
 0x936   : > { %8052 = vst.msk [vmem:[%s8655_s26 + $0x80] sm:$0xff] %vm8035_vm3, %v7972_v49  ;;  %v7151_v8 = vadd.f32 %v7150_v3, %v6968_v32  ;;  %v7671_v58 = vpop.f32.mrf.mxu1  ;;  %v7526_v63 = vpop.f32.mrf.mxu0 }
 0x937   : > { %v7668_v54 = vadd.f32 %v7667_v25, %v7519_v43 }
 0x939   : > { %v7870_v62 = vadd.f32 %v12509_v30, %v7668_v54 }
 0x93a   : > { %v7361_v18 = vpop.f32.mrf.mxu3 }
 0x93b   : > { %v7362_v42 = vadd.f32 %v7361_v18, %v7151_v8  ;;  %7995 = vrot.lane.b32.xlu2 %v7870_v62, %s8384_s19 }
 0x93d   : > { %v7155_v60 = vpop.f32.mrf.mxu2  ;;  %v7523_v23 = vadd.f32 %v7522_v28, %v7362_v42  ;;  %v7968_v27 = vpop.permute.xlu0 %7967 }
 0x93e   : > { %8050 = vst.msk [vmem:[%s8655_s26 + $0x70] sm:$0xff] %vm8035_vm3, %v7968_v27  ;;  %v7156_v2 = vadd.f32 %v7155_v60, %v6972_v36  ;;  %v7675_v55 = vpop.f32.mrf.mxu1  ;;  %v7530_v29 = vpop.f32.mrf.mxu0 }
 0x93f   : > { %v7672_v9 = vadd.f32 %v7671_v58, %v7523_v23 }
 0x941   : > { %v7871_v30 = vadd.f32 %v12499_v24, %v7672_v9 }
 0x942   : > { %v7367_v57 = vpop.f32.mrf.mxu3 }
 0x943   : > { %v7368_v56 = vadd.f32 %v7367_v57, %v7156_v2  ;;  %7997 = vrot.lane.b32.xlu0 %v7871_v30, %s8384_s19 }
 0x945   : > { %v7527_v26 = vadd.f32 %v7526_v63, %v7368_v56  ;;  %v7970_v39 = vpop.permute.xlu1 %7969  ;;  %v7160_v4 = vpop.f32.mrf.mxu2 }
 0x946   : > { %8051 = vst.msk [vmem:[%s8655_s26 + $0x78] sm:$0xff] %vm8035_vm3, %v7970_v39  ;;  %v7161_v24 = vadd.f32 %v7160_v4, %v6976_v13  ;;  %v7679_v44 = vpop.f32.mrf.mxu1 }
 0x947   : > { %v7676_v5 = vadd.f32 %v7675_v55, %v7527_v26 }
 0x949   : > { %v7872_v31 = vadd.f32 %v12469_v1, %v7676_v5 }
 0x94a   : > { %v7373_v48 = vpop.f32.mrf.mxu3 }
 0x94b   : > { %v7374_v21 = vadd.f32 %v7373_v48, %v7161_v24  ;;  %7999 = vrot.lane.b32.xlu1 %v7872_v31, %s8384_s19 }
 0x94d   : > { %v7531_v7 = vadd.f32 %v7530_v29, %v7374_v21  ;;  %v7978_v37 = vpop.permute.xlu2 %7977 }
 0x94e   : > { %8055 = vst.msk [vmem:[%s8655_s26 + $0x98] sm:$0xff] %vm8035_vm3, %v7978_v37 }
 0x94f   : > { %v7680_v17 = vadd.f32 %v7679_v44, %v7531_v7 }
 0x951   : > { %v7873_v41 = vadd.f32 %v12518_v40, %v7680_v17 }
 0x953   : > { %8001 = vrot.lane.b32.xlu2 %v7873_v41, %s8384_s19 }
 0x955   : > { %v7974_v1 = vpop.permute.xlu0 %7973 }
 0x956   : > { %8053 = vst.msk [vmem:[%s8655_s26 + $0x88] sm:$0xff] %vm8035_vm3, %v7974_v1 }
 0x95d   : > { %v7976_v45 = vpop.permute.xlu1 %7975 }
 0x95e   : > { %8054 = vst.msk [vmem:[%s8655_s26 + $0x90] sm:$0xff] %vm8035_vm3, %v7976_v45 }
 0x965   : > { %v7984_v50 = vpop.permute.xlu2 %7983 }
 0x966   : > { %8058 = vst.msk [vmem:[%s8655_s26 + $0xb0] sm:$0xff] %vm8035_vm3, %v7984_v50 }
 0x96d   : > { %v7980_v12 = vpop.permute.xlu0 %7979 }
 0x96e   : > { %8056 = vst.msk [vmem:[%s8655_s26 + $0xa0] sm:$0xff] %vm8035_vm3, %v7980_v12 }
 0x975   : > { %v7982_v40 = vpop.permute.xlu1 %7981 }
 0x976   : > { %8057 = vst.msk [vmem:[%s8655_s26 + $0xa8] sm:$0xff] %vm8035_vm3, %v7982_v40 }
 0x97d   : > { %v7990_v33 = vpop.permute.xlu2 %7989 }
 0x97e   : > { %8061 = vst.msk [vmem:[%s8655_s26 + $0xc8] sm:$0xff] %vm8035_vm3, %v7990_v33 }
 0x985   : > { %v7986_v15 = vpop.permute.xlu0 %7985 }
 0x986   : > { %8059 = vst.msk [vmem:[%s8655_s26 + $0xb8] sm:$0xff] %vm8035_vm3, %v7986_v15 }
 0x98d   : > { %v7988_v38 = vpop.permute.xlu1 %7987 }
 0x98e   : > { %8060 = vst.msk [vmem:[%s8655_s26 + $0xc0] sm:$0xff] %vm8035_vm3, %v7988_v38 }
 0x995   : > { %v7996_v10 = vpop.permute.xlu2 %7995 }
 0x996   : > { %8064 = vst.msk [vmem:[%s8655_s26 + $0xe0] sm:$0xff] %vm8035_vm3, %v7996_v10 }
 0x99d   : > { %v7992_v35 = vpop.permute.xlu0 %7991 }
 0x99e   : > { %8062 = vst.msk [vmem:[%s8655_s26 + $0xd0] sm:$0xff] %vm8035_vm3, %v7992_v35 }
 0x9a5   : > { %v7994_v53 = vpop.permute.xlu1 %7993 }
 0x9a6   : > { %8063 = vst.msk [vmem:[%s8655_s26 + $0xd8] sm:$0xff] %vm8035_vm3, %v7994_v53 }
 0x9ad   : > { %v8002_v16 = vpop.permute.xlu2 %8001 }
 0x9ae   : > { %8067 = vst.msk [vmem:[%s8655_s26 + $0xf8] sm:$0xff] %vm8035_vm3, %v8002_v16 }
 0x9b5   : > { %v7998_v14 = vpop.permute.xlu0 %7997 }
 0x9b6   : > { %8065 = vst.msk [vmem:[%s8655_s26 + $0xe8] sm:$0xff] %vm8035_vm3, %v7998_v14 }
 0x9bd   : > { %v8000_v51 = vpop.permute.xlu1 %7999 }
 0x9be   : > { %8066 = vst.msk [vmem:[%s8655_s26 + $0xf0] sm:$0xff] %vm8035_vm3, %v8000_v51 }
 0x9bf PF: > { %s19_s15 = sadd.s32 1, %s8379_s15   ;;  %s13675_s16 = sld [smem:[#allocation4_spill]] }
 0x9c0   : > { %p16_p0 = scmp.ge.s32.totalorder %s19_s15, 6   ;;  %s13676_s21 = sld [smem:[#allocation5_spill]] }
 0x9c1   : > { %s13677_s30 = smov %s8359_s10  ;;  %s13678_s10 = smov %s8486_s22 }
 0x9c2   : > { %s13679_s11 = smov %s8371_s13  ;;  %s13680_s12 = smov %s8375_s14 }
 0x9c3   :  { %18 = sbr.rel (!%p16_p0) target bundleno = 6 (0x6), region = 134 }
 0x9c5   : > { %s13681_s13 = smov %s13675_s16 }
 0x9c6   : > { %s13682_s14 = smov %s13676_s21 }

</bundles_post_ra>
